<compile_context>
chip_gen: v5e
topology: v5e:2x2
jax: 0.10.0
libtpu: 0.0.40
codegen_flags: <defaults>
</compile_context>

<pallas_src>
import functools

import numpy as np
import jax
import jax.numpy as jnp
from jax import lax
from jax.experimental import pallas as pl
from jax.experimental.pallas import tpu as pltpu

F32 = jnp.float32
BF16 = jnp.bfloat16
_VMEM_LIMIT = 48 * 1024 * 1024  # < v7x 64 MiB physical VMEM, > default scoped limit


def _tile_rows(h, w):
    """Output rows per grid step: bigger tiles for narrower images."""
    if w >= 128:
        t = 8
    elif w >= 64:
        t = 16
    else:
        t = 32
    return min(t, h)


def _act_fn(v, sc, sh):
    # BN-apply (gamma=1/beta=0 folded into scale/shift) + ReLU, math in f32 (v5e-safe)
    return jnp.maximum(v.astype(F32) * sc + sh, 0.0).astype(BF16)


def _build_window(x_top_ref, x_mid_ref, x_bot_ref, sc_sh, th, w, cin):
    """Return 3 width-shifted (th+2, w, cin) views of the activated, zero-padded input.

    shifted[j][m, b, :] == pad(act(x))[row0 - 1 + m, b + j - 1, :] where row0 = t*th.
    Row padding comes from masking the clamped halo rows; column padding from explicit
    zero columns.  Padding is applied AFTER the activation (Conv pads the activated map).
    """
    t = pl.program_id(1)
    nt = pl.num_programs(1)
    top = x_top_ref[0, 0]            # (w, cin)
    mid = x_mid_ref[0]               # (th, w, cin)
    bot = x_bot_ref[0, 0]            # (w, cin)
    if sc_sh is not None:
        sc, sh = sc_sh               # (1, cin) f32 each, broadcast over rows
        top = _act_fn(top, sc, sh)
        mid = _act_fn(mid, sc, sh)
        bot = _act_fn(bot, sc, sh)
    top = jnp.where(t > 0, top, jnp.zeros_like(top))
    bot = jnp.where(t < nt - 1, bot, jnp.zeros_like(bot))
    win = jnp.concatenate([top[None], mid, bot[None]], axis=0)       # (th+2, w, cin)
    zcol = jnp.zeros((th + 2, 1, cin), win.dtype)
    left = jnp.concatenate([zcol, win[:, :w - 1, :]], axis=1)        # col index b-1
    right = jnp.concatenate([win[:, 1:, :], zcol], axis=1)           # col index b+1
    return (left, win, right)


def _flat_rows(x3, k, th, w, cin):
    # (th, w, cin) -> (th*w, cin); a pure tile relabel when w % 8 == 0
    return x3[k:k + th].reshape(th * w, cin)


# -----------------------------------------------------------------------------
# 3x3 conv (stride 1, pad 1) with fused input BN+ReLU and fused BN-stat epilogue
# -----------------------------------------------------------------------------
def _conv_kernel(*refs, th, w, cin, apply_act, with_stats):
    x_top, x_mid, x_bot, w_ref, b_ref = refs[:5]
    pos = 5
    sc_sh = None
    if apply_act:
        sc_sh = (refs[5][...], refs[6][...])
        pos = 7
    y_ref = refs[pos]
    if with_stats:
        s_ref, q_ref = refs[pos + 1], refs[pos + 2]

    cout = y_ref.shape[-1]
    bias = b_ref[...]                                               # (1, cout) f32
    shifted = _build_window(x_top, x_mid, x_bot, sc_sh, th, w, cin)

    if w % 8 == 0:
        # row-batched MXU path: 9 dots with M = th*w, K = cin
        acc = None
        for k in range(3):
            for j in range(3):
                lhs = _flat_rows(shifted[j], k, th, w, cin)
                d = jnp.dot(lhs, w_ref[k, j], preferred_element_type=F32)
                acc = d if acc is None else acc + d
        y = acc + bias                                              # (th*w, cout) f32
        yo = y.astype(y_ref.dtype)
        y_ref[0] = yo.reshape(th, w, cout)
        if with_stats:
            yf = yo.astype(F32)                                     # stats of stored values
            s_ref[0, 0] = jnp.sum(yf, axis=0, keepdims=True)
            q_ref[0, 0] = jnp.sum(yf * yf, axis=0, keepdims=True)
    else:
        # tiny-width layers (w in {2, 4}): per-row dots, no cross-tile reshapes
        s_acc = jnp.zeros((1, cout), F32)
        q_acc = jnp.zeros((1, cout), F32)
        for i in range(th):
            acc = None
            for k in range(3):
                for j in range(3):
                    d = jnp.dot(shifted[j][i + k], w_ref[k, j],
                                preferred_element_type=F32)
                    acc = d if acc is None else acc + d
            yo = (acc + bias).astype(y_ref.dtype)                   # (w, cout)
            y_ref[0, i] = yo
            if with_stats:
                yf = yo.astype(F32)
                s_acc = s_acc + jnp.sum(yf, axis=0, keepdims=True)
                q_acc = q_acc + jnp.sum(yf * yf, axis=0, keepdims=True)
        if with_stats:
            s_ref[0, 0] = s_acc
            q_ref[0, 0] = q_acc


@functools.lru_cache(maxsize=None)
def _build_conv(n, h, w, cin, cout, th, apply_act, with_stats, out_dtype):
    nt = h // th
    kernel = functools.partial(_conv_kernel, th=th, w=w, cin=cin,
                               apply_act=apply_act, with_stats=with_stats)
    in_specs = [
        pl.BlockSpec((1, 1, w, cin),                                # 1-row top halo
                     lambda nn, t: (nn, jnp.maximum(t * th - 1, 0), 0, 0)),
        pl.BlockSpec((1, th, w, cin), lambda nn, t: (nn, t, 0, 0)),  # body rows
        pl.BlockSpec((1, 1, w, cin),                                # 1-row bottom halo
                     lambda nn, t: (nn, jnp.minimum(t * th + th, h - 1), 0, 0)),
        pl.BlockSpec((3, 3, cin, cout), lambda nn, t: (0, 0, 0, 0)),
        pl.BlockSpec((1, cout), lambda nn, t: (0, 0)),
    ]
    if apply_act:
        in_specs += [pl.BlockSpec((1, cin), lambda nn, t: (0, 0)),
                     pl.BlockSpec((1, cin), lambda nn, t: (0, 0))]
    y_shape = jax.ShapeDtypeStruct((n, h, w, cout), out_dtype)
    y_spec = pl.BlockSpec((1, th, w, cout), lambda nn, t: (nn, t, 0, 0))
    if with_stats:
        stat_shape = jax.ShapeDtypeStruct((n, nt, 1, cout), F32)
        stat_spec = pl.BlockSpec((1, 1, 1, cout), lambda nn, t: (nn, t, 0, 0))
        out_shape = (y_shape, stat_shape, stat_shape)
        out_specs = (y_spec, stat_spec, stat_spec)
    else:
        out_shape = y_shape
        out_specs = y_spec
    return pl.pallas_call(
        kernel,
        grid=(n, nt),
        in_specs=in_specs,
        out_specs=out_specs,
        out_shape=out_shape,
        compiler_params=pltpu.CompilerParams(
            dimension_semantics=("parallel", "parallel"),
            vmem_limit_bytes=_VMEM_LIMIT),
    )


def conv3x3(x, w, b, *, scale=None, shift=None, with_stats=False, out_dtype=BF16):
    """y = Conv3x3(pad=1)(relu(x*scale+shift) if scale is given else x) + b.
    Optionally also returns per-tile partial channel sums / sums-of-squares of y."""
    n, h, wd, cin = x.shape
    cout = w.shape[-1]
    th = _tile_rows(h, wd)
    apply_act = scale is not None
    call = _build_conv(n, h, wd, cin, cout, th, apply_act, with_stats, out_dtype)
    args = [x, x, x, w, b.reshape(1, cout).astype(F32)]
    if apply_act:
        args += [scale.reshape(1, cin).astype(F32), shift.reshape(1, cin).astype(F32)]
    return call(*args)


# -----------------------------------------------------------------------------
# ConvTranspose2d(4, stride=2, padding=1, bias=False) via sub-pixel decomposition.
# The kernel stores the phases already interleaved into an (N, H, 2, W, 2*C) buffer;
# the final reshape to (N, 2H, 2W, C) is a row-major dim merge (free in XLA).
# -----------------------------------------------------------------------------
def _deconv_kernel(*refs, th, w, cin, apply_act):
    x_top, x_mid, x_bot, w_ref = refs[:4]
    pos = 4
    sc_sh = None
    if apply_act:
        sc_sh = (refs[4][...], refs[5][...])
        pos = 6
    o_ref = refs[pos]
    cout = o_ref.shape[-1] // 2
    shifted = _build_window(x_top, x_mid, x_bot, sc_sh, th, w, cin)

    if w % 8 == 0:
        for r in range(2):                                          # output-row phase
            phases = []
            for s in range(2):                                      # output-col phase
                acc = None
                for di in range(2):
                    for dj in range(2):
                        lhs = _flat_rows(shifted[s + dj], r + di, th, w, cin)
                        d = jnp.dot(lhs, w_ref[2 * di + r, 2 * dj + s],
                                    preferred_element_type=F32)
                        acc = d if acc is None else acc + d
                phases.append(acc.astype(BF16))                     # (th*w, cout)
            q = jnp.concatenate(phases, axis=-1)                    # (th*w, 2*cout)
            o_ref[0, :, r, :, :] = q.reshape(th, w, 2 * cout)
    else:
        for i in range(th):
            for r in range(2):
                phases = []
                for s in range(2):
                    acc = None
                    for di in range(2):
                        for dj in range(2):
                            d = jnp.dot(shifted[s + dj][i + r + di],
                                        w_ref[2 * di + r, 2 * dj + s],
                                        preferred_element_type=F32)
                            acc = d if acc is None else acc + d
                    phases.append(acc.astype(BF16))                 # (w, cout)
                o_ref[0, i, r, :, :] = jnp.concatenate(phases, axis=-1)


@functools.lru_cache(maxsize=None)
def _build_deconv(n, h, w, cin, cout, th, apply_act):
    nt = h // th
    kernel = functools.partial(_deconv_kernel, th=th, w=w, cin=cin, apply_act=apply_act)
    in_specs = [
        pl.BlockSpec((1, 1, w, cin),
                     lambda nn, t: (nn, jnp.maximum(t * th - 1, 0), 0, 0)),
        pl.BlockSpec((1, th, w, cin), lambda nn, t: (nn, t, 0, 0)),
        pl.BlockSpec((1, 1, w, cin),
                     lambda nn, t: (nn, jnp.minimum(t * th + th, h - 1), 0, 0)),
        pl.BlockSpec((4, 4, cin, cout), lambda nn, t: (0, 0, 0, 0)),
    ]
    if apply_act:
        in_specs += [pl.BlockSpec((1, cin), lambda nn, t: (0, 0)),
                     pl.BlockSpec((1, cin), lambda nn, t: (0, 0))]
    out_shape = jax.ShapeDtypeStruct((n, h, 2, w, 2 * cout), BF16)
    out_spec = pl.BlockSpec((1, th, 2, w, 2 * cout), lambda nn, t: (nn, t, 0, 0, 0))
    return pl.pallas_call(
        kernel,
        grid=(n, nt),
        in_specs=in_specs,
        out_specs=out_spec,
        out_shape=out_shape,
        compiler_params=pltpu.CompilerParams(
            dimension_semantics=("parallel", "parallel"),
            vmem_limit_bytes=_VMEM_LIMIT),
    )


def deconv4x4(x, w_flip, *, scale=None, shift=None):
    """Exact ConvTranspose2d(4, stride=2, padding=1, bias=False) forward on NHWC bf16;
    `w_flip` is the spatially-flipped HWIO kernel of the equivalent dilated conv.
    Optionally applies BN+ReLU (scale/shift) to the input first."""
    n, h, wd, cin = x.shape
    cout = w_flip.shape[-1]
    th = _tile_rows(h, wd)
    apply_act = scale is not None
    call = _build_deconv(n, h, wd, cin, cout, th, apply_act)
    args = [x, x, x, w_flip]
    if apply_act:
        args += [scale.reshape(1, cin).astype(F32), shift.reshape(1, cin).astype(F32)]
    out = call(*args)                                  # (n, h, 2, wd, 2*cout)
    return out.reshape(n, 2 * h, 2 * wd, cout)         # pure dim merge -> no data movement


# -----------------------------------------------------------------------------
# BatchNorm2d training-mode statistics (gamma=1, beta=0) from fused partial sums
# -----------------------------------------------------------------------------
def _bn_scale_shift(psum, psumsq, count, eps=1e-5):
    s = jnp.sum(psum, axis=(0, 1, 2))
    q = jnp.sum(psumsq, axis=(0, 1, 2))
    mean = s / count
    var = jnp.maximum(q / count - mean * mean, 0.0)     # biased batch variance
    scale = 1.0 / jnp.sqrt(var + eps)                   # gamma = 1
    shift = -mean * scale                               # beta  = 0
    return scale, shift


# -----------------------------------------------------------------------------
# Parameters (deterministic in-script init, matching the PyTorch module's init)
# -----------------------------------------------------------------------------
def _bilinear_wf(channels, k=4):
    """get_upsampling_weight(...) expressed as the flipped HWIO kernel of the equivalent
    stride-1 conv on the 2-dilated input; channel-diagonal bilinear filter."""
    factor = (k + 1) // 2
    center = factor - 1 if k % 2 == 1 else factor - 0.5
    og = np.ogrid[:k, :k]
    filt = ((1 - abs(og[0] - center) / factor) *
            (1 - abs(og[1] - center) / factor)).astype(np.float32)
    filt = filt[::-1, ::-1].copy()
    w = np.zeros((k, k, channels, channels), np.float32)
    idx = np.arange(channels)
    w[:, :, idx, idx] = filt[:, :, None]
    return jnp.asarray(w, BF16)


def _conv_init(key, cin, cout, ksz=3):
    kw_, kb = jax.random.split(key)
    fan_in = cin * ksz * ksz
    w = jax.random.normal(kw_, (ksz, ksz, cin, cout), F32) * (2.0 / fan_in) ** 0.5
    b = jax.random.normal(kb, (cout,), F32) * 0.01
    return w.astype(BF16), b


def init_decoder_params(key, out_ch=2):
    params = {"up1_w": _bilinear_wf(128)}
    w256 = _bilinear_wf(256)
    for i in range(2, 8):
        params[f"up{i}_w"] = w256
    keys = jax.random.split(key, 7)
    cin_list = [128, 256, 256, 256, 256, 256]
    for i, cin in enumerate(cin_list):
        k1, k2 = jax.random.split(keys[i])
        w1, b1 = _conv_init(k1, cin, 256)
        w2, b2 = _conv_init(k2, 256, 256)
        params[f"conv{i + 1}"] = {"w1": w1, "b1": b1, "w2": w2, "b2": b2}
    wo, bo = _conv_init(keys[6], 256, out_ch)
    params["out_w"], params["out_b"] = wo, bo
    return params


# -----------------------------------------------------------------------------
# Forward (mirrors decoder_conv.forward); each double_conv's BN+ReLU is fused into
# the input path of the kernel that consumes it (next conv or next deconv).
# -----------------------------------------------------------------------------
def decoder_conv_forward(x, params):
    """decoder_conv(if_deconv=True, out_ch=2). Input: any shape with N*128*2*2 elements
    (matches x.view(-1,128,2,2)); output NCHW (N, 2, 256, 256) f32."""
    x = x.reshape(-1, 128, 2, 2)                        # NCHW, like the PyTorch .view
    x = jnp.transpose(x, (0, 2, 3, 1)).astype(BF16)     # -> NHWC bf16
    n = x.shape[0]
    scale = shift = None
    for i in range(1, 7):
        x = deconv4x4(x, params[f"up{i}_w"], scale=scale, shift=shift)
        p = params[f"conv{i}"]
        cnt = float(n * x.shape[1] * x.shape[2])
        y, s1, q1 = conv3x3(x, p["w1"], p["b1"], with_stats=True)
        sc1, sh1 = _bn_scale_shift(s1, q1, cnt)
        y, s2, q2 = conv3x3(y, p["w2"], p["b2"], scale=sc1, shift=sh1, with_stats=True)
        scale, shift = _bn_scale_shift(s2, q2, cnt)
        x = y
    x = deconv4x4(x, params["up7_w"], scale=scale, shift=shift)
    y = conv3x3(x, params["out_w"], params["out_b"], with_stats=False, out_dtype=F32)
    return jnp.transpose(y, (0, 3, 1, 2))               # back to NCHW


# -----------------------------------------------------------------------------
# Numeric self-checks of the two primitives against lax convolutions
# -----------------------------------------------------------------------------
def _check_primitives():
    key = jax.random.PRNGKey(42)
    for h in (64, 4):                                   # batched path + tiny per-row path
        kx, kw, kb, kd, key = jax.random.split(key, 5)
        n, c = 2, 128
        x = jax.random.normal(kx, (n, h, h, c), F32).astype(BF16)
        w = (jax.random.normal(kw, (3, 3, c, c), F32) * 0.05).astype(BF16)
        b = jax.random.normal(kb, (c,), F32) * 0.1
        y = conv3x3(x, w, b, out_dtype=F32)
        ref = lax.conv_general_dilated(
            x.astype(F32), w.astype(F32), (1, 1), ((1, 1), (1, 1)),
            dimension_numbers=("NHWC", "HWIO", "NHWC")) + b
        np.testing.assert_allclose(np.asarray(y), np.asarray(ref), atol=5e-2, rtol=5e-2)

        w4 = (jax.random.normal(kd, (4, 4, c, c), F32) * 0.05).astype(BF16)
        yd = deconv4x4(x, w4)
        refd = lax.conv_general_dilated(
            x.astype(F32), w4.astype(F32), (1, 1), ((2, 2), (2, 2)),
            lhs_dilation=(2, 2), dimension_numbers=("NHWC", "HWIO", "NHWC"))
        np.testing.assert_allclose(np.asarray(yd.astype(jnp.float32)),
                                   np.asarray(refd), atol=5e-2, rtol=5e-2)


if __name__ == "__main__":
    _check_primitives()

    key = jax.random.PRNGKey(0)
    k_x, k_p = jax.random.split(key)
    batch = 2
    x = jax.random.normal(k_x, (batch, 128 * 2 * 2), F32)   # latent; viewed -> (N,128,2,2)
    params = init_decoder_params(k_p, out_ch=2)
    fwd = jax.jit(decoder_conv_forward)
    out = jax.block_until_ready(fwd(x, params))
    assert out.shape == (batch, 2, 256, 256), out.shape
    assert bool(jnp.all(jnp.isfinite(out)))
    print("KERNEL_OK")
</pallas_src>

<mosaic_0001>
module attributes {stable_mosaic.version = 11 : i64} {
  func.func @_conv_kernel(%arg0: i32, %arg1: i32, %arg2: memref<1x1x64x128xbf16, #tpu.memory_space<vmem>>, %arg3: memref<1x16x64x128xbf16, #tpu.memory_space<vmem>>, %arg4: memref<1x1x64x128xbf16, #tpu.memory_space<vmem>>, %arg5: memref<3x3x128x128xbf16, #tpu.memory_space<vmem>>, %arg6: memref<1x128xf32, #tpu.memory_space<vmem>>, %arg7: memref<1x16x64x128xf32, #tpu.memory_space<vmem>>) attributes {dimension_semantics = [#tpu.dimension_semantics<parallel>, #tpu.dimension_semantics<parallel>], iteration_bounds = array<i64: 2, 4>, scalar_prefetch = 0 : i64, scratch_operands = 0 : i64, tpu.core_type = #tpu.core_type<tc>, window_params = [{transform_indices = @transform_0, window_bounds = array<i64: 1, 1, 64, 128>}, {transform_indices = @transform_1, window_bounds = array<i64: 1, 16, 64, 128>}, {transform_indices = @transform_2, window_bounds = array<i64: 1, 1, 64, 128>}, {pipeline_mode = #tpu.pipeline_mode<synchronous>, transform_indices = @transform_3, window_bounds = array<i64: 3, 3, 128, 128>}, {pipeline_mode = #tpu.pipeline_mode<synchronous>, transform_indices = @transform_4, window_bounds = array<i64: 1, 128>}, {transform_indices = @transform_5, window_bounds = array<i64: 1, 16, 64, 128>}]} {
    %c0 = arith.constant 0 : index
    %c0_0 = arith.constant 0 : index
    %0 = vector.load %arg6[%c0, %c0_0] : memref<1x128xf32, #tpu.memory_space<vmem>>, vector<1x128xf32>
    %c0_1 = arith.constant 0 : index
    %c0_2 = arith.constant 0 : index
    %c0_3 = arith.constant 0 : index
    %c0_4 = arith.constant 0 : index
    %1 = vector.load %arg2[%c0_1, %c0_2, %c0_3, %c0_4] : memref<1x1x64x128xbf16, #tpu.memory_space<vmem>>, vector<1x1x64x128xbf16>
    %2 = vector.shape_cast %1 : vector<1x1x64x128xbf16> to vector<64x128xbf16>
    %c0_5 = arith.constant 0 : index
    %c0_6 = arith.constant 0 : index
    %c0_7 = arith.constant 0 : index
    %c0_8 = arith.constant 0 : index
    %3 = vector.load %arg3[%c0_5, %c0_6, %c0_7, %c0_8] : memref<1x16x64x128xbf16, #tpu.memory_space<vmem>>, vector<1x16x64x128xbf16>
    %4 = vector.shape_cast %3 : vector<1x16x64x128xbf16> to vector<16x64x128xbf16>
    %c0_9 = arith.constant 0 : index
    %c0_10 = arith.constant 0 : index
    %c0_11 = arith.constant 0 : index
    %c0_12 = arith.constant 0 : index
    %5 = vector.load %arg4[%c0_9, %c0_10, %c0_11, %c0_12] : memref<1x1x64x128xbf16, #tpu.memory_space<vmem>>, vector<1x1x64x128xbf16>
    %6 = vector.shape_cast %5 : vector<1x1x64x128xbf16> to vector<64x128xbf16>
    %c0_i32 = arith.constant 0 : i32
    %7 = arith.cmpi sgt, %arg1, %c0_i32 : i32
    %cst = arith.constant 0.000000e+00 : bf16
    %8 = vector.broadcast %cst : bf16 to vector<64x128xbf16>
    %9 = arith.select %7, %2, %8 : vector<64x128xbf16>
    %c3_i32 = arith.constant 3 : i32
    %10 = arith.cmpi slt, %arg1, %c3_i32 : i32
    %cst_13 = arith.constant 0.000000e+00 : bf16
    %11 = vector.broadcast %cst_13 : bf16 to vector<64x128xbf16>
    %12 = arith.select %10, %6, %11 : vector<64x128xbf16>
    %13 = vector.shape_cast %9 : vector<64x128xbf16> to vector<1x64x128xbf16>
    %14 = vector.shape_cast %12 : vector<64x128xbf16> to vector<1x64x128xbf16>
    %15 = tpu.concatenate %13, %4, %14 in 0 : vector<1x64x128xbf16>, vector<16x64x128xbf16>, vector<1x64x128xbf16> -> vector<18x64x128xbf16>
    %cst_14 = arith.constant 0.000000e+00 : bf16
    %16 = vector.broadcast %cst_14 : bf16 to vector<18x1x128xbf16>
    %17 = vector.extract_strided_slice %15 {offsets = [0, 0, 0], sizes = [18, 63, 128], strides = [1, 1, 1]} : vector<18x64x128xbf16> to vector<18x63x128xbf16>
    %18 = tpu.concatenate %16, %17 in 1 : vector<18x1x128xbf16>, vector<18x63x128xbf16> -> vector<18x64x128xbf16>
    %19 = vector.extract_strided_slice %15 {offsets = [0, 1, 0], sizes = [18, 63, 128], strides = [1, 1, 1]} : vector<18x64x128xbf16> to vector<18x63x128xbf16>
    %20 = tpu.concatenate %19, %16 in 1 : vector<18x63x128xbf16>, vector<18x1x128xbf16> -> vector<18x64x128xbf16>
    %21 = vector.extract_strided_slice %18 {offsets = [0, 0, 0], sizes = [16, 64, 128], strides = [1, 1, 1]} : vector<18x64x128xbf16> to vector<16x64x128xbf16>
    %22 = vector.shape_cast %21 : vector<16x64x128xbf16> to vector<1024x128xbf16>
    %c0_15 = arith.constant 0 : index
    %c0_16 = arith.constant 0 : index
    %c0_17 = arith.constant 0 : index
    %c0_18 = arith.constant 0 : index
    %23 = vector.load %arg5[%c0_15, %c0_16, %c0_17, %c0_18] : memref<3x3x128x128xbf16, #tpu.memory_space<vmem>>, vector<1x1x128x128xbf16>
    %24 = vector.shape_cast %23 : vector<1x1x128x128xbf16> to vector<128x128xbf16>
    %cst_19 = arith.constant dense<0.000000e+00> : vector<1024x128xf32>
    %25 = tpu.matmul %22, %24, %cst_19 {dimension_numbers = #tpu.dot_dimension_numbers<[1], [0], [0], [1], [0, 0, 1, 1], [], []>} : vector<1024x128xbf16>, vector<128x128xbf16>, vector<1024x128xf32> -> vector<1024x128xf32>
    %26 = vector.extract_strided_slice %15 {offsets = [0, 0, 0], sizes = [16, 64, 128], strides = [1, 1, 1]} : vector<18x64x128xbf16> to vector<16x64x128xbf16>
    %27 = vector.shape_cast %26 : vector<16x64x128xbf16> to vector<1024x128xbf16>
    %c0_20 = arith.constant 0 : index
    %c1 = arith.constant 1 : index
    %c0_21 = arith.constant 0 : index
    %c0_22 = arith.constant 0 : index
    %28 = vector.load %arg5[%c0_20, %c1, %c0_21, %c0_22] : memref<3x3x128x128xbf16, #tpu.memory_space<vmem>>, vector<1x1x128x128xbf16>
    %29 = vector.shape_cast %28 : vector<1x1x128x128xbf16> to vector<128x128xbf16>
    %cst_23 = arith.constant dense<0.000000e+00> : vector<1024x128xf32>
    %30 = tpu.matmul %27, %29, %cst_23 {dimension_numbers = #tpu.dot_dimension_numbers<[1], [0], [0], [1], [0, 0, 1, 1], [], []>} : vector<1024x128xbf16>, vector<128x128xbf16>, vector<1024x128xf32> -> vector<1024x128xf32>
    %31 = arith.addf %25, %30 : vector<1024x128xf32>
    %32 = vector.extract_strided_slice %20 {offsets = [0, 0, 0], sizes = [16, 64, 128], strides = [1, 1, 1]} : vector<18x64x128xbf16> to vector<16x64x128xbf16>
    %33 = vector.shape_cast %32 : vector<16x64x128xbf16> to vector<1024x128xbf16>
    %c0_24 = arith.constant 0 : index
    %c2 = arith.constant 2 : index
    %c0_25 = arith.constant 0 : index
    %c0_26 = arith.constant 0 : index
    %34 = vector.load %arg5[%c0_24, %c2, %c0_25, %c0_26] : memref<3x3x128x128xbf16, #tpu.memory_space<vmem>>, vector<1x1x128x128xbf16>
    %35 = vector.shape_cast %34 : vector<1x1x128x128xbf16> to vector<128x128xbf16>
    %cst_27 = arith.constant dense<0.000000e+00> : vector<1024x128xf32>
    %36 = tpu.matmul %33, %35, %cst_27 {dimension_numbers = #tpu.dot_dimension_numbers<[1], [0], [0], [1], [0, 0, 1, 1], [], []>} : vector<1024x128xbf16>, vector<128x128xbf16>, vector<1024x128xf32> -> vector<1024x128xf32>
    %37 = arith.addf %31, %36 : vector<1024x128xf32>
    %38 = vector.extract_strided_slice %18 {offsets = [1, 0, 0], sizes = [16, 64, 128], strides = [1, 1, 1]} : vector<18x64x128xbf16> to vector<16x64x128xbf16>
    %39 = vector.shape_cast %38 : vector<16x64x128xbf16> to vector<1024x128xbf16>
    %c1_28 = arith.constant 1 : index
    %c0_29 = arith.constant 0 : index
    %c0_30 = arith.constant 0 : index
    %c0_31 = arith.constant 0 : index
    %40 = vector.load %arg5[%c1_28, %c0_29, %c0_30, %c0_31] : memref<3x3x128x128xbf16, #tpu.memory_space<vmem>>, vector<1x1x128x128xbf16>
    %41 = vector.shape_cast %40 : vector<1x1x128x128xbf16> to vector<128x128xbf16>
    %cst_32 = arith.constant dense<0.000000e+00> : vector<1024x128xf32>
    %42 = tpu.matmul %39, %41, %cst_32 {dimension_numbers = #tpu.dot_dimension_numbers<[1], [0], [0], [1], [0, 0, 1, 1], [], []>} : vector<1024x128xbf16>, vector<128x128xbf16>, vector<1024x128xf32> -> vector<1024x128xf32>
    %43 = arith.addf %37, %42 : vector<1024x128xf32>
    %44 = vector.extract_strided_slice %15 {offsets = [1, 0, 0], sizes = [16, 64, 128], strides = [1, 1, 1]} : vector<18x64x128xbf16> to vector<16x64x128xbf16>
    %45 = vector.shape_cast %44 : vector<16x64x128xbf16> to vector<1024x128xbf16>
    %c1_33 = arith.constant 1 : index
    %c1_34 = arith.constant 1 : index
    %c0_35 = arith.constant 0 : index
    %c0_36 = arith.constant 0 : index
    %46 = vector.load %arg5[%c1_33, %c1_34, %c0_35, %c0_36] : memref<3x3x128x128xbf16, #tpu.memory_space<vmem>>, vector<1x1x128x128xbf16>
    %47 = vector.shape_cast %46 : vector<1x1x128x128xbf16> to vector<128x128xbf16>
    %cst_37 = arith.constant dense<0.000000e+00> : vector<1024x128xf32>
    %48 = tpu.matmul %45, %47, %cst_37 {dimension_numbers = #tpu.dot_dimension_numbers<[1], [0], [0], [1], [0, 0, 1, 1], [], []>} : vector<1024x128xbf16>, vector<128x128xbf16>, vector<1024x128xf32> -> vector<1024x128xf32>
    %49 = arith.addf %43, %48 : vector<1024x128xf32>
    %50 = vector.extract_strided_slice %20 {offsets = [1, 0, 0], sizes = [16, 64, 128], strides = [1, 1, 1]} : vector<18x64x128xbf16> to vector<16x64x128xbf16>
    %51 = vector.shape_cast %50 : vector<16x64x128xbf16> to vector<1024x128xbf16>
    %c1_38 = arith.constant 1 : index
    %c2_39 = arith.constant 2 : index
    %c0_40 = arith.constant 0 : index
    %c0_41 = arith.constant 0 : index
    %52 = vector.load %arg5[%c1_38, %c2_39, %c0_40, %c0_41] : memref<3x3x128x128xbf16, #tpu.memory_space<vmem>>, vector<1x1x128x128xbf16>
    %53 = vector.shape_cast %52 : vector<1x1x128x128xbf16> to vector<128x128xbf16>
    %cst_42 = arith.constant dense<0.000000e+00> : vector<1024x128xf32>
    %54 = tpu.matmul %51, %53, %cst_42 {dimension_numbers = #tpu.dot_dimension_numbers<[1], [0], [0], [1], [0, 0, 1, 1], [], []>} : vector<1024x128xbf16>, vector<128x128xbf16>, vector<1024x128xf32> -> vector<1024x128xf32>
    %55 = arith.addf %49, %54 : vector<1024x128xf32>
    %56 = vector.extract_strided_slice %18 {offsets = [2, 0, 0], sizes = [16, 64, 128], strides = [1, 1, 1]} : vector<18x64x128xbf16> to vector<16x64x128xbf16>
    %57 = vector.shape_cast %56 : vector<16x64x128xbf16> to vector<1024x128xbf16>
    %c2_43 = arith.constant 2 : index
    %c0_44 = arith.constant 0 : index
    %c0_45 = arith.constant 0 : index
    %c0_46 = arith.constant 0 : index
    %58 = vector.load %arg5[%c2_43, %c0_44, %c0_45, %c0_46] : memref<3x3x128x128xbf16, #tpu.memory_space<vmem>>, vector<1x1x128x128xbf16>
    %59 = vector.shape_cast %58 : vector<1x1x128x128xbf16> to vector<128x128xbf16>
    %cst_47 = arith.constant dense<0.000000e+00> : vector<1024x128xf32>
    %60 = tpu.matmul %57, %59, %cst_47 {dimension_numbers = #tpu.dot_dimension_numbers<[1], [0], [0], [1], [0, 0, 1, 1], [], []>} : vector<1024x128xbf16>, vector<128x128xbf16>, vector<1024x128xf32> -> vector<1024x128xf32>
    %61 = arith.addf %55, %60 : vector<1024x128xf32>
    %62 = vector.extract_strided_slice %15 {offsets = [2, 0, 0], sizes = [16, 64, 128], strides = [1, 1, 1]} : vector<18x64x128xbf16> to vector<16x64x128xbf16>
    %63 = vector.shape_cast %62 : vector<16x64x128xbf16> to vector<1024x128xbf16>
    %c2_48 = arith.constant 2 : index
    %c1_49 = arith.constant 1 : index
    %c0_50 = arith.constant 0 : index
    %c0_51 = arith.constant 0 : index
    %64 = vector.load %arg5[%c2_48, %c1_49, %c0_50, %c0_51] : memref<3x3x128x128xbf16, #tpu.memory_space<vmem>>, vector<1x1x128x128xbf16>
    %65 = vector.shape_cast %64 : vector<1x1x128x128xbf16> to vector<128x128xbf16>
    %cst_52 = arith.constant dense<0.000000e+00> : vector<1024x128xf32>
    %66 = tpu.matmul %63, %65, %cst_52 {dimension_numbers = #tpu.dot_dimension_numbers<[1], [0], [0], [1], [0, 0, 1, 1], [], []>} : vector<1024x128xbf16>, vector<128x128xbf16>, vector<1024x128xf32> -> vector<1024x128xf32>
    %67 = arith.addf %61, %66 : vector<1024x128xf32>
    %68 = vector.extract_strided_slice %20 {offsets = [2, 0, 0], sizes = [16, 64, 128], strides = [1, 1, 1]} : vector<18x64x128xbf16> to vector<16x64x128xbf16>
    %69 = vector.shape_cast %68 : vector<16x64x128xbf16> to vector<1024x128xbf16>
    %c2_53 = arith.constant 2 : index
    %c2_54 = arith.constant 2 : index
    %c0_55 = arith.constant 0 : index
    %c0_56 = arith.constant 0 : index
    %70 = vector.load %arg5[%c2_53, %c2_54, %c0_55, %c0_56] : memref<3x3x128x128xbf16, #tpu.memory_space<vmem>>, vector<1x1x128x128xbf16>
    %71 = vector.shape_cast %70 : vector<1x1x128x128xbf16> to vector<128x128xbf16>
    %cst_57 = arith.constant dense<0.000000e+00> : vector<1024x128xf32>
    %72 = tpu.matmul %69, %71, %cst_57 {dimension_numbers = #tpu.dot_dimension_numbers<[1], [0], [0], [1], [0, 0, 1, 1], [], []>} : vector<1024x128xbf16>, vector<128x128xbf16>, vector<1024x128xf32> -> vector<1024x128xf32>
    %73 = arith.addf %67, %72 : vector<1024x128xf32>
    %74 = vector.broadcast %0 : vector<1x128xf32> to vector<1024x128xf32>
    %75 = arith.addf %73, %74 : vector<1024x128xf32>
    %76 = vector.shape_cast %75 : vector<1024x128xf32> to vector<16x64x128xf32>
    %c0_58 = arith.constant 0 : index
    %c0_59 = arith.constant 0 : index
    %c0_60 = arith.constant 0 : index
    %c0_61 = arith.constant 0 : index
    %77 = vector.load %arg7[%c0_58, %c0_59, %c0_60, %c0_61] : memref<1x16x64x128xf32, #tpu.memory_space<vmem>>, vector<1x16x64x128xf32>
    %78 = vector.shape_cast %77 : vector<1x16x64x128xf32> to vector<16x64x128xf32>
    %79 = vector.shape_cast %76 : vector<16x64x128xf32> to vector<1x16x64x128xf32>
    tpu.vector_store %arg7[%c0_58, %c0_59, %c0_60, %c0_61], %79 {strides = array<i32>} : memref<1x16x64x128xf32, #tpu.memory_space<vmem>>, vector<1x16x64x128xf32>,
    return
  }
  func.func @transform_0(%arg0: i32, %arg1: i32) -> (i32, i32, i32, i32) {
    %c16_i32 = arith.constant 16 : i32
    %0 = arith.muli %arg1, %c16_i32 : i32
    %c1_i32 = arith.constant 1 : i32
    %1 = arith.subi %0, %c1_i32 : i32
    %c0_i32 = arith.constant 0 : i32
    %2 = arith.maxsi %1, %c0_i32 : i32
    %c0_i32_0 = arith.constant 0 : i32
    %c0_i32_1 = arith.constant 0 : i32
    %c0_i32_2 = arith.constant 0 : i32
    return %arg0, %2, %c0_i32_0, %c0_i32_1 : i32, i32, i32, i32
  }
  func.func @transform_1(%arg0: i32, %arg1: i32) -> (i32, i32, i32, i32) {
    %c0_i32 = arith.constant 0 : i32
    %c0_i32_0 = arith.constant 0 : i32
    %c0_i32_1 = arith.constant 0 : i32
    return %arg0, %arg1, %c0_i32, %c0_i32_0 : i32, i32, i32, i32
  }
  func.func @transform_2(%arg0: i32, %arg1: i32) -> (i32, i32, i32, i32) {
    %c16_i32 = arith.constant 16 : i32
    %0 = arith.muli %arg1, %c16_i32 : i32
    %c16_i32_0 = arith.constant 16 : i32
    %1 = arith.addi %0, %c16_i32_0 : i32
    %c63_i32 = arith.constant 63 : i32
    %2 = arith.minsi %1, %c63_i32 : i32
    %c0_i32 = arith.constant 0 : i32
    %c0_i32_1 = arith.constant 0 : i32
    %c0_i32_2 = arith.constant 0 : i32
    return %arg0, %2, %c0_i32, %c0_i32_1 : i32, i32, i32, i32
  }
  func.func @transform_3(%arg0: i32, %arg1: i32) -> (i32, i32, i32, i32) {
    %c0_i32 = arith.constant 0 : i32
    %c0_i32_0 = arith.constant 0 : i32
    %c0_i32_1 = arith.constant 0 : i32
    %c0_i32_2 = arith.constant 0 : i32
    %c0_i32_3 = arith.constant 0 : i32
    return %c0_i32, %c0_i32_0, %c0_i32_1, %c0_i32_2 : i32, i32, i32, i32
  }
  func.func @transform_4(%arg0: i32, %arg1: i32) -> (i32, i32) {
    %c0_i32 = arith.constant 0 : i32
    %c0_i32_0 = arith.constant 0 : i32
    %c0_i32_1 = arith.constant 0 : i32
    return %c0_i32, %c0_i32_0 : i32, i32
  }
  func.func @transform_5(%arg0: i32, %arg1: i32) -> (i32, i32, i32, i32) {
    %c0_i32 = arith.constant 0 : i32
    %c0_i32_0 = arith.constant 0 : i32
    %c0_i32_1 = arith.constant 0 : i32
    return %arg0, %arg1, %c0_i32, %c0_i32_0 : i32, i32, i32, i32
  }
}

</mosaic_0001>

<bundles_post_ra>
// kernel: tpu_custom_call.1
= control target key start
LH: loop header
LB: loop body
LE: loop exit
PB: predicated region body
PF: predicated region fallthrough
CT: control target
= control target key end

     0   :  { %s11492_s0 = inlined_call_operand.hbm [shape: bf16[2,64,64,128], index: 0, kind: input, shape index: {}]   ;;  %s11493_s1 = inlined_call_operand.hbm [shape: bf16[2,64,64,128], index: 1, kind: input, shape index: {}]   ;;  %s11494_s2 = inlined_call_operand.hbm [shape: bf16[2,64,64,128], index: 2, kind: input, shape index: {}]   ;;  %s11495_s3 = inlined_call_operand.hbm [shape: bf16[3,3,128,128], index: 3, kind: input, shape index: {}]   ;;  %s11496_s4 = inlined_call_operand.hbm [shape: f32[1,128], index: 4, kind: input, shape index: {}]   ;;  %s11497_s5 = inlined_call_operand.hbm [shape: f32[2,64,64,128], index: 5, kind: output, shape index: {}]  }
   0x1   :  { %11770 = sst [smem:[#allocation241_spill]] %s11492_s0 }
   0x2   :  { %11771 = sst [smem:[#allocation242_spill]] %s11493_s1 }
   0x3   :  { %11772 = sst [smem:[#allocation243_spill]] %s11494_s2 }
   0x4   :  { %11773 = sst [smem:[#allocation244_spill]] %s11495_s3 }
   0x5   :  { %11774 = sst [smem:[#allocation245_spill]] %s11496_s4 }
   0x6   :  { %11775 = sst [smem:[#allocation246_spill]] %s11497_s5 }
   0x7   :  { %10 = vsyncpa [#allocation3], 0 }
   0x8   :  { %12 = vsyncpa [#allocation3 + $0x1], 0 }
   0x9   :  { %13 = vsyncpa [#allocation6], 0 }
   0xa   :  { %15 = vsyncpa [#allocation6 + $0x1], 0 }
   0xb   :  { %16 = vsyncpa [#allocation9], 0 }
   0xc   :  { %17 = vsyncpa [#allocation4], 0 }
   0xd   :  { %19 = vsyncpa [#allocation4 + $0x1], 0  ;;  %s8206_s18 = smov 0   ;;  %s8208_s19 = smov 0  }
   0xe   :  { %s8210_s20 = smov 0   ;;  %s8212_s21 = smov 0  }
   0xf   :  { %s8214_s22 = smov 0   ;;  %s8216_s23 = smov 0  }
  0x10   :  { %s8218_s24 = smov 0   ;;  %s8220_s25 = smov 0  }
  0x11   :  { %s8222_s26 = smov 0   ;;  %s8224_s27 = smov 0  }
  0x12   :  { %s8226_s28 = smov 0   ;;  %s8228_s29 = smov 0  }
  0x13   :  { %s8230_s30 = smov 0   ;;  %s8232_s6 = smov 0  }
  0x14 LB: > { %11776 = sst [smem:[#allocation17_spill]] %s8128_s21  ;;  %s8277_s7 = sadd.s32 4294967295, %s8168_s6   ;;  %s8168_s6 = sphi %s8232_s6, %s25_s6   ;;  %s8164_s30 = sphi %s8230_s30, %s12556_s30   ;;  %s8160_s29 = sphi %s8228_s29, %s12555_s29   ;;  %s8156_s28 = sphi %s8226_s28, %s12543_s28   ;;  %s8152_s27 = sphi %s8224_s27, %s12542_s27   ;;  %s8148_s26 = sphi %s8222_s26, %s12554_s26   ;;  %s8144_s25 = sphi %s8220_s25, %s12553_s25   ;;  %s8140_s24 = sphi %s8218_s24, %s12552_s24   ;;  %s8136_s23 = sphi %s8216_s23, %s12551_s23   ;;  %s8132_s22 = sphi %s8214_s22, %s12550_s22   ;;  %s8128_s21 = sphi %s8212_s21, %s12549_s21   ;;  %s8124_s20 = sphi %s8210_s20, %s12548_s20   ;;  %s8120_s19 = sphi %s8208_s19, %s12547_s19   ;;  %s8116_s18 = sphi %s8206_s18, %s12546_s18  }
  0x15   : > { %11777 = sst [smem:[#allocation18_spill]] %s8132_s22  ;;  %p6847_p0 = scmp.ge.s32.totalorder %s8168_s6, 1 }
  0x16   : > { %11778 = sst [smem:[#allocation19_spill]] %s8152_s27  ;;  %p68_p1 = scmp.eq.s32.totalorder %s8277_s7, 0 }
  0x17   : > { %11779 = sst [smem:[#allocation20_spill]] %s8156_s28  ;;  %p212_p2 = scmp.lt.s32.totalorder %s8168_s6, 9 }
  0x18   : > { %11780 = sst [smem:[#allocation21_spill]] %s8160_s29  ;;  %s8170_s12 = smov [#allocation8]  }
  0x19   : > { %11781 = sst [smem:[#allocation22_spill]] %s8164_s30  ;;  %p8285_p3 = pnand %p6847_p0, %p212_p2 }
  0x1a   : > { %s11782_s3 = sld [smem:[#allocation244_spill]]  ;;  %s225_s13 = sshll.u32 %s8170_s12, 4  ;;  %s226_s13 = int_to_ptr.vmem [resolvable:$true] %s225_s13 }
  0x1b   : > { %s11783_s11 = scalar_select %p8285_p3, 1, 0 }
  0x1c   : > { %p7603_p4 = pneg %p8285_p3  ;;  %s11498_s15 = smov 64  }
  0x1d   : > { %11784 = sst [smem:[#allocation23_spill]] %s11783_s11  ;;  %s11500_s16 = smov 4  }
  0x1e   : > { %p8293_p5 = pnand %p7603_p4, %p68_p1  ;;  %s6840_s17 = sadd.s32 4294967294, %s8168_s6  }
  0x1f   : > { %s34_s8 = sadd.s32 1, %s8160_s29  ;;  %s37_s9 = sadd.s32 1, %s8164_s30 }
  0x20   : > { %s223_s10 = sshll.u32 %s11782_s3, 4  ;;  %p35_p6 = scmp.ge.s32.totalorder %s34_s8, 4  ;;  %s224_s10 = int_to_ptr.hbm [resolvable:$true] %s223_s10 }
  0x21   : > { %7606 = dma.hbm_to_vmem [thread:$0]  (!%p8293_p5), %s224_s10, 9216, %s226_s13, [#allocation9], %s11498_s15, %s11498_s15, %s11500_s16  }
  0x22   : > { %p62_p7 = scmp.eq.s32.totalorder %s8168_s6, 0  ;;  %s82_s12 = sadd.s32 1, %s8136_s23 }
  0x23   : > { %p89_p8 = scmp.ne.s32.totalorder %s8136_s23, %s8132_s22  ;;  %s12558_s8 = smov (%p35_p6, %s34_s8), 0 }
  0x24   : > { %11786 = sst [smem:[#allocation24_spill]] %s12558_s8  ;;  %s12560_s9 = smov (!%p35_p6, %s37_s9), %s8164_s30 }
  0x25   : > { %s78_s3 = ssub.s32 %s8160_s29, %s12558_s8  ;;  %p8316_p9 = por %p89_p8, %p62_p7 }
  0x26   : > { %p39_p10 = scmp.ge.s32.totalorder %s12560_s9, 2  ;;  %p95_p11 = scmp.ne.s32.totalorder %s8132_s22, %s8128_s21 }
  0x27   : > { %p199_p12 = scmp.eq.s32.totalorder %s8277_s7, 7  ;;  %p205_p13 = scmp.eq.s32.totalorder %s6840_s17, 7 }
  0x28   : > { %s12562_s9 = smov (%p39_p10, %s12560_s9), 0  ;;  %p8327_p0 = por %p95_p11, %p68_p1 }
  0x29   : > { %11788 = sst [smem:[#allocation25_spill]] %s12562_s9  ;;  %p8331_p2 = por %p199_p12, %p89_p8 }
  0x2a   : > { %s11789_s13 = scalar_select %p8327_p0, 1, 0 }
  0x2b   : > { %s11791_s15 = scalar_select %p8331_p2, 1, 0 }
  0x2c   : > { %11790 = sst [smem:[#allocation26_spill]] %s11789_s13  ;;  %s8337_s16 = ssub.s32 %s8164_s30, %s12562_s9 }
  0x2d   : > { %11792 = sst [smem:[#allocation27_spill]] %s11791_s15  ;;  %p8339_p4 = por %p205_p13, %p95_p11 }
  0x2e   : > { %s79_s17 = sor.u32 %s78_s3, %s8337_s16  ;;  %p11516_p6 = scmp.lt.s32.totalorder %s8168_s6, 8 }
  0x2f   : > { %s11793_s21 = scalar_select %p8339_p4, 1, 0 }
  0x30   : > { %p80_p10 = scmp.eq.s32.totalorder %s79_s17, 0  ;;  %s8346_s5 = sshll.u32 %s8164_s30, 9 }
  0x31   : > { %11794 = sst [smem:[#allocation28_spill]] %s11793_s21  ;;  %s279_s28 = sand.u32 1, %s8168_s6  }
  0x32   : > { %s281_s27 = sand.u32 1, %s8136_s23   ;;  %s7425_s9 = sshll.u32 %s8160_s29, 7 }
  0x33   : > { %s8351_s13 = scalar_select %p80_p10, %s8136_s23, %s82_s12  }
  0x34   : > { %s6857_s15 = sshll.u32 %s281_s27, 9  ;;  %s289_s22 = sadd.s32 %s7425_s9, %s8346_s5 }
  0x35   : > { %11795 = sst [smem:[#allocation29_spill]] %s8351_s13  ;;  %s283_s11 = scalar_lea.vmem [#allocation5], %s6857_s15 }
  0x36   : > { %s294_s2 = sshll.u32 %s283_s11, 4  ;;  %s6861_s21 = sshll.u32 %s289_s22, 2  ;;  %s295_s2 = int_to_ptr.vmem [resolvable:$true] %s294_s2 }
  0x37   : > { %s11796_s1 = sld [smem:[#allocation242_spill]]  ;;  %p7614_p8 = pnand %p11516_p6, %p8316_p9 }
  0x38   : > { %s11797_s4 = sld [smem:[#allocation245_spill]]  ;;  %s8365_s11 = scalar_lea.sflag [#allocation6], %s279_s28 }
  0x39   : > { %s11798_s22 = smov 4   ;;  %s11799_s15 = smov 64  }
  0x3a   : > { %s8173_s0 = smov [#allocation10]   ;;  %s6841_s9 = sshll.u32 %s8160_s29, 4 }
  0x3b   : > { %s6843_s10 = sshll.u32 %s12558_s8, 4  ;;  %s6842_s28 = sadd.s32 4294967295, %s6841_s9 }
  0x3c   : > { %s6844_s13 = sadd.s32 4294967295, %s6843_s10  ;;  %p43_p9 = scmp.gt.s32.totalorder %s6842_s28, 0 }
  0x3d   : > { %s291_s17 = scalar_lea.hbm %s11796_s1, %s6861_s21  ;;  %s240_s21 = sshll.u32 %s8173_s0, 4  ;;  %s241_s21 = int_to_ptr.vmem [resolvable:$true] %s240_s21 }
  0x3e   : > { %s292_s30 = sshll.u32 %s291_s17, 4  ;;  %s238_s27 = sshll.u32 %s11797_s4, 4  ;;  %s293_s30 = int_to_ptr.hbm [resolvable:$true] %s292_s30  ;;  %s239_s27 = int_to_ptr.hbm [resolvable:$true] %s238_s27 }
  0x3f   : > { %7616 = dma.hbm_to_vmem [thread:$0]  (!%p7614_p8), %s293_s30, 8192, %s295_s2, %s8365_s11, %s11799_s15, %s11799_s15, %s11798_s22  }
  0x40   : > { %7609 = dma.hbm_to_vmem [thread:$0]  (!%p8293_p5), %s239_s27, 16, %s241_s21, [#allocation9]  }
  0x41   : > { %p47_p11 = scmp.gt.s32.totalorder %s6844_s13, 0  ;;  %s54_s2 = sadd.s32 1, %s8148_s26 }
  0x42   : > { %p61_p12 = scmp.ne.s32.totalorder %s8148_s26, %s8144_s25  ;;  %s12564_s28 = smov (!%p43_p9, %s6842_s28), 0 }
  0x43   : > { %s12566_s13 = smov (!%p47_p11, %s6844_s13), 0  ;;  %p67_p5 = scmp.ne.s32.totalorder %s8144_s25, %s8140_s24 }
  0x44   : > { %p8380_p13 = por %p62_p7, %p61_p12  ;;  %s50_s14 = ssub.s32 %s12564_s28, %s12566_s13 }
  0x45   : > { %s106_s3 = sadd.s32 16, %s6841_s9  ;;  %s51_s17 = sor.u32 %s50_s14, %s8337_s16 }
  0x46   : > { %p8389_p10 = por %p68_p1, %p67_p5  ;;  %p52_p8 = scmp.eq.s32.totalorder %s51_s17, 0 }
  0x47   : > { %p107_p9 = scmp.lt.s32.totalorder %s106_s3, 63  ;;  %s110_s27 = sadd.s32 16, %s6843_s10 }
  0x48   : > { %s251_s0 = sand.u32 1, %s8148_s26   ;;  %p111_p11 = scmp.lt.s32.totalorder %s110_s27, 63 }
  0x49   : > { %s8395_s21 = scalar_select %p52_p8, %s8148_s26, %s54_s2  }
  0x4a   : > { %s6851_s1 = sshll.u32 %s251_s0, 5  ;;  %s6854_s24 = sshll.u32 %s12564_s28, 3 }
  0x4b   : > { %s264_s9 = sadd.s32 %s8346_s5, %s6854_s24  ;;  %s255_s14 = scalar_lea.vmem [#allocation2], %s6851_s1 }
  0x4c   : > { %s6856_s13 = sshll.u32 %s264_s9, 2  ;;  %s269_s4 = sshll.u32 %s255_s14, 4  ;;  %s270_s4 = int_to_ptr.vmem [resolvable:$true] %s269_s4 }
  0x4d   : > { %s11802_s10 = sld [smem:[#allocation241_spill]]  ;;  %p7611_p12 = pnand %p11516_p6, %p8380_p13 }
  0x4e   : > { %s252_s28 = scalar_lea.sflag [#allocation3], %s251_s0  ;;  %s12568_s3 = smov (!%p107_p9, %s106_s3), 63 }
  0x4f   : > { %s12570_s27 = smov (!%p111_p11, %s110_s27), 63  ;;  %s118_s1 = sadd.s32 1, %s8124_s20 }
  0x50   : > { %p125_p5 = scmp.ne.s32.totalorder %s8124_s20, %s8120_s19  ;;  %s114_s8 = ssub.s32 %s12568_s3, %s12570_s27 }
  0x51   : > { %p131_p8 = scmp.ne.s32.totalorder %s8120_s19, %s8116_s18  ;;  %s306_s0 = sand.u32 1, %s8124_s20  }
  0x52   : > { %p8418_p13 = por %p125_p5, %p62_p7  ;;  %s6864_s24 = sshll.u32 %s12568_s3, 3 }
  0x53   : > { %s266_s29 = scalar_lea.hbm %s11802_s10, %s6856_s13  ;;  %s6862_s18 = sshll.u32 %s306_s0, 5 }
  0x54   : > { %s267_s2 = sshll.u32 %s266_s29, 4  ;;  %s115_s29 = sor.u32 %s114_s8, %s8337_s16  ;;  %s268_s2 = int_to_ptr.hbm [resolvable:$true] %s267_s2 }
  0x55   : > { %7613 = dma.hbm_to_vmem [thread:$0]  (!%p7611_p12), %s268_s2, 512, %s270_s4, %s252_s28, %s11799_s15, %s11799_s15, %s11798_s22  }
  0x56   : > { %p116_p6 = scmp.eq.s32.totalorder %s115_s29, 0  ;;  %p8424_p12 = por %p131_p8, %p68_p1 }
  0x57   : > { %s317_s16 = sadd.s32 %s6864_s24, %s8346_s5  ;;  %s11805_s17 = sld [smem:[#allocation243_spill]] }
  0x58   : > { %s8430_s9 = scalar_select %p116_p6, %s8124_s20, %s118_s1  }
  0x59   : > { %s6866_s27 = sshll.u32 %s317_s16, 2  ;;  %s308_s2 = scalar_lea.vmem [#allocation7], %s6862_s18 }
  0x5a   : > { %s322_s28 = sshll.u32 %s308_s2, 4  ;;  %p11806_p7 = scmp.lt.s32.totalorder %s8168_s6, 8  ;;  %s323_s28 = int_to_ptr.vmem [resolvable:$true] %s322_s28 }
  0x5b   : > { %334 = sbr.rel (%p8285_p3) target bundleno = 2588 (0xa1c), region = 40 }
  0x5c   : > { %p7617_p9 = pnand %p11806_p7, %p8418_p13 }
  0x5d   : > { %s319_s10 = scalar_lea.hbm %s11805_s17, %s6866_s27 }
  0x5e   : > { %s320_s8 = sshll.u32 %s319_s10, 4  ;;  %s321_s8 = int_to_ptr.hbm [resolvable:$true] %s320_s8 }
  0x5f   : > { %7619 = dma.hbm_to_vmem [thread:$0]  (!%p7617_p9), %s321_s8, 512, %s323_s28, %s8365_s11, %s11799_s15, %s11799_s15, %s11798_s22  }
  0x60   : > { %s336_s5 = sand.u32 1, %s8144_s25  }
  0x61   : > { %s6868_s1 = sshll.u32 %s336_s5, 5  ;;  %s337_s29 = scalar_lea.sflag [#allocation3], %s336_s5 }
  0x62   : > { %s8447_s0 = scalar_lea.vmem [#allocation2], %s6868_s1 }
  0x63   : > { %8095 = dma.done.wait (%p8389_p10), %s337_s29, 512  }
  0x64   : > { %8097 = vsyncadd (%p8389_p10), %s337_s29, 4294966784  ;;  %s11808_s30 = sld [smem:[#allocation18_spill]]  ;;  %s346_s18 = sand.u32 1, %s8277_s7  }
  0x65   : > { %s347_s15 = scalar_lea.sflag [#allocation6], %s346_s18 }
  0x6a   : > { %s8455_s11 = sand.u32 1, %s11808_s30  }
  0x6b   : > { %s6869_s22 = sshll.u32 %s8455_s11, 9 }
  0x6c   : > { %s8458_s16 = scalar_lea.vmem [#allocation5], %s6869_s22 }
  0x6d   : > { %8099 = dma.done.wait (%p8327_p0), %s347_s15, 8192  }
  0x6e   : > { %8101 = vsyncadd (%p8327_p0), %s347_s15, 4294959104  ;;  %s358_s12 = sand.u32 1, %s8120_s19  }
  0x6f   : > { %s6870_s27 = sshll.u32 %s358_s12, 5 }
  0x70   : > { %s8465_s13 = scalar_lea.vmem [#allocation7], %s6870_s27 }
  0x71   : > { %8103 = dma.done.wait (%p8424_p12), %s347_s15, 512  }
  0x72   : > { %8105 = vsyncadd (%p8424_p12), %s347_s15, 4294966784 }
  0x73   : > { %8107 = dma.done.wait (%p68_p1), [#allocation9], 9232  }
  0x74   : > { %8109 = vsyncadd (%p68_p1), [#allocation9], 4294958064  ;;  %s11810_s14 = sld [smem:[#allocation19_spill]]  ;;  %v7505_v0 = vld [vmem:[#allocation8 + $0x78] sm:$0xff]  ;;  %v7504_v1 = vld [vmem:[#allocation8 + $0x70] sm:$0xff]  ;;  %vm1579_vm2 = vcmask 1040384  }
  0x75   : > { %7563 = vmatpush.bf16.msra.mxu1 %v7505_v0  ;;  %7564 = vmatpush.bf16.msra.mxu2 %v7505_v0  ;;  %v7503_v2 = vld [vmem:[#allocation8 + $0x68] sm:$0xff]  ;;  %v7502_v3 = vld [vmem:[#allocation8 + $0x60] sm:$0xff]  ;;  %v7501_v4 = vld [vmem:[#allocation8 + $0x58] sm:$0xff]  ;;  %vm948_vm1 = vsmask.f32 256  ;;  %vm1870_vm5 = vcmask 1047552  }
  0x76   : > { %7565 = vmatpush.bf16.msra.mxu3 %v7505_v0  ;;  %2035 = vmatpush.bf16.msra.mxu0 %v7505_v0  ;;  %v7500_v6 = vld [vmem:[#allocation8 + $0x50] sm:$0xff]  ;;  %v420_v7 = vld [vmem:[%s8447_s0] sm:$0xf]  ;;  %v421_v8 = vld [vmem:[%s8447_s0 + $0x4] sm:$0xf]  ;;  %s6873_s4 = sshll.u32 %s8455_s11, 10 }
  0x77   : > { %v7499_v10 = vld [vmem:[#allocation8 + $0x48] sm:$0xff]  ;;  %v7498_v13 = vld [vmem:[#allocation8 + $0x40] sm:$0xff]  ;;  %v7513_v16 = vld [vmem:[#allocation8 + $0xb8] sm:$0xff]  ;;  %vm1599_vm4 = vsmask.f32 7424  ;;  %s10753_s17 = scalar_lea.vmem [#allocation11], %s6873_s4 }
  0x78   : > { %v7521_v17 = vld [vmem:[#allocation8 + $0xf8] sm:$0xff]  ;;  %v7438_v18 = vld [vmem:[%s8458_s16 + $0x60] sm:$0xff]  ;;  %v7512_v24 = vld [vmem:[#allocation8 + $0xb0] sm:$0xff]  ;;  %s12533_s2 = sld [smem:[#allocation20_spill]]  ;;  %s6678_s18 = sshll.u32 %s10753_s17, 4  ;;  %s6679_s18 = int_to_ptr.vmem [resolvable:$true] %s6678_s18 }
  0x79   : > { %7566 = vmatpush.bf16.msra.mxu1 %v7504_v1  ;;  %7567 = vmatpush.bf16.msra.mxu2 %v7504_v1  ;;  %v7454_v19 = vld [vmem:[%s8458_s16 + $0xe0] sm:$0xff]  ;;  %v7497_v22 = vld [vmem:[#allocation8 + $0x38] sm:$0xff]  ;;  %v7520_v25 = vld [vmem:[#allocation8 + $0xf0] sm:$0xff]  ;;  %s6663_s15 = scalar_lea.sflag [#allocation4], %s8455_s11 }
  0x7a   : > { %7568 = vmatpush.bf16.msra.mxu3 %v7504_v1  ;;  %2036 = vmatpush.bf16.msra.mxu0 %v7504_v1  ;;  %p564_p3 = scmp.gt.s32.totalorder %s11810_s14, 0  ;;  %v7470_v20 = vld [vmem:[%s8458_s16 + $0x160] sm:$0xff]  ;;  %v7529_v23 = vld [vmem:[#allocation8 + $0x138] sm:$0xff]  ;;  %v7496_v26 = vld [vmem:[#allocation8 + $0x30] sm:$0xff]  ;;  %p576_p1 = scmp.lt.s32.totalorder %s11810_s14, 3 }
  0x7b   : > { %v7528_v27 = vld [vmem:[#allocation8 + $0x130] sm:$0xff]  ;;  %v422_v28 = vld [vmem:[%s8447_s0 + $0x8] sm:$0xf]  ;;  %v423_v29 = vld [vmem:[%s8447_s0 + $0xc] sm:$0xf]  ;;  %s7562_s28 = sshll.u32 %s11810_s14, 7 }
  0x7c   : > { %s565_s7 = scalar_select %p564_p3, 1, 0  ;;  %v7439_v34 = vld [vmem:[%s8458_s16 + $0x68] sm:$0xff]  ;;  %v424_v38 = vld [vmem:[%s8447_s0 + $0x10] sm:$0xf]  ;;  %v7441_v58 = vld [vmem:[%s8458_s16 + $0x78] sm:$0xff] }
  0x7d   : > { %7569 = vmatpush.bf16.msra.mxu1 %v7503_v2  ;;  %7570 = vmatpush.bf16.msra.mxu2 %v7503_v2  ;;  %v7455_v35 = vld [vmem:[%s8458_s16 + $0xe8] sm:$0xff]  ;;  %v425_v39 = vld [vmem:[%s8447_s0 + $0x14] sm:$0xf]  ;;  %v426_v52 = vld [vmem:[%s8447_s0 + $0x18] sm:$0xf] }
  0x7e   : > { %7571 = vmatpush.bf16.msra.mxu3 %v7503_v2  ;;  %2037 = vmatpush.bf16.msra.mxu0 %v7503_v2  ;;  %v566_v5 = vstv %s565_s7  ;;  %v7471_v36 = vld [vmem:[%s8458_s16 + $0x168] sm:$0xff]  ;;  %v7440_v44 = vld [vmem:[%s8458_s16 + $0x70] sm:$0xff]  ;;  %v427_v53 = vld [vmem:[%s8447_s0 + $0x1c] sm:$0xf]  ;;  %s577_s10 = scalar_select %p576_p1, 1, 0 }
  0x7f   : > { %vm8478_vm0 = vcmp.eq.s32.totalorder %v566_v5, 1  ;;  %v7456_v45 = vld [vmem:[%s8458_s16 + $0xf0] sm:$0xff]  ;;  %v7511_v48 = vld [vmem:[#allocation8 + $0xa8] sm:$0xff]  ;;  %v7457_v59 = vld [vmem:[%s8458_s16 + $0xf8] sm:$0xff]  ;;  %s7421_s8 = sshll.u32 %s12533_s2, 9  ;;  %s12534_s0 = sld [smem:[#allocation246_spill]] }
  0x80   : > { %v568_v11 = vsel %vm8478_vm0, %v420_v7, 0  ;;  %v569_v12 = vsel %vm8478_vm0, %v421_v8, 0  ;;  %v570_v30 = vsel %vm8478_vm0, %v422_v28, 0  ;;  %v571_v31 = vsel %vm8478_vm0, %v423_v29, 0  ;;  %v7472_v46 = vld [vmem:[%s8458_s16 + $0x170] sm:$0xff]  ;;  %v7519_v49 = vld [vmem:[#allocation8 + $0xe8] sm:$0xff]  ;;  %vm8744_vm3 = vmand %vm1579_vm2, %vm948_vm1  ;;  %s6675_s3 = sadd.s32 %s7562_s28, %s7421_s8 }
  0x81   : > { %7572 = vmatpush.bf16.msra.mxu1 %v7502_v3  ;;  %7573 = vmatpush.bf16.msra.mxu2 %v7502_v3  ;;  %v732_v14 = vunpack.c.l.b16 %v568_v11  ;;  %v733_v15 = vunpack.c.l.b16 %v569_v12  ;;  %v734_v32 = vunpack.c.l.b16 %v570_v30  ;;  %v735_v33 = vunpack.c.l.b16 %v571_v31  ;;  %v7495_v50 = vld [vmem:[#allocation8 + $0x28] sm:$0xff]  ;;  %v7473_v60 = vld [vmem:[%s8458_s16 + $0x178] sm:$0xff]  ;;  %v7442_v62 = vld [vmem:[%s8458_s16 + $0x80] sm:$0xff]  ;;  %s7422_s5 = sshll.u32 %s6675_s3, 3 }
  0x82   : > { %7574 = vmatpush.bf16.msra.mxu3 %v7502_v3  ;;  %2038 = vmatpush.bf16.msra.mxu0 %v7502_v3  ;;  %v572_v40 = vsel %vm8478_vm0, %v424_v38, 0  ;;  %v573_v41 = vsel %vm8478_vm0, %v425_v39, 0  ;;  %v7527_v51 = vld [vmem:[#allocation8 + $0x128] sm:$0xff]  ;;  %v574_v54 = vsel %vm8478_vm0, %v426_v52, 0  ;;  %v575_v55 = vsel %vm8478_vm0, %v427_v53, 0  ;;  %v7458_v63 = vld [vmem:[%s8458_s16 + $0x100] sm:$0xff]  ;;  %vm8843_vm6 = vmand %vm1870_vm5, %vm1599_vm4 }
  0x83   : > { %v8489_v21 = vpack.c.b16 %v733_v15, %v732_v14  ;;  %v8501_v37 = vpack.c.b16 %v735_v33, %v734_v32  ;;  %v736_v42 = vunpack.c.l.b16 %v572_v40  ;;  %v737_v43 = vunpack.c.l.b16 %v573_v41  ;;  %v7474_v0 = vld [vmem:[%s8458_s16 + $0x180] sm:$0xff]  ;;  %v7459_v7 = vld [vmem:[%s8458_s16 + $0x108] sm:$0xff]  ;;  %v7460_v11 = vld [vmem:[%s8458_s16 + $0x110] sm:$0xff] }
  0x84   : > { %v738_v56 = vunpack.c.l.b16 %v574_v54  ;;  %v739_v57 = vunpack.c.l.b16 %v575_v55  ;;  %v8532_v1 = vld [vmem:[%s8458_s16] sm:$0xff]  ;;  %v7475_v8 = vld [vmem:[%s8458_s16 + $0x188] sm:$0xff]  ;;  %v7476_v12 = vld [vmem:[%s8458_s16 + $0x190] sm:$0xff] }
  0x85   : > { %7575 = vmatpush.bf16.msra.mxu1 %v7501_v4  ;;  %7576 = vmatpush.bf16.msra.mxu2 %v7501_v4  ;;  %v8513_v47 = vpack.c.b16 %v737_v43, %v736_v42  ;;  %v7510_v2 = vld [vmem:[#allocation8 + $0xa0] sm:$0xff]  ;;  %v8539_v9 = vld [vmem:[%s8458_s16 + $0x8] sm:$0xff]  ;;  %v7509_v14 = vld [vmem:[#allocation8 + $0x98] sm:$0xff]  ;;  %s6677_s30 = scalar_lea.hbm %s12534_s0, %s7422_s5  ;;  %s8030_s14 = scalar_lea.hbm %s12534_s0, 8192 }
  0x86   : > { %7577 = vmatpush.bf16.msra.mxu3 %v7501_v4  ;;  %2039 = vmatpush.bf16.msra.mxu0 %v7501_v4  ;;  %v8525_v61 = vpack.c.b16 %v739_v57, %v738_v56  ;;  %v7518_v3 = vld [vmem:[#allocation8 + $0xe0] sm:$0xff]  ;;  %v7517_v15 = vld [vmem:[#allocation8 + $0xd8] sm:$0xff]  ;;  %v7508_v29 = vld [vmem:[#allocation8 + $0x90] sm:$0xff]  ;;  %s6680_s22 = sshll.u32 %s6677_s30, 4  ;;  %s6681_s22 = int_to_ptr.hbm [resolvable:$true] %s6680_s22 }
  0x87   : > { %v7494_v4 = vld [vmem:[#allocation8 + $0x20] sm:$0xff]  ;;  %v7516_v30 = vld [vmem:[#allocation8 + $0xd0] sm:$0xff]  ;;  %v7447_v40 = vld [vmem:[%s8458_s16 + $0xa8] sm:$0xff] }
  0x88   : > { %v7526_v5 = vld [vmem:[#allocation8 + $0x120] sm:$0xff]  ;;  %v7492_v33 = vld [vmem:[#allocation8 + $0x10] sm:$0xff]  ;;  %v7463_v41 = vld [vmem:[%s8458_s16 + $0x128] sm:$0xff] }
  0x89   : > { %7578 = vmatpush.bf16.msra.mxu1 %v7500_v6  ;;  %7579 = vmatpush.bf16.msra.mxu2 %v7500_v6  ;;  %v7479_v43 = vld [vmem:[%s8458_s16 + $0x1a8] sm:$0xff]  ;;  %v7448_v53 = vld [vmem:[%s8458_s16 + $0xb0] sm:$0xff] }
  0x8a   : > { %7580 = vmatpush.bf16.msra.mxu3 %v7500_v6  ;;  %2040 = vmatpush.bf16.msra.mxu0 %v7500_v6  ;;  %v7443_v6 = vld [vmem:[%s8458_s16 + $0x88] sm:$0xff]  ;;  %v7464_v54 = vld [vmem:[%s8458_s16 + $0x130] sm:$0xff] }
  0x8b   : > { %v7480_v56 = vld [vmem:[%s8458_s16 + $0x1b0] sm:$0xff] }
  0x8c   : > { %v8608_v57 = vld [vmem:[%s8458_s16 + $0x30] sm:$0xff] }
  0x8d   : > { %7581 = vmatpush.bf16.msra.mxu1 %v7499_v10  ;;  %7582 = vmatpush.bf16.msra.mxu2 %v7499_v10 }
  0x8e   : > { %7583 = vmatpush.bf16.msra.mxu3 %v7499_v10  ;;  %2041 = vmatpush.bf16.msra.mxu0 %v7499_v10  ;;  %v7444_v10 = vld [vmem:[%s8458_s16 + $0x90] sm:$0xff] }
  0x91   : > { %7584 = vmatpush.bf16.msra.mxu1 %v7498_v13  ;;  %7585 = vmatpush.bf16.msra.mxu2 %v7498_v13 }
  0x92   : > { %7586 = vmatpush.bf16.msra.mxu3 %v7498_v13  ;;  %2042 = vmatpush.bf16.msra.mxu0 %v7498_v13  ;;  %v8546_v13 = vld [vmem:[%s8458_s16 + $0x10] sm:$0xff] }
  0x94   : > { %2123 = vmatmul.bf16.vlgmr.msra.gmra.mxu1 %v7438_v18  ;;  %2203 = vmatmul.bf16.vlgmr.msra.gmra.mxu2 %v7454_v19  ;;  %v7445_v18 = vld [vmem:[%s8458_s16 + $0x98] sm:$0xff] }
  0x95   : > { %2806 = vmatpush.bf16.msrb.mxu2 %v7513_v16  ;;  %2283 = vmatmul.bf16.vlgmr.msra.gmra.mxu3 %v7470_v20  ;;  %v7493_v16 = vld [vmem:[#allocation8 + $0x18] sm:$0xff] }
  0x96   : > { %3328 = vmatpush.bf16.msrb.mxu3 %v7521_v17  ;;  %2043 = vmatmul.bf16.vlgmr.msra.gmra.mxu0 %v8489_v21  ;;  %v7525_v17 = vld [vmem:[#allocation8 + $0x118] sm:$0xff] }
  0x97   : > { %2412 = vmatpush.bf16.msrb.mxu1 %v7497_v22  ;;  %3854 = vmatpush.bf16.msrb.mxu0 %v7529_v23  ;;  %v7461_v19 = vld [vmem:[%s8458_s16 + $0x118] sm:$0xff]  ;;  %v7446_v23 = vld [vmem:[%s8458_s16 + $0xa0] sm:$0xff] }
  0x98   : > { %v7477_v20 = vld [vmem:[%s8458_s16 + $0x198] sm:$0xff] }
  0x99   : > { %2807 = vmatpush.bf16.msrb.mxu2 %v7512_v24  ;;  %v8553_v22 = vld [vmem:[%s8458_s16 + $0x18] sm:$0xff]  ;;  %v7462_v24 = vld [vmem:[%s8458_s16 + $0x120] sm:$0xff] }
  0x9a   : > { %3329 = vmatpush.bf16.msrb.mxu3 %v7520_v25 }
  0x9b   : > { %2413 = vmatpush.bf16.msrb.mxu1 %v7496_v26  ;;  %3855 = vmatpush.bf16.msrb.mxu0 %v7528_v27  ;;  %v7478_v26 = vld [vmem:[%s8458_s16 + $0x1a0] sm:$0xff] }
  0x9c   : > { %v8562_v27 = vld [vmem:[%s8458_s16 + $0x20] sm:$0xff] }
  0x9d   : > { %2808 = vmatpush.bf16.msrb.mxu2 %v7511_v48 }
  0x9e   : > { %3330 = vmatpush.bf16.msrb.mxu3 %v7519_v49 }
  0x9f   : > { %2414 = vmatpush.bf16.msrb.mxu1 %v7495_v50  ;;  %3856 = vmatpush.bf16.msrb.mxu0 %v7527_v51 }
  0xa1   : > { %2809 = vmatpush.bf16.msrb.mxu2 %v7510_v2 }
  0xa2   : > { %3331 = vmatpush.bf16.msrb.mxu3 %v7518_v3 }
  0xa3   : > { %2415 = vmatpush.bf16.msrb.mxu1 %v7494_v4  ;;  %3857 = vmatpush.bf16.msrb.mxu0 %v7526_v5  ;;  %v7523_v4 = vld [vmem:[#allocation8 + $0x108] sm:$0xff] }
  0xa4   : > { %2128 = vmatmul.bf16.gmra.mxu1 %v7439_v34  ;;  %2208 = vmatmul.bf16.gmra.mxu2 %v7455_v35 }
  0xa5   : > { %2288 = vmatmul.bf16.gmra.mxu3 %v7471_v36  ;;  %2810 = vmatpush.bf16.msrb.mxu2 %v7509_v14  ;;  %v7524_v36 = vld [vmem:[#allocation8 + $0x110] sm:$0xff] }
  0xa6   : > { %2048 = vmatmul.bf16.gmra.mxu0 %v8501_v37  ;;  %3332 = vmatpush.bf16.msrb.mxu3 %v7517_v15 }
  0xa7   : > { %2416 = vmatpush.bf16.msrb.mxu1 %v7493_v16  ;;  %3858 = vmatpush.bf16.msrb.mxu0 %v7525_v17 }
  0xa9   : > { %2811 = vmatpush.bf16.msrb.mxu2 %v7508_v29  ;;  %v7482_v29 = vld [vmem:[%s8458_s16 + $0x1c0] sm:$0xff] }
  0xaa   : > { %3333 = vmatpush.bf16.msrb.mxu3 %v7516_v30  ;;  %v8654_v30 = vld [vmem:[%s8458_s16 + $0x40] sm:$0xff] }
  0xab   : > { %2417 = vmatpush.bf16.msrb.mxu1 %v7492_v33  ;;  %3859 = vmatpush.bf16.msrb.mxu0 %v7524_v36  ;;  %v7506_v36 = vld [vmem:[#allocation8 + $0x80] sm:$0xff] }
  0xaf   : > { %3860 = vmatpush.bf16.msrb.mxu0 %v7523_v4  ;;  %v7451_v4 = vld [vmem:[%s8458_s16 + $0xc8] sm:$0xff] }
  0xb4   : > { %2133 = vmatmul.bf16.gmra.mxu1 %v7440_v44  ;;  %2213 = vmatmul.bf16.gmra.mxu2 %v7456_v45  ;;  %v8585_v44 = vld [vmem:[%s8458_s16 + $0x28] sm:$0xff] }
  0xb5   : > { %2293 = vmatmul.bf16.gmra.mxu3 %v7472_v46 }
  0xb6   : > { %2053 = vmatmul.bf16.gmra.mxu0 %v8513_v47 }
  0xc4   : > { %2138 = vmatmul.bf16.gmra.mxu1 %v7441_v58  ;;  %2218 = vmatmul.bf16.gmra.mxu2 %v7457_v59  ;;  %v7507_v59 = vld [vmem:[#allocation8 + $0x88] sm:$0xff] }
  0xc5   : > { %2298 = vmatmul.bf16.gmra.mxu3 %v7473_v60  ;;  %v7515_v60 = vld [vmem:[#allocation8 + $0xc8] sm:$0xff]  ;;  %2812 = vmatpush.bf16.msrb.mxu2 %v7507_v59  ;;  %v7522_v59 = vld [vmem:[#allocation8 + $0x100] sm:$0xff] }
  0xc6   : > { %2058 = vmatmul.bf16.gmra.mxu0 %v8525_v61  ;;  %3334 = vmatpush.bf16.msrb.mxu3 %v7515_v60 }
  0xc7   : > { %3861 = vmatpush.bf16.msrb.mxu0 %v7522_v59 }
  0xc9   : > { %2813 = vmatpush.bf16.msrb.mxu2 %v7506_v36 }
  0xd4   : > { %2143 = vmatmul.bf16.gmra.mxu1 %v7442_v62  ;;  %2223 = vmatmul.bf16.gmra.mxu2 %v7458_v63 }
  0xd5   : > { %2303 = vmatmul.bf16.gmra.mxu3 %v7474_v0  ;;  %v7491_v0 = vld [vmem:[#allocation8 + $0x8] sm:$0xff] }
  0xd6   : > { %2063 = vmatmul.bf16.gmra.mxu0 %v8532_v1  ;;  %2418 = vmatpush.bf16.msrb.mxu1 %v7491_v0 }
  0xe4   : > { %2148 = vmatmul.bf16.gmra.mxu1 %v7443_v6  ;;  %2228 = vmatmul.bf16.gmra.mxu2 %v7459_v7  ;;  %v7449_v7 = vld [vmem:[%s8458_s16 + $0xb8] sm:$0xff] }
  0xe5   : > { %2308 = vmatmul.bf16.gmra.mxu3 %v7475_v8  ;;  %v7465_v8 = vld [vmem:[%s8458_s16 + $0x138] sm:$0xff] }
  0xe6   : > { %2068 = vmatmul.bf16.gmra.mxu0 %v8539_v9 }
  0xf4   : > { %2153 = vmatmul.bf16.gmra.mxu1 %v7444_v10  ;;  %2233 = vmatmul.bf16.gmra.mxu2 %v7460_v11  ;;  %v7481_v11 = vld [vmem:[%s8458_s16 + $0x1b8] sm:$0xff] }
  0xf5   : > { %2313 = vmatmul.bf16.gmra.mxu3 %v7476_v12  ;;  %v8631_v12 = vld [vmem:[%s8458_s16 + $0x38] sm:$0xff] }
  0xf6   : > { %2073 = vmatmul.bf16.gmra.mxu0 %v8546_v13 }
 0x104   : > { %2158 = vmatmul.bf16.gmra.mxu1 %v7445_v18  ;;  %2238 = vmatmul.bf16.gmra.mxu2 %v7461_v19 }
 0x105   : > { %2318 = vmatmul.bf16.gmra.mxu3 %v7477_v20 }
 0x106   : > { %2078 = vmatmul.bf16.gmra.mxu0 %v8553_v22 }
 0x111   : > { %v8558_v25 = vpop.f32.mrf.mxu1 }
 0x112   : > { %11813 = vst [vmem:[#allocation30_spill] sm:$0xff] %v8558_v25 }
 0x113   : > { %v8564_v28 = vpop.f32.mrf.mxu0 }
 0x114   : > { %2163 = vmatmul.bf16.gmra.mxu1 %v7446_v23  ;;  %2243 = vmatmul.bf16.gmra.mxu2 %v7462_v24  ;;  %v7450_v23 = vld [vmem:[%s8458_s16 + $0xc0] sm:$0xff] }
 0x115   : > { %2323 = vmatmul.bf16.gmra.mxu3 %v7478_v26  ;;  %v7466_v24 = vld [vmem:[%s8458_s16 + $0x140] sm:$0xff] }
 0x116   : > { %2083 = vmatmul.bf16.gmra.mxu0 %v8562_v27 }
 0x117   : > { %v8567_v31 = vpop.f32.mrf.mxu2 }
 0x118   : > { %11814 = vst [vmem:[#allocation31_spill] sm:$0xff] %v8567_v31  ;;  %v8569_v32 = vpop.f32.mrf.mxu3 }
 0x119   : > { %11815 = vst [vmem:[#allocation32_spill] sm:$0xff] %v8569_v32  ;;  %v8571_v34 = vpop.f32.mrf.mxu1  ;;  %v7453_v32 = vld [vmem:[%s8458_s16 + $0xd8] sm:$0xff] }
 0x11a   : > { %11816 = vst [vmem:[#allocation33_spill] sm:$0xff] %v8571_v34 }
 0x11b   : > { %v8573_v35 = vpop.f32.mrf.mxu0 }
 0x11f   : > { %v8575_v38 = vpop.f32.mrf.mxu2 }
 0x120   : > { %11817 = vst [vmem:[#allocation34_spill] sm:$0xff] %v8575_v38  ;;  %v8577_v39 = vpop.f32.mrf.mxu3 }
 0x121   : > { %11818 = vst [vmem:[#allocation35_spill] sm:$0xff] %v8577_v39  ;;  %v8581_v42 = vpop.f32.mrf.mxu1 }
 0x122   : > { %11819 = vst [vmem:[#allocation36_spill] sm:$0xff] %v8581_v42 }
 0x123   : > { %v8587_v45 = vpop.f32.mrf.mxu0 }
 0x124   : > { %2168 = vmatmul.bf16.gmra.mxu1 %v7447_v40  ;;  %2248 = vmatmul.bf16.gmra.mxu2 %v7463_v41  ;;  %v7514_v40 = vld [vmem:[#allocation8 + $0xc0] sm:$0xff] }
 0x125   : > { %2328 = vmatmul.bf16.gmra.mxu3 %v7479_v43 }
 0x126   : > { %2088 = vmatmul.bf16.gmra.mxu0 %v8585_v44  ;;  %3335 = vmatpush.bf16.msrb.mxu3 %v7514_v40 }
 0x127   : > { %v8590_v46 = vpop.f32.mrf.mxu2 }
 0x128   : > { %11820 = vst [vmem:[#allocation37_spill] sm:$0xff] %v8590_v46  ;;  %v8592_v48 = vpop.f32.mrf.mxu3 }
 0x129   : > { %11821 = vst [vmem:[#allocation38_spill] sm:$0xff] %v8592_v48  ;;  %v8594_v49 = vpop.f32.mrf.mxu1 }
 0x12a   : > { %11822 = vst [vmem:[#allocation39_spill] sm:$0xff] %v8594_v49  ;;  %v11931_v49 = vshrl.u32 %v8585_v44, 16 }
 0x12b   : > { %v8596_v50 = vpop.f32.mrf.mxu0 }
 0x12f   : > { %v8598_v51 = vpop.f32.mrf.mxu2 }
 0x130   : > { %11823 = vst [vmem:[#allocation40_spill] sm:$0xff] %v8598_v51  ;;  %v8600_v52 = vpop.f32.mrf.mxu3 }
 0x131   : > { %11824 = vst [vmem:[#allocation41_spill] sm:$0xff] %v8600_v52  ;;  %v8604_v55 = vpop.f32.mrf.mxu1  ;;  %v7537_v52 = vld [vmem:[#allocation8 + $0x178] sm:$0xff] }
 0x132   : > { %11825 = vst [vmem:[#allocation42_spill] sm:$0xff] %v8604_v55 }
 0x133   : > { %v8610_v58 = vpop.f32.mrf.mxu0 }
 0x134   : > { %2173 = vmatmul.bf16.gmra.mxu1 %v7448_v53  ;;  %2253 = vmatmul.bf16.gmra.mxu2 %v7464_v54  ;;  %v7490_v53 = vld [vmem:[#allocation8] sm:$0xff] }
 0x135   : > { %2333 = vmatmul.bf16.gmra.mxu3 %v7480_v56  ;;  %2419 = vmatpush.bf16.msrb.mxu1 %v7490_v53 }
 0x136   : > { %2093 = vmatmul.bf16.gmra.mxu0 %v8608_v57 }
 0x137   : > { %v8613_v62 = vpop.f32.mrf.mxu2 }
 0x138   : > { %11826 = vst [vmem:[#allocation43_spill] sm:$0xff] %v8613_v62  ;;  %v8615_v63 = vpop.f32.mrf.mxu3 }
 0x139   : > { %11827 = vst [vmem:[#allocation44_spill] sm:$0xff] %v8615_v63  ;;  %v8617_v2 = vpop.f32.mrf.mxu1  ;;  %4376 = vmatpush.bf16.msra.mxu1 %v7537_v52  ;;  %v953_v52 = vshll.u32 %v8489_v21, 16 }
 0x13a   : > { %11828 = vst [vmem:[#allocation45_spill] sm:$0xff] %v8617_v2 }
 0x13b   : > { %v8619_v3 = vpop.f32.mrf.mxu0 }
 0x13f   : > { %v8621_v5 = vpop.f32.mrf.mxu2 }
 0x140   : > { %11829 = vst [vmem:[#allocation46_spill] sm:$0xff] %v8621_v5  ;;  %v8623_v6 = vpop.f32.mrf.mxu3 }
 0x141   : > { %11830 = vst [vmem:[#allocation47_spill] sm:$0xff] %v8623_v6  ;;  %v8627_v10 = vpop.f32.mrf.mxu1  ;;  %v7553_v6 = vld [vmem:[#allocation8 + $0x1f8] sm:$0xff] }
 0x142   : > { %11831 = vst [vmem:[#allocation48_spill] sm:$0xff] %v8627_v10  ;;  %5424 = vmatpush.bf16.msra.mxu3 %v7553_v6  ;;  %v8723_v6 = vld [vmem:[%s8458_s16 + $0x58] sm:$0xff] }
 0x143   : > { %v8633_v14 = vpop.f32.mrf.mxu0 }
 0x144   : > { %2178 = vmatmul.bf16.gmra.mxu1 %v7449_v7  ;;  %2258 = vmatmul.bf16.gmra.mxu2 %v7465_v8  ;;  %v7467_v7 = vld [vmem:[%s8458_s16 + $0x148] sm:$0xff] }
 0x145   : > { %2338 = vmatmul.bf16.gmra.mxu3 %v7481_v11  ;;  %v7483_v11 = vld [vmem:[%s8458_s16 + $0x1c8] sm:$0xff] }
 0x146   : > { %2098 = vmatmul.bf16.gmra.mxu0 %v8631_v12 }
 0x147   : > { %v8636_v15 = vpop.f32.mrf.mxu2 }
 0x148   : > { %11832 = vst [vmem:[#allocation49_spill] sm:$0xff] %v8636_v15  ;;  %v8638_v16 = vpop.f32.mrf.mxu3  ;;  %v11518_v15 = vshll.u32 %v8532_v1, 16 }
 0x149   : > { %11833 = vst [vmem:[#allocation50_spill] sm:$0xff] %v8638_v16  ;;  %v8640_v17 = vpop.f32.mrf.mxu1 }
 0x14a   : > { %11834 = vst [vmem:[#allocation51_spill] sm:$0xff] %v8640_v17 }
 0x14b   : > { %v8642_v18 = vpop.f32.mrf.mxu0 }
 0x14f   : > { %v8644_v19 = vpop.f32.mrf.mxu2 }
 0x150   : > { %11835 = vst [vmem:[#allocation52_spill] sm:$0xff] %v8644_v19  ;;  %v8646_v20 = vpop.f32.mrf.mxu3 }
 0x151   : > { %11836 = vst [vmem:[#allocation53_spill] sm:$0xff] %v8646_v20  ;;  %v8650_v26 = vpop.f32.mrf.mxu1  ;;  %v7468_v20 = vld [vmem:[%s8458_s16 + $0x150] sm:$0xff] }
 0x152   : > { %11837 = vst [vmem:[#allocation54_spill] sm:$0xff] %v8650_v26 }
 0x153   : > { %v8656_v33 = vpop.f32.mrf.mxu0 }
 0x154   : > { %2183 = vmatmul.bf16.gmra.mxu1 %v7450_v23  ;;  %2263 = vmatmul.bf16.gmra.mxu2 %v7466_v24  ;;  %v8677_v23 = vld [vmem:[%s8458_s16 + $0x48] sm:$0xff] }
 0x155   : > { %2343 = vmatmul.bf16.gmra.mxu3 %v7482_v29 }
 0x156   : > { %2103 = vmatmul.bf16.gmra.mxu0 %v8654_v30 }
 0x157   : > { %v8659_v41 = vpop.f32.mrf.mxu2 }
 0x158   : > { %11838 = vst [vmem:[#allocation55_spill] sm:$0xff] %v8659_v41  ;;  %v8661_v43 = vpop.f32.mrf.mxu3 }
 0x159   : > { %11839 = vst [vmem:[#allocation56_spill] sm:$0xff] %v8661_v43  ;;  %v8663_v54 = vpop.f32.mrf.mxu1  ;;  %v7452_v43 = vld [vmem:[%s8458_s16 + $0xd0] sm:$0xff] }
 0x15a   : > { %11840 = vst [vmem:[#allocation57_spill] sm:$0xff] %v8663_v54 }
 0x15b   : > { %v8665_v56 = vpop.f32.mrf.mxu0 }
 0x15f   : > { %v8667_v60 = vpop.f32.mrf.mxu2 }
 0x160   : > { %11841 = vst [vmem:[#allocation58_spill] sm:$0xff] %v8667_v60  ;;  %v8669_v0 = vpop.f32.mrf.mxu3  ;;  %v960_v60 = vshll.u32 %v8501_v37, 16 }
 0x161   : > { %11842 = vst [vmem:[#allocation59_spill] sm:$0xff] %v8669_v0  ;;  %v8673_v8 = vpop.f32.mrf.mxu1 }
 0x162   : > { %11843 = vst [vmem:[#allocation60_spill] sm:$0xff] %v8673_v8 }
 0x163   : > { %v8679_v24 = vpop.f32.mrf.mxu0 }
 0x164   : > { %2188 = vmatmul.bf16.gmra.mxu1 %v7451_v4  ;;  %2268 = vmatmul.bf16.gmra.mxu2 %v7467_v7  ;;  %v7484_v4 = vld [vmem:[%s8458_s16 + $0x1d0] sm:$0xff] }
 0x165   : > { %2348 = vmatmul.bf16.gmra.mxu3 %v7483_v11  ;;  %v8700_v7 = vld [vmem:[%s8458_s16 + $0x50] sm:$0xff] }
 0x166   : > { %2108 = vmatmul.bf16.gmra.mxu0 %v8677_v23 }
 0x167   : > { %v8682_v29 = vpop.f32.mrf.mxu2 }
 0x168   : > { %11844 = vst [vmem:[#allocation61_spill] sm:$0xff] %v8682_v29  ;;  %v8684_v36 = vpop.f32.mrf.mxu3  ;;  %v950_v29 = vshrl.u32 %v8489_v21, 16 }
 0x169   : > { %11845 = vst [vmem:[#allocation62_spill] sm:$0xff] %v8684_v36  ;;  %v8686_v40 = vpop.f32.mrf.mxu1  ;;  %v7545_v36 = vld [vmem:[#allocation8 + $0x1b8] sm:$0xff] }
 0x16a   : > { %11846 = vst [vmem:[#allocation63_spill] sm:$0xff] %v8686_v40  ;;  %4898 = vmatpush.bf16.msra.mxu2 %v7545_v36  ;;  %v7485_v36 = vld [vmem:[%s8458_s16 + $0x1d8] sm:$0xff]  ;;  %v952_v19 = vrot.slane %v950_v29, 7 }
 0x16b   : > { %v8688_v53 = vpop.f32.mrf.mxu0 }
 0x16c   : > { %v955_v21 = vor.u32 %v953_v52, %v952_v19 }
 0x16f   : > { %v8690_v59 = vpop.f32.mrf.mxu2 }
 0x170   : > { %11847 = vst [vmem:[#allocation64_spill] sm:$0xff] %v8690_v59  ;;  %v8692_v0 = vpop.f32.mrf.mxu3  ;;  %v7469_v59 = vld [vmem:[%s8458_s16 + $0x158] sm:$0xff] }
 0x171   : > { %11848 = vst [vmem:[#allocation65_spill] sm:$0xff] %v8692_v0  ;;  %v8696_v16 = vpop.f32.mrf.mxu1 }
 0x172   : > { %11849 = vst [vmem:[#allocation66_spill] sm:$0xff] %v8696_v16 }
 0x173   : > { %v8702_v11 = vpop.f32.mrf.mxu0 }
 0x174   : > { %2193 = vmatmul.bf16.gmra.mxu1 %v7452_v43  ;;  %2273 = vmatmul.bf16.gmra.mxu2 %v7468_v20  ;;  %v7561_v20 = vld [vmem:[#allocation8 + $0x238] sm:$0xff] }
 0x175   : > { %2353 = vmatmul.bf16.gmra.mxu3 %v7484_v4  ;;  %5946 = vmatpush.bf16.msra.mxu0 %v7561_v20  ;;  %v11517_v20 = vshrl.u32 %v8532_v1, 16 }
 0x176   : > { %2113 = vmatmul.bf16.gmra.mxu0 %v8700_v7 }
 0x177   : > { %v8705_v0 = vpop.f32.mrf.mxu2 }
 0x178   : > { %11850 = vst [vmem:[#allocation67_spill] sm:$0xff] %v8705_v0  ;;  %v8707_v63 = vpop.f32.mrf.mxu3 }
 0x179   : > { %11851 = vst [vmem:[#allocation68_spill] sm:$0xff] %v8707_v63  ;;  %v8709_v48 = vpop.f32.mrf.mxu1 }
 0x17a   : > { %11852 = vst [vmem:[#allocation69_spill] sm:$0xff] %v8709_v48 }
 0x17b   : > { %v8711_v43 = vpop.f32.mrf.mxu0 }
 0x17f   : > { %v8713_v4 = vpop.f32.mrf.mxu2 }
 0x180   : > { %11853 = vst [vmem:[#allocation70_spill] sm:$0xff] %v8713_v4  ;;  %v8715_v39 = vpop.f32.mrf.mxu3 }
 0x181   : > { %11854 = vst [vmem:[#allocation71_spill] sm:$0xff] %v8715_v39  ;;  %v8719_v0 = vpop.f32.mrf.mxu1 }
 0x182   : > { %11855 = vst [vmem:[#allocation72_spill] sm:$0xff] %v8719_v0 }
 0x183   : > { %v8725_v63 = vpop.f32.mrf.mxu0 }
 0x184   : > { %2198 = vmatmul.bf16.gmra.mxu1 %v7453_v32  ;;  %2278 = vmatmul.bf16.gmra.mxu2 %v7469_v59  ;;  %v1600_v32 = vrot.slane %v953_v52, 1  ;;  %v1581_v52 = vsel %vm8744_vm3, 0, %v955_v21 }
 0x185   : > { %2358 = vmatmul.bf16.gmra.mxu3 %v7485_v36  ;;  %v983_v36 = vrot.slane %v11517_v20, 7 }
 0x186   : > { %2118 = vmatmul.bf16.gmra.mxu0 %v8723_v6  ;;  %v1601_v5 = vor.u32 %v1600_v32, %v950_v29 }
 0x187   : > { %v8731_v39 = vpop.f32.mrf.mxu2  ;;  %v986_v62 = vor.u32 %v11518_v15, %v983_v36  ;;  %v957_v15 = vshrl.u32 %v8501_v37, 16 }
 0x188   : > { %11856 = vst [vmem:[#allocation73_spill] sm:$0xff] %v8731_v39  ;;  %v8733_v4 = vpop.f32.mrf.mxu3  ;;  %v1602_v39 = vrot.slane %v960_v60, 1 }
 0x189   : > { %11857 = vst [vmem:[#allocation74_spill] sm:$0xff] %v8733_v4  ;;  %v8736_v41 = vpop.f32.mrf.mxu1  ;;  %v11859_v4 = vmov 0  ;;  %v8763_v38 = vsel %vm8744_vm3, 0, %v986_v62  ;;  %v959_v31 = vrot.slane %v957_v15, 7  ;;  %v968_v62 = vshll.u32 %v8513_v47, 16 }
 0x18a   : > { %11858 = vst [vmem:[#allocation75_spill] sm:$0xff] %v8736_v41  ;;  %v11860_v4 = vsel %vm8744_vm3, 4294967295, %v11859_v4  ;;  %v1603_v29 = vsel %vm1599_vm4, %v1601_v5, %v1602_v39  ;;  %v1604_v41 = vor.u32 %v1602_v39, %v957_v15  ;;  %v965_v39 = vshrl.u32 %v8513_v47, 16 }
 0x18b   : > { %v8738_v59 = vpop.f32.mrf.mxu0  ;;  %11861 = vst [vmem:[#allocation76_spill] sm:$0xff] %v11860_v4  ;;  %v1605_v0 = vrot.slane %v968_v62, 1  ;;  %v11521_v15 = vshrl.u32 %v8546_v13, 16 }
 0x18d   : > { %v1606_v40 = vsel %vm1599_vm4, %v1604_v41, %v1605_v0  ;;  %v998_v47 = vrot.slane %v11521_v15, 7 }
 0x18f   : > { %v8750_v51 = vpop.f32.mrf.mxu2 }
 0x190   : > { %11862 = vst [vmem:[#allocation77_spill] sm:$0xff] %v8750_v51  ;;  %v8752_v46 = vpop.f32.mrf.mxu3 }
 0x191   : > { %11863 = vst [vmem:[#allocation78_spill] sm:$0xff] %v8752_v46  ;;  %v8754_v20 = vpop.f32.mrf.mxu1  ;;  %v11519_v46 = vshrl.u32 %v8539_v9, 16 }
 0x192   : > { %11864 = vst [vmem:[#allocation79_spill] sm:$0xff] %v8754_v20 }
 0x193   : > { %v8759_v32 = vpop.f32.mrf.mxu0  ;;  %v990_v37 = vrot.slane %v11519_v46, 7 }
 0x194   : > { %2420 = vmatmul.bf16.vlgmr.msrb.gmra.mxu1 %v1581_v52  ;;  %2814 = vmatmul.bf16.vlgmr.msrb.gmra.mxu2 %v1603_v29  ;;  %v11520_v52 = vshll.u32 %v8539_v9, 16  ;;  %v962_v29 = vor.u32 %v960_v60, %v959_v31 }
 0x195   : > { %3336 = vmatmul.bf16.vlgmr.msrb.gmra.mxu3 %v8763_v38 }
 0x196   : > { %3862 = vmatmul.bf16.vlgmr.msrb.gmra.mxu0 %v8532_v1  ;;  %v963_v16 = vsel %vm948_vm1, %v952_v19, %v962_v29  ;;  %v967_v29 = vrot.slane %v965_v39, 7 }
 0x197   : > { %v8769_v51 = vpop.f32.mrf.mxu2 }
 0x198   : > { %11865 = vst [vmem:[#allocation80_spill] sm:$0xff] %v8769_v51  ;;  %v8771_v21 = vpop.f32.mrf.mxu3  ;;  %v993_v51 = vor.u32 %v11520_v52, %v990_v37  ;;  %v1607_v52 = vor.u32 %v1605_v0, %v965_v39  ;;  %v973_v0 = vshrl.u32 %v8525_v61, 16 }
 0x199   : > { %11866 = vst [vmem:[#allocation81_spill] sm:$0xff] %v8771_v21  ;;  %v8773_v5 = vpop.f32.mrf.mxu1 }
 0x19a   : > { %11867 = vst [vmem:[#allocation82_spill] sm:$0xff] %v8773_v5  ;;  %v8794_v46 = vsel %vm948_vm1, %v983_v36, %v993_v51  ;;  %v976_v51 = vshll.u32 %v8525_v61, 16  ;;  %v11524_v61 = vshll.u32 %v8553_v22, 16 }
 0x19b   : > { %v8776_v20 = vpop.f32.mrf.mxu0 }
 0x19f   : > { %v8783_v48 = vpop.f32.mrf.mxu2 }
 0x1a0   : > { %11868 = vst [vmem:[#allocation83_spill] sm:$0xff] %v8783_v48  ;;  %v8785_v21 = vpop.f32.mrf.mxu3 }
 0x1a1   : > { %11869 = vst [vmem:[#allocation84_spill] sm:$0xff] %v8785_v21  ;;  %v8787_v5 = vpop.f32.mrf.mxu1  ;;  %v1608_v21 = vrot.slane %v976_v51, 1 }
 0x1a2   : > { %11870 = vst [vmem:[#allocation85_spill] sm:$0xff] %v8787_v5 }
 0x1a3   : > { %v8791_v8 = vpop.f32.mrf.mxu0  ;;  %v1609_v54 = vsel %vm1599_vm4, %v1607_v52, %v1608_v21 }
 0x1a4   : > { %2425 = vmatmul.bf16.gmra.mxu1 %v963_v16  ;;  %2819 = vmatmul.bf16.gmra.mxu2 %v1606_v40  ;;  %v11522_v16 = vshll.u32 %v8546_v13, 16  ;;  %v970_v40 = vor.u32 %v968_v62, %v967_v29  ;;  %v11523_v62 = vshrl.u32 %v8553_v22, 16 }
 0x1a5   : > { %3341 = vmatmul.bf16.gmra.mxu3 %v8794_v46 }
 0x1a6   : > { %3867 = vmatmul.bf16.gmra.mxu0 %v8539_v9  ;;  %v971_v5 = vsel %vm948_vm1, %v959_v31, %v970_v40  ;;  %v975_v40 = vrot.slane %v973_v0, 7 }
 0x1a7   : > { %v8800_v60 = vpop.f32.mrf.mxu2 }
 0x1a8   : > { %11871 = vst [vmem:[#allocation86_spill] sm:$0xff] %v8800_v60  ;;  %v8802_v19 = vpop.f32.mrf.mxu3  ;;  %v1001_v60 = vor.u32 %v11522_v16, %v998_v47 }
 0x1a9   : > { %11872 = vst [vmem:[#allocation87_spill] sm:$0xff] %v8802_v19  ;;  %v8804_v41 = vpop.f32.mrf.mxu1 }
 0x1aa   : > { %11873 = vst [vmem:[#allocation88_spill] sm:$0xff] %v8804_v41  ;;  %v8825_v15 = vsel %vm948_vm1, %v990_v37, %v1001_v60  ;;  %v1610_v37 = vor.u32 %v1608_v21, %v973_v0 }
 0x1ab   : > { %v8807_v36 = vpop.f32.mrf.mxu0 }
 0x1af   : > { %v8814_v48 = vpop.f32.mrf.mxu2 }
 0x1b0   : > { %11874 = vst [vmem:[#allocation89_spill] sm:$0xff] %v8814_v48  ;;  %v8816_v19 = vpop.f32.mrf.mxu3 }
 0x1b1   : > { %11875 = vst [vmem:[#allocation90_spill] sm:$0xff] %v8816_v19  ;;  %v8818_v41 = vpop.f32.mrf.mxu1 }
 0x1b2   : > { %11876 = vst [vmem:[#allocation91_spill] sm:$0xff] %v8818_v41 }
 0x1b3   : > { %v8822_v26 = vpop.f32.mrf.mxu0 }
 0x1b4   : > { %2430 = vmatmul.bf16.gmra.mxu1 %v971_v5  ;;  %2824 = vmatmul.bf16.gmra.mxu2 %v1609_v54  ;;  %v1006_v54 = vrot.slane %v11523_v62, 7  ;;  %v978_v5 = vor.u32 %v976_v51, %v975_v40  ;;  %v1872_v51 = vsel %vm8843_vm6, %v1610_v37, 0  ;;  %v11525_v40 = vshrl.u32 %v8562_v27, 16 }
 0x1b5   : > { %3346 = vmatmul.bf16.gmra.mxu3 %v8825_v15 }
 0x1b6   : > { %3872 = vmatmul.bf16.gmra.mxu0 %v8546_v13  ;;  %v979_v62 = vsel %vm948_vm1, %v967_v29, %v978_v5  ;;  %v11888_v5 = vshll.u32 %v8532_v1, 16 }
 0x1b7   : > { %v8831_v39 = vpop.f32.mrf.mxu2 }
 0x1b8   : > { %11877 = vst [vmem:[#allocation92_spill] sm:$0xff] %v8831_v39  ;;  %v8833_v31 = vpop.f32.mrf.mxu3  ;;  %v1611_v37 = vrot.slane %v11888_v5, 1 }
 0x1b9   : > { %11878 = vst [vmem:[#allocation93_spill] sm:$0xff] %v8833_v31  ;;  %v8835_v52 = vpop.f32.mrf.mxu1  ;;  %v1009_v31 = vor.u32 %v11524_v61, %v1006_v54 }
 0x1ba   : > { %11879 = vst [vmem:[#allocation94_spill] sm:$0xff] %v8835_v52 }
 0x1bb   : > { %v8837_v16 = vpop.f32.mrf.mxu0  ;;  %v8861_v0 = vsel %vm948_vm1, %v998_v47, %v1009_v31  ;;  %v1014_v47 = vrot.slane %v11525_v40, 7  ;;  %v11889_v31 = vshrl.u32 %v8532_v1, 16 }
 0x1bf   : > { %v8849_v19 = vpop.f32.mrf.mxu2 }
 0x1c0   : > { %11882 = vst [vmem:[#allocation95_spill] sm:$0xff] %v8849_v19  ;;  %v8851_v39 = vpop.f32.mrf.mxu3  ;;  %v11890_v19 = vshll.u32 %v8539_v9, 16 }
 0x1c1   : > { %11883 = vst [vmem:[#allocation96_spill] sm:$0xff] %v8851_v39  ;;  %v8853_v48 = vpop.f32.mrf.mxu1 }
 0x1c2   : > { %11884 = vst [vmem:[#allocation97_spill] sm:$0xff] %v8853_v48 }
 0x1c3   : > { %v8858_v21 = vpop.f32.mrf.mxu0 }
 0x1c4   : > { %2435 = vmatmul.bf16.gmra.mxu1 %v979_v62  ;;  %2829 = vmatmul.bf16.gmra.mxu2 %v1872_v51  ;;  %v11526_v62 = vshll.u32 %v8562_v27, 16  ;;  %v1612_v51 = vor.u32 %v1611_v37, %v11889_v31 }
 0x1c5   : > { %3351 = vmatmul.bf16.gmra.mxu3 %v8861_v0 }
 0x1c6   : > { %3877 = vmatmul.bf16.gmra.mxu0 %v8553_v22 }
 0x1c7   : > { %v8866_v54 = vpop.f32.mrf.mxu2 }
 0x1c8   : > { %11885 = vst [vmem:[#allocation98_spill] sm:$0xff] %v8866_v54  ;;  %v8868_v61 = vpop.f32.mrf.mxu3  ;;  %v1613_v54 = vrot.slane %v11890_v19, 1  ;;  %v11528_v19 = vshrl.u32 %v8585_v44, 16 }
 0x1c9   : > { %11886 = vst [vmem:[#allocation99_spill] sm:$0xff] %v8868_v61  ;;  %v8870_v29 = vpop.f32.mrf.mxu1  ;;  %v1017_v61 = vor.u32 %v11526_v62, %v1014_v47 }
 0x1ca   : > { %11887 = vst [vmem:[#allocation100_spill] sm:$0xff] %v8870_v29  ;;  %v8892_v52 = vsel %vm1599_vm4, %v1612_v51, %v1613_v54 }
 0x1cb   : > { %v8874_v39 = vpop.f32.mrf.mxu0  ;;  %11894 = vst [vmem:[#allocation104_spill] sm:$0xff] %v8892_v52  ;;  %v8898_v1 = vsel %vm8744_vm3, 0, %v1017_v61  ;;  %v1021_v61 = vrot.slane %v11528_v19, 7 }
 0x1cc   : > { %11895 = vst [vmem:[#allocation105_spill] sm:$0xff] %v8898_v1 }
 0x1cf   : > { %v8885_v29 = vpop.f32.mrf.mxu2 }
 0x1d0   : > { %11891 = vst [vmem:[#allocation101_spill] sm:$0xff] %v8885_v29  ;;  %v8887_v48 = vpop.f32.mrf.mxu3  ;;  %v11900_v29 = vshll.u32 %v8546_v13, 16 }
 0x1d1   : > { %11892 = vst [vmem:[#allocation102_spill] sm:$0xff] %v8887_v48  ;;  %v8889_v5 = vpop.f32.mrf.mxu1  ;;  %v11899_v48 = vshrl.u32 %v8539_v9, 16 }
 0x1d2   : > { %11893 = vst [vmem:[#allocation103_spill] sm:$0xff] %v8889_v5  ;;  %v1616_v5 = vrot.slane %v11900_v29, 1 }
 0x1d3   : > { %v8894_v40 = vpop.f32.mrf.mxu0 }
 0x1d4   : > { %2440 = vmatmul.bf16.gmra.mxu1 %v8763_v38  ;;  %2834 = vmatmul.bf16.gmra.mxu2 %v8892_v52  ;;  %v11529_v38 = vshll.u32 %v8585_v44, 16  ;;  %v1615_v52 = vor.u32 %v1613_v54, %v11899_v48  ;;  %v11531_v48 = vshrl.u32 %v8608_v57, 16 }
 0x1d5   : > { %3356 = vmatmul.bf16.gmra.mxu3 %v8898_v1 }
 0x1d6   : > { %3882 = vmatmul.bf16.gmra.mxu0 %v8562_v27  ;;  %v8929_v17 = vsel %vm1599_vm4, %v1615_v52, %v1616_v5 }
 0x1d7   : > { %v8905_v37 = vpop.f32.mrf.mxu2  ;;  %11904 = vst [vmem:[#allocation112_spill] sm:$0xff] %v8929_v17 }
 0x1d8   : > { %11896 = vst [vmem:[#allocation106_spill] sm:$0xff] %v8905_v37  ;;  %v8907_v31 = vpop.f32.mrf.mxu3  ;;  %v1024_v37 = vor.u32 %v11529_v38, %v1021_v61 }
 0x1d9   : > { %11897 = vst [vmem:[#allocation107_spill] sm:$0xff] %v8907_v31  ;;  %v8909_v51 = vpop.f32.mrf.mxu1 }
 0x1da   : > { %11898 = vst [vmem:[#allocation108_spill] sm:$0xff] %v8909_v51  ;;  %v8934_v9 = vsel %vm948_vm1, %v1014_v47, %v1024_v37  ;;  %v1029_v47 = vrot.slane %v11531_v48, 7  ;;  %v11908_v37 = vshrl.u32 %v8546_v13, 16 }
 0x1db   : > { %v8911_v62 = vpop.f32.mrf.mxu0 }
 0x1df   : > { %v8922_v41 = vpop.f32.mrf.mxu2 }
 0x1e0   : > { %11901 = vst [vmem:[#allocation109_spill] sm:$0xff] %v8922_v41  ;;  %v8924_v31 = vpop.f32.mrf.mxu3 }
 0x1e1   : > { %11902 = vst [vmem:[#allocation110_spill] sm:$0xff] %v8924_v31  ;;  %v8926_v51 = vpop.f32.mrf.mxu1  ;;  %v1618_v31 = vor.u32 %v1616_v5, %v11908_v37  ;;  %v7552_v5 = vld [vmem:[#allocation8 + $0x1f0] sm:$0xff]  ;;  %v11534_v37 = vshrl.u32 %v8631_v12, 16 }
 0x1e2   : > { %11903 = vst [vmem:[#allocation111_spill] sm:$0xff] %v8926_v51  ;;  %5425 = vmatpush.bf16.msra.mxu3 %v7552_v5 }
 0x1e3   : > { %v8931_v19 = vpop.f32.mrf.mxu0 }
 0x1e4   : > { %2445 = vmatmul.bf16.gmra.mxu1 %v8794_v46  ;;  %2839 = vmatmul.bf16.gmra.mxu2 %v8929_v17  ;;  %v11532_v46 = vshll.u32 %v8608_v57, 16  ;;  %v11909_v17 = vshll.u32 %v8553_v22, 16 }
 0x1e5   : > { %3361 = vmatmul.bf16.gmra.mxu3 %v8934_v9 }
 0x1e6   : > { %3887 = vmatmul.bf16.gmra.mxu0 %v8585_v44  ;;  %v1619_v41 = vrot.slane %v11909_v17, 1  ;;  %v7544_v17 = vld [vmem:[#allocation8 + $0x1b0] sm:$0xff] }
 0x1e7   : > { %v8941_v54 = vpop.f32.mrf.mxu2  ;;  %4899 = vmatpush.bf16.msra.mxu2 %v7544_v17 }
 0x1e8   : > { %11905 = vst [vmem:[#allocation113_spill] sm:$0xff] %v8941_v54  ;;  %v8943_v29 = vpop.f32.mrf.mxu3  ;;  %v1032_v54 = vor.u32 %v11532_v46, %v1029_v47  ;;  %v8965_v10 = vsel %vm1599_vm4, %v1618_v31, %v1619_v41 }
 0x1e9   : > { %11906 = vst [vmem:[#allocation114_spill] sm:$0xff] %v8943_v29  ;;  %v8945_v52 = vpop.f32.mrf.mxu1 }
 0x1ea   : > { %11907 = vst [vmem:[#allocation115_spill] sm:$0xff] %v8945_v52  ;;  %v8970_v13 = vsel %vm948_vm1, %v1021_v61, %v1032_v54 }
 0x1eb   : > { %v8947_v38 = vpop.f32.mrf.mxu0  ;;  %11913 = vst [vmem:[#allocation119_spill] sm:$0xff] %v8965_v10 }
 0x1ef   : > { %v8958_v51 = vpop.f32.mrf.mxu2 }
 0x1f0   : > { %11910 = vst [vmem:[#allocation116_spill] sm:$0xff] %v8958_v51  ;;  %v8960_v29 = vpop.f32.mrf.mxu3  ;;  %v7560_v51 = vld [vmem:[#allocation8 + $0x230] sm:$0xff] }
 0x1f1   : > { %11911 = vst [vmem:[#allocation117_spill] sm:$0xff] %v8960_v29  ;;  %v8962_v52 = vpop.f32.mrf.mxu1  ;;  %v11535_v29 = vshll.u32 %v8631_v12, 16  ;;  %5947 = vmatpush.bf16.msra.mxu0 %v7560_v51 }
 0x1f2   : > { %11912 = vst [vmem:[#allocation118_spill] sm:$0xff] %v8962_v52  ;;  %v11917_v52 = vshrl.u32 %v8553_v22, 16  ;;  %v11537_v22 = vshrl.u32 %v8654_v30, 16 }
 0x1f3   : > { %v8967_v48 = vpop.f32.mrf.mxu0 }
 0x1f4   : > { %2450 = vmatmul.bf16.gmra.mxu1 %v8825_v15  ;;  %2844 = vmatmul.bf16.gmra.mxu2 %v8965_v10  ;;  %v1037_v15 = vrot.slane %v11534_v37, 7  ;;  %v7536_v10 = vld [vmem:[#allocation8 + $0x170] sm:$0xff] }
 0x1f5   : > { %3366 = vmatmul.bf16.gmra.mxu3 %v8970_v13  ;;  %4377 = vmatpush.bf16.msra.mxu1 %v7536_v10 }
 0x1f6   : > { %3892 = vmatmul.bf16.gmra.mxu0 %v8608_v57  ;;  %v1040_v17 = vor.u32 %v11535_v29, %v1037_v15  ;;  %v11926_v29 = vshrl.u32 %v8562_v27, 16 }
 0x1f7   : > { %v8977_v46 = vpop.f32.mrf.mxu2 }
 0x1f8   : > { %11914 = vst [vmem:[#allocation120_spill] sm:$0xff] %v8977_v46  ;;  %v8979_v31 = vpop.f32.mrf.mxu3  ;;  %v1621_v46 = vor.u32 %v1619_v41, %v11917_v52  ;;  %v9005_v10 = vsel %vm948_vm1, %v1029_v47, %v1040_v17  ;;  %v11924_v52 = vshll.u32 %v8562_v27, 16  ;;  %v11538_v17 = vshll.u32 %v8654_v30, 16 }
 0x1f9   : > { %11915 = vst [vmem:[#allocation121_spill] sm:$0xff] %v8979_v31  ;;  %v8981_v61 = vpop.f32.mrf.mxu1 }
 0x1fa   : > { %11916 = vst [vmem:[#allocation122_spill] sm:$0xff] %v8981_v61  ;;  %v9000_v37 = vsel %vm8843_vm6, %v1621_v46, 0  ;;  %v1622_v46 = vrot.slane %v11924_v52, 1 }
 0x1fb   : > { %v8983_v54 = vpop.f32.mrf.mxu0  ;;  %11921 = vst [vmem:[#allocation126_spill] sm:$0xff] %v9000_v37 }
 0x1ff   : > { %v8992_v5 = vpop.f32.mrf.mxu2 }
 0x200   : > { %11918 = vst [vmem:[#allocation123_spill] sm:$0xff] %v8992_v5  ;;  %v8994_v31 = vpop.f32.mrf.mxu3 }
 0x201   : > { %11919 = vst [vmem:[#allocation124_spill] sm:$0xff] %v8994_v31  ;;  %v8996_v61 = vpop.f32.mrf.mxu1  ;;  %v1623_v31 = vor.u32 %v1622_v46, %v11926_v29  ;;  %v11542_v29 = vshrl.u32 %v8677_v23, 16 }
 0x202   : > { %11920 = vst [vmem:[#allocation125_spill] sm:$0xff] %v8996_v61 }
 0x203   : > { %v9002_v2 = vpop.f32.mrf.mxu0 }
 0x204   : > { %2455 = vmatmul.bf16.gmra.mxu1 %v8861_v0  ;;  %2849 = vmatmul.bf16.gmra.mxu2 %v9000_v37  ;;  %v1045_v0 = vrot.slane %v11537_v22, 7  ;;  %v11927_v37 = vshll.u32 %v8585_v44, 16 }
 0x205   : > { %3371 = vmatmul.bf16.gmra.mxu3 %v9005_v10 }
 0x206   : > { %3897 = vmatmul.bf16.gmra.mxu0 %v8631_v12 }
 0x207   : > { %v9012_v41 = vpop.f32.mrf.mxu2 }
 0x208   : > { %11922 = vst [vmem:[#allocation127_spill] sm:$0xff] %v9012_v41  ;;  %v9014_v51 = vpop.f32.mrf.mxu3  ;;  %v1624_v41 = vrot.slane %v11927_v37, 1 }
 0x209   : > { %11923 = vst [vmem:[#allocation128_spill] sm:$0xff] %v9014_v51  ;;  %v9018_v15 = vpop.f32.mrf.mxu1  ;;  %v1048_v51 = vor.u32 %v11538_v17, %v1045_v0 }
 0x20a   : > { %11925 = vst [vmem:[#allocation129_spill] sm:$0xff] %v9018_v15  ;;  %v9036_v61 = vsel %vm1599_vm4, %v1623_v31, %v1624_v41  ;;  %v1626_v42 = vor.u32 %v1624_v41, %v11931_v49 }
 0x20b   : > { %v9020_v47 = vpop.f32.mrf.mxu0  ;;  %11930 = vst [vmem:[#allocation132_spill] sm:$0xff] %v9036_v61  ;;  %v9040_v55 = vsel %vm8744_vm3, 0, %v1048_v51  ;;  %v1052_v51 = vrot.slane %v11542_v29, 7 }
 0x20f   : > { %v9031_v5 = vpop.f32.mrf.mxu2 }
 0x210   : > { %11928 = vst [vmem:[#allocation130_spill] sm:$0xff] %v9031_v5  ;;  %v9033_v52 = vpop.f32.mrf.mxu3 }
 0x211   : > { %11929 = vst [vmem:[#allocation131_spill] sm:$0xff] %v9033_v52  ;;  %v2421_v15 = vpop.f32.mrf.mxu1 }
 0x212   : > { %v2422_v27 = vadd.f32 %v2421_v15, %v8564_v28  ;;  %v11932_v28 = vshll.u32 %v8608_v57, 16 }
 0x213   : > { %v3863_v22 = vpop.f32.mrf.mxu0 }
 0x214   : > { %2460 = vmatmul.bf16.gmra.mxu1 %v8898_v1  ;;  %2854 = vmatmul.bf16.gmra.mxu2 %v9036_v61  ;;  %v11543_v1 = vshll.u32 %v8677_v23, 16  ;;  %v1627_v15 = vrot.slane %v11932_v28, 1 }
 0x215   : > { %3376 = vmatmul.bf16.gmra.mxu3 %v9040_v55 }
 0x216   : > { %3902 = vmatmul.bf16.gmra.mxu0 %v8654_v30  ;;  %v9061_v29 = vsel %vm1599_vm4, %v1626_v42, %v1627_v15  ;;  %v11544_v42 = vshrl.u32 %v8700_v7, 16 }
 0x217   : > { %v2815_v37 = vpop.f32.mrf.mxu2 }
 0x218   : > { %v3135_v31 = vadd.f32 %v2815_v37, %v2422_v27  ;;  %v3337_v46 = vpop.f32.mrf.mxu3  ;;  %v1055_v27 = vor.u32 %v11543_v1, %v1052_v51 }
 0x219   : > { %v2423_v17 = vpop.f32.mrf.mxu1 }
 0x21a   : > { %v3657_v52 = vadd.f32 %v3337_v46, %v3135_v31  ;;  %v2424_v34 = vadd.f32 %v2423_v17, %v8573_v35  ;;  %v9064_v44 = vsel %vm948_vm1, %v1045_v0, %v1055_v27 }
 0x21b   : > { %v3865_v5 = vpop.f32.mrf.mxu0 }
 0x21c   : > { %v9051_v61 = vadd.f32 %v3863_v22, %v3657_v52 }
 0x21f   : > { %v2817_v37 = vpop.f32.mrf.mxu2 }
 0x220   : > { %v3136_v31 = vadd.f32 %v2817_v37, %v2424_v34  ;;  %v3339_v46 = vpop.f32.mrf.mxu3  ;;  %v1060_v37 = vrot.slane %v11544_v42, 7 }
 0x221   : > { %v2426_v25 = vpop.f32.mrf.mxu1 }
 0x222   : > { %v3658_v22 = vadd.f32 %v3339_v46, %v3136_v31  ;;  %v2427_v34 = vadd.f32 %v2426_v25, %v8587_v45  ;;  %v11934_v46 = vshrl.u32 %v8608_v57, 16  ;;  %v11935_v25 = vshll.u32 %v8631_v12, 16 }
 0x223   : > { %v3868_v52 = vpop.f32.mrf.mxu0 }
 0x224   : > { %2465 = vmatmul.bf16.gmra.mxu1 %v8934_v9  ;;  %2859 = vmatmul.bf16.gmra.mxu2 %v9061_v29  ;;  %v9068_v35 = vadd.f32 %v3865_v5, %v3658_v22  ;;  %v11546_v5 = vshll.u32 %v8700_v7, 16  ;;  %v1629_v22 = vor.u32 %v1627_v15, %v11934_v46  ;;  %v1630_v45 = vrot.slane %v11935_v25, 1 }
 0x225   : > { %3381 = vmatmul.bf16.gmra.mxu3 %v9064_v44  ;;  %v11545_v15 = vshrl.u32 %v8723_v6, 16 }
 0x226   : > { %11933 = vst [vmem:[#allocation133_spill] sm:$0xff] %v9068_v35  ;;  %3907 = vmatmul.bf16.gmra.mxu0 %v8677_v23  ;;  %v9087_v42 = vsel %vm1599_vm4, %v1629_v22, %v1630_v45 }
 0x227   : > { %v2820_v49 = vpop.f32.mrf.mxu2 }
 0x228   : > { %v3137_v41 = vadd.f32 %v2820_v49, %v2427_v34  ;;  %v3342_v17 = vpop.f32.mrf.mxu3  ;;  %v1063_v34 = vor.u32 %v11546_v5, %v1060_v37 }
 0x229   : > { %v2428_v28 = vpop.f32.mrf.mxu1 }
 0x22a   : > { %v3659_v0 = vadd.f32 %v3342_v17, %v3137_v41  ;;  %v2429_v1 = vadd.f32 %v2428_v28, %v8596_v50  ;;  %v9090_v57 = vsel %vm948_vm1, %v1052_v51, %v1063_v34 }
 0x22b   : > { %v3870_v27 = vpop.f32.mrf.mxu0 }
 0x22c   : > { %v9077_v31 = vadd.f32 %v3868_v52, %v3659_v0 }
 0x22f   : > { %v2822_v49 = vpop.f32.mrf.mxu2 }
 0x230   : > { %v3138_v41 = vadd.f32 %v2822_v49, %v2429_v1  ;;  %v3344_v17 = vpop.f32.mrf.mxu3  ;;  %v1068_v49 = vrot.slane %v11545_v15, 7 }
 0x231   : > { %v2431_v35 = vpop.f32.mrf.mxu1 }
 0x232   : > { %v3660_v52 = vadd.f32 %v3344_v17, %v3138_v41  ;;  %v2432_v1 = vadd.f32 %v2431_v35, %v8610_v58  ;;  %v11938_v17 = vshrl.u32 %v8631_v12, 16 }
 0x233   : > { %v3873_v0 = vpop.f32.mrf.mxu0 }
 0x234   : > { %2470 = vmatmul.bf16.gmra.mxu1 %v8970_v13  ;;  %2864 = vmatmul.bf16.gmra.mxu2 %v9087_v42  ;;  %v9094_v50 = vadd.f32 %v3870_v27, %v3660_v52  ;;  %v11547_v27 = vshll.u32 %v8723_v6, 16  ;;  %v1632_v52 = vor.u32 %v1630_v45, %v11938_v17  ;;  %v9125_v45 = vld [vmem:[%s8458_s16 + $0x60] sm:$0xff] }
 0x235   : > { %3386 = vmatmul.bf16.gmra.mxu3 %v9090_v57 }
 0x236   : > { %11936 = vst [vmem:[#allocation134_spill] sm:$0xff] %v9094_v50  ;;  %3912 = vmatmul.bf16.gmra.mxu0 %v8700_v7  ;;  %v1071_v35 = vor.u32 %v11547_v27, %v1068_v49  ;;  %v9112_v15 = vsel %vm8843_vm6, %v1632_v52, 0  ;;  %v11940_v52 = vshll.u32 %v8654_v30, 16  ;;  %v11943_v27 = vshll.u32 %v8677_v23, 16 }
 0x237   : > { %v2825_v28 = vpop.f32.mrf.mxu2 }
 0x238   : > { %v3139_v46 = vadd.f32 %v2825_v28, %v2432_v1  ;;  %v3347_v22 = vpop.f32.mrf.mxu3 }
 0x239   : > { %v2433_v25 = vpop.f32.mrf.mxu1 }
 0x23a   : > { %v3661_v51 = vadd.f32 %v3347_v22, %v3139_v46  ;;  %v2434_v58 = vadd.f32 %v2433_v25, %v8619_v3  ;;  %v11548_v25 = vshrl.u32 %v9125_v45, 16 }
 0x23b   : > { %v3875_v34 = vpop.f32.mrf.mxu0 }
 0x23c   : > { %v9103_v41 = vadd.f32 %v3873_v0, %v3661_v51  ;;  %v9115_v51 = vsel %vm948_vm1, %v1060_v37, %v1071_v35 }
 0x23e   : > { %11937 = vst [vmem:[#allocation135_spill] sm:$0xff] %v9103_v41 }
 0x23f   : > { %v2827_v1 = vpop.f32.mrf.mxu2 }
 0x240   : > { %v3140_v28 = vadd.f32 %v2827_v1, %v2434_v58  ;;  %v3349_v46 = vpop.f32.mrf.mxu3  ;;  %v1633_v58 = vrot.slane %v11940_v52, 1 }
 0x241   : > { %v2436_v22 = vpop.f32.mrf.mxu1 }
 0x242   : > { %v3662_v5 = vadd.f32 %v3349_v46, %v3140_v28  ;;  %v2437_v12 = vadd.f32 %v2436_v22, %v8633_v14  ;;  %v11549_v28 = vshll.u32 %v9125_v45, 16  ;;  %v11942_v14 = vshrl.u32 %v8654_v30, 16 }
 0x243   : > { %v3878_v0 = vpop.f32.mrf.mxu0 }
 0x244   : > { %2475 = vmatmul.bf16.gmra.mxu1 %v9005_v10  ;;  %2869 = vmatmul.bf16.gmra.mxu2 %v9112_v15  ;;  %v9119_v3 = vadd.f32 %v3875_v34, %v3662_v5  ;;  %v1076_v34 = vrot.slane %v11548_v25, 7  ;;  %v1634_v22 = vor.u32 %v1633_v58, %v11942_v14  ;;  %v9157_v58 = vld [vmem:[%s8458_s16 + $0x68] sm:$0xff] }
 0x245   : > { %3391 = vmatmul.bf16.gmra.mxu3 %v9115_v51 }
 0x246   : > { %11939 = vst [vmem:[#allocation136_spill] sm:$0xff] %v9119_v3  ;;  %3917 = vmatmul.bf16.gmra.mxu0 %v8723_v6 }
 0x247   : > { %v2830_v49 = vpop.f32.mrf.mxu2 }
 0x248   : > { %v3141_v17 = vadd.f32 %v2830_v49, %v2437_v12  ;;  %v3352_v37 = vpop.f32.mrf.mxu3  ;;  %v1635_v12 = vrot.slane %v11943_v27, 1 }
 0x249   : > { %v2438_v35 = vpop.f32.mrf.mxu1 }
 0x24a   : > { %v3663_v1 = vadd.f32 %v3352_v37, %v3141_v17  ;;  %v2439_v49 = vadd.f32 %v2438_v35, %v8642_v18  ;;  %v1079_v17 = vor.u32 %v11549_v28, %v1076_v34  ;;  %v9143_v41 = vsel %vm1599_vm4, %v1634_v22, %v1635_v12 }
 0x24b   : > { %v3880_v5 = vpop.f32.mrf.mxu0  ;;  %v11946_v28 = vshrl.u32 %v8677_v23, 16 }
 0x24c   : > { %v9133_v46 = vadd.f32 %v3878_v0, %v3663_v1  ;;  %v9147_v30 = vsel %vm8744_vm3, 0, %v1079_v17 }
 0x24e   : > { %11941 = vst [vmem:[#allocation137_spill] sm:$0xff] %v9133_v46 }
 0x24f   : > { %v2832_v37 = vpop.f32.mrf.mxu2 }
 0x250   : > { %v3142_v52 = vadd.f32 %v2832_v37, %v2439_v49  ;;  %v3354_v3 = vpop.f32.mrf.mxu3 }
 0x251   : > { %v2441_v25 = vpop.f32.mrf.mxu1 }
 0x252   : > { %v3664_v0 = vadd.f32 %v3354_v3, %v3142_v52  ;;  %v2442_v27 = vadd.f32 %v2441_v25, %v8656_v33  ;;  %v11550_v3 = vshrl.u32 %v9157_v58, 16  ;;  %v11551_v52 = vshll.u32 %v9157_v58, 16 }
 0x253   : > { %v3883_v1 = vpop.f32.mrf.mxu0  ;;  %v1637_v33 = vor.u32 %v1635_v12, %v11946_v28  ;;  %v11947_v25 = vshll.u32 %v8700_v7, 16 }
 0x254   : > { %2480 = vmatmul.bf16.gmra.mxu1 %v9040_v55  ;;  %2874 = vmatmul.bf16.gmra.mxu2 %v9143_v41  ;;  %v9151_v18 = vadd.f32 %v3880_v5, %v3664_v0  ;;  %v1083_v5 = vrot.slane %v11550_v3, 7 }
 0x255   : > { %3396 = vmatmul.bf16.gmra.mxu3 %v9147_v30 }
 0x256   : > { %11944 = vst [vmem:[#allocation138_spill] sm:$0xff] %v9151_v18  ;;  %3922 = vmatmul.bf16.gmra.mxu0 %v9125_v45  ;;  %v1638_v18 = vrot.slane %v11947_v25, 1 }
 0x257   : > { %v2835_v35 = vpop.f32.mrf.mxu2 }
 0x258   : > { %v3143_v14 = vadd.f32 %v2835_v35, %v2442_v27  ;;  %v3357_v22 = vpop.f32.mrf.mxu3  ;;  %v1086_v27 = vor.u32 %v11551_v52, %v1083_v5  ;;  %v9173_v50 = vsel %vm1599_vm4, %v1637_v33, %v1638_v18 }
 0x259   : > { %v2443_v49 = vpop.f32.mrf.mxu1 }
 0x25a   : > { %v3665_v17 = vadd.f32 %v3357_v22, %v3143_v14  ;;  %v2444_v46 = vadd.f32 %v2443_v49, %v8665_v56  ;;  %v9176_v23 = vsel %vm948_vm1, %v1076_v34, %v1086_v27 }
 0x25b   : > { %v3885_v37 = vpop.f32.mrf.mxu0 }
 0x25c   : > { %v9163_v0 = vadd.f32 %v3883_v1, %v3665_v17 }
 0x25e   : > { %11945 = vst [vmem:[#allocation139_spill] sm:$0xff] %v9163_v0 }
 0x25f   : > { %v2837_v35 = vpop.f32.mrf.mxu2 }
 0x260   : > { %v3144_v14 = vadd.f32 %v2837_v35, %v2444_v46  ;;  %v3359_v22 = vpop.f32.mrf.mxu3  ;;  %v9186_v46 = vld [vmem:[%s8458_s16 + $0x70] sm:$0xff] }
 0x261   : > { %v2446_v3 = vpop.f32.mrf.mxu1  ;;  %v11552_v12 = vshrl.u32 %v9186_v46, 16 }
 0x262   : > { %v3666_v1 = vadd.f32 %v3359_v22, %v3144_v14  ;;  %v2447_v28 = vadd.f32 %v2446_v3, %v8679_v24  ;;  %v11553_v14 = vshll.u32 %v9186_v46, 16  ;;  %v11951_v3 = vshll.u32 %v8723_v6, 16 }
 0x263   : > { %v3888_v17 = vpop.f32.mrf.mxu0 }
 0x264   : > { %2485 = vmatmul.bf16.gmra.mxu1 %v9064_v44  ;;  %2879 = vmatmul.bf16.gmra.mxu2 %v9173_v50  ;;  %v9180_v56 = vadd.f32 %v3885_v37, %v3666_v1  ;;  %v1091_v37 = vrot.slane %v11552_v12, 7  ;;  %v11950_v1 = vshrl.u32 %v8700_v7, 16  ;;  %v1641_v52 = vrot.slane %v11951_v3, 1 }
 0x265   : > { %3401 = vmatmul.bf16.gmra.mxu3 %v9176_v23 }
 0x266   : > { %11948 = vst [vmem:[#allocation140_spill] sm:$0xff] %v9180_v56  ;;  %3927 = vmatmul.bf16.gmra.mxu0 %v9157_v58  ;;  %v1640_v24 = vor.u32 %v1638_v18, %v11950_v1  ;;  %v7543_v18 = vld [vmem:[#allocation8 + $0x1a8] sm:$0xff]  ;;  %v9215_v1 = vld [vmem:[%s8458_s16 + $0x78] sm:$0xff] }
 0x267   : > { %v2840_v49 = vpop.f32.mrf.mxu2  ;;  %4900 = vmatpush.bf16.msra.mxu2 %v7543_v18 }
 0x268   : > { %v3145_v33 = vadd.f32 %v2840_v49, %v2447_v28  ;;  %v3362_v34 = vpop.f32.mrf.mxu3  ;;  %v1094_v28 = vor.u32 %v11553_v14, %v1091_v37  ;;  %v9202_v0 = vsel %vm1599_vm4, %v1640_v24, %v1641_v52  ;;  %v11554_v24 = vshrl.u32 %v9215_v1, 16  ;;  %v7535_v14 = vld [vmem:[#allocation8 + $0x168] sm:$0xff] }
 0x269   : > { %v2448_v25 = vpop.f32.mrf.mxu1  ;;  %4378 = vmatpush.bf16.msra.mxu1 %v7535_v14 }
 0x26a   : > { %v3667_v27 = vadd.f32 %v3362_v34, %v3145_v33  ;;  %v2449_v56 = vadd.f32 %v2448_v25, %v8688_v53  ;;  %v9205_v7 = vsel %vm948_vm1, %v1083_v5, %v1094_v28 }
 0x26b   : > { %v3890_v35 = vpop.f32.mrf.mxu0 }
 0x26c   : > { %v9192_v22 = vadd.f32 %v3888_v17, %v3667_v27 }
 0x26e   : > { %11949 = vst [vmem:[#allocation141_spill] sm:$0xff] %v9192_v22 }
 0x26f   : > { %v2842_v49 = vpop.f32.mrf.mxu2 }
 0x270   : > { %v3146_v33 = vadd.f32 %v2842_v49, %v2449_v56  ;;  %v3364_v34 = vpop.f32.mrf.mxu3  ;;  %v7551_v56 = vld [vmem:[#allocation8 + $0x1e8] sm:$0xff] }
 0x271   : > { %v2451_v12 = vpop.f32.mrf.mxu1  ;;  %5426 = vmatpush.bf16.msra.mxu3 %v7551_v56 }
 0x272   : > { %v3668_v17 = vadd.f32 %v3364_v34, %v3146_v33  ;;  %v2452_v25 = vadd.f32 %v2451_v12, %v8702_v11  ;;  %v1099_v34 = vrot.slane %v11554_v24, 7  ;;  %v11954_v12 = vshrl.u32 %v8723_v6, 16 }
 0x273   : > { %v3893_v27 = vpop.f32.mrf.mxu0 }
 0x274   : > { %2490 = vmatmul.bf16.gmra.mxu1 %v9090_v57  ;;  %2884 = vmatmul.bf16.gmra.mxu2 %v9202_v0  ;;  %v9209_v53 = vadd.f32 %v3890_v35, %v3668_v17  ;;  %v11555_v17 = vshll.u32 %v9215_v1, 16  ;;  %v1643_v18 = vor.u32 %v1641_v52, %v11954_v12  ;;  %v9243_v52 = vld [vmem:[%s8458_s16 + $0x80] sm:$0xff]  ;;  %v11956_v12 = vshll.u32 %v9125_v45, 16 }
 0x275   : > { %3406 = vmatmul.bf16.gmra.mxu3 %v9205_v7 }
 0x276   : > { %11952 = vst [vmem:[#allocation142_spill] sm:$0xff] %v9209_v53  ;;  %3932 = vmatmul.bf16.gmra.mxu0 %v9186_v46  ;;  %v7559_v53 = vld [vmem:[#allocation8 + $0x228] sm:$0xff]  ;;  %v9230_v22 = vsel %vm8843_vm6, %v1643_v18, 0  ;;  %v1644_v18 = vrot.slane %v11956_v12, 1 }
 0x277   : > { %v2845_v5 = vpop.f32.mrf.mxu2  ;;  %5948 = vmatpush.bf16.msra.mxu0 %v7559_v53 }
 0x278   : > { %v3147_v3 = vadd.f32 %v2845_v5, %v2452_v25  ;;  %v3367_v28 = vpop.f32.mrf.mxu3  ;;  %v1102_v25 = vor.u32 %v11555_v17, %v1099_v34 }
 0x279   : > { %v2453_v49 = vpop.f32.mrf.mxu1 }
 0x27a   : > { %v3669_v35 = vadd.f32 %v3367_v28, %v3147_v3  ;;  %v2454_v56 = vadd.f32 %v2453_v49, %v8711_v43  ;;  %v9233_v53 = vsel %vm948_vm1, %v1091_v37, %v1102_v25  ;;  %v11556_v49 = vshrl.u32 %v9243_v52, 16 }
 0x27b   : > { %v3895_v33 = vpop.f32.mrf.mxu0 }
 0x27c   : > { %v9221_v11 = vadd.f32 %v3893_v27, %v3669_v35 }
 0x27e   : > { %11953 = vst [vmem:[#allocation143_spill] sm:$0xff] %v9221_v11 }
 0x27f   : > { %v2847_v5 = vpop.f32.mrf.mxu2 }
 0x280   : > { %v3148_v3 = vadd.f32 %v2847_v5, %v2454_v56  ;;  %v3369_v28 = vpop.f32.mrf.mxu3  ;;  %v1107_v5 = vrot.slane %v11556_v49, 7 }
 0x281   : > { %v2456_v24 = vpop.f32.mrf.mxu1 }
 0x282   : > { %v3670_v14 = vadd.f32 %v3369_v28, %v3148_v3  ;;  %v2457_v6 = vadd.f32 %v2456_v24, %v8725_v63  ;;  %v11557_v3 = vshll.u32 %v9243_v52, 16  ;;  %v11958_v63 = vshrl.u32 %v9125_v45, 16 }
 0x283   : > { %v3898_v27 = vpop.f32.mrf.mxu0 }
 0x284   : > { %2495 = vmatmul.bf16.gmra.mxu1 %v9115_v51  ;;  %2889 = vmatmul.bf16.gmra.mxu2 %v9230_v22  ;;  %v9237_v43 = vadd.f32 %v3895_v33, %v3670_v14  ;;  %v1645_v24 = vor.u32 %v1644_v18, %v11958_v63  ;;  %v11959_v14 = vshll.u32 %v9157_v58, 16 }
 0x285   : > { %3411 = vmatmul.bf16.gmra.mxu3 %v9233_v53 }
 0x286   : > { %11955 = vst [vmem:[#allocation144_spill] sm:$0xff] %v9237_v43  ;;  %3937 = vmatmul.bf16.gmra.mxu0 %v9215_v1 }
 0x287   : > { %v2850_v35 = vpop.f32.mrf.mxu2 }
 0x288   : > { %v3149_v34 = vadd.f32 %v2850_v35, %v2457_v6  ;;  %v3372_v37 = vpop.f32.mrf.mxu3  ;;  %v1646_v6 = vrot.slane %v11959_v14, 1 }
 0x289   : > { %v2458_v56 = vpop.f32.mrf.mxu1 }
 0x28a   : > { %v3671_v25 = vadd.f32 %v3372_v37, %v3149_v34  ;;  %v2459_v35 = vadd.f32 %v2458_v56, %v8738_v59  ;;  %v1110_v34 = vor.u32 %v11557_v3, %v1107_v5  ;;  %v9261_v43 = vsel %vm1599_vm4, %v1645_v24, %v1646_v6  ;;  %v9275_v56 = vld [vmem:[%s8458_s16 + $0x88] sm:$0xff] }
 0x28b   : > { %v3900_v33 = vpop.f32.mrf.mxu0  ;;  %v11962_v3 = vshrl.u32 %v9157_v58, 16 }
 0x28c   : > { %v9251_v28 = vadd.f32 %v3898_v27, %v3671_v25  ;;  %v9265_v45 = vsel %vm8744_vm3, 0, %v1110_v34 }
 0x28e   : > { %11957 = vst [vmem:[#allocation145_spill] sm:$0xff] %v9251_v28 }
 0x28f   : > { %v2852_v37 = vpop.f32.mrf.mxu2 }
 0x290   : > { %v3150_v12 = vadd.f32 %v2852_v37, %v2459_v35  ;;  %v3374_v17 = vpop.f32.mrf.mxu3 }
 0x291   : > { %v2461_v49 = vpop.f32.mrf.mxu1 }
 0x292   : > { %v3672_v27 = vadd.f32 %v3374_v17, %v3150_v12  ;;  %v2462_v18 = vadd.f32 %v2461_v49, %v8759_v32  ;;  %v11558_v17 = vshrl.u32 %v9275_v56, 16  ;;  %v11559_v12 = vshll.u32 %v9275_v56, 16 }
 0x293   : > { %v3903_v25 = vpop.f32.mrf.mxu0  ;;  %v1648_v32 = vor.u32 %v1646_v6, %v11962_v3  ;;  %v11963_v49 = vshll.u32 %v9186_v46, 16 }
 0x294   : > { %2500 = vmatmul.bf16.gmra.mxu1 %v9147_v30  ;;  %2894 = vmatmul.bf16.gmra.mxu2 %v9261_v43  ;;  %v9269_v59 = vadd.f32 %v3900_v33, %v3672_v27  ;;  %v1114_v33 = vrot.slane %v11558_v17, 7 }
 0x295   : > { %3416 = vmatmul.bf16.gmra.mxu3 %v9265_v45 }
 0x296   : > { %11960 = vst [vmem:[#allocation146_spill] sm:$0xff] %v9269_v59  ;;  %3942 = vmatmul.bf16.gmra.mxu0 %v9243_v52  ;;  %v1649_v59 = vrot.slane %v11963_v49, 1 }
 0x297   : > { %v2855_v63 = vpop.f32.mrf.mxu2 }
 0x298   : > { %v3151_v24 = vadd.f32 %v2855_v63, %v2462_v18  ;;  %v3377_v14 = vpop.f32.mrf.mxu3  ;;  %v1117_v18 = vor.u32 %v11559_v12, %v1114_v33  ;;  %v9291_v11 = vsel %vm1599_vm4, %v1648_v32, %v1649_v59 }
 0x299   : > { %v2463_v35 = vpop.f32.mrf.mxu1 }
 0x29a   : > { %v3673_v34 = vadd.f32 %v3377_v14, %v3151_v24  ;;  %v2464_v28 = vadd.f32 %v2463_v35, %v8776_v20  ;;  %v9294_v58 = vsel %vm948_vm1, %v1107_v5, %v1117_v18 }
 0x29b   : > { %v3905_v37 = vpop.f32.mrf.mxu0 }
 0x29c   : > { %v9281_v27 = vadd.f32 %v3903_v25, %v3673_v34 }
 0x29e   : > { %11961 = vst [vmem:[#allocation147_spill] sm:$0xff] %v9281_v27 }
 0x29f   : > { %v2857_v63 = vpop.f32.mrf.mxu2 }
 0x2a0   : > { %v3152_v24 = vadd.f32 %v2857_v63, %v2464_v28  ;;  %v3379_v14 = vpop.f32.mrf.mxu3  ;;  %v9304_v28 = vld [vmem:[%s8458_s16 + $0x90] sm:$0xff] }
 0x2a1   : > { %v2466_v17 = vpop.f32.mrf.mxu1  ;;  %v11560_v6 = vshrl.u32 %v9304_v28, 16 }
 0x2a2   : > { %v3674_v25 = vadd.f32 %v3379_v14, %v3152_v24  ;;  %v2467_v3 = vadd.f32 %v2466_v17, %v8791_v8  ;;  %v11561_v24 = vshll.u32 %v9304_v28, 16  ;;  %v11967_v17 = vshll.u32 %v9215_v1, 16 }
 0x2a3   : > { %v3908_v34 = vpop.f32.mrf.mxu0 }
 0x2a4   : > { %2505 = vmatmul.bf16.gmra.mxu1 %v9176_v23  ;;  %2899 = vmatmul.bf16.gmra.mxu2 %v9291_v11  ;;  %v9298_v20 = vadd.f32 %v3905_v37, %v3674_v25  ;;  %v1122_v37 = vrot.slane %v11560_v6, 7  ;;  %v11966_v25 = vshrl.u32 %v9186_v46, 16  ;;  %v1652_v12 = vrot.slane %v11967_v17, 1 }
 0x2a5   : > { %3421 = vmatmul.bf16.gmra.mxu3 %v9294_v58 }
 0x2a6   : > { %11964 = vst [vmem:[#allocation148_spill] sm:$0xff] %v9298_v20  ;;  %3947 = vmatmul.bf16.gmra.mxu0 %v9275_v56  ;;  %v1651_v8 = vor.u32 %v1649_v59, %v11966_v25 }
 0x2a7   : > { %v2860_v35 = vpop.f32.mrf.mxu2 }
 0x2a8   : > { %v3153_v32 = vadd.f32 %v2860_v35, %v2467_v3  ;;  %v3382_v5 = vpop.f32.mrf.mxu3  ;;  %v1125_v3 = vor.u32 %v11561_v24, %v1122_v37  ;;  %v9320_v27 = vsel %vm1599_vm4, %v1651_v8, %v1652_v12 }
 0x2a9   : > { %v2468_v49 = vpop.f32.mrf.mxu1 }
 0x2aa   : > { %v3675_v18 = vadd.f32 %v3382_v5, %v3153_v32  ;;  %v2469_v20 = vadd.f32 %v2468_v49, %v8807_v36  ;;  %v9323_v46 = vsel %vm948_vm1, %v1114_v33, %v1125_v3 }
 0x2ab   : > { %v3910_v63 = vpop.f32.mrf.mxu0 }
 0x2ac   : > { %v9310_v14 = vadd.f32 %v3908_v34, %v3675_v18 }
 0x2ae   : > { %11965 = vst [vmem:[#allocation149_spill] sm:$0xff] %v9310_v14 }
 0x2af   : > { %v2862_v35 = vpop.f32.mrf.mxu2 }
 0x2b0   : > { %v3154_v32 = vadd.f32 %v2862_v35, %v2469_v20  ;;  %v3384_v5 = vpop.f32.mrf.mxu3  ;;  %v9333_v20 = vld [vmem:[%s8458_s16 + $0x98] sm:$0xff] }
 0x2b1   : > { %v2471_v6 = vpop.f32.mrf.mxu1  ;;  %v11562_v49 = vshrl.u32 %v9333_v20, 16 }
 0x2b2   : > { %v3676_v34 = vadd.f32 %v3384_v5, %v3154_v32  ;;  %v2472_v59 = vadd.f32 %v2471_v6, %v8822_v26  ;;  %v11563_v32 = vshll.u32 %v9333_v20, 16 }
 0x2b3   : > { %v3913_v18 = vpop.f32.mrf.mxu0 }
 0x2b4   : > { %2510 = vmatmul.bf16.gmra.mxu1 %v9205_v7  ;;  %2904 = vmatmul.bf16.gmra.mxu2 %v9320_v27  ;;  %v9327_v36 = vadd.f32 %v3910_v63, %v3676_v34  ;;  %v1130_v63 = vrot.slane %v11562_v49, 7  ;;  %v11970_v34 = vshrl.u32 %v9215_v1, 16 }
 0x2b5   : > { %3426 = vmatmul.bf16.gmra.mxu3 %v9323_v46 }
 0x2b6   : > { %11968 = vst [vmem:[#allocation150_spill] sm:$0xff] %v9327_v36  ;;  %3952 = vmatmul.bf16.gmra.mxu0 %v9304_v28  ;;  %v1654_v26 = vor.u32 %v1652_v12, %v11970_v34  ;;  %v9361_v12 = vld [vmem:[%s8458_s16 + $0xa0] sm:$0xff]  ;;  %v11972_v34 = vshll.u32 %v9243_v52, 16 }
 0x2b7   : > { %v2865_v25 = vpop.f32.mrf.mxu2 }
 0x2b8   : > { %v3155_v8 = vadd.f32 %v2865_v25, %v2472_v59  ;;  %v3387_v33 = vpop.f32.mrf.mxu3  ;;  %v1133_v59 = vor.u32 %v11563_v32, %v1130_v63  ;;  %v9348_v49 = vsel %vm8843_vm6, %v1654_v26, 0  ;;  %v1655_v26 = vrot.slane %v11972_v34, 1 }
 0x2b9   : > { %v2473_v17 = vpop.f32.mrf.mxu1  ;;  %v11975_v32 = vshll.u32 %v9275_v56, 16 }
 0x2ba   : > { %v3677_v3 = vadd.f32 %v3387_v33, %v3155_v8  ;;  %v2474_v6 = vadd.f32 %v2473_v17, %v8837_v16 }
 0x2bb   : > { %v3915_v35 = vpop.f32.mrf.mxu0 }
 0x2bc   : > { %v9339_v5 = vadd.f32 %v3913_v18, %v3677_v3  ;;  %v9351_v3 = vsel %vm948_vm1, %v1122_v37, %v1133_v59 }
 0x2be   : > { %11969 = vst [vmem:[#allocation151_spill] sm:$0xff] %v9339_v5 }
 0x2bf   : > { %v2867_v25 = vpop.f32.mrf.mxu2 }
 0x2c0   : > { %v3156_v24 = vadd.f32 %v2867_v25, %v2474_v6  ;;  %v3389_v8 = vpop.f32.mrf.mxu3  ;;  %v11565_v25 = vshll.u32 %v9361_v12, 16 }
 0x2c1   : > { %v2476_v33 = vpop.f32.mrf.mxu1 }
 0x2c2   : > { %v3678_v36 = vadd.f32 %v3389_v8, %v3156_v24  ;;  %v2477_v1 = vadd.f32 %v2476_v33, %v8858_v21  ;;  %v11564_v24 = vshrl.u32 %v9361_v12, 16  ;;  %v11974_v21 = vshrl.u32 %v9243_v52, 16 }
 0x2c3   : > { %v3918_v18 = vpop.f32.mrf.mxu0 }
 0x2c4   : > { %2515 = vmatmul.bf16.gmra.mxu1 %v9233_v53  ;;  %2909 = vmatmul.bf16.gmra.mxu2 %v9348_v49  ;;  %v9355_v16 = vadd.f32 %v3915_v35, %v3678_v36  ;;  %v1138_v35 = vrot.slane %v11564_v24, 7  ;;  %v1656_v33 = vor.u32 %v1655_v26, %v11974_v21  ;;  %v9393_v26 = vld [vmem:[%s8458_s16 + $0xa8] sm:$0xff] }
 0x2c5   : > { %3431 = vmatmul.bf16.gmra.mxu3 %v9351_v3 }
 0x2c6   : > { %11971 = vst [vmem:[#allocation152_spill] sm:$0xff] %v9355_v16  ;;  %3957 = vmatmul.bf16.gmra.mxu0 %v9333_v20 }
 0x2c7   : > { %v2870_v17 = vpop.f32.mrf.mxu2 }
 0x2c8   : > { %v3157_v63 = vadd.f32 %v2870_v17, %v2477_v1  ;;  %v3392_v37 = vpop.f32.mrf.mxu3  ;;  %v1657_v1 = vrot.slane %v11975_v32, 1 }
 0x2c9   : > { %v2478_v6 = vpop.f32.mrf.mxu1 }
 0x2ca   : > { %v3679_v59 = vadd.f32 %v3392_v37, %v3157_v63  ;;  %v2479_v17 = vadd.f32 %v2478_v6, %v8874_v39  ;;  %v1141_v63 = vor.u32 %v11565_v25, %v1138_v35  ;;  %v9379_v5 = vsel %vm1599_vm4, %v1656_v33, %v1657_v1 }
 0x2cb   : > { %v3920_v36 = vpop.f32.mrf.mxu0  ;;  %v11979_v25 = vshrl.u32 %v9275_v56, 16 }
 0x2cc   : > { %v9369_v8 = vadd.f32 %v3918_v18, %v3679_v59  ;;  %v9383_v52 = vsel %vm8744_vm3, 0, %v1141_v63 }
 0x2cd   : > { %11976 = vst [vmem:[#allocation154_spill] sm:$0xff] %v9383_v52 }
 0x2ce   : > { %11973 = vst [vmem:[#allocation153_spill] sm:$0xff] %v9369_v8 }
 0x2cf   : > { %v2872_v37 = vpop.f32.mrf.mxu2 }
 0x2d0   : > { %v3158_v34 = vadd.f32 %v2872_v37, %v2479_v17  ;;  %v3394_v16 = vpop.f32.mrf.mxu3 }
 0x2d1   : > { %v2481_v24 = vpop.f32.mrf.mxu1 }
 0x2d2   : > { %v3680_v18 = vadd.f32 %v3394_v16, %v3158_v34  ;;  %v2482_v32 = vadd.f32 %v2481_v24, %v8894_v40  ;;  %v11566_v16 = vshrl.u32 %v9393_v26, 16  ;;  %v11567_v34 = vshll.u32 %v9393_v26, 16 }
 0x2d3   : > { %v3923_v59 = vpop.f32.mrf.mxu0  ;;  %v1659_v40 = vor.u32 %v1657_v1, %v11979_v25  ;;  %v11980_v24 = vshll.u32 %v9304_v28, 16 }
 0x2d4   : > { %2520 = vmatmul.bf16.gmra.mxu1 %v9265_v45  ;;  %2914 = vmatmul.bf16.gmra.mxu2 %v9379_v5  ;;  %v9387_v39 = vadd.f32 %v3920_v36, %v3680_v18  ;;  %v1145_v36 = vrot.slane %v11566_v16, 7 }
 0x2d5   : > { %3436 = vmatmul.bf16.gmra.mxu3 %v9383_v52 }
 0x2d6   : > { %11977 = vst [vmem:[#allocation155_spill] sm:$0xff] %v9387_v39  ;;  %3962 = vmatmul.bf16.gmra.mxu0 %v9361_v12  ;;  %v1660_v39 = vrot.slane %v11980_v24, 1 }
 0x2d7   : > { %v2875_v6 = vpop.f32.mrf.mxu2 }
 0x2d8   : > { %v3159_v21 = vadd.f32 %v2875_v6, %v2482_v32  ;;  %v3397_v33 = vpop.f32.mrf.mxu3  ;;  %v1148_v32 = vor.u32 %v11567_v34, %v1145_v36  ;;  %v9409_v14 = vsel %vm1599_vm4, %v1659_v40, %v1660_v39 }
 0x2d9   : > { %v2483_v17 = vpop.f32.mrf.mxu1 }
 0x2da   : > { %v3681_v63 = vadd.f32 %v3397_v33, %v3159_v21  ;;  %v2484_v8 = vadd.f32 %v2483_v17, %v8911_v62  ;;  %v9412_v56 = vsel %vm948_vm1, %v1138_v35, %v1148_v32 }
 0x2db   : > { %v3925_v37 = vpop.f32.mrf.mxu0  ;;  %11981 = vst [vmem:[#allocation157_spill] sm:$0xff] %v9412_v56 }
 0x2dc   : > { %v9399_v18 = vadd.f32 %v3923_v59, %v3681_v63 }
 0x2de   : > { %11978 = vst [vmem:[#allocation156_spill] sm:$0xff] %v9399_v18 }
 0x2df   : > { %v2877_v6 = vpop.f32.mrf.mxu2 }
 0x2e0   : > { %v3160_v21 = vadd.f32 %v2877_v6, %v2484_v8  ;;  %v3399_v33 = vpop.f32.mrf.mxu3  ;;  %v9422_v8 = vld [vmem:[%s8458_s16 + $0xb0] sm:$0xff] }
 0x2e1   : > { %v2486_v16 = vpop.f32.mrf.mxu1  ;;  %v11568_v1 = vshrl.u32 %v9422_v8, 16 }
 0x2e2   : > { %v3682_v59 = vadd.f32 %v3399_v33, %v3160_v21  ;;  %v2487_v25 = vadd.f32 %v2486_v16, %v8931_v19  ;;  %v11569_v21 = vshll.u32 %v9422_v8, 16  ;;  %v11985_v16 = vshll.u32 %v9333_v20, 16 }
 0x2e3   : > { %v3928_v63 = vpop.f32.mrf.mxu0 }
 0x2e4   : > { %2525 = vmatmul.bf16.gmra.mxu1 %v9294_v58  ;;  %2919 = vmatmul.bf16.gmra.mxu2 %v9409_v14  ;;  %v9416_v62 = vadd.f32 %v3925_v37, %v3682_v59  ;;  %v1153_v37 = vrot.slane %v11568_v1, 7  ;;  %v11984_v59 = vshrl.u32 %v9304_v28, 16  ;;  %v1663_v34 = vrot.slane %v11985_v16, 1 }
 0x2e5   : > { %3441 = vmatmul.bf16.gmra.mxu3 %v9412_v56 }
 0x2e6   : > { %11982 = vst [vmem:[#allocation158_spill] sm:$0xff] %v9416_v62  ;;  %3967 = vmatmul.bf16.gmra.mxu0 %v9393_v26  ;;  %v1662_v19 = vor.u32 %v1660_v39, %v11984_v59  ;;  %v7542_v39 = vld [vmem:[#allocation8 + $0x1a0] sm:$0xff]  ;;  %v9451_v59 = vld [vmem:[%s8458_s16 + $0xb8] sm:$0xff] }
 0x2e7   : > { %v2880_v17 = vpop.f32.mrf.mxu2  ;;  %4901 = vmatpush.bf16.msra.mxu2 %v7542_v39 }
 0x2e8   : > { %v3161_v40 = vadd.f32 %v2880_v17, %v2487_v25  ;;  %v3402_v35 = vpop.f32.mrf.mxu3  ;;  %v1156_v25 = vor.u32 %v11569_v21, %v1153_v37  ;;  %v9438_v18 = vsel %vm1599_vm4, %v1662_v19, %v1663_v34  ;;  %v11570_v19 = vshrl.u32 %v9451_v59, 16  ;;  %v7534_v21 = vld [vmem:[#allocation8 + $0x160] sm:$0xff] }
 0x2e9   : > { %v2488_v24 = vpop.f32.mrf.mxu1  ;;  %4379 = vmatpush.bf16.msra.mxu1 %v7534_v21 }
 0x2ea   : > { %v3683_v32 = vadd.f32 %v3402_v35, %v3161_v40  ;;  %v2489_v62 = vadd.f32 %v2488_v24, %v8947_v38  ;;  %v9441_v28 = vsel %vm948_vm1, %v1145_v36, %v1156_v25 }
 0x2eb   : > { %v3930_v6 = vpop.f32.mrf.mxu0  ;;  %11986 = vst [vmem:[#allocation160_spill] sm:$0xff] %v9441_v28 }
 0x2ec   : > { %v9428_v33 = vadd.f32 %v3928_v63, %v3683_v32 }
 0x2ee   : > { %11983 = vst [vmem:[#allocation159_spill] sm:$0xff] %v9428_v33 }
 0x2ef   : > { %v2882_v17 = vpop.f32.mrf.mxu2 }
 0x2f0   : > { %v3162_v40 = vadd.f32 %v2882_v17, %v2489_v62  ;;  %v3404_v35 = vpop.f32.mrf.mxu3  ;;  %v7550_v62 = vld [vmem:[#allocation8 + $0x1e0] sm:$0xff] }
 0x2f1   : > { %v2491_v1 = vpop.f32.mrf.mxu1  ;;  %5427 = vmatpush.bf16.msra.mxu3 %v7550_v62 }
 0x2f2   : > { %v3684_v63 = vadd.f32 %v3404_v35, %v3162_v40  ;;  %v2492_v24 = vadd.f32 %v2491_v1, %v8967_v48  ;;  %v1161_v35 = vrot.slane %v11570_v19, 7  ;;  %v11989_v1 = vshrl.u32 %v9333_v20, 16 }
 0x2f3   : > { %v3933_v32 = vpop.f32.mrf.mxu0 }
 0x2f4   : > { %2530 = vmatmul.bf16.gmra.mxu1 %v9323_v46  ;;  %2924 = vmatmul.bf16.gmra.mxu2 %v9438_v18  ;;  %v9445_v38 = vadd.f32 %v3930_v6, %v3684_v63  ;;  %v11571_v63 = vshll.u32 %v9451_v59, 16  ;;  %v1665_v39 = vor.u32 %v1663_v34, %v11989_v1  ;;  %v9479_v34 = vld [vmem:[%s8458_s16 + $0xc0] sm:$0xff]  ;;  %v11992_v1 = vshll.u32 %v9361_v12, 16 }
 0x2f5   : > { %3446 = vmatmul.bf16.gmra.mxu3 %v9441_v28 }
 0x2f6   : > { %11987 = vst [vmem:[#allocation161_spill] sm:$0xff] %v9445_v38  ;;  %3972 = vmatmul.bf16.gmra.mxu0 %v9422_v8  ;;  %v7558_v38 = vld [vmem:[#allocation8 + $0x220] sm:$0xff]  ;;  %v9466_v33 = vsel %vm8843_vm6, %v1665_v39, 0  ;;  %v1666_v39 = vrot.slane %v11992_v1, 1 }
 0x2f7   : > { %v2885_v36 = vpop.f32.mrf.mxu2  ;;  %5949 = vmatpush.bf16.msra.mxu0 %v7558_v38 }
 0x2f8   : > { %v3163_v16 = vadd.f32 %v2885_v36, %v2492_v24  ;;  %v3407_v25 = vpop.f32.mrf.mxu3  ;;  %v1164_v24 = vor.u32 %v11571_v63, %v1161_v35 }
 0x2f9   : > { %v2493_v17 = vpop.f32.mrf.mxu1 }
 0x2fa   : > { %v3685_v6 = vadd.f32 %v3407_v25, %v3163_v16  ;;  %v2494_v62 = vadd.f32 %v2493_v17, %v8983_v54  ;;  %v9469_v38 = vsel %vm948_vm1, %v1153_v37, %v1164_v24  ;;  %v11572_v17 = vshrl.u32 %v9479_v34, 16 }
 0x2fb   : > { %v3935_v40 = vpop.f32.mrf.mxu0  ;;  %11990 = vst [vmem:[#allocation163_spill] sm:$0xff] %v9469_v38 }
 0x2fc   : > { %v9457_v48 = vadd.f32 %v3933_v32, %v3685_v6 }
 0x2fe   : > { %11988 = vst [vmem:[#allocation162_spill] sm:$0xff] %v9457_v48  ;;  %v12003_v48 = vld [vmem:[#allocation33_spill] sm:$0xff] }
 0x2ff   : > { %v2887_v36 = vpop.f32.mrf.mxu2 }
 0x300   : > { %v3164_v16 = vadd.f32 %v2887_v36, %v2494_v62  ;;  %v3409_v25 = vpop.f32.mrf.mxu3  ;;  %v1169_v36 = vrot.slane %v11572_v17, 7 }
 0x301   : > { %v2496_v19 = vpop.f32.mrf.mxu1 }
 0x302   : > { %v3686_v21 = vadd.f32 %v3409_v25, %v3164_v16  ;;  %v2497_v20 = vadd.f32 %v2496_v19, %v9002_v2  ;;  %v11573_v16 = vshll.u32 %v9479_v34, 16  ;;  %v11994_v2 = vshrl.u32 %v9361_v12, 16 }
 0x303   : > { %v3938_v32 = vpop.f32.mrf.mxu0 }
 0x304   : > { %2535 = vmatmul.bf16.gmra.mxu1 %v9351_v3  ;;  %2929 = vmatmul.bf16.gmra.mxu2 %v9466_v33  ;;  %v9473_v54 = vadd.f32 %v3935_v40, %v3686_v21  ;;  %v1667_v19 = vor.u32 %v1666_v39, %v11994_v2  ;;  %v11995_v21 = vshll.u32 %v9393_v26, 16  ;;  %v11999_v39 = vld [vmem:[#allocation30_spill] sm:$0xff] }
 0x305   : > { %3451 = vmatmul.bf16.gmra.mxu3 %v9469_v38  ;;  %v9511_v2 = vld [vmem:[%s8458_s16 + $0xc8] sm:$0xff] }
 0x306   : > { %11991 = vst [vmem:[#allocation164_spill] sm:$0xff] %v9473_v54  ;;  %3977 = vmatmul.bf16.gmra.mxu0 %v9451_v59 }
 0x307   : > { %v2890_v6 = vpop.f32.mrf.mxu2 }
 0x308   : > { %v3165_v35 = vadd.f32 %v2890_v6, %v2497_v20  ;;  %v3412_v37 = vpop.f32.mrf.mxu3  ;;  %v1668_v20 = vrot.slane %v11995_v21, 1 }
 0x309   : > { %v2498_v62 = vpop.f32.mrf.mxu1 }
 0x30a   : > { %v3687_v24 = vadd.f32 %v3412_v37, %v3165_v35  ;;  %v2499_v6 = vadd.f32 %v2498_v62, %v9020_v47  ;;  %v1172_v35 = vor.u32 %v11573_v16, %v1169_v36  ;;  %v9497_v54 = vsel %vm1599_vm4, %v1667_v19, %v1668_v20 }
 0x30b   : > { %v3940_v40 = vpop.f32.mrf.mxu0  ;;  %11996 = vst [vmem:[#allocation166_spill] sm:$0xff] %v9497_v54 }
 0x30c   : > { %v9487_v25 = vadd.f32 %v3938_v32, %v3687_v24  ;;  %v9501_v12 = vsel %vm8744_vm3, 0, %v1172_v35 }
 0x30d   : > { %11997 = vst [vmem:[#allocation167_spill] sm:$0xff] %v9501_v12 }
 0x30e   : > { %11993 = vst [vmem:[#allocation165_spill] sm:$0xff] %v9487_v25 }
 0x30f   : > { %v2892_v37 = vpop.f32.mrf.mxu2 }
 0x310   : > { %v3166_v1 = vadd.f32 %v2892_v37, %v2499_v6  ;;  %v3414_v63 = vpop.f32.mrf.mxu3 }
 0x311   : > { %v2501_v17 = vpop.f32.mrf.mxu1 }
 0x312   : > { %v3688_v32 = vadd.f32 %v3414_v63, %v3166_v1  ;;  %v2502_v62 = vadd.f32 %v2501_v17, %v11999_v39  ;;  %v11576_v63 = vshrl.u32 %v9511_v2, 16  ;;  %v12002_v39 = vshll.u32 %v9422_v8, 16 }
 0x313   : > { %v3943_v24 = vpop.f32.mrf.mxu0 }
 0x314   : > { %2540 = vmatmul.bf16.gmra.mxu1 %v9383_v52  ;;  %2934 = vmatmul.bf16.gmra.mxu2 %v9497_v54  ;;  %v9505_v47 = vadd.f32 %v3940_v40, %v3688_v32  ;;  %v1176_v40 = vrot.slane %v11576_v63, 7  ;;  %v11578_v32 = vshll.u32 %v9511_v2, 16  ;;  %v1671_v25 = vrot.slane %v12002_v39, 1 }
 0x315   : > { %3456 = vmatmul.bf16.gmra.mxu3 %v9501_v12 }
 0x316   : > { %11998 = vst [vmem:[#allocation168_spill] sm:$0xff] %v9505_v47  ;;  %3982 = vmatmul.bf16.gmra.mxu0 %v9479_v34  ;;  %v12001_v47 = vshrl.u32 %v9393_v26, 16 }
 0x317   : > { %v2895_v19 = vpop.f32.mrf.mxu2 }
 0x318   : > { %v3167_v21 = vadd.f32 %v2895_v19, %v2502_v62  ;;  %v3417_v6 = vpop.f32.mrf.mxu3  ;;  %v1670_v17 = vor.u32 %v1668_v20, %v12001_v47  ;;  %v1179_v62 = vor.u32 %v11578_v32, %v1176_v40  ;;  %v9540_v47 = vld [vmem:[%s8458_s16 + $0xd0] sm:$0xff]  ;;  %v12009_v32 = vshrl.u32 %v9422_v8, 16 }
 0x319   : > { %v2503_v35 = vpop.f32.mrf.mxu1 }
 0x31a   : > { %v3689_v37 = vadd.f32 %v3417_v6, %v3167_v21  ;;  %v2504_v54 = vadd.f32 %v2503_v35, %v12003_v48  ;;  %v9527_v52 = vsel %vm1599_vm4, %v1670_v17, %v1671_v25  ;;  %v9530_v26 = vsel %vm948_vm1, %v1169_v36, %v1179_v62 }
 0x31b   : > { %v3945_v1 = vpop.f32.mrf.mxu0  ;;  %12004 = vst [vmem:[#allocation33_spill] sm:$0xff] %v9527_v52  ;;  %v11581_v35 = vshrl.u32 %v9540_v47, 16 }
 0x31c   : > { %v9517_v16 = vadd.f32 %v3943_v24, %v3689_v37  ;;  %12005 = vst [vmem:[#allocation169_spill] sm:$0xff] %v9530_v26 }
 0x31e   : > { %12000 = vst [vmem:[#allocation30_spill] sm:$0xff] %v9517_v16  ;;  %v12011_v16 = vld [vmem:[#allocation39_spill] sm:$0xff] }
 0x31f   : > { %v2897_v19 = vpop.f32.mrf.mxu2 }
 0x320   : > { %v3168_v21 = vadd.f32 %v2897_v19, %v2504_v54  ;;  %v3419_v6 = vpop.f32.mrf.mxu3  ;;  %v12007_v54 = vld [vmem:[#allocation36_spill] sm:$0xff] }
 0x321   : > { %v2506_v63 = vpop.f32.mrf.mxu1 }
 0x322   : > { %v3690_v24 = vadd.f32 %v3419_v6, %v3168_v21  ;;  %v2507_v20 = vadd.f32 %v2506_v63, %v12007_v54  ;;  %v11583_v6 = vshll.u32 %v9540_v47, 16  ;;  %v1673_v63 = vor.u32 %v1671_v25, %v12009_v32  ;;  %v9569_v32 = vld [vmem:[%s8458_s16 + $0xd8] sm:$0xff] }
 0x323   : > { %v3948_v37 = vpop.f32.mrf.mxu0  ;;  %v12010_v54 = vshll.u32 %v9451_v59, 16 }
 0x324   : > { %2545 = vmatmul.bf16.gmra.mxu1 %v9412_v56  ;;  %2939 = vmatmul.bf16.gmra.mxu2 %v9527_v52  ;;  %v9534_v48 = vadd.f32 %v3945_v1, %v3690_v24  ;;  %v1184_v1 = vrot.slane %v11581_v35, 7 }
 0x325   : > { %3461 = vmatmul.bf16.gmra.mxu3 %v9530_v26 }
 0x326   : > { %12006 = vst [vmem:[#allocation170_spill] sm:$0xff] %v9534_v48  ;;  %3987 = vmatmul.bf16.gmra.mxu0 %v9511_v2  ;;  %v1674_v48 = vrot.slane %v12010_v54, 1 }
 0x327   : > { %v2900_v17 = vpop.f32.mrf.mxu2 }
 0x328   : > { %v3169_v39 = vadd.f32 %v2900_v17, %v2507_v20  ;;  %v3422_v36 = vpop.f32.mrf.mxu3  ;;  %v1187_v20 = vor.u32 %v11583_v6, %v1184_v1  ;;  %v9556_v56 = vsel %vm1599_vm4, %v1673_v63, %v1674_v48  ;;  %v12017_v6 = vshrl.u32 %v9451_v59, 16 }
 0x329   : > { %v2508_v62 = vpop.f32.mrf.mxu1  ;;  %12012 = vst [vmem:[#allocation39_spill] sm:$0xff] %v9556_v56 }
 0x32a   : > { %v3691_v19 = vadd.f32 %v3422_v36, %v3169_v39  ;;  %v2509_v52 = vadd.f32 %v2508_v62, %v12011_v16  ;;  %v9559_v8 = vsel %vm948_vm1, %v1176_v40, %v1187_v20  ;;  %v11584_v62 = vshrl.u32 %v9569_v32, 16 }
 0x32b   : > { %v3950_v21 = vpop.f32.mrf.mxu0  ;;  %12013 = vst [vmem:[#allocation171_spill] sm:$0xff] %v9559_v8 }
 0x32c   : > { %v9546_v24 = vadd.f32 %v3948_v37, %v3691_v19 }
 0x32e   : > { %12008 = vst [vmem:[#allocation36_spill] sm:$0xff] %v9546_v24 }
 0x32f   : > { %v2902_v17 = vpop.f32.mrf.mxu2 }
 0x330   : > { %v3170_v39 = vadd.f32 %v2902_v17, %v2509_v52  ;;  %v3424_v36 = vpop.f32.mrf.mxu3  ;;  %v12015_v52 = vld [vmem:[#allocation42_spill] sm:$0xff] }
 0x331   : > { %v2511_v35 = vpop.f32.mrf.mxu1 }
 0x332   : > { %v3692_v37 = vadd.f32 %v3424_v36, %v3170_v39  ;;  %v2512_v25 = vadd.f32 %v2511_v35, %v12015_v52  ;;  %v11587_v36 = vshll.u32 %v9569_v32, 16  ;;  %v1676_v35 = vor.u32 %v1674_v48, %v12017_v6  ;;  %v12018_v52 = vld [vmem:[#allocation45_spill] sm:$0xff]  ;;  %v12022_v48 = vld [vmem:[#allocation48_spill] sm:$0xff] }
 0x333   : > { %v3953_v19 = vpop.f32.mrf.mxu0 }
 0x334   : > { %2550 = vmatmul.bf16.gmra.mxu1 %v9441_v28  ;;  %2944 = vmatmul.bf16.gmra.mxu2 %v9556_v56  ;;  %v9563_v16 = vadd.f32 %v3950_v21, %v3692_v37  ;;  %v1192_v21 = vrot.slane %v11584_v62, 7  ;;  %v9584_v62 = vsel %vm8843_vm6, %v1676_v35, 0  ;;  %v12023_v35 = vshll.u32 %v9479_v34, 16 }
 0x335   : > { %3466 = vmatmul.bf16.gmra.mxu3 %v9559_v8  ;;  %12019 = vst [vmem:[#allocation45_spill] sm:$0xff] %v9584_v62 }
 0x336   : > { %12014 = vst [vmem:[#allocation172_spill] sm:$0xff] %v9563_v16  ;;  %3992 = vmatmul.bf16.gmra.mxu0 %v9540_v47 }
 0x337   : > { %v2905_v63 = vpop.f32.mrf.mxu2 }
 0x338   : > { %v3171_v54 = vadd.f32 %v2905_v63, %v2512_v25  ;;  %v3427_v40 = vpop.f32.mrf.mxu3  ;;  %v1195_v25 = vor.u32 %v11587_v36, %v1192_v21 }
 0x339   : > { %v2513_v20 = vpop.f32.mrf.mxu1 }
 0x33a   : > { %v3693_v17 = vadd.f32 %v3427_v40, %v3171_v54  ;;  %v2514_v16 = vadd.f32 %v2513_v20, %v12018_v52  ;;  %v1677_v52 = vrot.slane %v12023_v35, 1 }
 0x33b   : > { %v3955_v39 = vpop.f32.mrf.mxu0 }
 0x33c   : > { %v9575_v37 = vadd.f32 %v3953_v19, %v3693_v17  ;;  %v9587_v17 = vsel %vm948_vm1, %v1184_v1, %v1195_v25 }
 0x33d   : > { %12020 = vst [vmem:[#allocation173_spill] sm:$0xff] %v9587_v17 }
 0x33e   : > { %12016 = vst [vmem:[#allocation42_spill] sm:$0xff] %v9575_v37 }
 0x33f   : > { %v2907_v63 = vpop.f32.mrf.mxu2 }
 0x340   : > { %v3172_v24 = vadd.f32 %v2907_v63, %v2514_v16  ;;  %v3429_v54 = vpop.f32.mrf.mxu3  ;;  %v9597_v16 = vld [vmem:[%s8458_s16 + $0xe0] sm:$0xff] }
 0x341   : > { %v2516_v40 = vpop.f32.mrf.mxu1 }
 0x342   : > { %v3694_v56 = vadd.f32 %v3429_v54, %v3172_v24  ;;  %v2517_v6 = vadd.f32 %v2516_v40, %v12022_v48  ;;  %v11590_v24 = vshrl.u32 %v9597_v16, 16  ;;  %v11592_v54 = vshll.u32 %v9597_v16, 16 }
 0x343   : > { %v3958_v19 = vpop.f32.mrf.mxu0  ;;  %v12025_v40 = vshrl.u32 %v9479_v34, 16 }
 0x344   : > { %2555 = vmatmul.bf16.gmra.mxu1 %v9469_v38  ;;  %2949 = vmatmul.bf16.gmra.mxu2 %v9584_v62  ;;  %v9591_v59 = vadd.f32 %v3955_v39, %v3694_v56  ;;  %v1200_v39 = vrot.slane %v11590_v24, 7 }
 0x345   : > { %3471 = vmatmul.bf16.gmra.mxu3 %v9587_v17  ;;  %v1678_v48 = vor.u32 %v1677_v52, %v12025_v40 }
 0x346   : > { %12021 = vst [vmem:[#allocation174_spill] sm:$0xff] %v9591_v59  ;;  %3997 = vmatmul.bf16.gmra.mxu0 %v9569_v32  ;;  %v12026_v59 = vshll.u32 %v9511_v2, 16 }
 0x347   : > { %v2910_v20 = vpop.f32.mrf.mxu2 }
 0x348   : > { %v3173_v21 = vadd.f32 %v2910_v20, %v2517_v6  ;;  %v3432_v1 = vpop.f32.mrf.mxu3  ;;  %v1679_v6 = vrot.slane %v12026_v59, 1  ;;  %v12027_v20 = vld [vmem:[#allocation51_spill] sm:$0xff] }
 0x349   : > { %v2518_v25 = vpop.f32.mrf.mxu1 }
 0x34a   : > { %v3695_v63 = vadd.f32 %v3432_v1, %v3173_v21  ;;  %v2519_v37 = vadd.f32 %v2518_v25, %v12027_v20  ;;  %v1203_v21 = vor.u32 %v11592_v54, %v1200_v39  ;;  %v9615_v38 = vsel %vm1599_vm4, %v1678_v48, %v1679_v6  ;;  %v9629_v25 = vld [vmem:[%s8458_s16 + $0xe8] sm:$0xff] }
 0x34b   : > { %v3960_v56 = vpop.f32.mrf.mxu0  ;;  %12028 = vst [vmem:[#allocation51_spill] sm:$0xff] %v9615_v38 }
 0x34c   : > { %v9605_v36 = vadd.f32 %v3958_v19, %v3695_v63  ;;  %v9619_v34 = vsel %vm8744_vm3, 0, %v1203_v21 }
 0x34d   : > { %12029 = vst [vmem:[#allocation175_spill] sm:$0xff] %v9619_v34 }
 0x34e   : > { %12024 = vst [vmem:[#allocation48_spill] sm:$0xff] %v9605_v36 }
 0x34f   : > { %v2912_v1 = vpop.f32.mrf.mxu2 }
 0x350   : > { %v3174_v35 = vadd.f32 %v2912_v1, %v2519_v37  ;;  %v3434_v62 = vpop.f32.mrf.mxu3  ;;  %v12031_v37 = vld [vmem:[#allocation54_spill] sm:$0xff] }
 0x351   : > { %v2521_v24 = vpop.f32.mrf.mxu1 }
 0x352   : > { %v3696_v19 = vadd.f32 %v3434_v62, %v3174_v35  ;;  %v2522_v52 = vadd.f32 %v2521_v24, %v12031_v37  ;;  %v11596_v62 = vshrl.u32 %v9629_v25, 16  ;;  %v12034_v37 = vshll.u32 %v9540_v47, 16 }
 0x353   : > { %v3963_v63 = vpop.f32.mrf.mxu0 }
 0x354   : > { %2560 = vmatmul.bf16.gmra.mxu1 %v9501_v12  ;;  %2954 = vmatmul.bf16.gmra.mxu2 %v9615_v38  ;;  %v9623_v59 = vadd.f32 %v3960_v56, %v3696_v19  ;;  %v1207_v56 = vrot.slane %v11596_v62, 7  ;;  %v11598_v19 = vshll.u32 %v9629_v25, 16  ;;  %v1682_v36 = vrot.slane %v12034_v37, 1  ;;  %v12035_v38 = vld [vmem:[#allocation57_spill] sm:$0xff] }
 0x355   : > { %3476 = vmatmul.bf16.gmra.mxu3 %v9619_v34 }
 0x356   : > { %12030 = vst [vmem:[#allocation176_spill] sm:$0xff] %v9623_v59  ;;  %4002 = vmatmul.bf16.gmra.mxu0 %v9597_v16  ;;  %v12033_v59 = vshrl.u32 %v9511_v2, 16 }
 0x357   : > { %v2915_v40 = vpop.f32.mrf.mxu2 }
 0x358   : > { %v3175_v48 = vadd.f32 %v2915_v40, %v2522_v52  ;;  %v3437_v20 = vpop.f32.mrf.mxu3  ;;  %v1681_v24 = vor.u32 %v1679_v6, %v12033_v59  ;;  %v1210_v52 = vor.u32 %v11598_v19, %v1207_v56  ;;  %v9658_v59 = vld [vmem:[%s8458_s16 + $0xf0] sm:$0xff]  ;;  %v12041_v19 = vshrl.u32 %v9540_v47, 16 }
 0x359   : > { %v2523_v21 = vpop.f32.mrf.mxu1 }
 0x35a   : > { %v3697_v1 = vadd.f32 %v3437_v20, %v3175_v48  ;;  %v2524_v12 = vadd.f32 %v2523_v21, %v12035_v38  ;;  %v9645_v28 = vsel %vm1599_vm4, %v1681_v24, %v1682_v36  ;;  %v9648_v2 = vsel %vm948_vm1, %v1200_v39, %v1210_v52 }
 0x35b   : > { %v3965_v35 = vpop.f32.mrf.mxu0  ;;  %12036 = vst [vmem:[#allocation57_spill] sm:$0xff] %v9645_v28  ;;  %v11601_v21 = vshrl.u32 %v9658_v59, 16 }
 0x35c   : > { %v9635_v54 = vadd.f32 %v3963_v63, %v3697_v1  ;;  %12037 = vst [vmem:[#allocation177_spill] sm:$0xff] %v9648_v2 }
 0x35e   : > { %12032 = vst [vmem:[#allocation54_spill] sm:$0xff] %v9635_v54  ;;  %v12043_v54 = vld [vmem:[#allocation63_spill] sm:$0xff] }
 0x35f   : > { %v2917_v40 = vpop.f32.mrf.mxu2 }
 0x360   : > { %v3176_v48 = vadd.f32 %v2917_v40, %v2524_v12  ;;  %v3439_v20 = vpop.f32.mrf.mxu3  ;;  %v12039_v12 = vld [vmem:[#allocation60_spill] sm:$0xff] }
 0x361   : > { %v2526_v62 = vpop.f32.mrf.mxu1 }
 0x362   : > { %v3698_v63 = vadd.f32 %v3439_v20, %v3176_v48  ;;  %v2527_v6 = vadd.f32 %v2526_v62, %v12039_v12  ;;  %v11603_v20 = vshll.u32 %v9658_v59, 16  ;;  %v1684_v62 = vor.u32 %v1682_v36, %v12041_v19  ;;  %v12047_v19 = vld [vmem:[#allocation66_spill] sm:$0xff] }
 0x363   : > { %v3968_v1 = vpop.f32.mrf.mxu0  ;;  %v12042_v12 = vshll.u32 %v9569_v32, 16 }
 0x364   : > { %2565 = vmatmul.bf16.gmra.mxu1 %v9530_v26  ;;  %2959 = vmatmul.bf16.gmra.mxu2 %v9645_v28  ;;  %v9652_v38 = vadd.f32 %v3965_v35, %v3698_v63  ;;  %v1215_v35 = vrot.slane %v11601_v21, 7 }
 0x365   : > { %3481 = vmatmul.bf16.gmra.mxu3 %v9648_v2 }
 0x366   : > { %12038 = vst [vmem:[#allocation178_spill] sm:$0xff] %v9652_v38  ;;  %4007 = vmatmul.bf16.gmra.mxu0 %v9629_v25  ;;  %v1685_v38 = vrot.slane %v12042_v12, 1 }
 0x367   : > { %v2920_v24 = vpop.f32.mrf.mxu2 }
 0x368   : > { %v3177_v37 = vadd.f32 %v2920_v24, %v2527_v6  ;;  %v3442_v39 = vpop.f32.mrf.mxu3  ;;  %v1218_v6 = vor.u32 %v11603_v20, %v1215_v35  ;;  %v9674_v26 = vsel %vm1599_vm4, %v1684_v62, %v1685_v38  ;;  %v9687_v62 = vld [vmem:[%s8458_s16 + $0xf8] sm:$0xff] }
 0x369   : > { %v2528_v52 = vpop.f32.mrf.mxu1  ;;  %12044 = vst [vmem:[#allocation63_spill] sm:$0xff] %v9674_v26  ;;  %v11604_v12 = vshrl.u32 %v9687_v62, 16  ;;  %v11608_v20 = vshll.u32 %v9687_v62, 16 }
 0x36a   : > { %v3699_v40 = vadd.f32 %v3442_v39, %v3177_v37  ;;  %v2529_v28 = vadd.f32 %v2528_v52, %v12043_v54  ;;  %v9677_v47 = vsel %vm948_vm1, %v1207_v56, %v1218_v6  ;;  %v7549_v54 = vld [vmem:[#allocation8 + $0x1d8] sm:$0xff] }
 0x36b   : > { %v3970_v48 = vpop.f32.mrf.mxu0  ;;  %12045 = vst [vmem:[#allocation179_spill] sm:$0xff] %v9677_v47  ;;  %5428 = vmatpush.bf16.msra.mxu3 %v7549_v54  ;;  %v12050_v54 = vld [vmem:[#allocation69_spill] sm:$0xff] }
 0x36c   : > { %v9664_v63 = vadd.f32 %v3968_v1, %v3699_v40 }
 0x36e   : > { %12040 = vst [vmem:[#allocation60_spill] sm:$0xff] %v9664_v63  ;;  %v7557_v63 = vld [vmem:[#allocation8 + $0x218] sm:$0xff] }
 0x36f   : > { %v2922_v24 = vpop.f32.mrf.mxu2  ;;  %5950 = vmatpush.bf16.msra.mxu0 %v7557_v63 }
 0x370   : > { %v3178_v37 = vadd.f32 %v2922_v24, %v2529_v28  ;;  %v3444_v39 = vpop.f32.mrf.mxu3  ;;  %v7541_v28 = vld [vmem:[#allocation8 + $0x198] sm:$0xff] }
 0x371   : > { %v2531_v21 = vpop.f32.mrf.mxu1  ;;  %4902 = vmatpush.bf16.msra.mxu2 %v7541_v28 }
 0x372   : > { %v3700_v1 = vadd.f32 %v3444_v39, %v3178_v37  ;;  %v2532_v52 = vadd.f32 %v2531_v21, %v12047_v19  ;;  %v12049_v19 = vshrl.u32 %v9569_v32, 16 }
 0x373   : > { %v3973_v40 = vpop.f32.mrf.mxu0 }
 0x374   : > { %2570 = vmatmul.bf16.gmra.mxu1 %v9559_v8  ;;  %2964 = vmatmul.bf16.gmra.mxu2 %v9674_v26  ;;  %v9681_v36 = vadd.f32 %v3970_v48, %v3700_v1  ;;  %v1223_v1 = vrot.slane %v11604_v12, 7  ;;  %v1687_v28 = vor.u32 %v1685_v38, %v12049_v19  ;;  %v12054_v38 = vld [vmem:[#allocation72_spill] sm:$0xff] }
 0x375   : > { %3486 = vmatmul.bf16.gmra.mxu3 %v9677_v47 }
 0x376   : > { %12046 = vst [vmem:[#allocation180_spill] sm:$0xff] %v9681_v36  ;;  %4012 = vmatmul.bf16.gmra.mxu0 %v9658_v59  ;;  %v7533_v36 = vld [vmem:[#allocation8 + $0x158] sm:$0xff]  ;;  %v9702_v8 = vsel %vm8843_vm6, %v1687_v28, 0  ;;  %v12055_v28 = vshll.u32 %v9597_v16, 16 }
 0x377   : > { %v2925_v56 = vpop.f32.mrf.mxu2  ;;  %4380 = vmatpush.bf16.msra.mxu1 %v7533_v36  ;;  %12051 = vst [vmem:[#allocation69_spill] sm:$0xff] %v9702_v8 }
 0x378   : > { %v3179_v6 = vadd.f32 %v2925_v56, %v2532_v52  ;;  %v3447_v24 = vpop.f32.mrf.mxu3  ;;  %v1226_v56 = vor.u32 %v11608_v20, %v1223_v1  ;;  %v12058_v20 = vshll.u32 %v9629_v25, 16 }
 0x379   : > { %v2533_v37 = vpop.f32.mrf.mxu1 }
 0x37a   : > { %v3701_v48 = vadd.f32 %v3447_v24, %v3179_v6  ;;  %v2534_v52 = vadd.f32 %v2533_v37, %v12050_v54  ;;  %v9705_v36 = vsel %vm948_vm1, %v1215_v35, %v1226_v56  ;;  %v1688_v54 = vrot.slane %v12055_v28, 1 }
 0x37b   : > { %v3975_v39 = vpop.f32.mrf.mxu0  ;;  %12052 = vst [vmem:[#allocation181_spill] sm:$0xff] %v9705_v36 }
 0x37c   : > { %v9693_v21 = vadd.f32 %v3973_v40, %v3701_v48  ;;  %v9715_v48 = vld [vmem:[%s8458_s16 + $0x100] sm:$0xff] }
 0x37e   : > { %12048 = vst [vmem:[#allocation66_spill] sm:$0xff] %v9693_v21 }
 0x37f   : > { %v2927_v6 = vpop.f32.mrf.mxu2 }
 0x380   : > { %v3180_v24 = vadd.f32 %v2927_v6, %v2534_v52  ;;  %v3449_v12 = vpop.f32.mrf.mxu3 }
 0x381   : > { %v2536_v26 = vpop.f32.mrf.mxu1 }
 0x382   : > { %v3702_v63 = vadd.f32 %v3449_v12, %v3180_v24  ;;  %v2537_v37 = vadd.f32 %v2536_v26, %v12054_v38  ;;  %v11609_v12 = vshrl.u32 %v9715_v48, 16  ;;  %v11612_v24 = vshll.u32 %v9715_v48, 16 }
 0x383   : > { %v3978_v40 = vpop.f32.mrf.mxu0  ;;  %v12057_v26 = vshrl.u32 %v9597_v16, 16 }
 0x384   : > { %2575 = vmatmul.bf16.gmra.mxu1 %v9587_v17  ;;  %2969 = vmatmul.bf16.gmra.mxu2 %v9702_v8  ;;  %v9709_v32 = vadd.f32 %v3975_v39, %v3702_v63  ;;  %v1231_v6 = vrot.slane %v11609_v12, 7 }
 0x385   : > { %3491 = vmatmul.bf16.gmra.mxu3 %v9705_v36  ;;  %v1689_v38 = vor.u32 %v1688_v54, %v12057_v26 }
 0x386   : > { %12053 = vst [vmem:[#allocation182_spill] sm:$0xff] %v9709_v32  ;;  %4017 = vmatmul.bf16.gmra.mxu0 %v9687_v62 }
 0x387   : > { %v2930_v1 = vpop.f32.mrf.mxu2 }
 0x388   : > { %v3181_v19 = vadd.f32 %v2930_v1, %v2537_v37  ;;  %v3452_v35 = vpop.f32.mrf.mxu3  ;;  %v1690_v37 = vrot.slane %v12058_v20, 1  ;;  %v12059_v1 = vld [vmem:[#allocation75_spill] sm:$0xff] }
 0x389   : > { %v2538_v52 = vpop.f32.mrf.mxu1 }
 0x38a   : > { %v3703_v56 = vadd.f32 %v3452_v35, %v3181_v19  ;;  %v2539_v32 = vadd.f32 %v2538_v52, %v12059_v1  ;;  %v1234_v19 = vor.u32 %v11612_v24, %v1231_v6  ;;  %v9733_v8 = vsel %vm1599_vm4, %v1689_v38, %v1690_v37  ;;  %v9747_v52 = vld [vmem:[%s8458_s16 + $0x108] sm:$0xff] }
 0x38b   : > { %v3980_v39 = vpop.f32.mrf.mxu0  ;;  %12060 = vst [vmem:[#allocation75_spill] sm:$0xff] %v9733_v8 }
 0x38c   : > { %v9723_v63 = vadd.f32 %v3978_v40, %v3703_v56  ;;  %v9737_v16 = vsel %vm8744_vm3, 0, %v1234_v19 }
 0x38d   : > { %12061 = vst [vmem:[#allocation183_spill] sm:$0xff] %v9737_v16 }
 0x38e   : > { %12056 = vst [vmem:[#allocation72_spill] sm:$0xff] %v9723_v63 }
 0x38f   : > { %v2932_v35 = vpop.f32.mrf.mxu2 }
 0x390   : > { %v3182_v28 = vadd.f32 %v2932_v35, %v2539_v32  ;;  %v3454_v21 = vpop.f32.mrf.mxu3  ;;  %v12063_v32 = vld [vmem:[#allocation79_spill] sm:$0xff] }
 0x391   : > { %v2541_v12 = vpop.f32.mrf.mxu1 }
 0x392   : > { %v3704_v40 = vadd.f32 %v3454_v21, %v3182_v28  ;;  %v2542_v54 = vadd.f32 %v2541_v12, %v12063_v32  ;;  %v11616_v21 = vshrl.u32 %v9747_v52, 16  ;;  %v12066_v32 = vshll.u32 %v9658_v59, 16 }
 0x393   : > { %v3983_v56 = vpop.f32.mrf.mxu0 }
 0x394   : > { %2580 = vmatmul.bf16.gmra.mxu1 %v9619_v34  ;;  %2974 = vmatmul.bf16.gmra.mxu2 %v9733_v8  ;;  %v9741_v20 = vadd.f32 %v3980_v39, %v3704_v40  ;;  %v1238_v39 = vrot.slane %v11616_v21, 7  ;;  %v11618_v40 = vshll.u32 %v9747_v52, 16  ;;  %v1693_v63 = vrot.slane %v12066_v32, 1  ;;  %v12067_v8 = vld [vmem:[#allocation82_spill] sm:$0xff] }
 0x395   : > { %3496 = vmatmul.bf16.gmra.mxu3 %v9737_v16 }
 0x396   : > { %12062 = vst [vmem:[#allocation184_spill] sm:$0xff] %v9741_v20  ;;  %4022 = vmatmul.bf16.gmra.mxu0 %v9715_v48  ;;  %v12065_v20 = vshrl.u32 %v9629_v25, 16 }
 0x397   : > { %v2935_v26 = vpop.f32.mrf.mxu2 }
 0x398   : > { %v3183_v38 = vadd.f32 %v2935_v26, %v2542_v54  ;;  %v3457_v1 = vpop.f32.mrf.mxu3  ;;  %v1692_v12 = vor.u32 %v1690_v37, %v12065_v20  ;;  %v1241_v54 = vor.u32 %v11618_v40, %v1238_v39  ;;  %v9776_v20 = vld [vmem:[%s8458_s16 + $0x110] sm:$0xff]  ;;  %v12073_v40 = vshrl.u32 %v9658_v59, 16 }
 0x399   : > { %v2543_v19 = vpop.f32.mrf.mxu1 }
 0x39a   : > { %v3705_v35 = vadd.f32 %v3457_v1, %v3183_v38  ;;  %v2544_v34 = vadd.f32 %v2543_v19, %v12067_v8  ;;  %v9763_v17 = vsel %vm1599_vm4, %v1692_v12, %v1693_v63  ;;  %v9766_v25 = vsel %vm948_vm1, %v1231_v6, %v1241_v54 }
 0x39b   : > { %v3985_v28 = vpop.f32.mrf.mxu0  ;;  %12068 = vst [vmem:[#allocation82_spill] sm:$0xff] %v9763_v17  ;;  %v11621_v19 = vshrl.u32 %v9776_v20, 16 }
 0x39c   : > { %v9753_v24 = vadd.f32 %v3983_v56, %v3705_v35  ;;  %12069 = vst [vmem:[#allocation185_spill] sm:$0xff] %v9766_v25 }
 0x39e   : > { %12064 = vst [vmem:[#allocation79_spill] sm:$0xff] %v9753_v24  ;;  %v12075_v24 = vld [vmem:[#allocation88_spill] sm:$0xff] }
 0x39f   : > { %v2937_v26 = vpop.f32.mrf.mxu2 }
 0x3a0   : > { %v3184_v38 = vadd.f32 %v2937_v26, %v2544_v34  ;;  %v3459_v1 = vpop.f32.mrf.mxu3  ;;  %v12071_v34 = vld [vmem:[#allocation85_spill] sm:$0xff] }
 0x3a1   : > { %v2546_v21 = vpop.f32.mrf.mxu1 }
 0x3a2   : > { %v3706_v56 = vadd.f32 %v3459_v1, %v3184_v38  ;;  %v2547_v37 = vadd.f32 %v2546_v21, %v12071_v34  ;;  %v11623_v1 = vshll.u32 %v9776_v20, 16  ;;  %v1695_v21 = vor.u32 %v1693_v63, %v12073_v40  ;;  %v9805_v40 = vld [vmem:[%s8458_s16 + $0x118] sm:$0xff] }
 0x3a3   : > { %v3988_v35 = vpop.f32.mrf.mxu0  ;;  %v12074_v34 = vshll.u32 %v9687_v62, 16 }
 0x3a4   : > { %2585 = vmatmul.bf16.gmra.mxu1 %v9648_v2  ;;  %2979 = vmatmul.bf16.gmra.mxu2 %v9763_v17  ;;  %v9770_v8 = vadd.f32 %v3985_v28, %v3706_v56  ;;  %v1246_v28 = vrot.slane %v11621_v19, 7 }
 0x3a5   : > { %3501 = vmatmul.bf16.gmra.mxu3 %v9766_v25 }
 0x3a6   : > { %12070 = vst [vmem:[#allocation186_spill] sm:$0xff] %v9770_v8  ;;  %4027 = vmatmul.bf16.gmra.mxu0 %v9747_v52  ;;  %v1696_v8 = vrot.slane %v12074_v34, 1 }
 0x3a7   : > { %v2940_v12 = vpop.f32.mrf.mxu2 }
 0x3a8   : > { %v3185_v32 = vadd.f32 %v2940_v12, %v2547_v37  ;;  %v3462_v6 = vpop.f32.mrf.mxu3  ;;  %v1249_v37 = vor.u32 %v11623_v1, %v1246_v28  ;;  %v9792_v2 = vsel %vm1599_vm4, %v1695_v21, %v1696_v8  ;;  %v12081_v1 = vshrl.u32 %v9687_v62, 16 }
 0x3a9   : > { %v2548_v54 = vpop.f32.mrf.mxu1  ;;  %12076 = vst [vmem:[#allocation88_spill] sm:$0xff] %v9792_v2 }
 0x3aa   : > { %v3707_v26 = vadd.f32 %v3462_v6, %v3185_v32  ;;  %v2549_v17 = vadd.f32 %v2548_v54, %v12075_v24  ;;  %v9795_v59 = vsel %vm948_vm1, %v1238_v39, %v1249_v37  ;;  %v11624_v54 = vshrl.u32 %v9805_v40, 16 }
 0x3ab   : > { %v3990_v38 = vpop.f32.mrf.mxu0  ;;  %12077 = vst [vmem:[#allocation187_spill] sm:$0xff] %v9795_v59 }
 0x3ac   : > { %v9782_v56 = vadd.f32 %v3988_v35, %v3707_v26 }
 0x3ae   : > { %12072 = vst [vmem:[#allocation85_spill] sm:$0xff] %v9782_v56 }
 0x3af   : > { %v2942_v12 = vpop.f32.mrf.mxu2 }
 0x3b0   : > { %v3186_v32 = vadd.f32 %v2942_v12, %v2549_v17  ;;  %v3464_v6 = vpop.f32.mrf.mxu3  ;;  %v12079_v17 = vld [vmem:[#allocation91_spill] sm:$0xff] }
 0x3b1   : > { %v2551_v19 = vpop.f32.mrf.mxu1 }
 0x3b2   : > { %v3708_v35 = vadd.f32 %v3464_v6, %v3186_v32  ;;  %v2552_v63 = vadd.f32 %v2551_v19, %v12079_v17  ;;  %v11627_v6 = vshll.u32 %v9805_v40, 16  ;;  %v1698_v19 = vor.u32 %v1696_v8, %v12081_v1  ;;  %v12082_v17 = vld [vmem:[#allocation94_spill] sm:$0xff]  ;;  %v12086_v8 = vld [vmem:[#allocation97_spill] sm:$0xff] }
 0x3b3   : > { %v3993_v26 = vpop.f32.mrf.mxu0 }
 0x3b4   : > { %2590 = vmatmul.bf16.gmra.mxu1 %v9677_v47  ;;  %2984 = vmatmul.bf16.gmra.mxu2 %v9792_v2  ;;  %v9799_v24 = vadd.f32 %v3990_v38, %v3708_v35  ;;  %v1254_v38 = vrot.slane %v11624_v54, 7  ;;  %v9820_v54 = vsel %vm8843_vm6, %v1698_v19, 0  ;;  %v12087_v19 = vshll.u32 %v9715_v48, 16 }
 0x3b5   : > { %3506 = vmatmul.bf16.gmra.mxu3 %v9795_v59  ;;  %12083 = vst [vmem:[#allocation94_spill] sm:$0xff] %v9820_v54 }
 0x3b6   : > { %12078 = vst [vmem:[#allocation188_spill] sm:$0xff] %v9799_v24  ;;  %4032 = vmatmul.bf16.gmra.mxu0 %v9776_v20 }
 0x3b7   : > { %v2945_v21 = vpop.f32.mrf.mxu2 }
 0x3b8   : > { %v3187_v34 = vadd.f32 %v2945_v21, %v2552_v63  ;;  %v3467_v39 = vpop.f32.mrf.mxu3  ;;  %v1257_v63 = vor.u32 %v11627_v6, %v1254_v38 }
 0x3b9   : > { %v2553_v37 = vpop.f32.mrf.mxu1 }
 0x3ba   : > { %v3709_v12 = vadd.f32 %v3467_v39, %v3187_v34  ;;  %v2554_v24 = vadd.f32 %v2553_v37, %v12082_v17  ;;  %v1699_v17 = vrot.slane %v12087_v19, 1 }
 0x3bb   : > { %v3995_v32 = vpop.f32.mrf.mxu0 }
 0x3bc   : > { %v9811_v35 = vadd.f32 %v3993_v26, %v3709_v12  ;;  %v9823_v12 = vsel %vm948_vm1, %v1246_v28, %v1257_v63 }
 0x3bd   : > { %12084 = vst [vmem:[#allocation189_spill] sm:$0xff] %v9823_v12 }
 0x3be   : > { %12080 = vst [vmem:[#allocation91_spill] sm:$0xff] %v9811_v35 }
 0x3bf   : > { %v2947_v21 = vpop.f32.mrf.mxu2 }
 0x3c0   : > { %v3188_v56 = vadd.f32 %v2947_v21, %v2554_v24  ;;  %v3469_v34 = vpop.f32.mrf.mxu3  ;;  %v9833_v24 = vld [vmem:[%s8458_s16 + $0x120] sm:$0xff] }
 0x3c1   : > { %v2556_v39 = vpop.f32.mrf.mxu1 }
 0x3c2   : > { %v3710_v2 = vadd.f32 %v3469_v34, %v3188_v56  ;;  %v2557_v1 = vadd.f32 %v2556_v39, %v12086_v8  ;;  %v11630_v56 = vshrl.u32 %v9833_v24, 16  ;;  %v11632_v34 = vshll.u32 %v9833_v24, 16 }
 0x3c3   : > { %v3998_v26 = vpop.f32.mrf.mxu0  ;;  %v12089_v39 = vshrl.u32 %v9715_v48, 16 }
 0x3c4   : > { %2595 = vmatmul.bf16.gmra.mxu1 %v9705_v36  ;;  %2989 = vmatmul.bf16.gmra.mxu2 %v9820_v54  ;;  %v9827_v62 = vadd.f32 %v3995_v32, %v3710_v2  ;;  %v1262_v32 = vrot.slane %v11630_v56, 7 }
 0x3c5   : > { %3511 = vmatmul.bf16.gmra.mxu3 %v9823_v12  ;;  %v1700_v8 = vor.u32 %v1699_v17, %v12089_v39 }
 0x3c6   : > { %12085 = vst [vmem:[#allocation190_spill] sm:$0xff] %v9827_v62  ;;  %4037 = vmatmul.bf16.gmra.mxu0 %v9805_v40  ;;  %v12090_v62 = vshll.u32 %v9747_v52, 16 }
 0x3c7   : > { %v2950_v37 = vpop.f32.mrf.mxu2 }
 0x3c8   : > { %v3189_v38 = vadd.f32 %v2950_v37, %v2557_v1  ;;  %v3472_v28 = vpop.f32.mrf.mxu3  ;;  %v1701_v1 = vrot.slane %v12090_v62, 1  ;;  %v12091_v37 = vld [vmem:[#allocation100_spill] sm:$0xff] }
 0x3c9   : > { %v2558_v63 = vpop.f32.mrf.mxu1 }
 0x3ca   : > { %v3711_v21 = vadd.f32 %v3472_v28, %v3189_v38  ;;  %v2559_v35 = vadd.f32 %v2558_v63, %v12091_v37  ;;  %v1265_v38 = vor.u32 %v11632_v34, %v1262_v32  ;;  %v9851_v36 = vsel %vm1599_vm4, %v1700_v8, %v1701_v1  ;;  %v9865_v63 = vld [vmem:[%s8458_s16 + $0x128] sm:$0xff] }
 0x3cb   : > { %v4000_v2 = vpop.f32.mrf.mxu0  ;;  %12092 = vst [vmem:[#allocation100_spill] sm:$0xff] %v9851_v36 }
 0x3cc   : > { %v9841_v6 = vadd.f32 %v3998_v26, %v3711_v21  ;;  %v9855_v48 = vsel %vm8744_vm3, 0, %v1265_v38 }
 0x3cd   : > { %12093 = vst [vmem:[#allocation191_spill] sm:$0xff] %v9855_v48 }
 0x3ce   : > { %12088 = vst [vmem:[#allocation97_spill] sm:$0xff] %v9841_v6 }
 0x3cf   : > { %v2952_v28 = vpop.f32.mrf.mxu2 }
 0x3d0   : > { %v3190_v19 = vadd.f32 %v2952_v28, %v2559_v35  ;;  %v3474_v54 = vpop.f32.mrf.mxu3  ;;  %v12095_v35 = vld [vmem:[#allocation103_spill] sm:$0xff] }
 0x3d1   : > { %v2561_v56 = vpop.f32.mrf.mxu1 }
 0x3d2   : > { %v3712_v26 = vadd.f32 %v3474_v54, %v3190_v19  ;;  %v2562_v17 = vadd.f32 %v2561_v56, %v12095_v35  ;;  %v11636_v54 = vshrl.u32 %v9865_v63, 16  ;;  %v12098_v35 = vshll.u32 %v9776_v20, 16 }
 0x3d3   : > { %v4003_v21 = vpop.f32.mrf.mxu0 }
 0x3d4   : > { %2600 = vmatmul.bf16.gmra.mxu1 %v9737_v16  ;;  %2994 = vmatmul.bf16.gmra.mxu2 %v9851_v36  ;;  %v9859_v62 = vadd.f32 %v4000_v2, %v3712_v26  ;;  %v1269_v2 = vrot.slane %v11636_v54, 7  ;;  %v11638_v26 = vshll.u32 %v9865_v63, 16  ;;  %v1704_v6 = vrot.slane %v12098_v35, 1  ;;  %v12099_v36 = vld [vmem:[#allocation108_spill] sm:$0xff] }
 0x3d5   : > { %3516 = vmatmul.bf16.gmra.mxu3 %v9855_v48 }
 0x3d6   : > { %12094 = vst [vmem:[#allocation192_spill] sm:$0xff] %v9859_v62  ;;  %4042 = vmatmul.bf16.gmra.mxu0 %v9833_v24  ;;  %v12097_v62 = vshrl.u32 %v9747_v52, 16 }
 0x3d7   : > { %v2955_v39 = vpop.f32.mrf.mxu2 }
 0x3d8   : > { %v3191_v8 = vadd.f32 %v2955_v39, %v2562_v17  ;;  %v3477_v37 = vpop.f32.mrf.mxu3  ;;  %v1703_v56 = vor.u32 %v1701_v1, %v12097_v62  ;;  %v1272_v17 = vor.u32 %v11638_v26, %v1269_v2  ;;  %v9894_v62 = vld [vmem:[%s8458_s16 + $0x130] sm:$0xff]  ;;  %v12105_v26 = vshrl.u32 %v9776_v20, 16 }
 0x3d9   : > { %v2563_v38 = vpop.f32.mrf.mxu1 }
 0x3da   : > { %v3713_v28 = vadd.f32 %v3477_v37, %v3191_v8  ;;  %v2564_v16 = vadd.f32 %v2563_v38, %v12099_v36  ;;  %v9881_v47 = vsel %vm1599_vm4, %v1703_v56, %v1704_v6  ;;  %v9884_v52 = vsel %vm948_vm1, %v1262_v32, %v1272_v17 }
 0x3db   : > { %v4005_v19 = vpop.f32.mrf.mxu0  ;;  %12100 = vst [vmem:[#allocation108_spill] sm:$0xff] %v9881_v47  ;;  %v11641_v38 = vshrl.u32 %v9894_v62, 16 }
 0x3dc   : > { %v9871_v34 = vadd.f32 %v4003_v21, %v3713_v28  ;;  %12101 = vst [vmem:[#allocation193_spill] sm:$0xff] %v9884_v52 }
 0x3de   : > { %12096 = vst [vmem:[#allocation103_spill] sm:$0xff] %v9871_v34  ;;  %v12107_v34 = vld [vmem:[#allocation115_spill] sm:$0xff] }
 0x3df   : > { %v2957_v39 = vpop.f32.mrf.mxu2 }
 0x3e0   : > { %v3192_v8 = vadd.f32 %v2957_v39, %v2564_v16  ;;  %v3479_v37 = vpop.f32.mrf.mxu3  ;;  %v12103_v16 = vld [vmem:[#allocation111_spill] sm:$0xff] }
 0x3e1   : > { %v2566_v54 = vpop.f32.mrf.mxu1 }
 0x3e2   : > { %v3714_v21 = vadd.f32 %v3479_v37, %v3192_v8  ;;  %v2567_v1 = vadd.f32 %v2566_v54, %v12103_v16  ;;  %v11643_v37 = vshll.u32 %v9894_v62, 16  ;;  %v1706_v54 = vor.u32 %v1704_v6, %v12105_v26  ;;  %v12111_v26 = vld [vmem:[#allocation118_spill] sm:$0xff] }
 0x3e3   : > { %v4008_v28 = vpop.f32.mrf.mxu0  ;;  %v12106_v16 = vshll.u32 %v9805_v40, 16 }
 0x3e4   : > { %2605 = vmatmul.bf16.gmra.mxu1 %v9766_v25  ;;  %2999 = vmatmul.bf16.gmra.mxu2 %v9881_v47  ;;  %v9888_v36 = vadd.f32 %v4005_v19, %v3714_v21  ;;  %v1277_v19 = vrot.slane %v11641_v38, 7 }
 0x3e5   : > { %3521 = vmatmul.bf16.gmra.mxu3 %v9884_v52 }
 0x3e6   : > { %12102 = vst [vmem:[#allocation194_spill] sm:$0xff] %v9888_v36  ;;  %4047 = vmatmul.bf16.gmra.mxu0 %v9865_v63  ;;  %v1707_v36 = vrot.slane %v12106_v16, 1 }
 0x3e7   : > { %v2960_v56 = vpop.f32.mrf.mxu2 }
 0x3e8   : > { %v3193_v35 = vadd.f32 %v2960_v56, %v2567_v1  ;;  %v3482_v32 = vpop.f32.mrf.mxu3  ;;  %v1280_v1 = vor.u32 %v11643_v37, %v1277_v19  ;;  %v9910_v25 = vsel %vm1599_vm4, %v1706_v54, %v1707_v36  ;;  %v9923_v54 = vld [vmem:[%s8458_s16 + $0x138] sm:$0xff] }
 0x3e9   : > { %v2568_v17 = vpop.f32.mrf.mxu1  ;;  %12108 = vst [vmem:[#allocation115_spill] sm:$0xff] %v9910_v25  ;;  %v11644_v16 = vshrl.u32 %v9923_v54, 16  ;;  %v11648_v37 = vshll.u32 %v9923_v54, 16 }
 0x3ea   : > { %v3715_v39 = vadd.f32 %v3482_v32, %v3193_v35  ;;  %v2569_v47 = vadd.f32 %v2568_v17, %v12107_v34  ;;  %v9913_v20 = vsel %vm948_vm1, %v1269_v2, %v1280_v1  ;;  %v7548_v34 = vld [vmem:[#allocation8 + $0x1d0] sm:$0xff] }
 0x3eb   : > { %v4010_v8 = vpop.f32.mrf.mxu0  ;;  %12109 = vst [vmem:[#allocation195_spill] sm:$0xff] %v9913_v20  ;;  %5429 = vmatpush.bf16.msra.mxu3 %v7548_v34  ;;  %v12114_v34 = vld [vmem:[#allocation122_spill] sm:$0xff] }
 0x3ec   : > { %v9900_v21 = vadd.f32 %v4008_v28, %v3715_v39 }
 0x3ee   : > { %12104 = vst [vmem:[#allocation111_spill] sm:$0xff] %v9900_v21  ;;  %v7556_v21 = vld [vmem:[#allocation8 + $0x210] sm:$0xff] }
 0x3ef   : > { %v2962_v56 = vpop.f32.mrf.mxu2  ;;  %5951 = vmatpush.bf16.msra.mxu0 %v7556_v21 }
 0x3f0   : > { %v3194_v35 = vadd.f32 %v2962_v56, %v2569_v47  ;;  %v3484_v32 = vpop.f32.mrf.mxu3  ;;  %v7540_v47 = vld [vmem:[#allocation8 + $0x190] sm:$0xff] }
 0x3f1   : > { %v2571_v38 = vpop.f32.mrf.mxu1  ;;  %4903 = vmatpush.bf16.msra.mxu2 %v7540_v47 }
 0x3f2   : > { %v3716_v28 = vadd.f32 %v3484_v32, %v3194_v35  ;;  %v2572_v17 = vadd.f32 %v2571_v38, %v12111_v26  ;;  %v12113_v26 = vshrl.u32 %v9805_v40, 16 }
 0x3f3   : > { %v4013_v39 = vpop.f32.mrf.mxu0 }
 0x3f4   : > { %2610 = vmatmul.bf16.gmra.mxu1 %v9795_v59  ;;  %3004 = vmatmul.bf16.gmra.mxu2 %v9910_v25  ;;  %v9917_v6 = vadd.f32 %v4010_v8, %v3716_v28  ;;  %v1285_v28 = vrot.slane %v11644_v16, 7  ;;  %v1709_v47 = vor.u32 %v1707_v36, %v12113_v26  ;;  %v12118_v36 = vld [vmem:[#allocation125_spill] sm:$0xff] }
 0x3f5   : > { %3526 = vmatmul.bf16.gmra.mxu3 %v9913_v20 }
 0x3f6   : > { %12110 = vst [vmem:[#allocation196_spill] sm:$0xff] %v9917_v6  ;;  %4052 = vmatmul.bf16.gmra.mxu0 %v9894_v62  ;;  %v7532_v6 = vld [vmem:[#allocation8 + $0x150] sm:$0xff]  ;;  %v9938_v59 = vsel %vm8843_vm6, %v1709_v47, 0  ;;  %v12119_v47 = vshll.u32 %v9833_v24, 16 }
 0x3f7   : > { %v2965_v2 = vpop.f32.mrf.mxu2  ;;  %4381 = vmatpush.bf16.msra.mxu1 %v7532_v6  ;;  %12115 = vst [vmem:[#allocation122_spill] sm:$0xff] %v9938_v59 }
 0x3f8   : > { %v3195_v1 = vadd.f32 %v2965_v2, %v2572_v17  ;;  %v3487_v56 = vpop.f32.mrf.mxu3  ;;  %v1288_v2 = vor.u32 %v11648_v37, %v1285_v28  ;;  %v12122_v37 = vshll.u32 %v9865_v63, 16 }
 0x3f9   : > { %v2573_v35 = vpop.f32.mrf.mxu1 }
 0x3fa   : > { %v3717_v8 = vadd.f32 %v3487_v56, %v3195_v1  ;;  %v2574_v17 = vadd.f32 %v2573_v35, %v12114_v34  ;;  %v9941_v6 = vsel %vm948_vm1, %v1277_v19, %v1288_v2  ;;  %v1710_v34 = vrot.slane %v12119_v47, 1 }
 0x3fb   : > { %v4015_v32 = vpop.f32.mrf.mxu0  ;;  %12116 = vst [vmem:[#allocation197_spill] sm:$0xff] %v9941_v6 }
 0x3fc   : > { %v9929_v38 = vadd.f32 %v4013_v39, %v3717_v8  ;;  %v9951_v8 = vld [vmem:[%s8458_s16 + $0x140] sm:$0xff] }
 0x3fe   : > { %12112 = vst [vmem:[#allocation118_spill] sm:$0xff] %v9929_v38 }
 0x3ff   : > { %v2967_v1 = vpop.f32.mrf.mxu2 }
 0x400   : > { %v3196_v56 = vadd.f32 %v2967_v1, %v2574_v17  ;;  %v3489_v16 = vpop.f32.mrf.mxu3 }
 0x401   : > { %v2576_v25 = vpop.f32.mrf.mxu1 }
 0x402   : > { %v3718_v21 = vadd.f32 %v3489_v16, %v3196_v56  ;;  %v2577_v35 = vadd.f32 %v2576_v25, %v12118_v36  ;;  %v11649_v16 = vshrl.u32 %v9951_v8, 16  ;;  %v11652_v56 = vshll.u32 %v9951_v8, 16 }
 0x403   : > { %v4018_v39 = vpop.f32.mrf.mxu0  ;;  %v12121_v25 = vshrl.u32 %v9833_v24, 16 }
 0x404   : > { %2615 = vmatmul.bf16.gmra.mxu1 %v9823_v12  ;;  %3009 = vmatmul.bf16.gmra.mxu2 %v9938_v59  ;;  %v9945_v40 = vadd.f32 %v4015_v32, %v3718_v21  ;;  %v1293_v1 = vrot.slane %v11649_v16, 7 }
 0x405   : > { %3531 = vmatmul.bf16.gmra.mxu3 %v9941_v6  ;;  %v1711_v36 = vor.u32 %v1710_v34, %v12121_v25 }
 0x406   : > { %12117 = vst [vmem:[#allocation198_spill] sm:$0xff] %v9945_v40  ;;  %4057 = vmatmul.bf16.gmra.mxu0 %v9923_v54 }
 0x407   : > { %v2970_v28 = vpop.f32.mrf.mxu2 }
 0x408   : > { %v3197_v26 = vadd.f32 %v2970_v28, %v2577_v35  ;;  %v3492_v19 = vpop.f32.mrf.mxu3  ;;  %v1712_v35 = vrot.slane %v12122_v37, 1  ;;  %v12123_v28 = vld [vmem:[#allocation129_spill] sm:$0xff] }
 0x409   : > { %v2578_v17 = vpop.f32.mrf.mxu1 }
 0x40a   : > { %v3719_v2 = vadd.f32 %v3492_v19, %v3197_v26  ;;  %v2579_v40 = vadd.f32 %v2578_v17, %v12123_v28  ;;  %v1296_v26 = vor.u32 %v11652_v56, %v1293_v1  ;;  %v9969_v59 = vsel %vm1599_vm4, %v1711_v36, %v1712_v35  ;;  %v9983_v17 = vld [vmem:[%s8458_s16 + $0x148] sm:$0xff] }
 0x40b   : > { %v4020_v32 = vpop.f32.mrf.mxu0  ;;  %12124 = vst [vmem:[#allocation129_spill] sm:$0xff] %v9969_v59 }
 0x40c   : > { %v9959_v21 = vadd.f32 %v4018_v39, %v3719_v2  ;;  %v9973_v24 = vsel %vm8744_vm3, 0, %v1296_v26 }
 0x40d   : > { %12125 = vst [vmem:[#allocation199_spill] sm:$0xff] %v9973_v24 }
 0x40e   : > { %12120 = vst [vmem:[#allocation125_spill] sm:$0xff] %v9959_v21 }
 0x40f   : > { %v2972_v19 = vpop.f32.mrf.mxu2 }
 0x410   : > { %v3198_v47 = vadd.f32 %v2972_v19, %v2579_v40  ;;  %v3494_v38 = vpop.f32.mrf.mxu3  ;;  %v12127_v40 = vld [vmem:[#allocation31_spill] sm:$0xff] }
 0x411   : > { %v2581_v16 = vpop.f32.mrf.mxu1 }
 0x412   : > { %v3720_v39 = vadd.f32 %v3494_v38, %v3198_v47  ;;  %v2582_v34 = vadd.f32 %v2581_v16, %v12127_v40  ;;  %v11656_v38 = vshrl.u32 %v9983_v17, 16  ;;  %v12130_v40 = vshll.u32 %v9894_v62, 16 }
 0x413   : > { %v4023_v2 = vpop.f32.mrf.mxu0 }
 0x414   : > { %2620 = vmatmul.bf16.gmra.mxu1 %v9855_v48  ;;  %3014 = vmatmul.bf16.gmra.mxu2 %v9969_v59  ;;  %v9977_v37 = vadd.f32 %v4020_v32, %v3720_v39  ;;  %v1300_v32 = vrot.slane %v11656_v38, 7  ;;  %v11658_v39 = vshll.u32 %v9983_v17, 16  ;;  %v1715_v21 = vrot.slane %v12130_v40, 1  ;;  %v12131_v59 = vld [vmem:[#allocation34_spill] sm:$0xff] }
 0x415   : > { %3536 = vmatmul.bf16.gmra.mxu3 %v9973_v24 }
 0x416   : > { %12126 = vst [vmem:[#allocation200_spill] sm:$0xff] %v9977_v37  ;;  %4062 = vmatmul.bf16.gmra.mxu0 %v9951_v8  ;;  %v12129_v37 = vshrl.u32 %v9865_v63, 16 }
 0x417   : > { %v2975_v25 = vpop.f32.mrf.mxu2 }
 0x418   : > { %v3199_v36 = vadd.f32 %v2975_v25, %v2582_v34  ;;  %v3497_v28 = vpop.f32.mrf.mxu3  ;;  %v1714_v16 = vor.u32 %v1712_v35, %v12129_v37  ;;  %v1303_v34 = vor.u32 %v11658_v39, %v1300_v32  ;;  %v10012_v37 = vld [vmem:[%s8458_s16 + $0x150] sm:$0xff]  ;;  %v12137_v39 = vshrl.u32 %v9894_v62, 16 }
 0x419   : > { %v2583_v26 = vpop.f32.mrf.mxu1 }
 0x41a   : > { %v3721_v19 = vadd.f32 %v3497_v28, %v3199_v36  ;;  %v2584_v48 = vadd.f32 %v2583_v26, %v12131_v59  ;;  %v9999_v12 = vsel %vm1599_vm4, %v1714_v16, %v1715_v21  ;;  %v10002_v63 = vsel %vm948_vm1, %v1293_v1, %v1303_v34 }
 0x41b   : > { %v4025_v47 = vpop.f32.mrf.mxu0  ;;  %12132 = vst [vmem:[#allocation34_spill] sm:$0xff] %v9999_v12  ;;  %v11661_v26 = vshrl.u32 %v10012_v37, 16 }
 0x41c   : > { %v9989_v56 = vadd.f32 %v4023_v2, %v3721_v19  ;;  %12133 = vst [vmem:[#allocation201_spill] sm:$0xff] %v10002_v63 }
 0x41e   : > { %12128 = vst [vmem:[#allocation31_spill] sm:$0xff] %v9989_v56  ;;  %v12139_v56 = vld [vmem:[#allocation40_spill] sm:$0xff] }
 0x41f   : > { %v2977_v25 = vpop.f32.mrf.mxu2 }
 0x420   : > { %v3200_v36 = vadd.f32 %v2977_v25, %v2584_v48  ;;  %v3499_v28 = vpop.f32.mrf.mxu3  ;;  %v12135_v48 = vld [vmem:[#allocation37_spill] sm:$0xff] }
 0x421   : > { %v2586_v38 = vpop.f32.mrf.mxu1 }
 0x422   : > { %v3722_v2 = vadd.f32 %v3499_v28, %v3200_v36  ;;  %v2587_v35 = vadd.f32 %v2586_v38, %v12135_v48  ;;  %v11663_v28 = vshll.u32 %v10012_v37, 16  ;;  %v1717_v38 = vor.u32 %v1715_v21, %v12137_v39  ;;  %v10041_v39 = vld [vmem:[%s8458_s16 + $0x158] sm:$0xff] }
 0x423   : > { %v4028_v19 = vpop.f32.mrf.mxu0  ;;  %v12138_v48 = vshll.u32 %v9923_v54, 16 }
 0x424   : > { %2625 = vmatmul.bf16.gmra.mxu1 %v9884_v52  ;;  %3019 = vmatmul.bf16.gmra.mxu2 %v9999_v12  ;;  %v10006_v59 = vadd.f32 %v4025_v47, %v3722_v2  ;;  %v1308_v47 = vrot.slane %v11661_v26, 7 }
 0x425   : > { %3541 = vmatmul.bf16.gmra.mxu3 %v10002_v63 }
 0x426   : > { %12134 = vst [vmem:[#allocation202_spill] sm:$0xff] %v10006_v59  ;;  %4067 = vmatmul.bf16.gmra.mxu0 %v9983_v17  ;;  %v1718_v59 = vrot.slane %v12138_v48, 1 }
 0x427   : > { %v2980_v16 = vpop.f32.mrf.mxu2 }
 0x428   : > { %v3201_v40 = vadd.f32 %v2980_v16, %v2587_v35  ;;  %v3502_v1 = vpop.f32.mrf.mxu3  ;;  %v1311_v35 = vor.u32 %v11663_v28, %v1308_v47  ;;  %v10028_v52 = vsel %vm1599_vm4, %v1717_v38, %v1718_v59  ;;  %v12145_v28 = vshrl.u32 %v9923_v54, 16 }
 0x429   : > { %v2588_v34 = vpop.f32.mrf.mxu1  ;;  %12140 = vst [vmem:[#allocation40_spill] sm:$0xff] %v10028_v52 }
 0x42a   : > { %v3723_v25 = vadd.f32 %v3502_v1, %v3201_v40  ;;  %v2589_v12 = vadd.f32 %v2588_v34, %v12139_v56  ;;  %v10031_v62 = vsel %vm948_vm1, %v1300_v32, %v1311_v35  ;;  %v11664_v34 = vshrl.u32 %v10041_v39, 16 }
 0x42b   : > { %v4030_v36 = vpop.f32.mrf.mxu0  ;;  %12141 = vst [vmem:[#allocation203_spill] sm:$0xff] %v10031_v62 }
 0x42c   : > { %v10018_v2 = vadd.f32 %v4028_v19, %v3723_v25 }
 0x42e   : > { %12136 = vst [vmem:[#allocation37_spill] sm:$0xff] %v10018_v2 }
 0x42f   : > { %v2982_v16 = vpop.f32.mrf.mxu2 }
 0x430   : > { %v3202_v40 = vadd.f32 %v2982_v16, %v2589_v12  ;;  %v3504_v1 = vpop.f32.mrf.mxu3  ;;  %v12143_v12 = vld [vmem:[#allocation43_spill] sm:$0xff] }
 0x431   : > { %v2591_v26 = vpop.f32.mrf.mxu1 }
 0x432   : > { %v3724_v19 = vadd.f32 %v3504_v1, %v3202_v40  ;;  %v2592_v21 = vadd.f32 %v2591_v26, %v12143_v12  ;;  %v11667_v1 = vshll.u32 %v10041_v39, 16  ;;  %v1720_v26 = vor.u32 %v1718_v59, %v12145_v28  ;;  %v12146_v12 = vld [vmem:[#allocation46_spill] sm:$0xff]  ;;  %v12150_v59 = vld [vmem:[#allocation49_spill] sm:$0xff] }
 0x433   : > { %v4033_v25 = vpop.f32.mrf.mxu0 }
 0x434   : > { %2630 = vmatmul.bf16.gmra.mxu1 %v9913_v20  ;;  %3024 = vmatmul.bf16.gmra.mxu2 %v10028_v52  ;;  %v10035_v56 = vadd.f32 %v4030_v36, %v3724_v19  ;;  %v1316_v36 = vrot.slane %v11664_v34, 7  ;;  %v10056_v34 = vsel %vm8843_vm6, %v1720_v26, 0  ;;  %v12151_v26 = vshll.u32 %v9951_v8, 16 }
 0x435   : > { %3546 = vmatmul.bf16.gmra.mxu3 %v10031_v62  ;;  %12147 = vst [vmem:[#allocation46_spill] sm:$0xff] %v10056_v34 }
 0x436   : > { %12142 = vst [vmem:[#allocation204_spill] sm:$0xff] %v10035_v56  ;;  %4072 = vmatmul.bf16.gmra.mxu0 %v10012_v37 }
 0x437   : > { %v2985_v38 = vpop.f32.mrf.mxu2 }
 0x438   : > { %v3203_v48 = vadd.f32 %v2985_v38, %v2592_v21  ;;  %v3507_v32 = vpop.f32.mrf.mxu3  ;;  %v1319_v21 = vor.u32 %v11667_v1, %v1316_v36 }
 0x439   : > { %v2593_v35 = vpop.f32.mrf.mxu1 }
 0x43a   : > { %v3725_v16 = vadd.f32 %v3507_v32, %v3203_v48  ;;  %v2594_v56 = vadd.f32 %v2593_v35, %v12146_v12  ;;  %v1721_v12 = vrot.slane %v12151_v26, 1 }
 0x43b   : > { %v4035_v40 = vpop.f32.mrf.mxu0 }
 0x43c   : > { %v10047_v19 = vadd.f32 %v4033_v25, %v3725_v16  ;;  %v10059_v16 = vsel %vm948_vm1, %v1308_v47, %v1319_v21 }
 0x43d   : > { %12148 = vst [vmem:[#allocation205_spill] sm:$0xff] %v10059_v16 }
 0x43e   : > { %12144 = vst [vmem:[#allocation43_spill] sm:$0xff] %v10047_v19 }
 0x43f   : > { %v2987_v38 = vpop.f32.mrf.mxu2 }
 0x440   : > { %v3204_v2 = vadd.f32 %v2987_v38, %v2594_v56  ;;  %v3509_v48 = vpop.f32.mrf.mxu3  ;;  %v10069_v56 = vld [vmem:[%s8458_s16 + $0x160] sm:$0xff] }
 0x441   : > { %v2596_v32 = vpop.f32.mrf.mxu1 }
 0x442   : > { %v3726_v52 = vadd.f32 %v3509_v48, %v3204_v2  ;;  %v2597_v28 = vadd.f32 %v2596_v32, %v12150_v59  ;;  %v11670_v2 = vshrl.u32 %v10069_v56, 16  ;;  %v11672_v48 = vshll.u32 %v10069_v56, 16 }
 0x443   : > { %v4038_v25 = vpop.f32.mrf.mxu0  ;;  %v12153_v32 = vshrl.u32 %v9951_v8, 16 }
 0x444   : > { %2635 = vmatmul.bf16.gmra.mxu1 %v9941_v6  ;;  %3029 = vmatmul.bf16.gmra.mxu2 %v10056_v34  ;;  %v10063_v54 = vadd.f32 %v4035_v40, %v3726_v52  ;;  %v1324_v40 = vrot.slane %v11670_v2, 7 }
 0x445   : > { %3551 = vmatmul.bf16.gmra.mxu3 %v10059_v16  ;;  %v1722_v59 = vor.u32 %v1721_v12, %v12153_v32 }
 0x446   : > { %12149 = vst [vmem:[#allocation206_spill] sm:$0xff] %v10063_v54  ;;  %4077 = vmatmul.bf16.gmra.mxu0 %v10041_v39  ;;  %v12154_v54 = vshll.u32 %v9983_v17, 16 }
 0x447   : > { %v2990_v35 = vpop.f32.mrf.mxu2 }
 0x448   : > { %v3205_v36 = vadd.f32 %v2990_v35, %v2597_v28  ;;  %v3512_v47 = vpop.f32.mrf.mxu3  ;;  %v1723_v28 = vrot.slane %v12154_v54, 1  ;;  %v12155_v35 = vld [vmem:[#allocation52_spill] sm:$0xff] }
 0x449   : > { %v2598_v21 = vpop.f32.mrf.mxu1 }
 0x44a   : > { %v3727_v38 = vadd.f32 %v3512_v47, %v3205_v36  ;;  %v2599_v19 = vadd.f32 %v2598_v21, %v12155_v35  ;;  %v1327_v36 = vor.u32 %v11672_v48, %v1324_v40  ;;  %v10087_v6 = vsel %vm1599_vm4, %v1722_v59, %v1723_v28  ;;  %v10101_v21 = vld [vmem:[%s8458_s16 + $0x168] sm:$0xff] }
 0x44b   : > { %v4040_v52 = vpop.f32.mrf.mxu0  ;;  %12156 = vst [vmem:[#allocation52_spill] sm:$0xff] %v10087_v6 }
 0x44c   : > { %v10077_v1 = vadd.f32 %v4038_v25, %v3727_v38  ;;  %v10091_v8 = vsel %vm8744_vm3, 0, %v1327_v36 }
 0x44d   : > { %12157 = vst [vmem:[#allocation207_spill] sm:$0xff] %v10091_v8 }
 0x44e   : > { %12152 = vst [vmem:[#allocation49_spill] sm:$0xff] %v10077_v1 }
 0x44f   : > { %v2992_v47 = vpop.f32.mrf.mxu2 }
 0x450   : > { %v3206_v26 = vadd.f32 %v2992_v47, %v2599_v19  ;;  %v3514_v34 = vpop.f32.mrf.mxu3  ;;  %v12159_v19 = vld [vmem:[#allocation55_spill] sm:$0xff] }
 0x451   : > { %v2601_v2 = vpop.f32.mrf.mxu1 }
 0x452   : > { %v3728_v25 = vadd.f32 %v3514_v34, %v3206_v26  ;;  %v2602_v12 = vadd.f32 %v2601_v2, %v12159_v19  ;;  %v11676_v34 = vshrl.u32 %v10101_v21, 16  ;;  %v12162_v19 = vshll.u32 %v10012_v37, 16 }
 0x453   : > { %v4043_v38 = vpop.f32.mrf.mxu0 }
 0x454   : > { %2640 = vmatmul.bf16.gmra.mxu1 %v9973_v24  ;;  %3034 = vmatmul.bf16.gmra.mxu2 %v10087_v6  ;;  %v10095_v54 = vadd.f32 %v4040_v52, %v3728_v25  ;;  %v1331_v52 = vrot.slane %v11676_v34, 7  ;;  %v11678_v25 = vshll.u32 %v10101_v21, 16  ;;  %v1726_v1 = vrot.slane %v12162_v19, 1  ;;  %v12163_v6 = vld [vmem:[#allocation58_spill] sm:$0xff] }
 0x455   : > { %3556 = vmatmul.bf16.gmra.mxu3 %v10091_v8 }
 0x456   : > { %12158 = vst [vmem:[#allocation208_spill] sm:$0xff] %v10095_v54  ;;  %4082 = vmatmul.bf16.gmra.mxu0 %v10069_v56  ;;  %v12161_v54 = vshrl.u32 %v9983_v17, 16 }
 0x457   : > { %v2995_v32 = vpop.f32.mrf.mxu2 }
 0x458   : > { %v3207_v59 = vadd.f32 %v2995_v32, %v2602_v12  ;;  %v3517_v35 = vpop.f32.mrf.mxu3  ;;  %v1725_v2 = vor.u32 %v1723_v28, %v12161_v54  ;;  %v1334_v12 = vor.u32 %v11678_v25, %v1331_v52  ;;  %v10130_v54 = vld [vmem:[%s8458_s16 + $0x170] sm:$0xff]  ;;  %v12169_v25 = vshrl.u32 %v10012_v37, 16 }
 0x459   : > { %v2603_v36 = vpop.f32.mrf.mxu1 }
 0x45a   : > { %v3729_v47 = vadd.f32 %v3517_v35, %v3207_v59  ;;  %v2604_v24 = vadd.f32 %v2603_v36, %v12163_v6  ;;  %v10117_v20 = vsel %vm1599_vm4, %v1725_v2, %v1726_v1  ;;  %v10120_v17 = vsel %vm948_vm1, %v1324_v40, %v1334_v12 }
 0x45b   : > { %v4045_v26 = vpop.f32.mrf.mxu0  ;;  %12164 = vst [vmem:[#allocation58_spill] sm:$0xff] %v10117_v20  ;;  %v11681_v36 = vshrl.u32 %v10130_v54, 16 }
 0x45c   : > { %v10107_v48 = vadd.f32 %v4043_v38, %v3729_v47  ;;  %12165 = vst [vmem:[#allocation209_spill] sm:$0xff] %v10120_v17 }
 0x45e   : > { %12160 = vst [vmem:[#allocation55_spill] sm:$0xff] %v10107_v48  ;;  %v12171_v48 = vld [vmem:[#allocation64_spill] sm:$0xff] }
 0x45f   : > { %v2997_v32 = vpop.f32.mrf.mxu2 }
 0x460   : > { %v3208_v59 = vadd.f32 %v2997_v32, %v2604_v24  ;;  %v3519_v35 = vpop.f32.mrf.mxu3  ;;  %v12167_v24 = vld [vmem:[#allocation61_spill] sm:$0xff] }
 0x461   : > { %v2606_v34 = vpop.f32.mrf.mxu1 }
 0x462   : > { %v3730_v38 = vadd.f32 %v3519_v35, %v3208_v59  ;;  %v2607_v28 = vadd.f32 %v2606_v34, %v12167_v24  ;;  %v11683_v35 = vshll.u32 %v10130_v54, 16  ;;  %v1728_v34 = vor.u32 %v1726_v1, %v12169_v25  ;;  %v12175_v25 = vld [vmem:[#allocation67_spill] sm:$0xff] }
 0x463   : > { %v4048_v47 = vpop.f32.mrf.mxu0  ;;  %v12170_v24 = vshll.u32 %v10041_v39, 16 }
 0x464   : > { %2645 = vmatmul.bf16.gmra.mxu1 %v10002_v63  ;;  %3039 = vmatmul.bf16.gmra.mxu2 %v10117_v20  ;;  %v10124_v6 = vadd.f32 %v4045_v26, %v3730_v38  ;;  %v1339_v26 = vrot.slane %v11681_v36, 7 }
 0x465   : > { %3561 = vmatmul.bf16.gmra.mxu3 %v10120_v17 }
 0x466   : > { %12166 = vst [vmem:[#allocation210_spill] sm:$0xff] %v10124_v6  ;;  %4087 = vmatmul.bf16.gmra.mxu0 %v10101_v21  ;;  %v1729_v6 = vrot.slane %v12170_v24, 1 }
 0x467   : > { %v3000_v2 = vpop.f32.mrf.mxu2 }
 0x468   : > { %v3209_v19 = vadd.f32 %v3000_v2, %v2607_v28  ;;  %v3522_v40 = vpop.f32.mrf.mxu3  ;;  %v1342_v28 = vor.u32 %v11683_v35, %v1339_v26  ;;  %v10146_v63 = vsel %vm1599_vm4, %v1728_v34, %v1729_v6  ;;  %v10159_v34 = vld [vmem:[%s8458_s16 + $0x178] sm:$0xff] }
 0x469   : > { %v2608_v12 = vpop.f32.mrf.mxu1  ;;  %12172 = vst [vmem:[#allocation64_spill] sm:$0xff] %v10146_v63  ;;  %v11684_v24 = vshrl.u32 %v10159_v34, 16  ;;  %v11688_v35 = vshll.u32 %v10159_v34, 16 }
 0x46a   : > { %v3731_v32 = vadd.f32 %v3522_v40, %v3209_v19  ;;  %v2609_v20 = vadd.f32 %v2608_v12, %v12171_v48  ;;  %v10149_v37 = vsel %vm948_vm1, %v1331_v52, %v1342_v28  ;;  %v7547_v48 = vld [vmem:[#allocation8 + $0x1c8] sm:$0xff] }
 0x46b   : > { %v4050_v59 = vpop.f32.mrf.mxu0  ;;  %12173 = vst [vmem:[#allocation211_spill] sm:$0xff] %v10149_v37  ;;  %5430 = vmatpush.bf16.msra.mxu3 %v7547_v48  ;;  %v12178_v48 = vld [vmem:[#allocation70_spill] sm:$0xff] }
 0x46c   : > { %v10136_v38 = vadd.f32 %v4048_v47, %v3731_v32 }
 0x46e   : > { %12168 = vst [vmem:[#allocation61_spill] sm:$0xff] %v10136_v38  ;;  %v7555_v38 = vld [vmem:[#allocation8 + $0x208] sm:$0xff] }
 0x46f   : > { %v3002_v2 = vpop.f32.mrf.mxu2  ;;  %5952 = vmatpush.bf16.msra.mxu0 %v7555_v38 }
 0x470   : > { %v3210_v19 = vadd.f32 %v3002_v2, %v2609_v20  ;;  %v3524_v40 = vpop.f32.mrf.mxu3  ;;  %v7539_v20 = vld [vmem:[#allocation8 + $0x188] sm:$0xff] }
 0x471   : > { %v2611_v36 = vpop.f32.mrf.mxu1  ;;  %4904 = vmatpush.bf16.msra.mxu2 %v7539_v20 }
 0x472   : > { %v3732_v47 = vadd.f32 %v3524_v40, %v3210_v19  ;;  %v2612_v12 = vadd.f32 %v2611_v36, %v12175_v25  ;;  %v12177_v25 = vshrl.u32 %v10041_v39, 16 }
 0x473   : > { %v4053_v32 = vpop.f32.mrf.mxu0 }
 0x474   : > { %2650 = vmatmul.bf16.gmra.mxu1 %v10031_v62  ;;  %3044 = vmatmul.bf16.gmra.mxu2 %v10146_v63  ;;  %v10153_v1 = vadd.f32 %v4050_v59, %v3732_v47  ;;  %v1347_v47 = vrot.slane %v11684_v24, 7  ;;  %v1731_v20 = vor.u32 %v1729_v6, %v12177_v25  ;;  %v12182_v6 = vld [vmem:[#allocation73_spill] sm:$0xff] }
 0x475   : > { %3566 = vmatmul.bf16.gmra.mxu3 %v10149_v37 }
 0x476   : > { %12174 = vst [vmem:[#allocation212_spill] sm:$0xff] %v10153_v1  ;;  %4092 = vmatmul.bf16.gmra.mxu0 %v10130_v54  ;;  %v7531_v1 = vld [vmem:[#allocation8 + $0x148] sm:$0xff]  ;;  %v10174_v62 = vsel %vm8843_vm6, %v1731_v20, 0  ;;  %v12183_v20 = vshll.u32 %v10069_v56, 16 }
 0x477   : > { %v3005_v52 = vpop.f32.mrf.mxu2  ;;  %4382 = vmatpush.bf16.msra.mxu1 %v7531_v1  ;;  %12179 = vst [vmem:[#allocation70_spill] sm:$0xff] %v10174_v62 }
 0x478   : > { %v3211_v28 = vadd.f32 %v3005_v52, %v2612_v12  ;;  %v3527_v2 = vpop.f32.mrf.mxu3  ;;  %v1350_v52 = vor.u32 %v11688_v35, %v1347_v47  ;;  %v12186_v35 = vshll.u32 %v10101_v21, 16 }
 0x479   : > { %v2613_v19 = vpop.f32.mrf.mxu1 }
 0x47a   : > { %v3733_v59 = vadd.f32 %v3527_v2, %v3211_v28  ;;  %v2614_v12 = vadd.f32 %v2613_v19, %v12178_v48  ;;  %v10177_v1 = vsel %vm948_vm1, %v1339_v26, %v1350_v52  ;;  %v1732_v48 = vrot.slane %v12183_v20, 1 }
 0x47b   : > { %v4055_v40 = vpop.f32.mrf.mxu0  ;;  %12180 = vst [vmem:[#allocation213_spill] sm:$0xff] %v10177_v1 }
 0x47c   : > { %v10165_v36 = vadd.f32 %v4053_v32, %v3733_v59  ;;  %v10187_v59 = vld [vmem:[%s8458_s16 + $0x180] sm:$0xff] }
 0x47e   : > { %12176 = vst [vmem:[#allocation67_spill] sm:$0xff] %v10165_v36 }
 0x47f   : > { %v3007_v28 = vpop.f32.mrf.mxu2 }
 0x480   : > { %v3212_v2 = vadd.f32 %v3007_v28, %v2614_v12  ;;  %v3529_v24 = vpop.f32.mrf.mxu3 }
 0x481   : > { %v2616_v63 = vpop.f32.mrf.mxu1 }
 0x482   : > { %v3734_v38 = vadd.f32 %v3529_v24, %v3212_v2  ;;  %v2617_v19 = vadd.f32 %v2616_v63, %v12182_v6  ;;  %v11689_v24 = vshrl.u32 %v10187_v59, 16  ;;  %v11692_v2 = vshll.u32 %v10187_v59, 16 }
 0x483   : > { %v4058_v32 = vpop.f32.mrf.mxu0  ;;  %v12185_v63 = vshrl.u32 %v10069_v56, 16 }
 0x484   : > { %2655 = vmatmul.bf16.gmra.mxu1 %v10059_v16  ;;  %3049 = vmatmul.bf16.gmra.mxu2 %v10174_v62  ;;  %v10181_v39 = vadd.f32 %v4055_v40, %v3734_v38  ;;  %v1355_v28 = vrot.slane %v11689_v24, 7 }
 0x485   : > { %3571 = vmatmul.bf16.gmra.mxu3 %v10177_v1  ;;  %v1733_v6 = vor.u32 %v1732_v48, %v12185_v63 }
 0x486   : > { %12181 = vst [vmem:[#allocation214_spill] sm:$0xff] %v10181_v39  ;;  %4097 = vmatmul.bf16.gmra.mxu0 %v10159_v34 }
 0x487   : > { %v3010_v47 = vpop.f32.mrf.mxu2 }
 0x488   : > { %v3213_v25 = vadd.f32 %v3010_v47, %v2617_v19  ;;  %v3532_v26 = vpop.f32.mrf.mxu3  ;;  %v1734_v19 = vrot.slane %v12186_v35, 1  ;;  %v12187_v47 = vld [vmem:[#allocation77_spill] sm:$0xff] }
 0x489   : > { %v2618_v12 = vpop.f32.mrf.mxu1 }
 0x48a   : > { %v3735_v52 = vadd.f32 %v3532_v26, %v3213_v25  ;;  %v2619_v39 = vadd.f32 %v2618_v12, %v12187_v47  ;;  %v1358_v25 = vor.u32 %v11692_v2, %v1355_v28  ;;  %v10205_v62 = vsel %vm1599_vm4, %v1733_v6, %v1734_v19  ;;  %v10219_v12 = vld [vmem:[%s8458_s16 + $0x188] sm:$0xff] }
 0x48b   : > { %v4060_v40 = vpop.f32.mrf.mxu0  ;;  %12188 = vst [vmem:[#allocation77_spill] sm:$0xff] %v10205_v62 }
 0x48c   : > { %v10195_v38 = vadd.f32 %v4058_v32, %v3735_v52  ;;  %v10209_v56 = vsel %vm8744_vm3, 0, %v1358_v25 }
 0x48d   : > { %12189 = vst [vmem:[#allocation215_spill] sm:$0xff] %v10209_v56 }
 0x48e   : > { %12184 = vst [vmem:[#allocation73_spill] sm:$0xff] %v10195_v38 }
 0x48f   : > { %v3012_v26 = vpop.f32.mrf.mxu2 }
 0x490   : > { %v3214_v20 = vadd.f32 %v3012_v26, %v2619_v39  ;;  %v3534_v36 = vpop.f32.mrf.mxu3  ;;  %v12191_v39 = vld [vmem:[#allocation80_spill] sm:$0xff] }
 0x491   : > { %v2621_v24 = vpop.f32.mrf.mxu1 }
 0x492   : > { %v3736_v32 = vadd.f32 %v3534_v36, %v3214_v20  ;;  %v2622_v48 = vadd.f32 %v2621_v24, %v12191_v39  ;;  %v11696_v36 = vshrl.u32 %v10219_v12, 16  ;;  %v12194_v39 = vshll.u32 %v10130_v54, 16 }
 0x493   : > { %v4063_v52 = vpop.f32.mrf.mxu0 }
 0x494   : > { %2660 = vmatmul.bf16.gmra.mxu1 %v10091_v8  ;;  %3054 = vmatmul.bf16.gmra.mxu2 %v10205_v62  ;;  %v10213_v35 = vadd.f32 %v4060_v40, %v3736_v32  ;;  %v1362_v40 = vrot.slane %v11696_v36, 7  ;;  %v11698_v32 = vshll.u32 %v10219_v12, 16  ;;  %v1737_v38 = vrot.slane %v12194_v39, 1  ;;  %v12195_v62 = vld [vmem:[#allocation83_spill] sm:$0xff] }
 0x495   : > { %3576 = vmatmul.bf16.gmra.mxu3 %v10209_v56 }
 0x496   : > { %12190 = vst [vmem:[#allocation216_spill] sm:$0xff] %v10213_v35  ;;  %4102 = vmatmul.bf16.gmra.mxu0 %v10187_v59  ;;  %v12193_v35 = vshrl.u32 %v10101_v21, 16 }
 0x497   : > { %v3015_v63 = vpop.f32.mrf.mxu2 }
 0x498   : > { %v3215_v6 = vadd.f32 %v3015_v63, %v2622_v48  ;;  %v3537_v47 = vpop.f32.mrf.mxu3  ;;  %v1736_v24 = vor.u32 %v1734_v19, %v12193_v35  ;;  %v1365_v48 = vor.u32 %v11698_v32, %v1362_v40  ;;  %v10248_v35 = vld [vmem:[%s8458_s16 + $0x190] sm:$0xff]  ;;  %v12201_v32 = vshrl.u32 %v10130_v54, 16 }
 0x499   : > { %v2623_v25 = vpop.f32.mrf.mxu1 }
 0x49a   : > { %v3737_v26 = vadd.f32 %v3537_v47, %v3215_v6  ;;  %v2624_v8 = vadd.f32 %v2623_v25, %v12195_v62  ;;  %v10235_v16 = vsel %vm1599_vm4, %v1736_v24, %v1737_v38  ;;  %v10238_v21 = vsel %vm948_vm1, %v1355_v28, %v1365_v48 }
 0x49b   : > { %v4065_v20 = vpop.f32.mrf.mxu0  ;;  %12196 = vst [vmem:[#allocation83_spill] sm:$0xff] %v10235_v16  ;;  %v11701_v25 = vshrl.u32 %v10248_v35, 16 }
 0x49c   : > { %v10225_v2 = vadd.f32 %v4063_v52, %v3737_v26  ;;  %12197 = vst [vmem:[#allocation217_spill] sm:$0xff] %v10238_v21 }
 0x49e   : > { %12192 = vst [vmem:[#allocation80_spill] sm:$0xff] %v10225_v2  ;;  %v12203_v2 = vld [vmem:[#allocation89_spill] sm:$0xff] }
 0x49f   : > { %v3017_v63 = vpop.f32.mrf.mxu2 }
 0x4a0   : > { %v3216_v6 = vadd.f32 %v3017_v63, %v2624_v8  ;;  %v3539_v47 = vpop.f32.mrf.mxu3  ;;  %v12199_v8 = vld [vmem:[#allocation86_spill] sm:$0xff] }
 0x4a1   : > { %v2626_v36 = vpop.f32.mrf.mxu1 }
 0x4a2   : > { %v3738_v52 = vadd.f32 %v3539_v47, %v3216_v6  ;;  %v2627_v19 = vadd.f32 %v2626_v36, %v12199_v8  ;;  %v11703_v47 = vshll.u32 %v10248_v35, 16  ;;  %v1739_v36 = vor.u32 %v1737_v38, %v12201_v32  ;;  %v10277_v32 = vld [vmem:[%s8458_s16 + $0x198] sm:$0xff] }
 0x4a3   : > { %v4068_v26 = vpop.f32.mrf.mxu0  ;;  %v12202_v8 = vshll.u32 %v10159_v34, 16 }
 0x4a4   : > { %2665 = vmatmul.bf16.gmra.mxu1 %v10120_v17  ;;  %3059 = vmatmul.bf16.gmra.mxu2 %v10235_v16  ;;  %v10242_v62 = vadd.f32 %v4065_v20, %v3738_v52  ;;  %v1370_v20 = vrot.slane %v11701_v25, 7 }
 0x4a5   : > { %3581 = vmatmul.bf16.gmra.mxu3 %v10238_v21 }
 0x4a6   : > { %12198 = vst [vmem:[#allocation218_spill] sm:$0xff] %v10242_v62  ;;  %4107 = vmatmul.bf16.gmra.mxu0 %v10219_v12  ;;  %v1740_v62 = vrot.slane %v12202_v8, 1 }
 0x4a7   : > { %v3020_v24 = vpop.f32.mrf.mxu2 }
 0x4a8   : > { %v3217_v39 = vadd.f32 %v3020_v24, %v2627_v19  ;;  %v3542_v28 = vpop.f32.mrf.mxu3  ;;  %v1373_v19 = vor.u32 %v11703_v47, %v1370_v20  ;;  %v10264_v17 = vsel %vm1599_vm4, %v1739_v36, %v1740_v62  ;;  %v12209_v47 = vshrl.u32 %v10159_v34, 16 }
 0x4a9   : > { %v2628_v48 = vpop.f32.mrf.mxu1  ;;  %12204 = vst [vmem:[#allocation89_spill] sm:$0xff] %v10264_v17 }
 0x4aa   : > { %v3739_v63 = vadd.f32 %v3542_v28, %v3217_v39  ;;  %v2629_v16 = vadd.f32 %v2628_v48, %v12203_v2  ;;  %v10267_v54 = vsel %vm948_vm1, %v1362_v40, %v1373_v19  ;;  %v11704_v48 = vshrl.u32 %v10277_v32, 16 }
 0x4ab   : > { %v4070_v6 = vpop.f32.mrf.mxu0  ;;  %12205 = vst [vmem:[#allocation219_spill] sm:$0xff] %v10267_v54 }
 0x4ac   : > { %v10254_v52 = vadd.f32 %v4068_v26, %v3739_v63 }
 0x4ae   : > { %12200 = vst [vmem:[#allocation86_spill] sm:$0xff] %v10254_v52 }
 0x4af   : > { %v3022_v24 = vpop.f32.mrf.mxu2 }
 0x4b0   : > { %v3218_v39 = vadd.f32 %v3022_v24, %v2629_v16  ;;  %v3544_v28 = vpop.f32.mrf.mxu3  ;;  %v12207_v16 = vld [vmem:[#allocation92_spill] sm:$0xff] }
 0x4b1   : > { %v2631_v25 = vpop.f32.mrf.mxu1 }
 0x4b2   : > { %v3740_v26 = vadd.f32 %v3544_v28, %v3218_v39  ;;  %v2632_v38 = vadd.f32 %v2631_v25, %v12207_v16  ;;  %v11707_v28 = vshll.u32 %v10277_v32, 16  ;;  %v1742_v25 = vor.u32 %v1740_v62, %v12209_v47  ;;  %v12210_v16 = vld [vmem:[#allocation95_spill] sm:$0xff]  ;;  %v12214_v62 = vld [vmem:[#allocation98_spill] sm:$0xff] }
 0x4b3   : > { %v4073_v63 = vpop.f32.mrf.mxu0 }
 0x4b4   : > { %2670 = vmatmul.bf16.gmra.mxu1 %v10149_v37  ;;  %3064 = vmatmul.bf16.gmra.mxu2 %v10264_v17  ;;  %v10271_v2 = vadd.f32 %v4070_v6, %v3740_v26  ;;  %v1378_v6 = vrot.slane %v11704_v48, 7  ;;  %v10292_v48 = vsel %vm8843_vm6, %v1742_v25, 0  ;;  %v12215_v25 = vshll.u32 %v10187_v59, 16 }
 0x4b5   : > { %3586 = vmatmul.bf16.gmra.mxu3 %v10267_v54  ;;  %12211 = vst [vmem:[#allocation95_spill] sm:$0xff] %v10292_v48 }
 0x4b6   : > { %12206 = vst [vmem:[#allocation220_spill] sm:$0xff] %v10271_v2  ;;  %4112 = vmatmul.bf16.gmra.mxu0 %v10248_v35 }
 0x4b7   : > { %v3025_v36 = vpop.f32.mrf.mxu2 }
 0x4b8   : > { %v3219_v8 = vadd.f32 %v3025_v36, %v2632_v38  ;;  %v3547_v40 = vpop.f32.mrf.mxu3  ;;  %v1381_v38 = vor.u32 %v11707_v28, %v1378_v6 }
 0x4b9   : > { %v2633_v19 = vpop.f32.mrf.mxu1 }
 0x4ba   : > { %v3741_v24 = vadd.f32 %v3547_v40, %v3219_v8  ;;  %v2634_v2 = vadd.f32 %v2633_v19, %v12210_v16  ;;  %v1743_v16 = vrot.slane %v12215_v25, 1 }
 0x4bb   : > { %v4075_v39 = vpop.f32.mrf.mxu0 }
 0x4bc   : > { %v10283_v26 = vadd.f32 %v4073_v63, %v3741_v24  ;;  %v10295_v24 = vsel %vm948_vm1, %v1370_v20, %v1381_v38 }
 0x4bd   : > { %12212 = vst [vmem:[#allocation221_spill] sm:$0xff] %v10295_v24 }
 0x4be   : > { %12208 = vst [vmem:[#allocation92_spill] sm:$0xff] %v10283_v26 }
 0x4bf   : > { %v3027_v36 = vpop.f32.mrf.mxu2 }
 0x4c0   : > { %v3220_v52 = vadd.f32 %v3027_v36, %v2634_v2  ;;  %v3549_v8 = vpop.f32.mrf.mxu3  ;;  %v10305_v2 = vld [vmem:[%s8458_s16 + $0x1a0] sm:$0xff] }
 0x4c1   : > { %v2636_v40 = vpop.f32.mrf.mxu1 }
 0x4c2   : > { %v3742_v17 = vadd.f32 %v3549_v8, %v3220_v52  ;;  %v2637_v47 = vadd.f32 %v2636_v40, %v12214_v62  ;;  %v11710_v52 = vshrl.u32 %v10305_v2, 16  ;;  %v11712_v8 = vshll.u32 %v10305_v2, 16 }
 0x4c3   : > { %v4078_v63 = vpop.f32.mrf.mxu0  ;;  %v12217_v40 = vshrl.u32 %v10187_v59, 16 }
 0x4c4   : > { %2675 = vmatmul.bf16.gmra.mxu1 %v10177_v1  ;;  %3069 = vmatmul.bf16.gmra.mxu2 %v10292_v48  ;;  %v10299_v34 = vadd.f32 %v4075_v39, %v3742_v17  ;;  %v1386_v39 = vrot.slane %v11710_v52, 7 }
 0x4c5   : > { %3591 = vmatmul.bf16.gmra.mxu3 %v10295_v24  ;;  %v1744_v62 = vor.u32 %v1743_v16, %v12217_v40 }
 0x4c6   : > { %12213 = vst [vmem:[#allocation222_spill] sm:$0xff] %v10299_v34  ;;  %4117 = vmatmul.bf16.gmra.mxu0 %v10277_v32  ;;  %v12218_v34 = vshll.u32 %v10219_v12, 16 }
 0x4c7   : > { %v3030_v19 = vpop.f32.mrf.mxu2 }
 0x4c8   : > { %v3221_v6 = vadd.f32 %v3030_v19, %v2637_v47  ;;  %v3552_v20 = vpop.f32.mrf.mxu3  ;;  %v1745_v47 = vrot.slane %v12218_v34, 1  ;;  %v12219_v19 = vld [vmem:[#allocation101_spill] sm:$0xff] }
 0x4c9   : > { %v2638_v38 = vpop.f32.mrf.mxu1 }
 0x4ca   : > { %v3743_v36 = vadd.f32 %v3552_v20, %v3221_v6  ;;  %v2639_v26 = vadd.f32 %v2638_v38, %v12219_v19  ;;  %v1389_v6 = vor.u32 %v11712_v8, %v1386_v39  ;;  %v10323_v1 = vsel %vm1599_vm4, %v1744_v62, %v1745_v47  ;;  %v10337_v38 = vld [vmem:[%s8458_s16 + $0x1a8] sm:$0xff] }
 0x4cb   : > { %v4080_v17 = vpop.f32.mrf.mxu0  ;;  %12220 = vst [vmem:[#allocation101_spill] sm:$0xff] %v10323_v1 }
 0x4cc   : > { %v10313_v28 = vadd.f32 %v4078_v63, %v3743_v36  ;;  %v10327_v59 = vsel %vm8744_vm3, 0, %v1389_v6 }
 0x4cd   : > { %12221 = vst [vmem:[#allocation223_spill] sm:$0xff] %v10327_v59 }
 0x4ce   : > { %12216 = vst [vmem:[#allocation98_spill] sm:$0xff] %v10313_v28 }
 0x4cf   : > { %v3032_v20 = vpop.f32.mrf.mxu2 }
 0x4d0   : > { %v3222_v25 = vadd.f32 %v3032_v20, %v2639_v26  ;;  %v3554_v48 = vpop.f32.mrf.mxu3  ;;  %v12223_v26 = vld [vmem:[#allocation106_spill] sm:$0xff] }
 0x4d1   : > { %v2641_v52 = vpop.f32.mrf.mxu1 }
 0x4d2   : > { %v3744_v63 = vadd.f32 %v3554_v48, %v3222_v25  ;;  %v2642_v16 = vadd.f32 %v2641_v52, %v12223_v26  ;;  %v11716_v48 = vshrl.u32 %v10337_v38, 16  ;;  %v12226_v26 = vshll.u32 %v10248_v35, 16 }
 0x4d3   : > { %v4083_v36 = vpop.f32.mrf.mxu0 }
 0x4d4   : > { %2680 = vmatmul.bf16.gmra.mxu1 %v10209_v56  ;;  %3074 = vmatmul.bf16.gmra.mxu2 %v10323_v1  ;;  %v10331_v34 = vadd.f32 %v4080_v17, %v3744_v63  ;;  %v1393_v17 = vrot.slane %v11716_v48, 7  ;;  %v11718_v63 = vshll.u32 %v10337_v38, 16  ;;  %v1748_v28 = vrot.slane %v12226_v26, 1  ;;  %v12227_v1 = vld [vmem:[#allocation109_spill] sm:$0xff] }
 0x4d5   : > { %3596 = vmatmul.bf16.gmra.mxu3 %v10327_v59 }
 0x4d6   : > { %12222 = vst [vmem:[#allocation224_spill] sm:$0xff] %v10331_v34  ;;  %4122 = vmatmul.bf16.gmra.mxu0 %v10305_v2  ;;  %v12225_v34 = vshrl.u32 %v10219_v12, 16 }
 0x4d7   : > { %v3035_v40 = vpop.f32.mrf.mxu2 }
 0x4d8   : > { %v3223_v62 = vadd.f32 %v3035_v40, %v2642_v16  ;;  %v3557_v19 = vpop.f32.mrf.mxu3  ;;  %v1747_v52 = vor.u32 %v1745_v47, %v12225_v34  ;;  %v1396_v16 = vor.u32 %v11718_v63, %v1393_v17  ;;  %v10366_v34 = vld [vmem:[%s8458_s16 + $0x1b0] sm:$0xff]  ;;  %v12233_v63 = vshrl.u32 %v10248_v35, 16 }
 0x4d9   : > { %v2643_v6 = vpop.f32.mrf.mxu1 }
 0x4da   : > { %v3745_v20 = vadd.f32 %v3557_v19, %v3223_v62  ;;  %v2644_v56 = vadd.f32 %v2643_v6, %v12227_v1  ;;  %v10353_v37 = vsel %vm1599_vm4, %v1747_v52, %v1748_v28  ;;  %v10356_v12 = vsel %vm948_vm1, %v1386_v39, %v1396_v16 }
 0x4db   : > { %v4085_v25 = vpop.f32.mrf.mxu0  ;;  %12228 = vst [vmem:[#allocation109_spill] sm:$0xff] %v10353_v37  ;;  %v11721_v6 = vshrl.u32 %v10366_v34, 16 }
 0x4dc   : > { %v10343_v8 = vadd.f32 %v4083_v36, %v3745_v20  ;;  %12229 = vst [vmem:[#allocation225_spill] sm:$0xff] %v10356_v12 }
 0x4de   : > { %12224 = vst [vmem:[#allocation106_spill] sm:$0xff] %v10343_v8  ;;  %v12235_v8 = vld [vmem:[#allocation116_spill] sm:$0xff] }
 0x4df   : > { %v3037_v40 = vpop.f32.mrf.mxu2 }
 0x4e0   : > { %v3224_v62 = vadd.f32 %v3037_v40, %v2644_v56  ;;  %v3559_v19 = vpop.f32.mrf.mxu3  ;;  %v12231_v56 = vld [vmem:[#allocation113_spill] sm:$0xff] }
 0x4e1   : > { %v2646_v48 = vpop.f32.mrf.mxu1 }
 0x4e2   : > { %v3746_v36 = vadd.f32 %v3559_v19, %v3224_v62  ;;  %v2647_v47 = vadd.f32 %v2646_v48, %v12231_v56  ;;  %v11723_v19 = vshll.u32 %v10366_v34, 16  ;;  %v1750_v48 = vor.u32 %v1748_v28, %v12233_v63  ;;  %v12239_v63 = vld [vmem:[#allocation120_spill] sm:$0xff] }
 0x4e3   : > { %v4088_v20 = vpop.f32.mrf.mxu0  ;;  %v12234_v56 = vshll.u32 %v10277_v32, 16 }
 0x4e4   : > { %2685 = vmatmul.bf16.gmra.mxu1 %v10238_v21  ;;  %3079 = vmatmul.bf16.gmra.mxu2 %v10353_v37  ;;  %v10360_v1 = vadd.f32 %v4085_v25, %v3746_v36  ;;  %v1401_v25 = vrot.slane %v11721_v6, 7 }
 0x4e5   : > { %3601 = vmatmul.bf16.gmra.mxu3 %v10356_v12 }
 0x4e6   : > { %12230 = vst [vmem:[#allocation226_spill] sm:$0xff] %v10360_v1  ;;  %4127 = vmatmul.bf16.gmra.mxu0 %v10337_v38  ;;  %v1751_v1 = vrot.slane %v12234_v56, 1 }
 0x4e7   : > { %v3040_v52 = vpop.f32.mrf.mxu2 }
 0x4e8   : > { %v3225_v26 = vadd.f32 %v3040_v52, %v2647_v47  ;;  %v3562_v39 = vpop.f32.mrf.mxu3  ;;  %v1404_v47 = vor.u32 %v11723_v19, %v1401_v25  ;;  %v10382_v21 = vsel %vm1599_vm4, %v1750_v48, %v1751_v1  ;;  %v10395_v48 = vld [vmem:[%s8458_s16 + $0x1b8] sm:$0xff] }
 0x4e9   : > { %v2648_v16 = vpop.f32.mrf.mxu1  ;;  %12236 = vst [vmem:[#allocation116_spill] sm:$0xff] %v10382_v21  ;;  %v11724_v56 = vshrl.u32 %v10395_v48, 16  ;;  %v11728_v19 = vshll.u32 %v10395_v48, 16 }
 0x4ea   : > { %v3747_v40 = vadd.f32 %v3562_v39, %v3225_v26  ;;  %v2649_v37 = vadd.f32 %v2648_v16, %v12235_v8  ;;  %v10385_v35 = vsel %vm948_vm1, %v1393_v17, %v1404_v47  ;;  %v7546_v8 = vld [vmem:[#allocation8 + $0x1c0] sm:$0xff] }
 0x4eb   : > { %v4090_v62 = vpop.f32.mrf.mxu0  ;;  %12237 = vst [vmem:[#allocation227_spill] sm:$0xff] %v10385_v35  ;;  %5431 = vmatpush.bf16.msra.mxu3 %v7546_v8  ;;  %v12242_v8 = vld [vmem:[#allocation123_spill] sm:$0xff] }
 0x4ec   : > { %v10372_v36 = vadd.f32 %v4088_v20, %v3747_v40 }
 0x4ee   : > { %12232 = vst [vmem:[#allocation113_spill] sm:$0xff] %v10372_v36  ;;  %v7554_v36 = vld [vmem:[#allocation8 + $0x200] sm:$0xff] }
 0x4ef   : > { %v3042_v52 = vpop.f32.mrf.mxu2  ;;  %5953 = vmatpush.bf16.msra.mxu0 %v7554_v36 }
 0x4f0   : > { %v3226_v26 = vadd.f32 %v3042_v52, %v2649_v37  ;;  %v3564_v39 = vpop.f32.mrf.mxu3  ;;  %v7538_v37 = vld [vmem:[#allocation8 + $0x180] sm:$0xff] }
 0x4f1   : > { %v2651_v6 = vpop.f32.mrf.mxu1  ;;  %4905 = vmatpush.bf16.msra.mxu2 %v7538_v37 }
 0x4f2   : > { %v3748_v20 = vadd.f32 %v3564_v39, %v3226_v26  ;;  %v2652_v16 = vadd.f32 %v2651_v6, %v12239_v63  ;;  %v12241_v63 = vshrl.u32 %v10277_v32, 16 }
 0x4f3   : > { %v4093_v40 = vpop.f32.mrf.mxu0 }
 0x4f4   : > { %2690 = vmatmul.bf16.gmra.mxu1 %v10267_v54  ;;  %3084 = vmatmul.bf16.gmra.mxu2 %v10382_v21  ;;  %v10389_v28 = vadd.f32 %v4090_v62, %v3748_v20  ;;  %v1409_v20 = vrot.slane %v11724_v56, 7  ;;  %v1753_v37 = vor.u32 %v1751_v1, %v12241_v63  ;;  %v12245_v1 = vld [vmem:[#allocation127_spill] sm:$0xff] }
 0x4f5   : > { %3606 = vmatmul.bf16.gmra.mxu3 %v10385_v35 }
 0x4f6   : > { %12238 = vst [vmem:[#allocation228_spill] sm:$0xff] %v10389_v28  ;;  %4132 = vmatmul.bf16.gmra.mxu0 %v10366_v34  ;;  %v7530_v28 = vld [vmem:[#allocation8 + $0x140] sm:$0xff]  ;;  %v10410_v54 = vsel %vm8843_vm6, %v1753_v37, 0  ;;  %v12246_v37 = vshll.u32 %v10305_v2, 16 }
 0x4f7   : > { %v3045_v17 = vpop.f32.mrf.mxu2  ;;  %4383 = vmatpush.bf16.msra.mxu1 %v7530_v28  ;;  %12243 = vst [vmem:[#allocation123_spill] sm:$0xff] %v10410_v54 }
 0x4f8   : > { %v3227_v47 = vadd.f32 %v3045_v17, %v2652_v16  ;;  %v3567_v52 = vpop.f32.mrf.mxu3  ;;  %v1412_v17 = vor.u32 %v11728_v19, %v1409_v20  ;;  %v12249_v19 = vshll.u32 %v10337_v38, 16 }
 0x4f9   : > { %v2653_v26 = vpop.f32.mrf.mxu1 }
 0x4fa   : > { %v3749_v62 = vadd.f32 %v3567_v52, %v3227_v47  ;;  %v2654_v16 = vadd.f32 %v2653_v26, %v12242_v8  ;;  %v10413_v28 = vsel %vm948_vm1, %v1401_v25, %v1412_v17  ;;  %v1754_v8 = vrot.slane %v12246_v37, 1 }
 0x4fb   : > { %v4095_v39 = vpop.f32.mrf.mxu0 }
 0x4fc   : > { %v10401_v6 = vadd.f32 %v4093_v40, %v3749_v62  ;;  %v10423_v62 = vld [vmem:[%s8458_s16 + $0x1c0] sm:$0xff] }
 0x4fe   : > { %12240 = vst [vmem:[#allocation120_spill] sm:$0xff] %v10401_v6 }
 0x4ff   : > { %v3047_v47 = vpop.f32.mrf.mxu2 }
 0x500   : > { %v3228_v52 = vadd.f32 %v3047_v47, %v2654_v16  ;;  %v3569_v56 = vpop.f32.mrf.mxu3 }
 0x501   : > { %v2656_v21 = vpop.f32.mrf.mxu1 }
 0x502   : > { %v3750_v36 = vadd.f32 %v3569_v56, %v3228_v52  ;;  %v2657_v26 = vadd.f32 %v2656_v21, %v12245_v1  ;;  %v11729_v56 = vshrl.u32 %v10423_v62, 16  ;;  %v11732_v52 = vshll.u32 %v10423_v62, 16 }
 0x503   : > { %v4098_v40 = vpop.f32.mrf.mxu0  ;;  %v12248_v21 = vshrl.u32 %v10305_v2, 16 }
 0x504   : > { %2695 = vmatmul.bf16.gmra.mxu1 %v10295_v24  ;;  %3089 = vmatmul.bf16.gmra.mxu2 %v10410_v54  ;;  %v10417_v32 = vadd.f32 %v4095_v39, %v3750_v36  ;;  %v1417_v47 = vrot.slane %v11729_v56, 7 }
 0x505   : > { %3611 = vmatmul.bf16.gmra.mxu3 %v10413_v28  ;;  %v1755_v1 = vor.u32 %v1754_v8, %v12248_v21 }
 0x506   : > { %12244 = vst [vmem:[#allocation229_spill] sm:$0xff] %v10417_v32  ;;  %4137 = vmatmul.bf16.gmra.mxu0 %v10395_v48 }
 0x507   : > { %v3050_v20 = vpop.f32.mrf.mxu2 }
 0x508   : > { %v3229_v63 = vadd.f32 %v3050_v20, %v2657_v26  ;;  %v3572_v25 = vpop.f32.mrf.mxu3  ;;  %v1756_v26 = vrot.slane %v12249_v19, 1  ;;  %v12250_v20 = vld [vmem:[#allocation130_spill] sm:$0xff] }
 0x509   : > { %v2658_v16 = vpop.f32.mrf.mxu1 }
 0x50a   : > { %v3751_v17 = vadd.f32 %v3572_v25, %v3229_v63  ;;  %v2659_v32 = vadd.f32 %v2658_v16, %v12250_v20  ;;  %v1420_v63 = vor.u32 %v11732_v52, %v1417_v47  ;;  %v10441_v54 = vsel %vm1599_vm4, %v1755_v1, %v1756_v26  ;;  %v10455_v16 = vld [vmem:[%s8458_s16 + $0x1c8] sm:$0xff] }
 0x50b   : > { %v4100_v39 = vpop.f32.mrf.mxu0  ;;  %12251 = vst [vmem:[#allocation130_spill] sm:$0xff] %v10441_v54  ;;  %v12285_v4 = vshrl.u32 %v10455_v16, 16 }
 0x50c   : > { %v10431_v36 = vadd.f32 %v4098_v40, %v3751_v17  ;;  %v10445_v2 = vsel %vm8744_vm3, 0, %v1420_v63 }
 0x50e   : > { %12247 = vst [vmem:[#allocation127_spill] sm:$0xff] %v10431_v36 }
 0x50f   : > { %v3052_v25 = vpop.f32.mrf.mxu2 }
 0x510   : > { %v3230_v37 = vadd.f32 %v3052_v25, %v2659_v32  ;;  %v3574_v6 = vpop.f32.mrf.mxu3  ;;  %v12253_v32 = vld [vmem:[#allocation32_spill] sm:$0xff] }
 0x511   : > { %v2661_v56 = vpop.f32.mrf.mxu1 }
 0x512   : > { %v3752_v40 = vadd.f32 %v3574_v6, %v3230_v37  ;;  %v2662_v8 = vadd.f32 %v2661_v56, %v12253_v32  ;;  %v11736_v6 = vshrl.u32 %v10455_v16, 16  ;;  %v12256_v32 = vshll.u32 %v10366_v34, 16 }
 0x513   : > { %v4103_v17 = vpop.f32.mrf.mxu0 }
 0x514   : > { %2700 = vmatmul.bf16.gmra.mxu1 %v10327_v59  ;;  %3094 = vmatmul.bf16.gmra.mxu2 %v10441_v54  ;;  %v10449_v19 = vadd.f32 %v4100_v39, %v3752_v40  ;;  %v1424_v39 = vrot.slane %v11736_v6, 7  ;;  %v11738_v40 = vshll.u32 %v10455_v16, 16  ;;  %v1759_v36 = vrot.slane %v12256_v32, 1  ;;  %v12257_v54 = vld [vmem:[#allocation35_spill] sm:$0xff] }
 0x515   : > { %3616 = vmatmul.bf16.gmra.mxu3 %v10445_v2 }
 0x516   : > { %12252 = vst [vmem:[#allocation230_spill] sm:$0xff] %v10449_v19  ;;  %4142 = vmatmul.bf16.gmra.mxu0 %v10423_v62  ;;  %v12255_v19 = vshrl.u32 %v10337_v38, 16 }
 0x517   : > { %v3055_v21 = vpop.f32.mrf.mxu2 }
 0x518   : > { %v3231_v1 = vadd.f32 %v3055_v21, %v2662_v8  ;;  %v3577_v20 = vpop.f32.mrf.mxu3  ;;  %v1758_v56 = vor.u32 %v1756_v26, %v12255_v19  ;;  %v1427_v8 = vor.u32 %v11738_v40, %v1424_v39  ;;  %v10484_v19 = vld [vmem:[%s8458_s16 + $0x1d0] sm:$0xff]  ;;  %v12262_v40 = vshrl.u32 %v10366_v34, 16 }
 0x519   : > { %v2663_v63 = vpop.f32.mrf.mxu1 }
 0x51a   : > { %v3753_v25 = vadd.f32 %v3577_v20, %v3231_v1  ;;  %v2664_v59 = vadd.f32 %v2663_v63, %v12257_v54  ;;  %v10471_v24 = vsel %vm1599_vm4, %v1758_v56, %v1759_v36  ;;  %v10474_v38 = vsel %vm948_vm1, %v1417_v47, %v1427_v8 }
 0x51b   : > { %v4105_v37 = vpop.f32.mrf.mxu0  ;;  %12258 = vst [vmem:[#allocation35_spill] sm:$0xff] %v10471_v24  ;;  %v11741_v63 = vshrl.u32 %v10484_v19, 16 }
 0x51c   : > { %v10461_v52 = vadd.f32 %v4103_v17, %v3753_v25 }
 0x51e   : > { %12254 = vst [vmem:[#allocation32_spill] sm:$0xff] %v10461_v52  ;;  %v12264_v52 = vld [vmem:[#allocation41_spill] sm:$0xff] }
 0x51f   : > { %v3057_v21 = vpop.f32.mrf.mxu2 }
 0x520   : > { %v3232_v1 = vadd.f32 %v3057_v21, %v2664_v59  ;;  %v3579_v20 = vpop.f32.mrf.mxu3  ;;  %v12260_v59 = vld [vmem:[#allocation38_spill] sm:$0xff] }
 0x521   : > { %v2666_v6 = vpop.f32.mrf.mxu1 }
 0x522   : > { %v3754_v17 = vadd.f32 %v3579_v20, %v3232_v1  ;;  %v2667_v26 = vadd.f32 %v2666_v6, %v12260_v59  ;;  %v11743_v20 = vshll.u32 %v10484_v19, 16  ;;  %v1761_v6 = vor.u32 %v1759_v36, %v12262_v40  ;;  %v10513_v40 = vld [vmem:[%s8458_s16 + $0x1d8] sm:$0xff] }
 0x523   : > { %v4108_v25 = vpop.f32.mrf.mxu0  ;;  %v12263_v59 = vshll.u32 %v10395_v48, 16 }
 0x524   : > { %2705 = vmatmul.bf16.gmra.mxu1 %v10356_v12  ;;  %3099 = vmatmul.bf16.gmra.mxu2 %v10471_v24  ;;  %v10478_v54 = vadd.f32 %v4105_v37, %v3754_v17  ;;  %v1432_v37 = vrot.slane %v11741_v63, 7 }
 0x525   : > { %3621 = vmatmul.bf16.gmra.mxu3 %v10474_v38 }
 0x526   : > { %12259 = vst [vmem:[#allocation231_spill] sm:$0xff] %v10478_v54  ;;  %4147 = vmatmul.bf16.gmra.mxu0 %v10455_v16  ;;  %v1762_v54 = vrot.slane %v12263_v59, 1 }
 0x527   : > { %v3060_v56 = vpop.f32.mrf.mxu2 }
 0x528   : > { %v3233_v32 = vadd.f32 %v3060_v56, %v2667_v26  ;;  %v3582_v47 = vpop.f32.mrf.mxu3  ;;  %v1435_v26 = vor.u32 %v11743_v20, %v1432_v37  ;;  %v10500_v12 = vsel %vm1599_vm4, %v1761_v6, %v1762_v54  ;;  %v12270_v20 = vld [vmem:[#allocation47_spill] sm:$0xff] }
 0x529   : > { %v2668_v8 = vpop.f32.mrf.mxu1  ;;  %12265 = vst [vmem:[#allocation41_spill] sm:$0xff] %v10500_v12 }
 0x52a   : > { %v3755_v21 = vadd.f32 %v3582_v47, %v3233_v32  ;;  %v2669_v24 = vadd.f32 %v2668_v8, %v12264_v52  ;;  %v10503_v34 = vsel %vm948_vm1, %v1424_v39, %v1435_v26  ;;  %v11746_v8 = vshrl.u32 %v10513_v40, 16 }
 0x52b   : > { %v4110_v1 = vpop.f32.mrf.mxu0 }
 0x52c   : > { %v10490_v17 = vadd.f32 %v4108_v25, %v3755_v21 }
 0x52e   : > { %12261 = vst [vmem:[#allocation38_spill] sm:$0xff] %v10490_v17 }
 0x52f   : > { %v3062_v56 = vpop.f32.mrf.mxu2 }
 0x530   : > { %v3234_v32 = vadd.f32 %v3062_v56, %v2669_v24  ;;  %v3584_v47 = vpop.f32.mrf.mxu3  ;;  %v12267_v24 = vld [vmem:[#allocation44_spill] sm:$0xff] }
 0x531   : > { %v2671_v63 = vpop.f32.mrf.mxu1 }
 0x532   : > { %v3756_v25 = vadd.f32 %v3584_v47, %v3234_v32  ;;  %v2672_v36 = vadd.f32 %v2671_v63, %v12267_v24  ;;  %v11748_v47 = vshll.u32 %v10513_v40, 16  ;;  %v12269_v63 = vshrl.u32 %v10395_v48, 16  ;;  %v10534_v48 = vld [vmem:[%s8458_s16 + $0x1e0] sm:$0xff] }
 0x533   : > { %v4113_v21 = vpop.f32.mrf.mxu0  ;;  %12272 = vst [vmem:[#allocation233_spill] sm:$0xff] %v10534_v48 }
 0x534   : > { %2710 = vmatmul.bf16.gmra.mxu1 %v10385_v35  ;;  %3104 = vmatmul.bf16.gmra.mxu2 %v10500_v12  ;;  %v10507_v52 = vadd.f32 %v4110_v1, %v3756_v25  ;;  %v1440_v1 = vrot.slane %v11746_v8, 7  ;;  %v1764_v24 = vor.u32 %v1762_v54, %v12269_v63 }
 0x535   : > { %3626 = vmatmul.bf16.gmra.mxu3 %v10503_v34 }
 0x536   : > { %12266 = vst [vmem:[#allocation232_spill] sm:$0xff] %v10507_v52  ;;  %4152 = vmatmul.bf16.gmra.mxu0 %v10484_v19  ;;  %v10528_v12 = vsel %vm8843_vm6, %v1764_v24, 0 }
 0x537   : > { %v3065_v6 = vpop.f32.mrf.mxu2  ;;  %12271 = vst [vmem:[#allocation47_spill] sm:$0xff] %v10528_v12 }
 0x538   : > { %v3235_v59 = vadd.f32 %v3065_v6, %v2672_v36  ;;  %v3587_v39 = vpop.f32.mrf.mxu3  ;;  %v1443_v36 = vor.u32 %v11748_v47, %v1440_v1  ;;  %v12275_v1 = vshll.u32 %v10423_v62, 16  ;;  %v12279_v47 = vld [vmem:[#allocation53_spill] sm:$0xff] }
 0x539   : > { %v2673_v26 = vpop.f32.mrf.mxu1 }
 0x53a   : > { %v3757_v56 = vadd.f32 %v3587_v39, %v3235_v59  ;;  %v2674_v52 = vadd.f32 %v2673_v26, %v12270_v20  ;;  %v12274_v20 = vld [vmem:[#allocation50_spill] sm:$0xff]  ;;  %v1765_v63 = vrot.slane %v12275_v1, 1 }
 0x53b   : > { %v4115_v32 = vpop.f32.mrf.mxu0 }
 0x53c   : > { %v10519_v25 = vadd.f32 %v4113_v21, %v3757_v56  ;;  %v10531_v21 = vsel %vm948_vm1, %v1432_v37, %v1443_v36 }
 0x53e   : > { %12268 = vst [vmem:[#allocation44_spill] sm:$0xff] %v10519_v25 }
 0x53f   : > { %v3067_v6 = vpop.f32.mrf.mxu2 }
 0x540   : > { %v3236_v17 = vadd.f32 %v3067_v6, %v2674_v52  ;;  %v3589_v59 = vpop.f32.mrf.mxu3 }
 0x541   : > { %v2676_v39 = vpop.f32.mrf.mxu1 }
 0x542   : > { %v3758_v8 = vadd.f32 %v3589_v59, %v3236_v17  ;;  %v2677_v52 = vadd.f32 %v2676_v39, %v12274_v20  ;;  %v11751_v17 = vshrl.u32 %v10534_v48, 16  ;;  %v12277_v39 = vshrl.u32 %v10423_v62, 16 }
 0x543   : > { %v4118_v35 = vpop.f32.mrf.mxu0 }
 0x544   : > { %2715 = vmatmul.bf16.gmra.mxu1 %v10413_v28  ;;  %3109 = vmatmul.bf16.gmra.mxu2 %v10528_v12  ;;  %v10538_v54 = vadd.f32 %v4115_v32, %v3758_v8  ;;  %v1448_v8 = vrot.slane %v11751_v17, 7  ;;  %v11752_v32 = vshll.u32 %v10534_v48, 16  ;;  %v1766_v20 = vor.u32 %v1765_v63, %v12277_v39  ;;  %v10566_v63 = vld [vmem:[%s8458_s16 + $0x1e8] sm:$0xff] }
 0x545   : > { %3631 = vmatmul.bf16.gmra.mxu3 %v10531_v21  ;;  %12281 = vst [vmem:[#allocation235_spill] sm:$0xff] %v10566_v63 }
 0x546   : > { %12273 = vst [vmem:[#allocation234_spill] sm:$0xff] %v10538_v54  ;;  %4157 = vmatmul.bf16.gmra.mxu0 %v10513_v40 }
 0x547   : > { %v3070_v26 = vpop.f32.mrf.mxu2 }
 0x548   : > { %v3237_v56 = vadd.f32 %v3070_v26, %v2677_v52  ;;  %v3592_v37 = vpop.f32.mrf.mxu3  ;;  %v12278_v52 = vshll.u32 %v10455_v16, 16 }
 0x549   : > { %v2678_v24 = vpop.f32.mrf.mxu1 }
 0x54a   : > { %v3759_v36 = vadd.f32 %v3592_v37, %v3237_v56  ;;  %v1767_v26 = vrot.slane %v12278_v52, 1  ;;  %v2679_v54 = vadd.f32 %v2678_v24, %v12279_v47  ;;  %v1451_v56 = vor.u32 %v11752_v32, %v1448_v8 }
 0x54b   : > { %v4120_v6 = vpop.f32.mrf.mxu0 }
 0x54c   : > { %v10549_v59 = vadd.f32 %v4118_v35, %v3759_v36  ;;  %v10559_v17 = vsel %vm1599_vm4, %v1766_v20, %v1767_v26  ;;  %v10563_v62 = vsel %vm8744_vm3, 0, %v1451_v56 }
 0x54d   : > { %12280 = vst [vmem:[#allocation53_spill] sm:$0xff] %v10563_v62 }
 0x54e   : > { %12276 = vst [vmem:[#allocation50_spill] sm:$0xff] %v10549_v59  ;;  %v12287_v59 = vld [vmem:[#allocation59_spill] sm:$0xff] }
 0x54f   : > { %v3072_v37 = vpop.f32.mrf.mxu2 }
 0x550   : > { %v3238_v1 = vadd.f32 %v3072_v37, %v2679_v54  ;;  %v3594_v25 = vpop.f32.mrf.mxu3  ;;  %v12283_v54 = vld [vmem:[#allocation56_spill] sm:$0xff] }
 0x551   : > { %v2681_v12 = vpop.f32.mrf.mxu1 }
 0x552   : > { %v3760_v35 = vadd.f32 %v3594_v25, %v3238_v1  ;;  %v2682_v24 = vadd.f32 %v2681_v12, %v12283_v54  ;;  %v11757_v25 = vshrl.u32 %v10566_v63, 16  ;;  %v12286_v12 = vshll.u32 %v10484_v19, 16 }
 0x553   : > { %v4123_v36 = vpop.f32.mrf.mxu0 }
 0x554   : > { %2720 = vmatmul.bf16.gmra.mxu1 %v10445_v2  ;;  %3114 = vmatmul.bf16.gmra.mxu2 %v10559_v17  ;;  %v10570_v47 = vadd.f32 %v4120_v6, %v3760_v35  ;;  %v1455_v32 = vrot.slane %v11757_v25, 7  ;;  %v11758_v6 = vshll.u32 %v10566_v63, 16  ;;  %v1770_v54 = vrot.slane %v12286_v12, 1 }
 0x555   : > { %3636 = vmatmul.bf16.gmra.mxu3 %v10563_v62 }
 0x556   : > { %12282 = vst [vmem:[#allocation236_spill] sm:$0xff] %v10570_v47  ;;  %4162 = vmatmul.bf16.gmra.mxu0 %v10534_v48  ;;  %v1769_v47 = vor.u32 %v1767_v26, %v12285_v4  ;;  %v10595_v4 = vld [vmem:[%s8458_s16 + $0x1f0] sm:$0xff]  ;;  %v12291_v26 = vld [vmem:[#allocation62_spill] sm:$0xff] }
 0x557   : > { %v3075_v39 = vpop.f32.mrf.mxu2  ;;  %12289 = vst [vmem:[#allocation237_spill] sm:$0xff] %v10595_v4 }
 0x558   : > { %v3239_v20 = vadd.f32 %v3075_v39, %v2682_v24  ;;  %v3597_v52 = vpop.f32.mrf.mxu3  ;;  %v1458_v39 = vor.u32 %v11758_v6, %v1455_v32  ;;  %v10589_v25 = vsel %vm1599_vm4, %v1769_v47, %v1770_v54  ;;  %v12293_v6 = vshrl.u32 %v10484_v19, 16 }
 0x559   : > { %v2683_v56 = vpop.f32.mrf.mxu1 }
 0x55a   : > { %v3761_v37 = vadd.f32 %v3597_v52, %v3239_v20  ;;  %v2684_v24 = vadd.f32 %v2683_v56, %v12287_v59  ;;  %v10592_v16 = vsel %vm948_vm1, %v1448_v8, %v1458_v39 }
 0x55b   : > { %v4125_v1 = vpop.f32.mrf.mxu0  ;;  %12288 = vst [vmem:[#allocation59_spill] sm:$0xff] %v10592_v16 }
 0x55c   : > { %v10579_v35 = vadd.f32 %v4123_v36, %v3761_v37 }
 0x55e   : > { %12284 = vst [vmem:[#allocation56_spill] sm:$0xff] %v10579_v35  ;;  %v12295_v35 = vld [vmem:[#allocation65_spill] sm:$0xff] }
 0x55f   : > { %v3077_v20 = vpop.f32.mrf.mxu2 }
 0x560   : > { %v3240_v52 = vadd.f32 %v3077_v20, %v2684_v24  ;;  %v3599_v62 = vpop.f32.mrf.mxu3 }
 0x561   : > { %v2686_v48 = vpop.f32.mrf.mxu1 }
 0x562   : > { %v3762_v36 = vadd.f32 %v3599_v62, %v3240_v52  ;;  %v2687_v47 = vadd.f32 %v2686_v48, %v12291_v26  ;;  %v11762_v62 = vshrl.u32 %v10595_v4, 16  ;;  %v12294_v48 = vshll.u32 %v10513_v40, 16 }
 0x563   : > { %v4128_v37 = vpop.f32.mrf.mxu0 }
 0x564   : > { %2725 = vmatmul.bf16.gmra.mxu1 %v10474_v38  ;;  %3119 = vmatmul.bf16.gmra.mxu2 %v10589_v25  ;;  %v10599_v59 = vadd.f32 %v4125_v1, %v3762_v36  ;;  %v1463_v52 = vrot.slane %v11762_v62, 7  ;;  %v11763_v1 = vshll.u32 %v10595_v4, 16  ;;  %v1773_v26 = vrot.slane %v12294_v48, 1 }
 0x565   : > { %3641 = vmatmul.bf16.gmra.mxu3 %v10592_v16 }
 0x566   : > { %12290 = vst [vmem:[#allocation238_spill] sm:$0xff] %v10599_v59  ;;  %4167 = vmatmul.bf16.gmra.mxu0 %v10566_v63  ;;  %v1772_v59 = vor.u32 %v1770_v54, %v12293_v6  ;;  %v10624_v6 = vld [vmem:[%s8458_s16 + $0x1f8] sm:$0xff] }
 0x567   : > { %v3080_v56 = vpop.f32.mrf.mxu2  ;;  %v12298_v54 = vld [vmem:[#allocation68_spill] sm:$0xff] }
 0x568   : > { %v3241_v12 = vadd.f32 %v3080_v56, %v2687_v47  ;;  %v3602_v8 = vpop.f32.mrf.mxu3  ;;  %v1466_v56 = vor.u32 %v11763_v1, %v1463_v52  ;;  %v10618_v62 = vsel %vm1599_vm4, %v1772_v59, %v1773_v26  ;;  %v12300_v1 = vshrl.u32 %v10513_v40, 16 }
 0x569   : > { %v2688_v24 = vpop.f32.mrf.mxu1 }
 0x56a   : > { %v3763_v39 = vadd.f32 %v3602_v8, %v3241_v12  ;;  %v2689_v47 = vadd.f32 %v2688_v24, %v12295_v35  ;;  %v10621_v19 = vsel %vm948_vm1, %v1455_v32, %v1466_v56 }
 0x56b   : > { %v4130_v20 = vpop.f32.mrf.mxu0  ;;  %12296 = vst [vmem:[#allocation65_spill] sm:$0xff] %v10621_v19 }
 0x56c   : > { %v10608_v36 = vadd.f32 %v4128_v37, %v3763_v39 }
 0x56e   : > { %12292 = vst [vmem:[#allocation62_spill] sm:$0xff] %v10608_v36  ;;  %v12301_v36 = vld [vmem:[#allocation71_spill] sm:$0xff] }
 0x56f   : > { %v3082_v12 = vpop.f32.mrf.mxu2 }
 0x570   : > { %v3242_v8 = vadd.f32 %v3082_v12, %v2689_v47  ;;  %v3604_v16 = vpop.f32.mrf.mxu3 }
 0x571   : > { %v2691_v63 = vpop.f32.mrf.mxu1 }
 0x572   : > { %v3764_v37 = vadd.f32 %v3604_v16, %v3242_v8  ;;  %v2692_v59 = vadd.f32 %v2691_v63, %v12298_v54  ;;  %v11765_v16 = vshrl.u32 %v10624_v6, 16 }
 0x573   : > { %v4133_v39 = vpop.f32.mrf.mxu0 }
 0x574   : > { %2730 = vmatmul.bf16.gmra.mxu1 %v10503_v34  ;;  %3124 = vmatmul.bf16.gmra.mxu2 %v10618_v62  ;;  %v10628_v35 = vadd.f32 %v4130_v20, %v3764_v37  ;;  %v1471_v8 = vrot.slane %v11765_v16, 7  ;;  %v11768_v20 = vshll.u32 %v10624_v6, 16 }
 0x575   : > { %3646 = vmatmul.bf16.gmra.mxu3 %v10621_v19 }
 0x576   : > { %12297 = vst [vmem:[#allocation239_spill] sm:$0xff] %v10628_v35  ;;  %4172 = vmatmul.bf16.gmra.mxu0 %v10595_v4  ;;  %v1775_v35 = vor.u32 %v1773_v26, %v12300_v1  ;;  %v1474_v54 = vor.u32 %v11768_v20, %v1471_v8  ;;  %v12304_v1 = vld [vmem:[#allocation74_spill] sm:$0xff] }
 0x577   : > { %v3085_v24 = vpop.f32.mrf.mxu2 }
 0x578   : > { %v3243_v48 = vadd.f32 %v3085_v24, %v2692_v59  ;;  %v3607_v32 = vpop.f32.mrf.mxu3 }
 0x579   : > { %v2693_v47 = vpop.f32.mrf.mxu1 }
 0x57a   : > { %v3765_v56 = vadd.f32 %v3607_v32, %v3243_v48  ;;  %v2694_v63 = vadd.f32 %v2693_v47, %v12301_v36  ;;  %v10646_v32 = vsel %vm8843_vm6, %v1775_v35, 0 }
 0x57b   : > { %v4135_v12 = vpop.f32.mrf.mxu0 }
 0x57c   : > { %v10637_v37 = vadd.f32 %v4133_v39, %v3765_v56  ;;  %v10649_v39 = vsel %vm948_vm1, %v1463_v52, %v1474_v54 }
 0x57d   : > { %12302 = vst [vmem:[#allocation71_spill] sm:$0xff] %v10649_v39 }
 0x57e   : > { %12299 = vst [vmem:[#allocation68_spill] sm:$0xff] %v10637_v37  ;;  %v12307_v37 = vld [vmem:[#allocation104_spill] sm:$0xff] }
 0x57f   : > { %v3087_v59 = vpop.f32.mrf.mxu2 }
 0x580   : > { %v3244_v24 = vadd.f32 %v3087_v59, %v2694_v63  ;;  %v3609_v19 = vpop.f32.mrf.mxu3  ;;  %v12306_v63 = vld [vmem:[#allocation78_spill] sm:$0xff] }
 0x581   : > { %v2696_v48 = vpop.f32.mrf.mxu1 }
 0x582   : > { %v3766_v16 = vadd.f32 %v3609_v19, %v3244_v24  ;;  %v2697_v36 = vadd.f32 %v2696_v48, %v12304_v1  ;;  %v12308_v48 = vld [vmem:[#allocation105_spill] sm:$0xff] }
 0x583   : > { %v4138_v4 = vpop.f32.mrf.mxu0 }
 0x584   : > { %2735 = vmatmul.bf16.gmra.mxu1 %v10531_v21  ;;  %3129 = vmatmul.bf16.gmra.mxu2 %v10646_v32  ;;  %v10653_v40 = vadd.f32 %v4135_v12, %v3766_v16 }
 0x585   : > { %3651 = vmatmul.bf16.gmra.mxu3 %v10649_v39  ;;  %v12313_v39 = vld [vmem:[#allocation112_spill] sm:$0xff] }
 0x586   : > { %12303 = vst [vmem:[#allocation240_spill] sm:$0xff] %v10653_v40  ;;  %4177 = vmatmul.bf16.gmra.mxu0 %v10624_v6 }
 0x587   : > { %v3090_v26 = vpop.f32.mrf.mxu2 }
 0x588   : > { %v3245_v35 = vadd.f32 %v3090_v26, %v2697_v36  ;;  %v3612_v19 = vpop.f32.mrf.mxu3  ;;  %v7797_v36 = vld [vmem:[%s8458_s16 + $0x20] sm:$0xff]  ;;  %v12310_v26 = vld [vmem:[#allocation132_spill] sm:$0xff] }
 0x589   : > { %v2698_v47 = vpop.f32.mrf.mxu1 }
 0x58a   : > { %v3767_v56 = vadd.f32 %v3612_v19, %v3245_v35  ;;  %v2699_v54 = vadd.f32 %v2698_v47, %v12306_v63 }
 0x58b   : > { %v4140_v52 = vpop.f32.mrf.mxu0 }
 0x58c   : > { %v10658_v8 = vadd.f32 %v4138_v4, %v3767_v56  ;;  %v12311_v4 = vld [vmem:[#allocation81_spill] sm:$0xff] }
 0x58e   : > { %12305 = vst [vmem:[#allocation74_spill] sm:$0xff] %v10658_v8 }
 0x58f   : > { %v3092_v59 = vpop.f32.mrf.mxu2 }
 0x590   : > { %v3246_v16 = vadd.f32 %v3092_v59, %v2699_v54  ;;  %v3614_v12 = vpop.f32.mrf.mxu3 }
 0x591   : > { %v2701_v24 = vpop.f32.mrf.mxu1 }
 0x592   : > { %v3768_v20 = vadd.f32 %v3614_v12, %v3246_v16  ;;  %v2702_v35 = vadd.f32 %v2701_v24, %v12311_v4  ;;  %v7798_v4 = vld [vmem:[%s8458_s16 + $0x28] sm:$0xff] }
 0x593   : > { %v4143_v40 = vpop.f32.mrf.mxu0 }
 0x594   : > { %4384 = vmatmul.bf16.vlgmr.msra.gmra.mxu1 %v12307_v37  ;;  %4906 = vmatmul.bf16.vlgmr.msra.gmra.mxu2 %v12308_v48  ;;  %v10663_v1 = vadd.f32 %v4140_v52, %v3768_v20  ;;  %v12312_v37 = vld [vmem:[#allocation84_spill] sm:$0xff] }
 0x595   : > { %5432 = vmatmul.bf16.vlgmr.msra.gmra.mxu3 %v7797_v36 }
 0x596   : > { %12309 = vst [vmem:[#allocation78_spill] sm:$0xff] %v10663_v1  ;;  %5954 = vmatmul.bf16.vlgmr.msra.gmra.mxu0 %v12310_v26 }
 0x597   : > { %v3095_v19 = vpop.f32.mrf.mxu2 }
 0x598   : > { %v3247_v47 = vadd.f32 %v3095_v19, %v2702_v35  ;;  %v3617_v56 = vpop.f32.mrf.mxu3 }
 0x599   : > { %v2703_v63 = vpop.f32.mrf.mxu1 }
 0x59a   : > { %v3769_v54 = vadd.f32 %v3617_v56, %v3247_v47  ;;  %v2704_v12 = vadd.f32 %v2703_v63, %v12312_v37 }
 0x59b   : > { %v4145_v59 = vpop.f32.mrf.mxu0 }
 0x59c   : > { %v10668_v16 = vadd.f32 %v4143_v40, %v3769_v54  ;;  %v12315_v40 = vld [vmem:[#allocation87_spill] sm:$0xff] }
 0x59f   : > { %v3097_v48 = vpop.f32.mrf.mxu2 }
 0x5a0   : > { %v3248_v20 = vadd.f32 %v3097_v48, %v2704_v12  ;;  %v3619_v52 = vpop.f32.mrf.mxu3 }
 0x5a1   : > { %v2706_v1 = vpop.f32.mrf.mxu1 }
 0x5a2   : > { %v3770_v36 = vadd.f32 %v3619_v52, %v3248_v20  ;;  %v2707_v35 = vadd.f32 %v2706_v1, %v12315_v40  ;;  %v7799_v40 = vld [vmem:[%s8458_s16 + $0x30] sm:$0xff] }
 0x5a3   : > { %v4148_v8 = vpop.f32.mrf.mxu0 }
 0x5a4   : > { %4389 = vmatmul.bf16.gmra.mxu1 %v12313_v39  ;;  %4911 = vmatmul.bf16.gmra.mxu2 %v8934_v9  ;;  %v10673_v24 = vadd.f32 %v4145_v59, %v3770_v36  ;;  %v12316_v39 = vld [vmem:[#allocation90_spill] sm:$0xff] }
 0x5a5   : > { %5437 = vmatmul.bf16.gmra.mxu3 %v7798_v4 }
 0x5a6   : > { %12314 = vst [vmem:[#allocation104_spill] sm:$0xff] %v10673_v24  ;;  %5959 = vmatmul.bf16.gmra.mxu0 %v9061_v29  ;;  %v12317_v24 = vld [vmem:[#allocation119_spill] sm:$0xff] }
 0x5a7   : > { %v3100_v19 = vpop.f32.mrf.mxu2 }
 0x5a8   : > { %v3249_v47 = vadd.f32 %v3100_v19, %v2707_v35  ;;  %v3622_v56 = vpop.f32.mrf.mxu3 }
 0x5a9   : > { %v2708_v63 = vpop.f32.mrf.mxu1 }
 0x5aa   : > { %v3771_v54 = vadd.f32 %v3622_v56, %v3249_v47  ;;  %v2709_v48 = vadd.f32 %v2708_v63, %v12316_v39 }
 0x5ab   : > { %v4150_v37 = vpop.f32.mrf.mxu0 }
 0x5ac   : > { %v10678_v12 = vadd.f32 %v4148_v8, %v3771_v54  ;;  %v12319_v8 = vld [vmem:[#allocation93_spill] sm:$0xff] }
 0x5af   : > { %v3102_v9 = vpop.f32.mrf.mxu2 }
 0x5b0   : > { %v3250_v59 = vadd.f32 %v3102_v9, %v2709_v48  ;;  %v3624_v20 = vpop.f32.mrf.mxu3 }
 0x5b1   : > { %v2711_v52 = vpop.f32.mrf.mxu1 }
 0x5b2   : > { %v3772_v36 = vadd.f32 %v3624_v20, %v3250_v59  ;;  %v2712_v35 = vadd.f32 %v2711_v52, %v12319_v8  ;;  %v7800_v8 = vld [vmem:[%s8458_s16 + $0x38] sm:$0xff] }
 0x5b3   : > { %v4153_v4 = vpop.f32.mrf.mxu0 }
 0x5b4   : > { %4394 = vmatmul.bf16.gmra.mxu1 %v12317_v24  ;;  %4916 = vmatmul.bf16.gmra.mxu2 %v8970_v13  ;;  %v10683_v1 = vadd.f32 %v4150_v37, %v3772_v36  ;;  %v12320_v24 = vld [vmem:[#allocation96_spill] sm:$0xff] }
 0x5b5   : > { %5442 = vmatmul.bf16.gmra.mxu3 %v7799_v40 }
 0x5b6   : > { %12318 = vst [vmem:[#allocation105_spill] sm:$0xff] %v10683_v1  ;;  %5964 = vmatmul.bf16.gmra.mxu0 %v9087_v42  ;;  %v12321_v1 = vld [vmem:[#allocation126_spill] sm:$0xff] }
 0x5b7   : > { %v3105_v19 = vpop.f32.mrf.mxu2 }
 0x5b8   : > { %v3251_v47 = vadd.f32 %v3105_v19, %v2712_v35  ;;  %v3627_v56 = vpop.f32.mrf.mxu3 }
 0x5b9   : > { %v2713_v63 = vpop.f32.mrf.mxu1 }
 0x5ba   : > { %v3773_v54 = vadd.f32 %v3627_v56, %v3251_v47  ;;  %v2714_v9 = vadd.f32 %v2713_v63, %v12320_v24 }
 0x5bb   : > { %v4155_v39 = vpop.f32.mrf.mxu0 }
 0x5bc   : > { %v10688_v48 = vadd.f32 %v4153_v4, %v3773_v54  ;;  %v12322_v4 = vld [vmem:[#allocation99_spill] sm:$0xff] }
 0x5bf   : > { %v3107_v13 = vpop.f32.mrf.mxu2 }
 0x5c0   : > { %v3252_v37 = vadd.f32 %v3107_v13, %v2714_v9  ;;  %v3629_v59 = vpop.f32.mrf.mxu3 }
 0x5c1   : > { %v2716_v20 = vpop.f32.mrf.mxu1 }
 0x5c2   : > { %v3774_v36 = vadd.f32 %v3629_v59, %v3252_v37  ;;  %v2717_v35 = vadd.f32 %v2716_v20, %v12322_v4  ;;  %v7801_v4 = vld [vmem:[%s8458_s16 + $0x40] sm:$0xff] }
 0x5c3   : > { %v4158_v40 = vpop.f32.mrf.mxu0 }
 0x5c4   : > { %4399 = vmatmul.bf16.gmra.mxu1 %v12321_v1  ;;  %4921 = vmatmul.bf16.gmra.mxu2 %v9005_v10  ;;  %v10693_v52 = vadd.f32 %v4155_v39, %v3774_v36  ;;  %v12323_v1 = vld [vmem:[#allocation102_spill] sm:$0xff] }
 0x5c5   : > { %5447 = vmatmul.bf16.gmra.mxu3 %v7800_v8 }
 0x5c6   : > { %5969 = vmatmul.bf16.gmra.mxu0 %v9112_v15 }
 0x5c7   : > { %v3110_v19 = vpop.f32.mrf.mxu2 }
 0x5c8   : > { %v3253_v47 = vadd.f32 %v3110_v19, %v2717_v35  ;;  %v3632_v56 = vpop.f32.mrf.mxu3 }
 0x5c9   : > { %v2718_v63 = vpop.f32.mrf.mxu1 }
 0x5ca   : > { %v3775_v54 = vadd.f32 %v3632_v56, %v3253_v47  ;;  %v2719_v13 = vadd.f32 %v2718_v63, %v12323_v1 }
 0x5cb   : > { %v4160_v24 = vpop.f32.mrf.mxu0 }
 0x5cc   : > { %v10698_v9 = vadd.f32 %v4158_v40, %v3775_v54  ;;  %v12324_v40 = vld [vmem:[#allocation107_spill] sm:$0xff] }
 0x5cf   : > { %v3112_v10 = vpop.f32.mrf.mxu2 }
 0x5d0   : > { %v3254_v39 = vadd.f32 %v3112_v10, %v2719_v13  ;;  %v3634_v37 = vpop.f32.mrf.mxu3 }
 0x5d1   : > { %v2721_v59 = vpop.f32.mrf.mxu1 }
 0x5d2   : > { %v3776_v36 = vadd.f32 %v3634_v37, %v3254_v39  ;;  %v2722_v35 = vadd.f32 %v2721_v59, %v12324_v40  ;;  %v7802_v40 = vld [vmem:[%s8458_s16 + $0x48] sm:$0xff] }
 0x5d3   : > { %v4163_v8 = vpop.f32.mrf.mxu0 }
 0x5d4   : > { %4404 = vmatmul.bf16.gmra.mxu1 %v12310_v26  ;;  %4926 = vmatmul.bf16.gmra.mxu2 %v9040_v55  ;;  %v10703_v20 = vadd.f32 %v4160_v24, %v3776_v36  ;;  %v12325_v26 = vld [vmem:[#allocation110_spill] sm:$0xff] }
 0x5d5   : > { %5452 = vmatmul.bf16.gmra.mxu3 %v7801_v4 }
 0x5d6   : > { %5974 = vmatmul.bf16.gmra.mxu0 %v9143_v41 }
 0x5d7   : > { %v3115_v19 = vpop.f32.mrf.mxu2 }
 0x5d8   : > { %v3255_v47 = vadd.f32 %v3115_v19, %v2722_v35  ;;  %v3637_v56 = vpop.f32.mrf.mxu3 }
 0x5d9   : > { %v2723_v63 = vpop.f32.mrf.mxu1 }
 0x5da   : > { %v3777_v54 = vadd.f32 %v3637_v56, %v3255_v47  ;;  %v2724_v10 = vadd.f32 %v2723_v63, %v12325_v26 }
 0x5db   : > { %v4165_v1 = vpop.f32.mrf.mxu0 }
 0x5dc   : > { %v10708_v13 = vadd.f32 %v4163_v8, %v3777_v54  ;;  %v12326_v8 = vld [vmem:[#allocation114_spill] sm:$0xff] }
 0x5df   : > { %v3117_v55 = vpop.f32.mrf.mxu2 }
 0x5e0   : > { %v3256_v24 = vadd.f32 %v3117_v55, %v2724_v10  ;;  %v3639_v39 = vpop.f32.mrf.mxu3 }
 0x5e1   : > { %v2726_v37 = vpop.f32.mrf.mxu1 }
 0x5e2   : > { %v3778_v36 = vadd.f32 %v3639_v39, %v3256_v24  ;;  %v2727_v35 = vadd.f32 %v2726_v37, %v12326_v8  ;;  %v7803_v8 = vld [vmem:[%s8458_s16 + $0x50] sm:$0xff] }
 0x5e3   : > { %v4168_v4 = vpop.f32.mrf.mxu0 }
 0x5e4   : > { %4409 = vmatmul.bf16.gmra.mxu1 %v9061_v29  ;;  %4931 = vmatmul.bf16.gmra.mxu2 %v9064_v44  ;;  %v10713_v59 = vadd.f32 %v4165_v1, %v3778_v36  ;;  %v12327_v29 = vld [vmem:[#allocation117_spill] sm:$0xff] }
 0x5e5   : > { %5457 = vmatmul.bf16.gmra.mxu3 %v7802_v40 }
 0x5e6   : > { %5979 = vmatmul.bf16.gmra.mxu0 %v9173_v50 }
 0x5e7   : > { %v3120_v19 = vpop.f32.mrf.mxu2 }
 0x5e8   : > { %v3257_v47 = vadd.f32 %v3120_v19, %v2727_v35  ;;  %v3642_v56 = vpop.f32.mrf.mxu3 }
 0x5e9   : > { %v2728_v63 = vpop.f32.mrf.mxu1 }
 0x5ea   : > { %v3779_v54 = vadd.f32 %v3642_v56, %v3257_v47  ;;  %v2729_v55 = vadd.f32 %v2728_v63, %v12327_v29 }
 0x5eb   : > { %v4170_v26 = vpop.f32.mrf.mxu0 }
 0x5ec   : > { %v10718_v10 = vadd.f32 %v4168_v4, %v3779_v54  ;;  %v12328_v4 = vld [vmem:[#allocation121_spill] sm:$0xff] }
 0x5ef   : > { %v3122_v44 = vpop.f32.mrf.mxu2 }
 0x5f0   : > { %v3258_v1 = vadd.f32 %v3122_v44, %v2729_v55  ;;  %v3644_v24 = vpop.f32.mrf.mxu3 }
 0x5f1   : > { %v2731_v39 = vpop.f32.mrf.mxu1 }
 0x5f2   : > { %v3780_v36 = vadd.f32 %v3644_v24, %v3258_v1  ;;  %v2732_v35 = vadd.f32 %v2731_v39, %v12328_v4  ;;  %v7804_v4 = vld [vmem:[%s8458_s16 + $0x58] sm:$0xff] }
 0x5f3   : > { %v4173_v40 = vpop.f32.mrf.mxu0 }
 0x5f4   : > { %4414 = vmatmul.bf16.gmra.mxu1 %v9087_v42  ;;  %4936 = vmatmul.bf16.gmra.mxu2 %v9090_v57  ;;  %v10723_v37 = vadd.f32 %v4170_v26, %v3780_v36  ;;  %v12329_v42 = vld [vmem:[#allocation124_spill] sm:$0xff] }
 0x5f5   : > { %5462 = vmatmul.bf16.gmra.mxu3 %v7803_v8 }
 0x5f6   : > { %5984 = vmatmul.bf16.gmra.mxu0 %v9202_v0 }
 0x5f7   : > { %v3125_v19 = vpop.f32.mrf.mxu2 }
 0x5f8   : > { %v3259_v47 = vadd.f32 %v3125_v19, %v2732_v35  ;;  %v3647_v56 = vpop.f32.mrf.mxu3 }
 0x5f9   : > { %v2733_v63 = vpop.f32.mrf.mxu1 }
 0x5fa   : > { %v3781_v54 = vadd.f32 %v3647_v56, %v3259_v47  ;;  %v2734_v44 = vadd.f32 %v2733_v63, %v12329_v42 }
 0x5fb   : > { %v4175_v29 = vpop.f32.mrf.mxu0 }
 0x5fc   : > { %v10728_v55 = vadd.f32 %v4173_v40, %v3781_v54  ;;  %v12330_v40 = vld [vmem:[#allocation128_spill] sm:$0xff] }
 0x5ff   : > { %v3127_v57 = vpop.f32.mrf.mxu2 }
 0x600   : > { %v3260_v26 = vadd.f32 %v3127_v57, %v2734_v44  ;;  %v3649_v1 = vpop.f32.mrf.mxu3 }
 0x601   : > { %v2736_v24 = vpop.f32.mrf.mxu1 }
 0x602   : > { %v3782_v36 = vadd.f32 %v3649_v1, %v3260_v26  ;;  %v2737_v35 = vadd.f32 %v2736_v24, %v12330_v40  ;;  %v7805_v40 = vld [vmem:[%s8458_s16 + $0x60] sm:$0xff] }
 0x603   : > { %v4178_v8 = vpop.f32.mrf.mxu0 }
 0x604   : > { %4419 = vmatmul.bf16.gmra.mxu1 %v9112_v15  ;;  %4941 = vmatmul.bf16.gmra.mxu2 %v9115_v51  ;;  %v10733_v39 = vadd.f32 %v4175_v29, %v3782_v36  ;;  %v12331_v15 = vld [vmem:[#allocation131_spill] sm:$0xff] }
 0x605   : > { %5467 = vmatmul.bf16.gmra.mxu3 %v7804_v4 }
 0x606   : > { %5989 = vmatmul.bf16.gmra.mxu0 %v9230_v22 }
 0x607   : > { %v3130_v19 = vpop.f32.mrf.mxu2 }
 0x608   : > { %v3261_v47 = vadd.f32 %v3130_v19, %v2737_v35  ;;  %v3652_v56 = vpop.f32.mrf.mxu3 }
 0x609   : > { %v2738_v63 = vpop.f32.mrf.mxu1 }
 0x60a   : > { %v3783_v54 = vadd.f32 %v3652_v56, %v3261_v47  ;;  %v2739_v57 = vadd.f32 %v2738_v63, %v12331_v15 }
 0x60b   : > { %v4180_v42 = vpop.f32.mrf.mxu0 }
 0x60c   : > { %v10738_v44 = vadd.f32 %v4178_v8, %v3783_v54  ;;  %v10749_v54 = vld [vmem:[#allocation10] ss:$0 sm:$0xff] }
 0x60f   : > { %v3132_v51 = vpop.f32.mrf.mxu2 }
 0x610   : > { %v3262_v29 = vadd.f32 %v3132_v51, %v2739_v57  ;;  %v3654_v26 = vpop.f32.mrf.mxu3 }
 0x611   : > { %v4385_v1 = vpop.f32.mrf.mxu1 }
 0x612   : > { %v3784_v36 = vadd.f32 %v3654_v26, %v3262_v29  ;;  %v4705_v8 = vadd.f32 %v4385_v1, %v9051_v61 }
 0x613   : > { %v5955_v4 = vpop.f32.mrf.mxu0 }
 0x614   : > { %4424 = vmatmul.bf16.gmra.mxu1 %v9143_v41  ;;  %4946 = vmatmul.bf16.gmra.mxu2 %v9147_v30  ;;  %v10743_v24 = vadd.f32 %v4180_v42, %v3784_v36  ;;  %v12332_v42 = vld [vmem:[#allocation133_spill] sm:$0xff] }
 0x615   : > { %5472 = vmatmul.bf16.gmra.mxu3 %v7805_v40 }
 0x616   : > { %5994 = vmatmul.bf16.gmra.mxu0 %v9261_v43 }
 0x617   : > { %v4907_v35 = vpop.f32.mrf.mxu2 }
 0x618   : > { %v5227_v19 = vadd.f32 %v4907_v35, %v4705_v8  ;;  %v5433_v47 = vpop.f32.mrf.mxu3 }
 0x619   : > { %v4387_v56 = vpop.f32.mrf.mxu1 }
 0x61a   : > { %v5753_v63 = vadd.f32 %v5433_v47, %v5227_v19  ;;  %v4706_v57 = vadd.f32 %v4387_v56, %v12332_v42 }
 0x61b   : > { %v5957_v41 = vpop.f32.mrf.mxu0 }
 0x61c   : > { %v6275_v15 = vadd.f32 %v5955_v4, %v5753_v63  ;;  %v7806_v4 = vld [vmem:[%s8458_s16 + $0x68] sm:$0xff] }
 0x61e   : > { %v6406_v30 = vadd.f32 %v10749_v54, %v6275_v15 }
 0x61f   : > { %v4909_v51 = vpop.f32.mrf.mxu2 }
 0x620   : > { %6534 = vst [vmem:[%s10753_s17] sm:$0xff] %v6406_v30  ;;  %v5228_v61 = vadd.f32 %v4909_v51, %v4706_v57  ;;  %v5435_v29 = vpop.f32.mrf.mxu3  ;;  %v12333_v30 = vld [vmem:[#allocation134_spill] sm:$0xff] }
 0x621   : > { %v4390_v26 = vpop.f32.mrf.mxu1 }
 0x622   : > { %v5754_v1 = vadd.f32 %v5435_v29, %v5228_v61  ;;  %v4707_v35 = vadd.f32 %v4390_v26, %v9077_v31 }
 0x623   : > { %v5960_v36 = vpop.f32.mrf.mxu0 }
 0x624   : > { %v6276_v40 = vadd.f32 %v5957_v41, %v5754_v1  ;;  %4429 = vmatmul.bf16.gmra.mxu1 %v9173_v50  ;;  %4951 = vmatmul.bf16.gmra.mxu2 %v9176_v23 }
 0x625   : > { %5477 = vmatmul.bf16.gmra.mxu3 %v7806_v4  ;;  %v12334_v4 = vld [vmem:[#allocation135_spill] sm:$0xff] }
 0x626   : > { %5999 = vmatmul.bf16.gmra.mxu0 %v9291_v11  ;;  %v6407_v8 = vadd.f32 %v10749_v54, %v6276_v40  ;;  %v7807_v40 = vld [vmem:[%s8458_s16 + $0x70] sm:$0xff] }
 0x627   : > { %v4912_v19 = vpop.f32.mrf.mxu2 }
 0x628   : > { %6535 = vst [vmem:[%s10753_s17 + $0x8] sm:$0xff] %v6407_v8  ;;  %v5229_v47 = vadd.f32 %v4912_v19, %v4707_v35  ;;  %v5438_v56 = vpop.f32.mrf.mxu3 }
 0x629   : > { %v4392_v63 = vpop.f32.mrf.mxu1 }
 0x62a   : > { %v5755_v41 = vadd.f32 %v5438_v56, %v5229_v47  ;;  %v4708_v42 = vadd.f32 %v4392_v63, %v12333_v30 }
 0x62b   : > { %v5962_v15 = vpop.f32.mrf.mxu0 }
 0x62c   : > { %v6277_v50 = vadd.f32 %v5960_v36, %v5755_v41 }
 0x62e   : > { %v6408_v23 = vadd.f32 %v10749_v54, %v6277_v50 }
 0x62f   : > { %v4914_v57 = vpop.f32.mrf.mxu2 }
 0x630   : > { %6536 = vst [vmem:[%s10753_s17 + $0x10] sm:$0xff] %v6408_v23  ;;  %v5230_v51 = vadd.f32 %v4914_v57, %v4708_v42  ;;  %v5440_v61 = vpop.f32.mrf.mxu3 }
 0x631   : > { %v4395_v29 = vpop.f32.mrf.mxu1 }
 0x632   : > { %v5756_v31 = vadd.f32 %v5440_v61, %v5230_v51  ;;  %v4709_v8 = vadd.f32 %v4395_v29, %v12334_v4 }
 0x633   : > { %v5965_v26 = vpop.f32.mrf.mxu0 }
 0x634   : > { %v6278_v1 = vadd.f32 %v5962_v15, %v5756_v31  ;;  %4434 = vmatmul.bf16.gmra.mxu1 %v9202_v0  ;;  %4956 = vmatmul.bf16.gmra.mxu2 %v9205_v7  ;;  %v12335_v15 = vld [vmem:[#allocation136_spill] sm:$0xff] }
 0x635   : > { %5482 = vmatmul.bf16.gmra.mxu3 %v7807_v40  ;;  %v7808_v31 = vld [vmem:[%s8458_s16 + $0x78] sm:$0xff] }
 0x636   : > { %6004 = vmatmul.bf16.gmra.mxu0 %v9320_v27  ;;  %v6409_v36 = vadd.f32 %v10749_v54, %v6278_v1  ;;  %v12336_v1 = vld [vmem:[#allocation137_spill] sm:$0xff] }
 0x637   : > { %v4917_v35 = vpop.f32.mrf.mxu2 }
 0x638   : > { %6537 = vst [vmem:[%s10753_s17 + $0x18] sm:$0xff] %v6409_v36  ;;  %v5231_v19 = vadd.f32 %v4917_v35, %v4709_v8  ;;  %v5443_v47 = vpop.f32.mrf.mxu3 }
 0x639   : > { %v4397_v56 = vpop.f32.mrf.mxu1 }
 0x63a   : > { %v5757_v63 = vadd.f32 %v5443_v47, %v5231_v19  ;;  %v4710_v50 = vadd.f32 %v4397_v56, %v12335_v15  ;;  %v12337_v56 = vld [vmem:[#allocation138_spill] sm:$0xff] }
 0x63b   : > { %v5967_v41 = vpop.f32.mrf.mxu0 }
 0x63c   : > { %v6279_v0 = vadd.f32 %v5965_v26, %v5757_v63 }
 0x63e   : > { %v6410_v7 = vadd.f32 %v10749_v54, %v6279_v0 }
 0x63f   : > { %v4919_v23 = vpop.f32.mrf.mxu2 }
 0x640   : > { %6538 = vst [vmem:[%s10753_s17 + $0x20] sm:$0xff] %v6410_v7  ;;  %v5232_v30 = vadd.f32 %v4919_v23, %v4710_v50  ;;  %v5445_v42 = vpop.f32.mrf.mxu3 }
 0x641   : > { %v4400_v57 = vpop.f32.mrf.mxu1 }
 0x642   : > { %v5758_v51 = vadd.f32 %v5445_v42, %v5232_v30  ;;  %v4711_v40 = vadd.f32 %v4400_v57, %v12336_v1  ;;  %v7809_v42 = vld [vmem:[%s8458_s16 + $0x80] sm:$0xff] }
 0x643   : > { %v5970_v61 = vpop.f32.mrf.mxu0 }
 0x644   : > { %v6280_v29 = vadd.f32 %v5967_v41, %v5758_v51  ;;  %4439 = vmatmul.bf16.gmra.mxu1 %v9230_v22  ;;  %4961 = vmatmul.bf16.gmra.mxu2 %v9233_v53  ;;  %v12338_v51 = vld [vmem:[#allocation139_spill] sm:$0xff] }
 0x645   : > { %5487 = vmatmul.bf16.gmra.mxu3 %v7808_v31 }
 0x646   : > { %6009 = vmatmul.bf16.gmra.mxu0 %v9348_v49  ;;  %v6411_v26 = vadd.f32 %v10749_v54, %v6280_v29 }
 0x647   : > { %v4922_v36 = vpop.f32.mrf.mxu2 }
 0x648   : > { %6539 = vst [vmem:[%s10753_s17 + $0x28] sm:$0xff] %v6411_v26  ;;  %v5233_v4 = vadd.f32 %v4922_v36, %v4711_v40  ;;  %v5448_v8 = vpop.f32.mrf.mxu3 }
 0x649   : > { %v4402_v35 = vpop.f32.mrf.mxu1 }
 0x64a   : > { %v5759_v19 = vadd.f32 %v5448_v8, %v5233_v4  ;;  %v4712_v63 = vadd.f32 %v4402_v35, %v12337_v56  ;;  %v12339_v4 = vld [vmem:[#allocation140_spill] sm:$0xff] }
 0x64b   : > { %v5972_v47 = vpop.f32.mrf.mxu0 }
 0x64c   : > { %v6281_v22 = vadd.f32 %v5970_v61, %v5759_v19 }
 0x64e   : > { %v6412_v53 = vadd.f32 %v10749_v54, %v6281_v22 }
 0x64f   : > { %v4924_v41 = vpop.f32.mrf.mxu2 }
 0x650   : > { %6540 = vst [vmem:[%s10753_s17 + $0x30] sm:$0xff] %v6412_v53  ;;  %v5234_v0 = vadd.f32 %v4924_v41, %v4712_v63  ;;  %v5450_v7 = vpop.f32.mrf.mxu3  ;;  %v7810_v41 = vld [vmem:[%s8458_s16 + $0x88] sm:$0xff] }
 0x651   : > { %v4405_v15 = vpop.f32.mrf.mxu1 }
 0x652   : > { %v5760_v50 = vadd.f32 %v5450_v7, %v5234_v0  ;;  %v4713_v61 = vadd.f32 %v4405_v15, %v12338_v51  ;;  %v12340_v7 = vld [vmem:[#allocation141_spill] sm:$0xff] }
 0x653   : > { %v5975_v23 = vpop.f32.mrf.mxu0 }
 0x654   : > { %v6282_v30 = vadd.f32 %v5972_v47, %v5760_v50  ;;  %4444 = vmatmul.bf16.gmra.mxu1 %v9261_v43  ;;  %4966 = vmatmul.bf16.gmra.mxu2 %v9265_v45 }
 0x655   : > { %5492 = vmatmul.bf16.gmra.mxu3 %v7809_v42 }
 0x656   : > { %6014 = vmatmul.bf16.gmra.mxu0 %v9379_v5  ;;  %v6413_v57 = vadd.f32 %v10749_v54, %v6282_v30 }
 0x657   : > { %v4927_v29 = vpop.f32.mrf.mxu2 }
 0x658   : > { %6541 = vst [vmem:[%s10753_s17 + $0x38] sm:$0xff] %v6413_v57  ;;  %v5235_v31 = vadd.f32 %v4927_v29, %v4713_v61  ;;  %v5453_v26 = vpop.f32.mrf.mxu3  ;;  %v12341_v61 = vld [vmem:[#allocation142_spill] sm:$0xff] }
 0x659   : > { %v4407_v1 = vpop.f32.mrf.mxu1 }
 0x65a   : > { %v5761_v40 = vadd.f32 %v5453_v26, %v5235_v31  ;;  %v4714_v8 = vadd.f32 %v4407_v1, %v12339_v4  ;;  %v7811_v4 = vld [vmem:[%s8458_s16 + $0x90] sm:$0xff] }
 0x65b   : > { %v5977_v36 = vpop.f32.mrf.mxu0 }
 0x65c   : > { %v6283_v43 = vadd.f32 %v5975_v23, %v5761_v40 }
 0x65e   : > { %v6414_v45 = vadd.f32 %v10749_v54, %v6283_v43 }
 0x65f   : > { %v4929_v35 = vpop.f32.mrf.mxu2 }
 0x660   : > { %6542 = vst [vmem:[%s10753_s17 + $0x40] sm:$0xff] %v6414_v45  ;;  %v5236_v19 = vadd.f32 %v4929_v35, %v4714_v8  ;;  %v5455_v47 = vpop.f32.mrf.mxu3  ;;  %v12342_v35 = vld [vmem:[#allocation143_spill] sm:$0xff] }
 0x661   : > { %v4410_v22 = vpop.f32.mrf.mxu1 }
 0x662   : > { %v5762_v53 = vadd.f32 %v5455_v47, %v5236_v19  ;;  %v4715_v15 = vadd.f32 %v4410_v22, %v12340_v7 }
 0x663   : > { %v5980_v56 = vpop.f32.mrf.mxu0 }
 0x664   : > { %v6284_v63 = vadd.f32 %v5977_v36, %v5762_v53  ;;  %4449 = vmatmul.bf16.gmra.mxu1 %v9291_v11  ;;  %4971 = vmatmul.bf16.gmra.mxu2 %v9294_v58 }
 0x665   : > { %5497 = vmatmul.bf16.gmra.mxu3 %v7810_v41 }
 0x666   : > { %6019 = vmatmul.bf16.gmra.mxu0 %v9409_v14  ;;  %v6415_v0 = vadd.f32 %v10749_v54, %v6284_v63 }
 0x667   : > { %v4932_v50 = vpop.f32.mrf.mxu2 }
 0x668   : > { %6543 = vst [vmem:[%s10753_s17 + $0x48] sm:$0xff] %v6415_v0  ;;  %v5237_v23 = vadd.f32 %v4932_v50, %v4715_v15  ;;  %v5458_v30 = vpop.f32.mrf.mxu3  ;;  %v12343_v0 = vld [vmem:[#allocation144_spill] sm:$0xff] }
 0x669   : > { %v4412_v42 = vpop.f32.mrf.mxu1 }
 0x66a   : > { %v5763_v57 = vadd.f32 %v5458_v30, %v5237_v23  ;;  %v4716_v29 = vadd.f32 %v4412_v42, %v12341_v61  ;;  %v12344_v61 = vld [vmem:[#allocation145_spill] sm:$0xff] }
 0x66b   : > { %v5982_v51 = vpop.f32.mrf.mxu0 }
 0x66c   : > { %v6285_v11 = vadd.f32 %v5980_v56, %v5763_v57 }
 0x66e   : > { %v6416_v58 = vadd.f32 %v10749_v54, %v6285_v11  ;;  %v7812_v11 = vld [vmem:[%s8458_s16 + $0x98] sm:$0xff] }
 0x66f   : > { %v4934_v31 = vpop.f32.mrf.mxu2 }
 0x670   : > { %6544 = vst [vmem:[%s10753_s17 + $0x50] sm:$0xff] %v6416_v58  ;;  %v5238_v26 = vadd.f32 %v4934_v31, %v4716_v29  ;;  %v5460_v1 = vpop.f32.mrf.mxu3 }
 0x671   : > { %v4415_v40 = vpop.f32.mrf.mxu1 }
 0x672   : > { %v5764_v36 = vadd.f32 %v5460_v1, %v5238_v26  ;;  %v4717_v19 = vadd.f32 %v4415_v40, %v12342_v35 }
 0x673   : > { %v5985_v43 = vpop.f32.mrf.mxu0 }
 0x674   : > { %v6286_v45 = vadd.f32 %v5982_v51, %v5764_v36  ;;  %4454 = vmatmul.bf16.gmra.mxu1 %v9320_v27  ;;  %4976 = vmatmul.bf16.gmra.mxu2 %v9323_v46 }
 0x675   : > { %5502 = vmatmul.bf16.gmra.mxu3 %v7811_v4 }
 0x676   : > { %6024 = vmatmul.bf16.gmra.mxu0 %v9438_v18  ;;  %v6417_v8 = vadd.f32 %v10749_v54, %v6286_v45  ;;  %v12345_v45 = vld [vmem:[#allocation146_spill] sm:$0xff] }
 0x677   : > { %v4937_v47 = vpop.f32.mrf.mxu2 }
 0x678   : > { %6545 = vst [vmem:[%s10753_s17 + $0x58] sm:$0xff] %v6417_v8  ;;  %v5239_v22 = vadd.f32 %v4937_v47, %v4717_v19  ;;  %v5463_v53 = vpop.f32.mrf.mxu3 }
 0x679   : > { %v4417_v56 = vpop.f32.mrf.mxu1 }
 0x67a   : > { %v5765_v63 = vadd.f32 %v5463_v53, %v5239_v22  ;;  %v4718_v7 = vadd.f32 %v4417_v56, %v12343_v0  ;;  %v12348_v0 = vld [vmem:[#allocation147_spill] sm:$0xff] }
 0x67b   : > { %v5987_v41 = vpop.f32.mrf.mxu0 }
 0x67c   : > { %v6287_v27 = vadd.f32 %v5985_v43, %v5765_v63  ;;  %v12346_v63 = vld [vmem:[#allocation154_spill] sm:$0xff] }
 0x67e   : > { %v6418_v46 = vadd.f32 %v10749_v54, %v6287_v27  ;;  %v12347_v27 = vld [vmem:[#allocation166_spill] sm:$0xff] }
 0x67f   : > { %v4939_v15 = vpop.f32.mrf.mxu2 }
 0x680   : > { %6546 = vst [vmem:[%s10753_s17 + $0x60] sm:$0xff] %v6418_v46  ;;  %v5240_v50 = vadd.f32 %v4939_v15, %v4718_v7  ;;  %v5465_v23 = vpop.f32.mrf.mxu3 }
 0x681   : > { %v4420_v30 = vpop.f32.mrf.mxu1 }
 0x682   : > { %v5766_v42 = vadd.f32 %v5465_v23, %v5240_v50  ;;  %v4719_v29 = vadd.f32 %v4420_v30, %v12344_v61 }
 0x683   : > { %v5990_v57 = vpop.f32.mrf.mxu0 }
 0x684   : > { %v6288_v51 = vadd.f32 %v5987_v41, %v5766_v42  ;;  %4459 = vmatmul.bf16.gmra.mxu1 %v9348_v49  ;;  %4981 = vmatmul.bf16.gmra.mxu2 %v9351_v3  ;;  %v7813_v41 = vld [vmem:[%s8458_s16 + $0xa0] sm:$0xff] }
 0x685   : > { %5507 = vmatmul.bf16.gmra.mxu3 %v7812_v11  ;;  %v12349_v11 = vld [vmem:[#allocation148_spill] sm:$0xff] }
 0x686   : > { %6029 = vmatmul.bf16.gmra.mxu0 %v9466_v33  ;;  %v6419_v58 = vadd.f32 %v10749_v54, %v6288_v51 }
 0x687   : > { %v4942_v31 = vpop.f32.mrf.mxu2 }
 0x688   : > { %6547 = vst [vmem:[%s10753_s17 + $0x68] sm:$0xff] %v6419_v58  ;;  %v5241_v26 = vadd.f32 %v4942_v31, %v4719_v29  ;;  %v5468_v1 = vpop.f32.mrf.mxu3 }
 0x689   : > { %v4422_v40 = vpop.f32.mrf.mxu1 }
 0x68a   : > { %v5767_v36 = vadd.f32 %v5468_v1, %v5241_v26  ;;  %v4720_v4 = vadd.f32 %v4422_v40, %v12345_v45 }
 0x68b   : > { %v5992_v43 = vpop.f32.mrf.mxu0 }
 0x68c   : > { %v6289_v49 = vadd.f32 %v5990_v57, %v5767_v36 }
 0x68e   : > { %v6420_v3 = vadd.f32 %v10749_v54, %v6289_v49  ;;  %v7814_v49 = vld [vmem:[%s8458_s16 + $0xa8] sm:$0xff] }
 0x68f   : > { %v4944_v8 = vpop.f32.mrf.mxu2 }
 0x690   : > { %6548 = vst [vmem:[%s10753_s17 + $0x70] sm:$0xff] %v6420_v3  ;;  %v5242_v35 = vadd.f32 %v4944_v8, %v4720_v4  ;;  %v5470_v19 = vpop.f32.mrf.mxu3  ;;  %v12351_v3 = vld [vmem:[#allocation33_spill] sm:$0xff] }
 0x691   : > { %v4425_v47 = vpop.f32.mrf.mxu1  ;;  %v12352_v4 = vld [vmem:[#allocation149_spill] sm:$0xff] }
 0x692   : > { %v5768_v22 = vadd.f32 %v5470_v19, %v5242_v35  ;;  %v4721_v7 = vadd.f32 %v4425_v47, %v12348_v0 }
 0x693   : > { %v5995_v53 = vpop.f32.mrf.mxu0 }
 0x694   : > { %v6290_v56 = vadd.f32 %v5992_v43, %v5768_v22  ;;  %4464 = vmatmul.bf16.gmra.mxu1 %v9379_v5  ;;  %4986 = vmatmul.bf16.gmra.mxu2 %v12346_v63  ;;  %v12350_v43 = vld [vmem:[#allocation157_spill] sm:$0xff] }
 0x695   : > { %5512 = vmatmul.bf16.gmra.mxu3 %v7813_v41  ;;  %v12353_v41 = vld [vmem:[#allocation150_spill] sm:$0xff] }
 0x696   : > { %6034 = vmatmul.bf16.gmra.mxu0 %v12347_v27  ;;  %v6421_v46 = vadd.f32 %v10749_v54, %v6290_v56 }
 0x697   : > { %v4947_v15 = vpop.f32.mrf.mxu2 }
 0x698   : > { %6549 = vst [vmem:[%s10753_s17 + $0x78] sm:$0xff] %v6421_v46  ;;  %v5243_v50 = vadd.f32 %v4947_v15, %v4721_v7  ;;  %v5473_v23 = vpop.f32.mrf.mxu3 }
 0x699   : > { %v4427_v30 = vpop.f32.mrf.mxu1 }
 0x69a   : > { %v5769_v42 = vadd.f32 %v5473_v23, %v5243_v50  ;;  %v4722_v58 = vadd.f32 %v4427_v30, %v12349_v11 }
 0x69b   : > { %v5997_v57 = vpop.f32.mrf.mxu0 }
 0x69c   : > { %v6291_v5 = vadd.f32 %v5995_v53, %v5769_v42 }
 0x69e   : > { %v6422_v51 = vadd.f32 %v10749_v54, %v6291_v5  ;;  %v7815_v5 = vld [vmem:[%s8458_s16 + $0xb0] sm:$0xff] }
 0x69f   : > { %v4949_v61 = vpop.f32.mrf.mxu2 }
 0x6a0   : > { %6550 = vst [vmem:[%s10753_s17 + $0x80] sm:$0xff] %v6422_v51  ;;  %v5244_v29 = vadd.f32 %v4949_v61, %v4722_v58  ;;  %v5475_v31 = vpop.f32.mrf.mxu3  ;;  %v12355_v51 = vld [vmem:[#allocation39_spill] sm:$0xff] }
 0x6a1   : > { %v4430_v26 = vpop.f32.mrf.mxu1  ;;  %v12356_v58 = vld [vmem:[#allocation151_spill] sm:$0xff] }
 0x6a2   : > { %v5770_v1 = vadd.f32 %v5475_v31, %v5244_v29  ;;  %v4723_v8 = vadd.f32 %v4430_v26, %v12352_v4 }
 0x6a3   : > { %v6000_v40 = vpop.f32.mrf.mxu0 }
 0x6a4   : > { %v6292_v36 = vadd.f32 %v5997_v57, %v5770_v1  ;;  %4469 = vmatmul.bf16.gmra.mxu1 %v9409_v14  ;;  %4991 = vmatmul.bf16.gmra.mxu2 %v12350_v43  ;;  %v12354_v57 = vld [vmem:[#allocation160_spill] sm:$0xff] }
 0x6a5   : > { %5517 = vmatmul.bf16.gmra.mxu3 %v7814_v49  ;;  %v12357_v49 = vld [vmem:[#allocation152_spill] sm:$0xff] }
 0x6a6   : > { %6039 = vmatmul.bf16.gmra.mxu0 %v12351_v3  ;;  %v6423_v45 = vadd.f32 %v10749_v54, %v6292_v36 }
 0x6a7   : > { %v4952_v35 = vpop.f32.mrf.mxu2 }
 0x6a8   : > { %6551 = vst [vmem:[%s10753_s17 + $0x88] sm:$0xff] %v6423_v45  ;;  %v5245_v19 = vadd.f32 %v4952_v35, %v4723_v8  ;;  %v5478_v47 = vpop.f32.mrf.mxu3 }
 0x6a9   : > { %v4432_v22 = vpop.f32.mrf.mxu1 }
 0x6aa   : > { %v5771_v53 = vadd.f32 %v5478_v47, %v5245_v19  ;;  %v4724_v46 = vadd.f32 %v4432_v22, %v12353_v41 }
 0x6ab   : > { %v6002_v56 = vpop.f32.mrf.mxu0 }
 0x6ac   : > { %v6293_v14 = vadd.f32 %v6000_v40, %v5771_v53 }
 0x6ae   : > { %v6424_v63 = vadd.f32 %v10749_v54, %v6293_v14  ;;  %v7816_v14 = vld [vmem:[%s8458_s16 + $0xb8] sm:$0xff] }
 0x6af   : > { %v4954_v0 = vpop.f32.mrf.mxu2 }
 0x6b0   : > { %6552 = vst [vmem:[%s10753_s17 + $0x90] sm:$0xff] %v6424_v63  ;;  %v5246_v7 = vadd.f32 %v4954_v0, %v4724_v46  ;;  %v5480_v15 = vpop.f32.mrf.mxu3  ;;  %v12359_v63 = vld [vmem:[#allocation45_spill] sm:$0xff] }
 0x6b1   : > { %v4435_v50 = vpop.f32.mrf.mxu1  ;;  %v12360_v46 = vld [vmem:[#allocation153_spill] sm:$0xff] }
 0x6b2   : > { %v5772_v23 = vadd.f32 %v5480_v15, %v5246_v7  ;;  %v4725_v61 = vadd.f32 %v4435_v50, %v12356_v58 }
 0x6b3   : > { %v6005_v30 = vpop.f32.mrf.mxu0 }
 0x6b4   : > { %v6294_v42 = vadd.f32 %v6002_v56, %v5772_v23  ;;  %4474 = vmatmul.bf16.gmra.mxu1 %v9438_v18  ;;  %4996 = vmatmul.bf16.gmra.mxu2 %v12354_v57  ;;  %v12358_v56 = vld [vmem:[#allocation163_spill] sm:$0xff] }
 0x6b5   : > { %5522 = vmatmul.bf16.gmra.mxu3 %v7815_v5  ;;  %v12361_v5 = vld [vmem:[#allocation155_spill] sm:$0xff] }
 0x6b6   : > { %6044 = vmatmul.bf16.gmra.mxu0 %v12355_v51  ;;  %v6425_v11 = vadd.f32 %v10749_v54, %v6294_v42 }
 0x6b7   : > { %v4957_v29 = vpop.f32.mrf.mxu2 }
 0x6b8   : > { %6553 = vst [vmem:[%s10753_s17 + $0x98] sm:$0xff] %v6425_v11  ;;  %v5247_v31 = vadd.f32 %v4957_v29, %v4725_v61  ;;  %v5483_v26 = vpop.f32.mrf.mxu3 }
 0x6b9   : > { %v4437_v1 = vpop.f32.mrf.mxu1 }
 0x6ba   : > { %v5773_v40 = vadd.f32 %v5483_v26, %v5247_v31  ;;  %v4726_v45 = vadd.f32 %v4437_v1, %v12357_v49 }
 0x6bb   : > { %v6007_v36 = vpop.f32.mrf.mxu0 }
 0x6bc   : > { %v6295_v18 = vadd.f32 %v6005_v30, %v5773_v40 }
 0x6be   : > { %v6426_v43 = vadd.f32 %v10749_v54, %v6295_v18  ;;  %v7817_v18 = vld [vmem:[%s8458_s16 + $0xc0] sm:$0xff] }
 0x6bf   : > { %v4959_v4 = vpop.f32.mrf.mxu2 }
 0x6c0   : > { %6554 = vst [vmem:[%s10753_s17 + $0xa0] sm:$0xff] %v6426_v43  ;;  %v5248_v8 = vadd.f32 %v4959_v4, %v4726_v45  ;;  %v5485_v35 = vpop.f32.mrf.mxu3  ;;  %v12363_v43 = vld [vmem:[#allocation51_spill] sm:$0xff]  ;;  %v12364_v45 = vld [vmem:[#allocation156_spill] sm:$0xff] }
 0x6c1   : > { %v4440_v19 = vpop.f32.mrf.mxu1 }
 0x6c2   : > { %v5774_v47 = vadd.f32 %v5485_v35, %v5248_v8  ;;  %v4727_v0 = vadd.f32 %v4440_v19, %v12360_v46 }
 0x6c3   : > { %v6010_v22 = vpop.f32.mrf.mxu0 }
 0x6c4   : > { %v6296_v53 = vadd.f32 %v6007_v36, %v5774_v47  ;;  %4479 = vmatmul.bf16.gmra.mxu1 %v9466_v33  ;;  %5001 = vmatmul.bf16.gmra.mxu2 %v12358_v56  ;;  %v12362_v36 = vld [vmem:[#allocation167_spill] sm:$0xff] }
 0x6c5   : > { %5527 = vmatmul.bf16.gmra.mxu3 %v7816_v14  ;;  %v12365_v14 = vld [vmem:[#allocation158_spill] sm:$0xff] }
 0x6c6   : > { %6049 = vmatmul.bf16.gmra.mxu0 %v12359_v63  ;;  %v6427_v41 = vadd.f32 %v10749_v54, %v6296_v53 }
 0x6c7   : > { %v4962_v7 = vpop.f32.mrf.mxu2 }
 0x6c8   : > { %6555 = vst [vmem:[%s10753_s17 + $0xa8] sm:$0xff] %v6427_v41  ;;  %v5249_v15 = vadd.f32 %v4962_v7, %v4727_v0  ;;  %v5488_v50 = vpop.f32.mrf.mxu3 }
 0x6c9   : > { %v4442_v23 = vpop.f32.mrf.mxu1 }
 0x6ca   : > { %v5775_v30 = vadd.f32 %v5488_v50, %v5249_v15  ;;  %v4728_v11 = vadd.f32 %v4442_v23, %v12361_v5 }
 0x6cb   : > { %v6012_v42 = vpop.f32.mrf.mxu0 }
 0x6cc   : > { %v6297_v33 = vadd.f32 %v6010_v22, %v5775_v30 }
 0x6ce   : > { %v6428_v57 = vadd.f32 %v10749_v54, %v6297_v33  ;;  %v7818_v33 = vld [vmem:[%s8458_s16 + $0xc8] sm:$0xff] }
 0x6cf   : > { %v4964_v58 = vpop.f32.mrf.mxu2 }
 0x6d0   : > { %6556 = vst [vmem:[%s10753_s17 + $0xb0] sm:$0xff] %v6428_v57  ;;  %v5250_v61 = vadd.f32 %v4964_v58, %v4728_v11  ;;  %v5490_v29 = vpop.f32.mrf.mxu3  ;;  %v12367_v57 = vld [vmem:[#allocation57_spill] sm:$0xff]  ;;  %v12368_v11 = vld [vmem:[#allocation159_spill] sm:$0xff] }
 0x6d1   : > { %v4445_v31 = vpop.f32.mrf.mxu1 }
 0x6d2   : > { %v5776_v26 = vadd.f32 %v5490_v29, %v5250_v61  ;;  %v4729_v4 = vadd.f32 %v4445_v31, %v12364_v45 }
 0x6d3   : > { %v6015_v1 = vpop.f32.mrf.mxu0 }
 0x6d4   : > { %v6298_v40 = vadd.f32 %v6012_v42, %v5776_v26  ;;  %4484 = vmatmul.bf16.gmra.mxu1 %v12347_v27  ;;  %5006 = vmatmul.bf16.gmra.mxu2 %v12362_v36  ;;  %v12366_v42 = vld [vmem:[#allocation169_spill] sm:$0xff] }
 0x6d5   : > { %5532 = vmatmul.bf16.gmra.mxu3 %v7817_v18  ;;  %v12369_v18 = vld [vmem:[#allocation161_spill] sm:$0xff] }
 0x6d6   : > { %6054 = vmatmul.bf16.gmra.mxu0 %v12363_v43  ;;  %v6429_v49 = vadd.f32 %v10749_v54, %v6298_v40 }
 0x6d7   : > { %v4967_v8 = vpop.f32.mrf.mxu2 }
 0x6d8   : > { %6557 = vst [vmem:[%s10753_s17 + $0xb8] sm:$0xff] %v6429_v49  ;;  %v5251_v35 = vadd.f32 %v4967_v8, %v4729_v4  ;;  %v5493_v19 = vpop.f32.mrf.mxu3 }
 0x6d9   : > { %v4447_v47 = vpop.f32.mrf.mxu1 }
 0x6da   : > { %v5777_v22 = vadd.f32 %v5493_v19, %v5251_v35  ;;  %v4730_v41 = vadd.f32 %v4447_v47, %v12365_v14 }
 0x6db   : > { %v6017_v53 = vpop.f32.mrf.mxu0 }
 0x6dc   : > { %v6299_v27 = vadd.f32 %v6015_v1, %v5777_v22 }
 0x6de   : > { %v6430_v56 = vadd.f32 %v10749_v54, %v6299_v27  ;;  %v7819_v27 = vld [vmem:[%s8458_s16 + $0xd0] sm:$0xff] }
 0x6df   : > { %v4969_v46 = vpop.f32.mrf.mxu2 }
 0x6e0   : > { %6558 = vst [vmem:[%s10753_s17 + $0xc0] sm:$0xff] %v6430_v56  ;;  %v5252_v0 = vadd.f32 %v4969_v46, %v4730_v41  ;;  %v5495_v7 = vpop.f32.mrf.mxu3  ;;  %v12371_v56 = vld [vmem:[#allocation63_spill] sm:$0xff]  ;;  %v12372_v41 = vld [vmem:[#allocation162_spill] sm:$0xff] }
 0x6e1   : > { %v4450_v15 = vpop.f32.mrf.mxu1 }
 0x6e2   : > { %v5778_v50 = vadd.f32 %v5495_v7, %v5252_v0  ;;  %v4731_v58 = vadd.f32 %v4450_v15, %v12368_v11 }
 0x6e3   : > { %v6020_v23 = vpop.f32.mrf.mxu0 }
 0x6e4   : > { %v6300_v30 = vadd.f32 %v6017_v53, %v5778_v50  ;;  %4489 = vmatmul.bf16.gmra.mxu1 %v12351_v3  ;;  %5011 = vmatmul.bf16.gmra.mxu2 %v12366_v42  ;;  %v12370_v53 = vld [vmem:[#allocation171_spill] sm:$0xff] }
 0x6e5   : > { %5537 = vmatmul.bf16.gmra.mxu3 %v7818_v33  ;;  %v12373_v33 = vld [vmem:[#allocation164_spill] sm:$0xff] }
 0x6e6   : > { %6059 = vmatmul.bf16.gmra.mxu0 %v12367_v57  ;;  %v6431_v5 = vadd.f32 %v10749_v54, %v6300_v30 }
 0x6e7   : > { %v4972_v61 = vpop.f32.mrf.mxu2 }
 0x6e8   : > { %6559 = vst [vmem:[%s10753_s17 + $0xc8] sm:$0xff] %v6431_v5  ;;  %v5253_v29 = vadd.f32 %v4972_v61, %v4731_v58  ;;  %v5498_v31 = vpop.f32.mrf.mxu3 }
 0x6e9   : > { %v4452_v26 = vpop.f32.mrf.mxu1 }
 0x6ea   : > { %v5779_v1 = vadd.f32 %v5498_v31, %v5253_v29  ;;  %v4732_v49 = vadd.f32 %v4452_v26, %v12369_v18 }
 0x6eb   : > { %v6022_v40 = vpop.f32.mrf.mxu0 }
 0x6ec   : > { %v6301_v3 = vadd.f32 %v6020_v23, %v5779_v1 }
 0x6ee   : > { %v6432_v36 = vadd.f32 %v10749_v54, %v6301_v3  ;;  %v7820_v3 = vld [vmem:[%s8458_s16 + $0xd8] sm:$0xff] }
 0x6ef   : > { %v4974_v45 = vpop.f32.mrf.mxu2 }
 0x6f0   : > { %6560 = vst [vmem:[%s10753_s17 + $0xd0] sm:$0xff] %v6432_v36  ;;  %v5254_v4 = vadd.f32 %v4974_v45, %v4732_v49  ;;  %v5500_v8 = vpop.f32.mrf.mxu3  ;;  %v12375_v36 = vld [vmem:[#allocation69_spill] sm:$0xff] }
 0x6f1   : > { %v4455_v35 = vpop.f32.mrf.mxu1  ;;  %v12376_v49 = vld [vmem:[#allocation165_spill] sm:$0xff] }
 0x6f2   : > { %v5780_v19 = vadd.f32 %v5500_v8, %v5254_v4  ;;  %v4733_v46 = vadd.f32 %v4455_v35, %v12372_v41 }
 0x6f3   : > { %v6025_v47 = vpop.f32.mrf.mxu0 }
 0x6f4   : > { %v6302_v22 = vadd.f32 %v6022_v40, %v5780_v19  ;;  %4494 = vmatmul.bf16.gmra.mxu1 %v12355_v51  ;;  %5016 = vmatmul.bf16.gmra.mxu2 %v12370_v53  ;;  %v12374_v40 = vld [vmem:[#allocation173_spill] sm:$0xff] }
 0x6f5   : > { %5542 = vmatmul.bf16.gmra.mxu3 %v7819_v27  ;;  %v12377_v27 = vld [vmem:[#allocation168_spill] sm:$0xff] }
 0x6f6   : > { %6064 = vmatmul.bf16.gmra.mxu0 %v12371_v56  ;;  %v6433_v14 = vadd.f32 %v10749_v54, %v6302_v22 }
 0x6f7   : > { %v4977_v0 = vpop.f32.mrf.mxu2 }
 0x6f8   : > { %6561 = vst [vmem:[%s10753_s17 + $0xd8] sm:$0xff] %v6433_v14  ;;  %v5255_v7 = vadd.f32 %v4977_v0, %v4733_v46  ;;  %v5503_v15 = vpop.f32.mrf.mxu3 }
 0x6f9   : > { %v4457_v50 = vpop.f32.mrf.mxu1 }
 0x6fa   : > { %v5781_v23 = vadd.f32 %v5503_v15, %v5255_v7  ;;  %v4734_v5 = vadd.f32 %v4457_v50, %v12373_v33 }
 0x6fb   : > { %v6027_v30 = vpop.f32.mrf.mxu0 }
 0x6fc   : > { %v6303_v51 = vadd.f32 %v6025_v47, %v5781_v23 }
 0x6fe   : > { %v6434_v42 = vadd.f32 %v10749_v54, %v6303_v51  ;;  %v7821_v51 = vld [vmem:[%s8458_s16 + $0xe0] sm:$0xff] }
 0x6ff   : > { %v4979_v11 = vpop.f32.mrf.mxu2 }
 0x700   : > { %6562 = vst [vmem:[%s10753_s17 + $0xe0] sm:$0xff] %v6434_v42  ;;  %v5256_v58 = vadd.f32 %v4979_v11, %v4734_v5  ;;  %v5505_v61 = vpop.f32.mrf.mxu3  ;;  %v12379_v42 = vld [vmem:[#allocation75_spill] sm:$0xff]  ;;  %v12380_v5 = vld [vmem:[#allocation30_spill] sm:$0xff] }
 0x701   : > { %v4460_v29 = vpop.f32.mrf.mxu1 }
 0x702   : > { %v5782_v31 = vadd.f32 %v5505_v61, %v5256_v58  ;;  %v4735_v45 = vadd.f32 %v4460_v29, %v12376_v49 }
 0x703   : > { %v6030_v26 = vpop.f32.mrf.mxu0 }
 0x704   : > { %v6304_v1 = vadd.f32 %v6027_v30, %v5782_v31  ;;  %4499 = vmatmul.bf16.gmra.mxu1 %v12359_v63  ;;  %5021 = vmatmul.bf16.gmra.mxu2 %v12374_v40  ;;  %v12378_v30 = vld [vmem:[#allocation175_spill] sm:$0xff] }
 0x705   : > { %5547 = vmatmul.bf16.gmra.mxu3 %v7820_v3  ;;  %v12381_v3 = vld [vmem:[#allocation170_spill] sm:$0xff] }
 0x706   : > { %6069 = vmatmul.bf16.gmra.mxu0 %v12375_v36  ;;  %v6435_v18 = vadd.f32 %v10749_v54, %v6304_v1 }
 0x707   : > { %v4982_v4 = vpop.f32.mrf.mxu2 }
 0x708   : > { %6563 = vst [vmem:[%s10753_s17 + $0xe8] sm:$0xff] %v6435_v18  ;;  %v5257_v8 = vadd.f32 %v4982_v4, %v4735_v45  ;;  %v5508_v35 = vpop.f32.mrf.mxu3 }
 0x709   : > { %v4462_v19 = vpop.f32.mrf.mxu1 }
 0x70a   : > { %v5783_v47 = vadd.f32 %v5508_v35, %v5257_v8  ;;  %v4736_v14 = vadd.f32 %v4462_v19, %v12377_v27 }
 0x70b   : > { %v6032_v22 = vpop.f32.mrf.mxu0 }
 0x70c   : > { %v6305_v63 = vadd.f32 %v6030_v26, %v5783_v47 }
 0x70e   : > { %v6436_v53 = vadd.f32 %v10749_v54, %v6305_v63  ;;  %v7822_v63 = vld [vmem:[%s8458_s16 + $0xe8] sm:$0xff] }
 0x70f   : > { %v4984_v41 = vpop.f32.mrf.mxu2 }
 0x710   : > { %6564 = vst [vmem:[%s10753_s17 + $0xf0] sm:$0xff] %v6436_v53  ;;  %v5258_v46 = vadd.f32 %v4984_v41, %v4736_v14  ;;  %v5510_v0 = vpop.f32.mrf.mxu3  ;;  %v12383_v53 = vld [vmem:[#allocation82_spill] sm:$0xff]  ;;  %v12384_v14 = vld [vmem:[#allocation36_spill] sm:$0xff] }
 0x711   : > { %v4465_v7 = vpop.f32.mrf.mxu1 }
 0x712   : > { %v5784_v15 = vadd.f32 %v5510_v0, %v5258_v46  ;;  %v4737_v11 = vadd.f32 %v4465_v7, %v12380_v5 }
 0x713   : > { %v6035_v50 = vpop.f32.mrf.mxu0 }
 0x714   : > { %v6306_v23 = vadd.f32 %v6032_v22, %v5784_v15  ;;  %4504 = vmatmul.bf16.gmra.mxu1 %v12363_v43  ;;  %5026 = vmatmul.bf16.gmra.mxu2 %v12378_v30  ;;  %v12382_v22 = vld [vmem:[#allocation177_spill] sm:$0xff] }
 0x715   : > { %5552 = vmatmul.bf16.gmra.mxu3 %v7821_v51  ;;  %v12385_v51 = vld [vmem:[#allocation172_spill] sm:$0xff] }
 0x716   : > { %6074 = vmatmul.bf16.gmra.mxu0 %v12379_v42  ;;  %v6437_v33 = vadd.f32 %v10749_v54, %v6306_v23 }
 0x717   : > { %v4987_v58 = vpop.f32.mrf.mxu2 }
 0x718   : > { %6565 = vst [vmem:[%s10753_s17 + $0xf8] sm:$0xff] %v6437_v33  ;;  %v5259_v61 = vadd.f32 %v4987_v58, %v4737_v11  ;;  %v5513_v29 = vpop.f32.mrf.mxu3 }
 0x719   : > { %v4467_v31 = vpop.f32.mrf.mxu1 }
 0x71a   : > { %v5785_v26 = vadd.f32 %v5513_v29, %v5259_v61  ;;  %v4738_v18 = vadd.f32 %v4467_v31, %v12381_v3 }
 0x71b   : > { %v6037_v1 = vpop.f32.mrf.mxu0 }
 0x71c   : > { %v6307_v43 = vadd.f32 %v6035_v50, %v5785_v26 }
 0x71e   : > { %v6438_v40 = vadd.f32 %v10749_v54, %v6307_v43  ;;  %v7823_v43 = vld [vmem:[%s8458_s16 + $0xf0] sm:$0xff] }
 0x71f   : > { %v4989_v49 = vpop.f32.mrf.mxu2 }
 0x720   : > { %6566 = vst [vmem:[%s10753_s17 + $0x100] sm:$0xff] %v6438_v40  ;;  %v5260_v45 = vadd.f32 %v4989_v49, %v4738_v18  ;;  %v5515_v4 = vpop.f32.mrf.mxu3  ;;  %v12387_v40 = vld [vmem:[#allocation88_spill] sm:$0xff]  ;;  %v12388_v18 = vld [vmem:[#allocation42_spill] sm:$0xff] }
 0x721   : > { %v4470_v8 = vpop.f32.mrf.mxu1 }
 0x722   : > { %v5786_v35 = vadd.f32 %v5515_v4, %v5260_v45  ;;  %v4739_v41 = vadd.f32 %v4470_v8, %v12384_v14 }
 0x723   : > { %v6040_v19 = vpop.f32.mrf.mxu0 }
 0x724   : > { %v6308_v47 = vadd.f32 %v6037_v1, %v5786_v35  ;;  %4509 = vmatmul.bf16.gmra.mxu1 %v12367_v57  ;;  %5031 = vmatmul.bf16.gmra.mxu2 %v12382_v22  ;;  %v12386_v1 = vld [vmem:[#allocation179_spill] sm:$0xff] }
 0x725   : > { %5557 = vmatmul.bf16.gmra.mxu3 %v7822_v63  ;;  %v12389_v63 = vld [vmem:[#allocation174_spill] sm:$0xff] }
 0x726   : > { %6079 = vmatmul.bf16.gmra.mxu0 %v12383_v53  ;;  %v6439_v27 = vadd.f32 %v10749_v54, %v6308_v47 }
 0x727   : > { %v4992_v46 = vpop.f32.mrf.mxu2 }
 0x728   : > { %6567 = vst [vmem:[%s10753_s17 + $0x108] sm:$0xff] %v6439_v27  ;;  %v5261_v0 = vadd.f32 %v4992_v46, %v4739_v41  ;;  %v5518_v7 = vpop.f32.mrf.mxu3 }
 0x729   : > { %v4472_v15 = vpop.f32.mrf.mxu1 }
 0x72a   : > { %v5787_v50 = vadd.f32 %v5518_v7, %v5261_v0  ;;  %v4740_v33 = vadd.f32 %v4472_v15, %v12385_v51 }
 0x72b   : > { %v6042_v23 = vpop.f32.mrf.mxu0 }
 0x72c   : > { %v6309_v57 = vadd.f32 %v6040_v19, %v5787_v50 }
 0x72e   : > { %v6440_v30 = vadd.f32 %v10749_v54, %v6309_v57  ;;  %v7824_v57 = vld [vmem:[%s8458_s16 + $0xf8] sm:$0xff] }
 0x72f   : > { %v4994_v5 = vpop.f32.mrf.mxu2 }
 0x730   : > { %6568 = vst [vmem:[%s10753_s17 + $0x110] sm:$0xff] %v6440_v30  ;;  %v5262_v11 = vadd.f32 %v4994_v5, %v4740_v33  ;;  %v5520_v58 = vpop.f32.mrf.mxu3  ;;  %v12391_v30 = vld [vmem:[#allocation94_spill] sm:$0xff]  ;;  %v12392_v33 = vld [vmem:[#allocation48_spill] sm:$0xff] }
 0x731   : > { %v4475_v61 = vpop.f32.mrf.mxu1 }
 0x732   : > { %v5788_v29 = vadd.f32 %v5520_v58, %v5262_v11  ;;  %v4741_v49 = vadd.f32 %v4475_v61, %v12388_v18 }
 0x733   : > { %v6045_v31 = vpop.f32.mrf.mxu0 }
 0x734   : > { %v6310_v26 = vadd.f32 %v6042_v23, %v5788_v29  ;;  %4514 = vmatmul.bf16.gmra.mxu1 %v12371_v56  ;;  %5036 = vmatmul.bf16.gmra.mxu2 %v12386_v1  ;;  %v12390_v23 = vld [vmem:[#allocation181_spill] sm:$0xff] }
 0x735   : > { %5562 = vmatmul.bf16.gmra.mxu3 %v7823_v43  ;;  %v12393_v43 = vld [vmem:[#allocation176_spill] sm:$0xff] }
 0x736   : > { %6084 = vmatmul.bf16.gmra.mxu0 %v12387_v40  ;;  %v6441_v3 = vadd.f32 %v10749_v54, %v6310_v26 }
 0x737   : > { %v4997_v45 = vpop.f32.mrf.mxu2 }
 0x738   : > { %6569 = vst [vmem:[%s10753_s17 + $0x118] sm:$0xff] %v6441_v3  ;;  %v5263_v4 = vadd.f32 %v4997_v45, %v4741_v49  ;;  %v5523_v8 = vpop.f32.mrf.mxu3 }
 0x739   : > { %v4477_v35 = vpop.f32.mrf.mxu1 }
 0x73a   : > { %v5789_v19 = vadd.f32 %v5523_v8, %v5263_v4  ;;  %v4742_v27 = vadd.f32 %v4477_v35, %v12389_v63 }
 0x73b   : > { %v6047_v47 = vpop.f32.mrf.mxu0 }
 0x73c   : > { %v6311_v56 = vadd.f32 %v6045_v31, %v5789_v19 }
 0x73e   : > { %v6442_v22 = vadd.f32 %v10749_v54, %v6311_v56  ;;  %v7825_v56 = vld [vmem:[%s8458_s16 + $0x100] sm:$0xff] }
 0x73f   : > { %v4999_v14 = vpop.f32.mrf.mxu2 }
 0x740   : > { %6570 = vst [vmem:[%s10753_s17 + $0x120] sm:$0xff] %v6442_v22  ;;  %v5264_v41 = vadd.f32 %v4999_v14, %v4742_v27  ;;  %v5525_v46 = vpop.f32.mrf.mxu3  ;;  %v12395_v22 = vld [vmem:[#allocation100_spill] sm:$0xff]  ;;  %v12396_v27 = vld [vmem:[#allocation54_spill] sm:$0xff] }
 0x741   : > { %v4480_v0 = vpop.f32.mrf.mxu1 }
 0x742   : > { %v5790_v7 = vadd.f32 %v5525_v46, %v5264_v41  ;;  %v4743_v5 = vadd.f32 %v4480_v0, %v12392_v33 }
 0x743   : > { %v6050_v15 = vpop.f32.mrf.mxu0 }
 0x744   : > { %v6312_v50 = vadd.f32 %v6047_v47, %v5790_v7  ;;  %4519 = vmatmul.bf16.gmra.mxu1 %v12375_v36  ;;  %5041 = vmatmul.bf16.gmra.mxu2 %v12390_v23  ;;  %v12394_v47 = vld [vmem:[#allocation183_spill] sm:$0xff] }
 0x745   : > { %5567 = vmatmul.bf16.gmra.mxu3 %v7824_v57  ;;  %v12397_v57 = vld [vmem:[#allocation178_spill] sm:$0xff] }
 0x746   : > { %6089 = vmatmul.bf16.gmra.mxu0 %v12391_v30  ;;  %v6443_v51 = vadd.f32 %v10749_v54, %v6312_v50 }
 0x747   : > { %v5002_v11 = vpop.f32.mrf.mxu2 }
 0x748   : > { %6571 = vst [vmem:[%s10753_s17 + $0x128] sm:$0xff] %v6443_v51  ;;  %v5265_v58 = vadd.f32 %v5002_v11, %v4743_v5  ;;  %v5528_v61 = vpop.f32.mrf.mxu3 }
 0x749   : > { %v4482_v29 = vpop.f32.mrf.mxu1 }
 0x74a   : > { %v5791_v31 = vadd.f32 %v5528_v61, %v5265_v58  ;;  %v4744_v3 = vadd.f32 %v4482_v29, %v12393_v43 }
 0x74b   : > { %v6052_v26 = vpop.f32.mrf.mxu0 }
 0x74c   : > { %v6313_v36 = vadd.f32 %v6050_v15, %v5791_v31 }
 0x74e   : > { %v6444_v1 = vadd.f32 %v10749_v54, %v6313_v36  ;;  %v7826_v36 = vld [vmem:[%s8458_s16 + $0x108] sm:$0xff] }
 0x74f   : > { %v5004_v18 = vpop.f32.mrf.mxu2 }
 0x750   : > { %6572 = vst [vmem:[%s10753_s17 + $0x130] sm:$0xff] %v6444_v1  ;;  %v5266_v49 = vadd.f32 %v5004_v18, %v4744_v3  ;;  %v5530_v45 = vpop.f32.mrf.mxu3  ;;  %v12399_v1 = vld [vmem:[#allocation108_spill] sm:$0xff] }
 0x751   : > { %v4485_v4 = vpop.f32.mrf.mxu1  ;;  %v12400_v3 = vld [vmem:[#allocation60_spill] sm:$0xff] }
 0x752   : > { %v5792_v8 = vadd.f32 %v5530_v45, %v5266_v49  ;;  %v4745_v14 = vadd.f32 %v4485_v4, %v12396_v27 }
 0x753   : > { %v6055_v35 = vpop.f32.mrf.mxu0 }
 0x754   : > { %v6314_v19 = vadd.f32 %v6052_v26, %v5792_v8  ;;  %4524 = vmatmul.bf16.gmra.mxu1 %v12379_v42  ;;  %5046 = vmatmul.bf16.gmra.mxu2 %v12394_v47  ;;  %v12398_v26 = vld [vmem:[#allocation185_spill] sm:$0xff] }
 0x755   : > { %5572 = vmatmul.bf16.gmra.mxu3 %v7825_v56  ;;  %v12401_v56 = vld [vmem:[#allocation180_spill] sm:$0xff] }
 0x756   : > { %6094 = vmatmul.bf16.gmra.mxu0 %v12395_v22  ;;  %v6445_v63 = vadd.f32 %v10749_v54, %v6314_v19 }
 0x757   : > { %v5007_v41 = vpop.f32.mrf.mxu2 }
 0x758   : > { %6573 = vst [vmem:[%s10753_s17 + $0x138] sm:$0xff] %v6445_v63  ;;  %v5267_v46 = vadd.f32 %v5007_v41, %v4745_v14  ;;  %v5533_v0 = vpop.f32.mrf.mxu3 }
 0x759   : > { %v4487_v7 = vpop.f32.mrf.mxu1 }
 0x75a   : > { %v5793_v15 = vadd.f32 %v5533_v0, %v5267_v46  ;;  %v4746_v51 = vadd.f32 %v4487_v7, %v12397_v57 }
 0x75b   : > { %v6057_v50 = vpop.f32.mrf.mxu0 }
 0x75c   : > { %v6315_v42 = vadd.f32 %v6055_v35, %v5793_v15 }
 0x75e   : > { %v6446_v23 = vadd.f32 %v10749_v54, %v6315_v42  ;;  %v7827_v42 = vld [vmem:[%s8458_s16 + $0x110] sm:$0xff] }
 0x75f   : > { %v5009_v33 = vpop.f32.mrf.mxu2 }
 0x760   : > { %6574 = vst [vmem:[%s10753_s17 + $0x140] sm:$0xff] %v6446_v23  ;;  %v5268_v5 = vadd.f32 %v5009_v33, %v4746_v51  ;;  %v5535_v11 = vpop.f32.mrf.mxu3  ;;  %v12403_v23 = vld [vmem:[#allocation115_spill] sm:$0xff]  ;;  %v12404_v51 = vld [vmem:[#allocation66_spill] sm:$0xff] }
 0x761   : > { %v4490_v58 = vpop.f32.mrf.mxu1 }
 0x762   : > { %v5794_v61 = vadd.f32 %v5535_v11, %v5268_v5  ;;  %v4747_v18 = vadd.f32 %v4490_v58, %v12400_v3 }
 0x763   : > { %v6060_v29 = vpop.f32.mrf.mxu0 }
 0x764   : > { %v6316_v31 = vadd.f32 %v6057_v50, %v5794_v61  ;;  %4529 = vmatmul.bf16.gmra.mxu1 %v12383_v53  ;;  %5051 = vmatmul.bf16.gmra.mxu2 %v12398_v26  ;;  %v12402_v50 = vld [vmem:[#allocation187_spill] sm:$0xff] }
 0x765   : > { %5577 = vmatmul.bf16.gmra.mxu3 %v7826_v36  ;;  %v12405_v36 = vld [vmem:[#allocation182_spill] sm:$0xff] }
 0x766   : > { %6099 = vmatmul.bf16.gmra.mxu0 %v12399_v1  ;;  %v6447_v43 = vadd.f32 %v10749_v54, %v6316_v31 }
 0x767   : > { %v5012_v49 = vpop.f32.mrf.mxu2 }
 0x768   : > { %6575 = vst [vmem:[%s10753_s17 + $0x148] sm:$0xff] %v6447_v43  ;;  %v5269_v45 = vadd.f32 %v5012_v49, %v4747_v18  ;;  %v5538_v4 = vpop.f32.mrf.mxu3 }
 0x769   : > { %v4492_v8 = vpop.f32.mrf.mxu1 }
 0x76a   : > { %v5795_v35 = vadd.f32 %v5538_v4, %v5269_v45  ;;  %v4748_v63 = vadd.f32 %v4492_v8, %v12401_v56 }
 0x76b   : > { %v6062_v19 = vpop.f32.mrf.mxu0 }
 0x76c   : > { %v6317_v53 = vadd.f32 %v6060_v29, %v5795_v35 }
 0x76e   : > { %v6448_v47 = vadd.f32 %v10749_v54, %v6317_v53  ;;  %v10970_v54 = vld [vmem:[#allocation10] ss:$0 sm:$0xff]  ;;  %v7829_v53 = vld [vmem:[%s8458_s16 + $0x118] sm:$0xff] }
 0x76f   : > { %v5014_v27 = vpop.f32.mrf.mxu2 }
 0x770   : > { %6576 = vst [vmem:[%s10753_s17 + $0x150] sm:$0xff] %v6448_v47  ;;  %v5270_v14 = vadd.f32 %v5014_v27, %v4748_v63  ;;  %v5540_v41 = vpop.f32.mrf.mxu3  ;;  %v12407_v47 = vld [vmem:[#allocation122_spill] sm:$0xff]  ;;  %v12408_v63 = vld [vmem:[#allocation72_spill] sm:$0xff] }
 0x771   : > { %v4495_v46 = vpop.f32.mrf.mxu1 }
 0x772   : > { %v5796_v0 = vadd.f32 %v5540_v41, %v5270_v14  ;;  %v4749_v33 = vadd.f32 %v4495_v46, %v12404_v51 }
 0x773   : > { %v6065_v7 = vpop.f32.mrf.mxu0 }
 0x774   : > { %v6318_v15 = vadd.f32 %v6062_v19, %v5796_v0  ;;  %4534 = vmatmul.bf16.gmra.mxu1 %v12387_v40  ;;  %5056 = vmatmul.bf16.gmra.mxu2 %v12402_v50  ;;  %v12406_v19 = vld [vmem:[#allocation189_spill] sm:$0xff] }
 0x775   : > { %5582 = vmatmul.bf16.gmra.mxu3 %v7827_v42  ;;  %v12409_v42 = vld [vmem:[#allocation184_spill] sm:$0xff] }
 0x776   : > { %6104 = vmatmul.bf16.gmra.mxu0 %v12403_v23  ;;  %v6449_v57 = vadd.f32 %v10970_v54, %v6318_v15 }
 0x777   : > { %v5017_v5 = vpop.f32.mrf.mxu2 }
 0x778   : > { %6577 = vst [vmem:[%s10753_s17 + $0x158] sm:$0xff] %v6449_v57  ;;  %v5271_v11 = vadd.f32 %v5017_v5, %v4749_v33  ;;  %v5543_v58 = vpop.f32.mrf.mxu3 }
 0x779   : > { %v4497_v61 = vpop.f32.mrf.mxu1 }
 0x77a   : > { %v5797_v40 = vadd.f32 %v5543_v58, %v5271_v11  ;;  %v4750_v43 = vadd.f32 %v4497_v61, %v12405_v36 }
 0x77b   : > { %v6067_v29 = vpop.f32.mrf.mxu0 }
 0x77c   : > { %v6319_v31 = vadd.f32 %v6065_v7, %v5797_v40 }
 0x77e   : > { %v6450_v26 = vadd.f32 %v10970_v54, %v6319_v31  ;;  %v7830_v31 = vld [vmem:[%s8458_s16 + $0x120] sm:$0xff] }
 0x77f   : > { %v5019_v3 = vpop.f32.mrf.mxu2 }
 0x780   : > { %6578 = vst [vmem:[%s10753_s17 + $0x160] sm:$0xff] %v6450_v26  ;;  %v5272_v18 = vadd.f32 %v5019_v3, %v4750_v43  ;;  %v5545_v49 = vpop.f32.mrf.mxu3  ;;  %v12411_v26 = vld [vmem:[#allocation129_spill] sm:$0xff]  ;;  %v12412_v43 = vld [vmem:[#allocation79_spill] sm:$0xff] }
 0x781   : > { %v4500_v45 = vpop.f32.mrf.mxu1 }
 0x782   : > { %v5798_v4 = vadd.f32 %v5545_v49, %v5272_v18  ;;  %v4751_v27 = vadd.f32 %v4500_v45, %v12408_v63 }
 0x783   : > { %v6070_v8 = vpop.f32.mrf.mxu0 }
 0x784   : > { %v6320_v35 = vadd.f32 %v6067_v29, %v5798_v4  ;;  %4539 = vmatmul.bf16.gmra.mxu1 %v12391_v30  ;;  %5061 = vmatmul.bf16.gmra.mxu2 %v12406_v19  ;;  %v12410_v29 = vld [vmem:[#allocation191_spill] sm:$0xff] }
 0x785   : > { %5587 = vmatmul.bf16.gmra.mxu3 %v7829_v53  ;;  %v12413_v53 = vld [vmem:[#allocation186_spill] sm:$0xff] }
 0x786   : > { %6109 = vmatmul.bf16.gmra.mxu0 %v12407_v47  ;;  %v6451_v56 = vadd.f32 %v10970_v54, %v6320_v35 }
 0x787   : > { %v5022_v14 = vpop.f32.mrf.mxu2 }
 0x788   : > { %6579 = vst [vmem:[%s10753_s17 + $0x168] sm:$0xff] %v6451_v56  ;;  %v5273_v41 = vadd.f32 %v5022_v14, %v4751_v27  ;;  %v5548_v46 = vpop.f32.mrf.mxu3 }
 0x789   : > { %v4502_v0 = vpop.f32.mrf.mxu1 }
 0x78a   : > { %v5799_v7 = vadd.f32 %v5548_v46, %v5273_v41  ;;  %v4752_v57 = vadd.f32 %v4502_v0, %v12409_v42 }
 0x78b   : > { %v6072_v15 = vpop.f32.mrf.mxu0 }
 0x78c   : > { %v6321_v30 = vadd.f32 %v6070_v8, %v5799_v7 }
 0x78e   : > { %v6452_v50 = vadd.f32 %v10970_v54, %v6321_v30  ;;  %v7831_v30 = vld [vmem:[%s8458_s16 + $0x128] sm:$0xff] }
 0x78f   : > { %v5024_v51 = vpop.f32.mrf.mxu2 }
 0x790   : > { %6580 = vst [vmem:[%s10753_s17 + $0x170] sm:$0xff] %v6452_v50  ;;  %v5274_v33 = vadd.f32 %v5024_v51, %v4752_v57  ;;  %v5550_v5 = vpop.f32.mrf.mxu3  ;;  %v12415_v50 = vld [vmem:[#allocation34_spill] sm:$0xff]  ;;  %v12416_v57 = vld [vmem:[#allocation85_spill] sm:$0xff] }
 0x791   : > { %v4505_v11 = vpop.f32.mrf.mxu1 }
 0x792   : > { %v5800_v58 = vadd.f32 %v5550_v5, %v5274_v33  ;;  %v4753_v3 = vadd.f32 %v4505_v11, %v12412_v43 }
 0x793   : > { %v6075_v61 = vpop.f32.mrf.mxu0 }
 0x794   : > { %v6322_v40 = vadd.f32 %v6072_v15, %v5800_v58  ;;  %4544 = vmatmul.bf16.gmra.mxu1 %v12395_v22  ;;  %5066 = vmatmul.bf16.gmra.mxu2 %v12410_v29  ;;  %v12414_v15 = vld [vmem:[#allocation193_spill] sm:$0xff] }
 0x795   : > { %5592 = vmatmul.bf16.gmra.mxu3 %v7830_v31  ;;  %v12417_v31 = vld [vmem:[#allocation188_spill] sm:$0xff] }
 0x796   : > { %6114 = vmatmul.bf16.gmra.mxu0 %v12411_v26  ;;  %v6453_v36 = vadd.f32 %v10970_v54, %v6322_v40 }
 0x797   : > { %v5027_v18 = vpop.f32.mrf.mxu2 }
 0x798   : > { %6581 = vst [vmem:[%s10753_s17 + $0x178] sm:$0xff] %v6453_v36  ;;  %v5275_v49 = vadd.f32 %v5027_v18, %v4753_v3  ;;  %v5553_v45 = vpop.f32.mrf.mxu3 }
 0x799   : > { %v4507_v4 = vpop.f32.mrf.mxu1 }
 0x79a   : > { %v5801_v8 = vadd.f32 %v5553_v45, %v5275_v49  ;;  %v4754_v56 = vadd.f32 %v4507_v4, %v12413_v53 }
 0x79b   : > { %v6077_v35 = vpop.f32.mrf.mxu0 }
 0x79c   : > { %v6323_v22 = vadd.f32 %v6075_v61, %v5801_v8 }
 0x79e   : > { %v6454_v19 = vadd.f32 %v10970_v54, %v6323_v22  ;;  %v7832_v22 = vld [vmem:[%s8458_s16 + $0x130] sm:$0xff] }
 0x79f   : > { %v5029_v63 = vpop.f32.mrf.mxu2 }
 0x7a0   : > { %6582 = vst [vmem:[%s10753_s17 + $0x180] sm:$0xff] %v6454_v19  ;;  %v5276_v27 = vadd.f32 %v5029_v63, %v4754_v56  ;;  %v5555_v14 = vpop.f32.mrf.mxu3  ;;  %v12419_v19 = vld [vmem:[#allocation40_spill] sm:$0xff]  ;;  %v12420_v56 = vld [vmem:[#allocation91_spill] sm:$0xff] }
 0x7a1   : > { %v4510_v41 = vpop.f32.mrf.mxu1 }
 0x7a2   : > { %v5802_v46 = vadd.f32 %v5555_v14, %v5276_v27  ;;  %v4755_v51 = vadd.f32 %v4510_v41, %v12416_v57 }
 0x7a3   : > { %v6080_v0 = vpop.f32.mrf.mxu0 }
 0x7a4   : > { %v6324_v7 = vadd.f32 %v6077_v35, %v5802_v46  ;;  %4549 = vmatmul.bf16.gmra.mxu1 %v12399_v1  ;;  %5071 = vmatmul.bf16.gmra.mxu2 %v12414_v15  ;;  %v12418_v35 = vld [vmem:[#allocation195_spill] sm:$0xff] }
 0x7a5   : > { %5597 = vmatmul.bf16.gmra.mxu3 %v7831_v30  ;;  %v12421_v30 = vld [vmem:[#allocation190_spill] sm:$0xff] }
 0x7a6   : > { %6119 = vmatmul.bf16.gmra.mxu0 %v12415_v50  ;;  %v6455_v42 = vadd.f32 %v10970_v54, %v6324_v7 }
 0x7a7   : > { %v5032_v33 = vpop.f32.mrf.mxu2 }
 0x7a8   : > { %6583 = vst [vmem:[%s10753_s17 + $0x188] sm:$0xff] %v6455_v42  ;;  %v5277_v5 = vadd.f32 %v5032_v33, %v4755_v51  ;;  %v5558_v11 = vpop.f32.mrf.mxu3 }
 0x7a9   : > { %v4512_v58 = vpop.f32.mrf.mxu1 }
 0x7aa   : > { %v5803_v61 = vadd.f32 %v5558_v11, %v5277_v5  ;;  %v4756_v36 = vadd.f32 %v4512_v58, %v12417_v31 }
 0x7ab   : > { %v6082_v40 = vpop.f32.mrf.mxu0 }
 0x7ac   : > { %v6325_v1 = vadd.f32 %v6080_v0, %v5803_v61 }
 0x7ae   : > { %v6456_v29 = vadd.f32 %v10970_v54, %v6325_v1  ;;  %v7833_v1 = vld [vmem:[%s8458_s16 + $0x138] sm:$0xff] }
 0x7af   : > { %v5034_v43 = vpop.f32.mrf.mxu2 }
 0x7b0   : > { %6584 = vst [vmem:[%s10753_s17 + $0x190] sm:$0xff] %v6456_v29  ;;  %v5278_v3 = vadd.f32 %v5034_v43, %v4756_v36  ;;  %v5560_v18 = vpop.f32.mrf.mxu3  ;;  %v12423_v29 = vld [vmem:[#allocation46_spill] sm:$0xff]  ;;  %v12424_v36 = vld [vmem:[#allocation97_spill] sm:$0xff] }
 0x7b1   : > { %v4515_v49 = vpop.f32.mrf.mxu1 }
 0x7b2   : > { %v5804_v45 = vadd.f32 %v5560_v18, %v5278_v3  ;;  %v4757_v63 = vadd.f32 %v4515_v49, %v12420_v56 }
 0x7b3   : > { %v6085_v4 = vpop.f32.mrf.mxu0 }
 0x7b4   : > { %v6326_v8 = vadd.f32 %v6082_v40, %v5804_v45  ;;  %4554 = vmatmul.bf16.gmra.mxu1 %v12403_v23  ;;  %5076 = vmatmul.bf16.gmra.mxu2 %v12418_v35  ;;  %v12422_v40 = vld [vmem:[#allocation197_spill] sm:$0xff] }
 0x7b5   : > { %5602 = vmatmul.bf16.gmra.mxu3 %v7832_v22  ;;  %v12425_v22 = vld [vmem:[#allocation192_spill] sm:$0xff] }
 0x7b6   : > { %6124 = vmatmul.bf16.gmra.mxu0 %v12419_v19  ;;  %v6457_v53 = vadd.f32 %v10970_v54, %v6326_v8 }
 0x7b7   : > { %v5037_v27 = vpop.f32.mrf.mxu2 }
 0x7b8   : > { %6585 = vst [vmem:[%s10753_s17 + $0x198] sm:$0xff] %v6457_v53  ;;  %v5279_v14 = vadd.f32 %v5037_v27, %v4757_v63  ;;  %v5563_v41 = vpop.f32.mrf.mxu3 }
 0x7b9   : > { %v4517_v46 = vpop.f32.mrf.mxu1 }
 0x7ba   : > { %v5805_v0 = vadd.f32 %v5563_v41, %v5279_v14  ;;  %v4758_v42 = vadd.f32 %v4517_v46, %v12421_v30 }
 0x7bb   : > { %v6087_v7 = vpop.f32.mrf.mxu0 }
 0x7bc   : > { %v6327_v23 = vadd.f32 %v6085_v4, %v5805_v0 }
 0x7be   : > { %v6458_v15 = vadd.f32 %v10970_v54, %v6327_v23  ;;  %v7834_v23 = vld [vmem:[%s8458_s16 + $0x140] sm:$0xff] }
 0x7bf   : > { %v5039_v57 = vpop.f32.mrf.mxu2 }
 0x7c0   : > { %6586 = vst [vmem:[%s10753_s17 + $0x1a0] sm:$0xff] %v6458_v15  ;;  %v5280_v51 = vadd.f32 %v5039_v57, %v4758_v42  ;;  %v5565_v33 = vpop.f32.mrf.mxu3  ;;  %v12427_v15 = vld [vmem:[#allocation52_spill] sm:$0xff]  ;;  %v12428_v42 = vld [vmem:[#allocation103_spill] sm:$0xff] }
 0x7c1   : > { %v4520_v5 = vpop.f32.mrf.mxu1 }
 0x7c2   : > { %v5806_v11 = vadd.f32 %v5565_v33, %v5280_v51  ;;  %v4759_v43 = vadd.f32 %v4520_v5, %v12424_v36 }
 0x7c3   : > { %v6090_v58 = vpop.f32.mrf.mxu0 }
 0x7c4   : > { %v6328_v61 = vadd.f32 %v6087_v7, %v5806_v11  ;;  %4559 = vmatmul.bf16.gmra.mxu1 %v12407_v47  ;;  %5081 = vmatmul.bf16.gmra.mxu2 %v12422_v40  ;;  %v12426_v7 = vld [vmem:[#allocation199_spill] sm:$0xff] }
 0x7c5   : > { %5607 = vmatmul.bf16.gmra.mxu3 %v7833_v1  ;;  %v12429_v1 = vld [vmem:[#allocation194_spill] sm:$0xff] }
 0x7c6   : > { %6129 = vmatmul.bf16.gmra.mxu0 %v12423_v29  ;;  %v6459_v31 = vadd.f32 %v10970_v54, %v6328_v61 }
 0x7c7   : > { %v5042_v3 = vpop.f32.mrf.mxu2 }
 0x7c8   : > { %6587 = vst [vmem:[%s10753_s17 + $0x1a8] sm:$0xff] %v6459_v31  ;;  %v5281_v18 = vadd.f32 %v5042_v3, %v4759_v43  ;;  %v5568_v49 = vpop.f32.mrf.mxu3 }
 0x7c9   : > { %v4522_v45 = vpop.f32.mrf.mxu1 }
 0x7ca   : > { %v5807_v4 = vadd.f32 %v5568_v49, %v5281_v18  ;;  %v4760_v53 = vadd.f32 %v4522_v45, %v12425_v22 }
 0x7cb   : > { %v6092_v8 = vpop.f32.mrf.mxu0 }
 0x7cc   : > { %v6329_v47 = vadd.f32 %v6090_v58, %v5807_v4 }
 0x7ce   : > { %v6460_v35 = vadd.f32 %v10970_v54, %v6329_v47  ;;  %v7835_v47 = vld [vmem:[%s8458_s16 + $0x148] sm:$0xff] }
 0x7cf   : > { %v5044_v56 = vpop.f32.mrf.mxu2 }
 0x7d0   : > { %6588 = vst [vmem:[%s10753_s17 + $0x1b0] sm:$0xff] %v6460_v35  ;;  %v5282_v63 = vadd.f32 %v5044_v56, %v4760_v53  ;;  %v5570_v27 = vpop.f32.mrf.mxu3  ;;  %v12431_v35 = vld [vmem:[#allocation58_spill] sm:$0xff]  ;;  %v12432_v53 = vld [vmem:[#allocation111_spill] sm:$0xff] }
 0x7d1   : > { %v4525_v14 = vpop.f32.mrf.mxu1 }
 0x7d2   : > { %v5808_v41 = vadd.f32 %v5570_v27, %v5282_v63  ;;  %v4761_v57 = vadd.f32 %v4525_v14, %v12428_v42 }
 0x7d3   : > { %v6095_v46 = vpop.f32.mrf.mxu0 }
 0x7d4   : > { %v6330_v0 = vadd.f32 %v6092_v8, %v5808_v41  ;;  %4564 = vmatmul.bf16.gmra.mxu1 %v12411_v26  ;;  %5086 = vmatmul.bf16.gmra.mxu2 %v12426_v7  ;;  %v12430_v8 = vld [vmem:[#allocation201_spill] sm:$0xff] }
 0x7d5   : > { %5612 = vmatmul.bf16.gmra.mxu3 %v7834_v23  ;;  %v12433_v23 = vld [vmem:[#allocation196_spill] sm:$0xff] }
 0x7d6   : > { %6134 = vmatmul.bf16.gmra.mxu0 %v12427_v15  ;;  %v6461_v30 = vadd.f32 %v10970_v54, %v6330_v0 }
 0x7d7   : > { %v5047_v51 = vpop.f32.mrf.mxu2 }
 0x7d8   : > { %6589 = vst [vmem:[%s10753_s17 + $0x1b8] sm:$0xff] %v6461_v30  ;;  %v5283_v33 = vadd.f32 %v5047_v51, %v4761_v57  ;;  %v5573_v5 = vpop.f32.mrf.mxu3 }
 0x7d9   : > { %v4527_v11 = vpop.f32.mrf.mxu1 }
 0x7da   : > { %v5809_v58 = vadd.f32 %v5573_v5, %v5283_v33  ;;  %v4762_v31 = vadd.f32 %v4527_v11, %v12429_v1 }
 0x7db   : > { %v6097_v61 = vpop.f32.mrf.mxu0 }
 0x7dc   : > { %v6331_v26 = vadd.f32 %v6095_v46, %v5809_v58 }
 0x7de   : > { %v6462_v40 = vadd.f32 %v10970_v54, %v6331_v26  ;;  %v7836_v26 = vld [vmem:[%s8458_s16 + $0x150] sm:$0xff] }
 0x7df   : > { %v5049_v36 = vpop.f32.mrf.mxu2 }
 0x7e0   : > { %6590 = vst [vmem:[%s10753_s17 + $0x1c0] sm:$0xff] %v6462_v40  ;;  %v5284_v43 = vadd.f32 %v5049_v36, %v4762_v31  ;;  %v5575_v3 = vpop.f32.mrf.mxu3  ;;  %v12435_v40 = vld [vmem:[#allocation64_spill] sm:$0xff]  ;;  %v12436_v31 = vld [vmem:[#allocation118_spill] sm:$0xff] }
 0x7e1   : > { %v4530_v18 = vpop.f32.mrf.mxu1 }
 0x7e2   : > { %v5810_v49 = vadd.f32 %v5575_v3, %v5284_v43  ;;  %v4763_v56 = vadd.f32 %v4530_v18, %v12432_v53 }
 0x7e3   : > { %v6100_v45 = vpop.f32.mrf.mxu0 }
 0x7e4   : > { %v6332_v4 = vadd.f32 %v6097_v61, %v5810_v49  ;;  %4569 = vmatmul.bf16.gmra.mxu1 %v12415_v50  ;;  %5091 = vmatmul.bf16.gmra.mxu2 %v12430_v8  ;;  %v12434_v61 = vld [vmem:[#allocation203_spill] sm:$0xff] }
 0x7e5   : > { %5617 = vmatmul.bf16.gmra.mxu3 %v7835_v47  ;;  %v12437_v47 = vld [vmem:[#allocation198_spill] sm:$0xff] }
 0x7e6   : > { %6139 = vmatmul.bf16.gmra.mxu0 %v12431_v35  ;;  %v6463_v22 = vadd.f32 %v10970_v54, %v6332_v4 }
 0x7e7   : > { %v5052_v63 = vpop.f32.mrf.mxu2 }
 0x7e8   : > { %6591 = vst [vmem:[%s10753_s17 + $0x1c8] sm:$0xff] %v6463_v22  ;;  %v5285_v27 = vadd.f32 %v5052_v63, %v4763_v56  ;;  %v5578_v14 = vpop.f32.mrf.mxu3 }
 0x7e9   : > { %v4532_v41 = vpop.f32.mrf.mxu1 }
 0x7ea   : > { %v5811_v46 = vadd.f32 %v5578_v14, %v5285_v27  ;;  %v4764_v30 = vadd.f32 %v4532_v41, %v12433_v23 }
 0x7eb   : > { %v6102_v0 = vpop.f32.mrf.mxu0 }
 0x7ec   : > { %v6333_v50 = vadd.f32 %v6100_v45, %v5811_v46 }
 0x7ee   : > { %v6464_v7 = vadd.f32 %v10970_v54, %v6333_v50  ;;  %v7837_v50 = vld [vmem:[%s8458_s16 + $0x158] sm:$0xff] }
 0x7ef   : > { %v5054_v42 = vpop.f32.mrf.mxu2 }
 0x7f0   : > { %6592 = vst [vmem:[%s10753_s17 + $0x1d0] sm:$0xff] %v6464_v7  ;;  %v5286_v57 = vadd.f32 %v5054_v42, %v4764_v30  ;;  %v5580_v51 = vpop.f32.mrf.mxu3  ;;  %v12439_v7 = vld [vmem:[#allocation70_spill] sm:$0xff]  ;;  %v12440_v30 = vld [vmem:[#allocation125_spill] sm:$0xff] }
 0x7f1   : > { %v4535_v33 = vpop.f32.mrf.mxu1 }
 0x7f2   : > { %v5812_v5 = vadd.f32 %v5580_v51, %v5286_v57  ;;  %v4765_v36 = vadd.f32 %v4535_v33, %v12436_v31 }
 0x7f3   : > { %v6105_v11 = vpop.f32.mrf.mxu0 }
 0x7f4   : > { %v6334_v58 = vadd.f32 %v6102_v0, %v5812_v5  ;;  %4574 = vmatmul.bf16.gmra.mxu1 %v12419_v19  ;;  %5096 = vmatmul.bf16.gmra.mxu2 %v12434_v61  ;;  %v12438_v0 = vld [vmem:[#allocation205_spill] sm:$0xff] }
 0x7f5   : > { %5622 = vmatmul.bf16.gmra.mxu3 %v7836_v26  ;;  %v12441_v26 = vld [vmem:[#allocation200_spill] sm:$0xff] }
 0x7f6   : > { %6144 = vmatmul.bf16.gmra.mxu0 %v12435_v40  ;;  %v6465_v1 = vadd.f32 %v10970_v54, %v6334_v58 }
 0x7f7   : > { %v5057_v43 = vpop.f32.mrf.mxu2 }
 0x7f8   : > { %6593 = vst [vmem:[%s10753_s17 + $0x1d8] sm:$0xff] %v6465_v1  ;;  %v5287_v3 = vadd.f32 %v5057_v43, %v4765_v36  ;;  %v5583_v18 = vpop.f32.mrf.mxu3 }
 0x7f9   : > { %v4537_v49 = vpop.f32.mrf.mxu1 }
 0x7fa   : > { %v5813_v45 = vadd.f32 %v5583_v18, %v5287_v3  ;;  %v4766_v22 = vadd.f32 %v4537_v49, %v12437_v47 }
 0x7fb   : > { %v6107_v4 = vpop.f32.mrf.mxu0 }
 0x7fc   : > { %v6335_v19 = vadd.f32 %v6105_v11, %v5813_v45 }
 0x7fe   : > { %v6466_v8 = vadd.f32 %v10970_v54, %v6335_v19  ;;  %v7838_v19 = vld [vmem:[%s8458_s16 + $0x160] sm:$0xff] }
 0x7ff   : > { %v5059_v53 = vpop.f32.mrf.mxu2 }
 0x800   : > { %6594 = vst [vmem:[%s10753_s17 + $0x1e0] sm:$0xff] %v6466_v8  ;;  %v5288_v56 = vadd.f32 %v5059_v53, %v4766_v22  ;;  %v5585_v63 = vpop.f32.mrf.mxu3  ;;  %v12443_v8 = vld [vmem:[#allocation77_spill] sm:$0xff]  ;;  %v12444_v22 = vld [vmem:[#allocation31_spill] sm:$0xff] }
 0x801   : > { %v4540_v27 = vpop.f32.mrf.mxu1 }
 0x802   : > { %v5814_v14 = vadd.f32 %v5585_v63, %v5288_v56  ;;  %v4767_v42 = vadd.f32 %v4540_v27, %v12440_v30 }
 0x803   : > { %v6110_v41 = vpop.f32.mrf.mxu0 }
 0x804   : > { %v6336_v46 = vadd.f32 %v6107_v4, %v5814_v14  ;;  %4579 = vmatmul.bf16.gmra.mxu1 %v12423_v29  ;;  %5101 = vmatmul.bf16.gmra.mxu2 %v12438_v0  ;;  %v12442_v4 = vld [vmem:[#allocation207_spill] sm:$0xff] }
 0x805   : > { %5627 = vmatmul.bf16.gmra.mxu3 %v7837_v50  ;;  %v12445_v50 = vld [vmem:[#allocation202_spill] sm:$0xff] }
 0x806   : > { %6149 = vmatmul.bf16.gmra.mxu0 %v12439_v7  ;;  %v6467_v23 = vadd.f32 %v10970_v54, %v6336_v46 }
 0x807   : > { %v5062_v57 = vpop.f32.mrf.mxu2 }
 0x808   : > { %6595 = vst [vmem:[%s10753_s17 + $0x1e8] sm:$0xff] %v6467_v23  ;;  %v5289_v51 = vadd.f32 %v5062_v57, %v4767_v42  ;;  %v5588_v33 = vpop.f32.mrf.mxu3 }
 0x809   : > { %v4542_v5 = vpop.f32.mrf.mxu1 }
 0x80a   : > { %v5815_v11 = vadd.f32 %v5588_v33, %v5289_v51  ;;  %v4768_v1 = vadd.f32 %v4542_v5, %v12441_v26 }
 0x80b   : > { %v6112_v58 = vpop.f32.mrf.mxu0 }
 0x80c   : > { %v6337_v29 = vadd.f32 %v6110_v41, %v5815_v11 }
 0x80e   : > { %v6468_v61 = vadd.f32 %v10970_v54, %v6337_v29  ;;  %v7839_v29 = vld [vmem:[%s8458_s16 + $0x168] sm:$0xff] }
 0x80f   : > { %v5064_v31 = vpop.f32.mrf.mxu2 }
 0x810   : > { %6596 = vst [vmem:[%s10753_s17 + $0x1f0] sm:$0xff] %v6468_v61  ;;  %v5290_v36 = vadd.f32 %v5064_v31, %v4768_v1  ;;  %v5590_v43 = vpop.f32.mrf.mxu3  ;;  %v12447_v61 = vld [vmem:[#allocation83_spill] sm:$0xff]  ;;  %v12448_v1 = vld [vmem:[#allocation37_spill] sm:$0xff] }
 0x811   : > { %v4545_v3 = vpop.f32.mrf.mxu1 }
 0x812   : > { %v5816_v18 = vadd.f32 %v5590_v43, %v5290_v36  ;;  %v4769_v53 = vadd.f32 %v4545_v3, %v12444_v22 }
 0x813   : > { %v6115_v49 = vpop.f32.mrf.mxu0 }
 0x814   : > { %v6338_v45 = vadd.f32 %v6112_v58, %v5816_v18  ;;  %4584 = vmatmul.bf16.gmra.mxu1 %v12427_v15  ;;  %5106 = vmatmul.bf16.gmra.mxu2 %v12442_v4  ;;  %v12446_v58 = vld [vmem:[#allocation209_spill] sm:$0xff] }
 0x815   : > { %5632 = vmatmul.bf16.gmra.mxu3 %v7838_v19  ;;  %v12449_v19 = vld [vmem:[#allocation204_spill] sm:$0xff] }
 0x816   : > { %6154 = vmatmul.bf16.gmra.mxu0 %v12443_v8  ;;  %v6469_v47 = vadd.f32 %v10970_v54, %v6338_v45 }
 0x817   : > { %v5067_v56 = vpop.f32.mrf.mxu2 }
 0x818   : > { %6597 = vst [vmem:[%s10753_s17 + $0x1f8] sm:$0xff] %v6469_v47  ;;  %v5291_v63 = vadd.f32 %v5067_v56, %v4769_v53  ;;  %v5593_v27 = vpop.f32.mrf.mxu3 }
 0x819   : > { %v4547_v14 = vpop.f32.mrf.mxu1 }
 0x81a   : > { %v5817_v41 = vadd.f32 %v5593_v27, %v5291_v63  ;;  %v4770_v23 = vadd.f32 %v4547_v14, %v12445_v50 }
 0x81b   : > { %v6117_v46 = vpop.f32.mrf.mxu0 }
 0x81c   : > { %v6339_v15 = vadd.f32 %v6115_v49, %v5817_v41 }
 0x81e   : > { %v6470_v0 = vadd.f32 %v10970_v54, %v6339_v15  ;;  %v7840_v15 = vld [vmem:[%s8458_s16 + $0x170] sm:$0xff] }
 0x81f   : > { %v5069_v30 = vpop.f32.mrf.mxu2 }
 0x820   : > { %6598 = vst [vmem:[%s10753_s17 + $0x200] sm:$0xff] %v6470_v0  ;;  %v5292_v42 = vadd.f32 %v5069_v30, %v4770_v23  ;;  %v5595_v57 = vpop.f32.mrf.mxu3  ;;  %v12451_v0 = vld [vmem:[#allocation89_spill] sm:$0xff]  ;;  %v12452_v23 = vld [vmem:[#allocation43_spill] sm:$0xff] }
 0x821   : > { %v4550_v51 = vpop.f32.mrf.mxu1 }
 0x822   : > { %v5818_v33 = vadd.f32 %v5595_v57, %v5292_v42  ;;  %v4771_v31 = vadd.f32 %v4550_v51, %v12448_v1 }
 0x823   : > { %v6120_v5 = vpop.f32.mrf.mxu0 }
 0x824   : > { %v6340_v11 = vadd.f32 %v6117_v46, %v5818_v33  ;;  %4589 = vmatmul.bf16.gmra.mxu1 %v12431_v35  ;;  %5111 = vmatmul.bf16.gmra.mxu2 %v12446_v58  ;;  %v12450_v46 = vld [vmem:[#allocation211_spill] sm:$0xff] }
 0x825   : > { %5637 = vmatmul.bf16.gmra.mxu3 %v7839_v29  ;;  %v12453_v29 = vld [vmem:[#allocation206_spill] sm:$0xff] }
 0x826   : > { %6159 = vmatmul.bf16.gmra.mxu0 %v12447_v61  ;;  %v6471_v26 = vadd.f32 %v10970_v54, %v6340_v11 }
 0x827   : > { %v5072_v36 = vpop.f32.mrf.mxu2 }
 0x828   : > { %6599 = vst [vmem:[%s10753_s17 + $0x208] sm:$0xff] %v6471_v26  ;;  %v5293_v43 = vadd.f32 %v5072_v36, %v4771_v31  ;;  %v5598_v3 = vpop.f32.mrf.mxu3 }
 0x829   : > { %v4552_v18 = vpop.f32.mrf.mxu1 }
 0x82a   : > { %v5819_v49 = vadd.f32 %v5598_v3, %v5293_v43  ;;  %v4772_v47 = vadd.f32 %v4552_v18, %v12449_v19 }
 0x82b   : > { %v6122_v45 = vpop.f32.mrf.mxu0 }
 0x82c   : > { %v6341_v35 = vadd.f32 %v6120_v5, %v5819_v49 }
 0x82e   : > { %v6472_v4 = vadd.f32 %v10970_v54, %v6341_v35  ;;  %v7841_v35 = vld [vmem:[%s8458_s16 + $0x178] sm:$0xff] }
 0x82f   : > { %v5074_v22 = vpop.f32.mrf.mxu2 }
 0x830   : > { %6600 = vst [vmem:[%s10753_s17 + $0x210] sm:$0xff] %v6472_v4  ;;  %v5294_v53 = vadd.f32 %v5074_v22, %v4772_v47  ;;  %v5600_v56 = vpop.f32.mrf.mxu3  ;;  %v12455_v4 = vld [vmem:[#allocation95_spill] sm:$0xff]  ;;  %v12456_v47 = vld [vmem:[#allocation49_spill] sm:$0xff] }
 0x831   : > { %v4555_v63 = vpop.f32.mrf.mxu1 }
 0x832   : > { %v5820_v27 = vadd.f32 %v5600_v56, %v5294_v53  ;;  %v4773_v30 = vadd.f32 %v4555_v63, %v12452_v23 }
 0x833   : > { %v6125_v14 = vpop.f32.mrf.mxu0 }
 0x834   : > { %v6342_v41 = vadd.f32 %v6122_v45, %v5820_v27  ;;  %4594 = vmatmul.bf16.gmra.mxu1 %v12435_v40  ;;  %5116 = vmatmul.bf16.gmra.mxu2 %v12450_v46  ;;  %v12454_v45 = vld [vmem:[#allocation213_spill] sm:$0xff] }
 0x835   : > { %5642 = vmatmul.bf16.gmra.mxu3 %v7840_v15  ;;  %v12457_v15 = vld [vmem:[#allocation208_spill] sm:$0xff] }
 0x836   : > { %6164 = vmatmul.bf16.gmra.mxu0 %v12451_v0  ;;  %v6473_v50 = vadd.f32 %v10970_v54, %v6342_v41 }
 0x837   : > { %v5077_v42 = vpop.f32.mrf.mxu2 }
 0x838   : > { %6601 = vst [vmem:[%s10753_s17 + $0x218] sm:$0xff] %v6473_v50  ;;  %v5295_v57 = vadd.f32 %v5077_v42, %v4773_v30  ;;  %v5603_v51 = vpop.f32.mrf.mxu3 }
 0x839   : > { %v4557_v33 = vpop.f32.mrf.mxu1 }
 0x83a   : > { %v5821_v5 = vadd.f32 %v5603_v51, %v5295_v57  ;;  %v4774_v26 = vadd.f32 %v4557_v33, %v12453_v29 }
 0x83b   : > { %v6127_v11 = vpop.f32.mrf.mxu0 }
 0x83c   : > { %v6343_v40 = vadd.f32 %v6125_v14, %v5821_v5 }
 0x83e   : > { %v6474_v58 = vadd.f32 %v10970_v54, %v6343_v40  ;;  %v7842_v40 = vld [vmem:[%s8458_s16 + $0x180] sm:$0xff] }
 0x83f   : > { %v5079_v1 = vpop.f32.mrf.mxu2 }
 0x840   : > { %6602 = vst [vmem:[%s10753_s17 + $0x220] sm:$0xff] %v6474_v58  ;;  %v5296_v31 = vadd.f32 %v5079_v1, %v4774_v26  ;;  %v5605_v36 = vpop.f32.mrf.mxu3  ;;  %v12459_v58 = vld [vmem:[#allocation101_spill] sm:$0xff]  ;;  %v12460_v26 = vld [vmem:[#allocation55_spill] sm:$0xff] }
 0x841   : > { %v4560_v43 = vpop.f32.mrf.mxu1 }
 0x842   : > { %v5822_v3 = vadd.f32 %v5605_v36, %v5296_v31  ;;  %v4775_v22 = vadd.f32 %v4560_v43, %v12456_v47 }
 0x843   : > { %v6130_v18 = vpop.f32.mrf.mxu0 }
 0x844   : > { %v6344_v49 = vadd.f32 %v6127_v11, %v5822_v3  ;;  %4599 = vmatmul.bf16.gmra.mxu1 %v12439_v7  ;;  %5121 = vmatmul.bf16.gmra.mxu2 %v12454_v45  ;;  %v12458_v11 = vld [vmem:[#allocation215_spill] sm:$0xff] }
 0x845   : > { %5647 = vmatmul.bf16.gmra.mxu3 %v7841_v35  ;;  %v12461_v35 = vld [vmem:[#allocation210_spill] sm:$0xff] }
 0x846   : > { %6169 = vmatmul.bf16.gmra.mxu0 %v12455_v4  ;;  %v6475_v19 = vadd.f32 %v10970_v54, %v6344_v49 }
 0x847   : > { %v5082_v53 = vpop.f32.mrf.mxu2 }
 0x848   : > { %6603 = vst [vmem:[%s10753_s17 + $0x228] sm:$0xff] %v6475_v19  ;;  %v5297_v56 = vadd.f32 %v5082_v53, %v4775_v22  ;;  %v5608_v63 = vpop.f32.mrf.mxu3 }
 0x849   : > { %v4562_v27 = vpop.f32.mrf.mxu1 }
 0x84a   : > { %v5823_v14 = vadd.f32 %v5608_v63, %v5297_v56  ;;  %v4776_v50 = vadd.f32 %v4562_v27, %v12457_v15 }
 0x84b   : > { %v6132_v41 = vpop.f32.mrf.mxu0 }
 0x84c   : > { %v6345_v7 = vadd.f32 %v6130_v18, %v5823_v14 }
 0x84e   : > { %v6476_v46 = vadd.f32 %v10970_v54, %v6345_v7  ;;  %v7843_v7 = vld [vmem:[%s8458_s16 + $0x188] sm:$0xff] }
 0x84f   : > { %v5084_v23 = vpop.f32.mrf.mxu2 }
 0x850   : > { %6604 = vst [vmem:[%s10753_s17 + $0x230] sm:$0xff] %v6476_v46  ;;  %v5298_v30 = vadd.f32 %v5084_v23, %v4776_v50  ;;  %v5610_v42 = vpop.f32.mrf.mxu3  ;;  %v12463_v46 = vld [vmem:[#allocation109_spill] sm:$0xff] }
 0x851   : > { %v4565_v57 = vpop.f32.mrf.mxu1  ;;  %v12464_v50 = vld [vmem:[#allocation61_spill] sm:$0xff] }
 0x852   : > { %v5824_v51 = vadd.f32 %v5610_v42, %v5298_v30  ;;  %v4777_v1 = vadd.f32 %v4565_v57, %v12460_v26 }
 0x853   : > { %v6135_v33 = vpop.f32.mrf.mxu0 }
 0x854   : > { %v6346_v5 = vadd.f32 %v6132_v41, %v5824_v51  ;;  %4604 = vmatmul.bf16.gmra.mxu1 %v12443_v8  ;;  %5126 = vmatmul.bf16.gmra.mxu2 %v12458_v11  ;;  %v12462_v41 = vld [vmem:[#allocation217_spill] sm:$0xff] }
 0x855   : > { %5652 = vmatmul.bf16.gmra.mxu3 %v7842_v40  ;;  %v12465_v40 = vld [vmem:[#allocation212_spill] sm:$0xff] }
 0x856   : > { %6174 = vmatmul.bf16.gmra.mxu0 %v12459_v58  ;;  %v6477_v29 = vadd.f32 %v10970_v54, %v6346_v5 }
 0x857   : > { %v5087_v31 = vpop.f32.mrf.mxu2 }
 0x858   : > { %6605 = vst [vmem:[%s10753_s17 + $0x238] sm:$0xff] %v6477_v29  ;;  %v5299_v36 = vadd.f32 %v5087_v31, %v4777_v1  ;;  %v5613_v43 = vpop.f32.mrf.mxu3 }
 0x859   : > { %v4567_v3 = vpop.f32.mrf.mxu1 }
 0x85a   : > { %v5825_v18 = vadd.f32 %v5613_v43, %v5299_v36  ;;  %v4778_v19 = vadd.f32 %v4567_v3, %v12461_v35 }
 0x85b   : > { %v6137_v49 = vpop.f32.mrf.mxu0 }
 0x85c   : > { %v6347_v8 = vadd.f32 %v6135_v33, %v5825_v18 }
 0x85e   : > { %v6478_v45 = vadd.f32 %v10970_v54, %v6347_v8  ;;  %v7844_v8 = vld [vmem:[%s8458_s16 + $0x190] sm:$0xff] }
 0x85f   : > { %v5089_v47 = vpop.f32.mrf.mxu2 }
 0x860   : > { %6606 = vst [vmem:[%s10753_s17 + $0x240] sm:$0xff] %v6478_v45  ;;  %v5300_v22 = vadd.f32 %v5089_v47, %v4778_v19  ;;  %v5615_v53 = vpop.f32.mrf.mxu3  ;;  %v12467_v45 = vld [vmem:[#allocation116_spill] sm:$0xff]  ;;  %v12468_v19 = vld [vmem:[#allocation67_spill] sm:$0xff] }
 0x861   : > { %v4570_v56 = vpop.f32.mrf.mxu1 }
 0x862   : > { %v5826_v63 = vadd.f32 %v5615_v53, %v5300_v22  ;;  %v4779_v23 = vadd.f32 %v4570_v56, %v12464_v50 }
 0x863   : > { %v6140_v27 = vpop.f32.mrf.mxu0 }
 0x864   : > { %v6348_v14 = vadd.f32 %v6137_v49, %v5826_v63  ;;  %4609 = vmatmul.bf16.gmra.mxu1 %v12447_v61  ;;  %5131 = vmatmul.bf16.gmra.mxu2 %v12462_v41  ;;  %v12466_v49 = vld [vmem:[#allocation219_spill] sm:$0xff] }
 0x865   : > { %5657 = vmatmul.bf16.gmra.mxu3 %v7843_v7  ;;  %v12469_v7 = vld [vmem:[#allocation214_spill] sm:$0xff] }
 0x866   : > { %6179 = vmatmul.bf16.gmra.mxu0 %v12463_v46  ;;  %v6479_v15 = vadd.f32 %v10970_v54, %v6348_v14 }
 0x867   : > { %v5092_v30 = vpop.f32.mrf.mxu2 }
 0x868   : > { %6607 = vst [vmem:[%s10753_s17 + $0x248] sm:$0xff] %v6479_v15  ;;  %v5301_v42 = vadd.f32 %v5092_v30, %v4779_v23  ;;  %v5618_v57 = vpop.f32.mrf.mxu3 }
 0x869   : > { %v4572_v51 = vpop.f32.mrf.mxu1 }
 0x86a   : > { %v5827_v33 = vadd.f32 %v5618_v57, %v5301_v42  ;;  %v4780_v29 = vadd.f32 %v4572_v51, %v12465_v40 }
 0x86b   : > { %v6142_v5 = vpop.f32.mrf.mxu0 }
 0x86c   : > { %v6349_v61 = vadd.f32 %v6140_v27, %v5827_v33 }
 0x86e   : > { %v6480_v11 = vadd.f32 %v10970_v54, %v6349_v61  ;;  %v7845_v61 = vld [vmem:[%s8458_s16 + $0x198] sm:$0xff] }
 0x86f   : > { %v5094_v26 = vpop.f32.mrf.mxu2 }
 0x870   : > { %6608 = vst [vmem:[%s10753_s17 + $0x250] sm:$0xff] %v6480_v11  ;;  %v5302_v1 = vadd.f32 %v5094_v26, %v4780_v29  ;;  %v5620_v31 = vpop.f32.mrf.mxu3  ;;  %v12471_v11 = vld [vmem:[#allocation123_spill] sm:$0xff]  ;;  %v12472_v29 = vld [vmem:[#allocation73_spill] sm:$0xff] }
 0x871   : > { %v4575_v36 = vpop.f32.mrf.mxu1 }
 0x872   : > { %v5828_v43 = vadd.f32 %v5620_v31, %v5302_v1  ;;  %v4781_v47 = vadd.f32 %v4575_v36, %v12468_v19 }
 0x873   : > { %v6145_v3 = vpop.f32.mrf.mxu0 }
 0x874   : > { %v6350_v18 = vadd.f32 %v6142_v5, %v5828_v43  ;;  %4614 = vmatmul.bf16.gmra.mxu1 %v12451_v0  ;;  %5136 = vmatmul.bf16.gmra.mxu2 %v12466_v49  ;;  %v12470_v5 = vld [vmem:[#allocation221_spill] sm:$0xff] }
 0x875   : > { %5662 = vmatmul.bf16.gmra.mxu3 %v7844_v8  ;;  %v12473_v8 = vld [vmem:[#allocation216_spill] sm:$0xff] }
 0x876   : > { %6184 = vmatmul.bf16.gmra.mxu0 %v12467_v45  ;;  %v6481_v35 = vadd.f32 %v10970_v54, %v6350_v18 }
 0x877   : > { %v5097_v22 = vpop.f32.mrf.mxu2 }
 0x878   : > { %6609 = vst [vmem:[%s10753_s17 + $0x258] sm:$0xff] %v6481_v35  ;;  %v5303_v53 = vadd.f32 %v5097_v22, %v4781_v47  ;;  %v5623_v56 = vpop.f32.mrf.mxu3 }
 0x879   : > { %v4577_v63 = vpop.f32.mrf.mxu1 }
 0x87a   : > { %v5829_v27 = vadd.f32 %v5623_v56, %v5303_v53  ;;  %v4782_v15 = vadd.f32 %v4577_v63, %v12469_v7 }
 0x87b   : > { %v6147_v14 = vpop.f32.mrf.mxu0 }
 0x87c   : > { %v6351_v0 = vadd.f32 %v6145_v3, %v5829_v27 }
 0x87e   : > { %v6482_v41 = vadd.f32 %v10970_v54, %v6351_v0  ;;  %v7846_v0 = vld [vmem:[%s8458_s16 + $0x1a0] sm:$0xff] }
 0x87f   : > { %v5099_v50 = vpop.f32.mrf.mxu2 }
 0x880   : > { %6610 = vst [vmem:[%s10753_s17 + $0x260] sm:$0xff] %v6482_v41  ;;  %v5304_v23 = vadd.f32 %v5099_v50, %v4782_v15  ;;  %v5625_v30 = vpop.f32.mrf.mxu3  ;;  %v12475_v41 = vld [vmem:[#allocation130_spill] sm:$0xff]  ;;  %v12476_v15 = vld [vmem:[#allocation80_spill] sm:$0xff] }
 0x881   : > { %v4580_v42 = vpop.f32.mrf.mxu1 }
 0x882   : > { %v5830_v57 = vadd.f32 %v5625_v30, %v5304_v23  ;;  %v4783_v26 = vadd.f32 %v4580_v42, %v12472_v29 }
 0x883   : > { %v6150_v51 = vpop.f32.mrf.mxu0 }
 0x884   : > { %v6352_v33 = vadd.f32 %v6147_v14, %v5830_v57  ;;  %4619 = vmatmul.bf16.gmra.mxu1 %v12455_v4  ;;  %5141 = vmatmul.bf16.gmra.mxu2 %v12470_v5  ;;  %v12474_v14 = vld [vmem:[#allocation223_spill] sm:$0xff] }
 0x885   : > { %5667 = vmatmul.bf16.gmra.mxu3 %v7845_v61  ;;  %v12477_v61 = vld [vmem:[#allocation218_spill] sm:$0xff] }
 0x886   : > { %6189 = vmatmul.bf16.gmra.mxu0 %v12471_v11  ;;  %v6483_v40 = vadd.f32 %v10970_v54, %v6352_v33 }
 0x887   : > { %v5102_v1 = vpop.f32.mrf.mxu2 }
 0x888   : > { %6611 = vst [vmem:[%s10753_s17 + $0x268] sm:$0xff] %v6483_v40  ;;  %v5305_v31 = vadd.f32 %v5102_v1, %v4783_v26  ;;  %v5628_v36 = vpop.f32.mrf.mxu3 }
 0x889   : > { %v4582_v43 = vpop.f32.mrf.mxu1 }
 0x88a   : > { %v5831_v3 = vadd.f32 %v5628_v36, %v5305_v31  ;;  %v4784_v35 = vadd.f32 %v4582_v43, %v12473_v8 }
 0x88b   : > { %v6152_v18 = vpop.f32.mrf.mxu0 }
 0x88c   : > { %v6353_v4 = vadd.f32 %v6150_v51, %v5831_v3 }
 0x88e   : > { %v6484_v49 = vadd.f32 %v10970_v54, %v6353_v4  ;;  %v7847_v4 = vld [vmem:[%s8458_s16 + $0x1a8] sm:$0xff] }
 0x88f   : > { %v5104_v19 = vpop.f32.mrf.mxu2 }
 0x890   : > { %6612 = vst [vmem:[%s10753_s17 + $0x270] sm:$0xff] %v6484_v49  ;;  %v5306_v47 = vadd.f32 %v5104_v19, %v4784_v35  ;;  %v5630_v22 = vpop.f32.mrf.mxu3  ;;  %v12479_v49 = vld [vmem:[#allocation35_spill] sm:$0xff]  ;;  %v12480_v35 = vld [vmem:[#allocation86_spill] sm:$0xff] }
 0x891   : > { %v4585_v53 = vpop.f32.mrf.mxu1 }
 0x892   : > { %v5832_v56 = vadd.f32 %v5630_v22, %v5306_v47  ;;  %v4785_v50 = vadd.f32 %v4585_v53, %v12476_v15 }
 0x893   : > { %v6155_v63 = vpop.f32.mrf.mxu0 }
 0x894   : > { %v6354_v27 = vadd.f32 %v6152_v18, %v5832_v56  ;;  %4624 = vmatmul.bf16.gmra.mxu1 %v12459_v58  ;;  %5146 = vmatmul.bf16.gmra.mxu2 %v12474_v14  ;;  %v12478_v18 = vld [vmem:[#allocation225_spill] sm:$0xff] }
 0x895   : > { %5672 = vmatmul.bf16.gmra.mxu3 %v7846_v0  ;;  %v12481_v0 = vld [vmem:[#allocation220_spill] sm:$0xff] }
 0x896   : > { %6194 = vmatmul.bf16.gmra.mxu0 %v12475_v41  ;;  %v6485_v7 = vadd.f32 %v10970_v54, %v6354_v27 }
 0x897   : > { %v5107_v23 = vpop.f32.mrf.mxu2 }
 0x898   : > { %6613 = vst [vmem:[%s10753_s17 + $0x278] sm:$0xff] %v6485_v7  ;;  %v5307_v30 = vadd.f32 %v5107_v23, %v4785_v50  ;;  %v5633_v42 = vpop.f32.mrf.mxu3 }
 0x899   : > { %v4587_v57 = vpop.f32.mrf.mxu1 }
 0x89a   : > { %v5833_v51 = vadd.f32 %v5633_v42, %v5307_v30  ;;  %v4786_v40 = vadd.f32 %v4587_v57, %v12477_v61 }
 0x89b   : > { %v6157_v33 = vpop.f32.mrf.mxu0 }
 0x89c   : > { %v6355_v58 = vadd.f32 %v6155_v63, %v5833_v51 }
 0x89e   : > { %v6486_v5 = vadd.f32 %v10970_v54, %v6355_v58  ;;  %v7848_v58 = vld [vmem:[%s8458_s16 + $0x1b0] sm:$0xff] }
 0x89f   : > { %v5109_v29 = vpop.f32.mrf.mxu2 }
 0x8a0   : > { %6614 = vst [vmem:[%s10753_s17 + $0x280] sm:$0xff] %v6486_v5  ;;  %v5308_v26 = vadd.f32 %v5109_v29, %v4786_v40  ;;  %v5635_v1 = vpop.f32.mrf.mxu3  ;;  %v12483_v5 = vld [vmem:[#allocation41_spill] sm:$0xff]  ;;  %v12484_v40 = vld [vmem:[#allocation92_spill] sm:$0xff] }
 0x8a1   : > { %v4590_v31 = vpop.f32.mrf.mxu1 }
 0x8a2   : > { %v5834_v36 = vadd.f32 %v5635_v1, %v5308_v26  ;;  %v4787_v19 = vadd.f32 %v4590_v31, %v12480_v35 }
 0x8a3   : > { %v6160_v43 = vpop.f32.mrf.mxu0 }
 0x8a4   : > { %v6356_v3 = vadd.f32 %v6157_v33, %v5834_v36  ;;  %4629 = vmatmul.bf16.gmra.mxu1 %v12463_v46  ;;  %5151 = vmatmul.bf16.gmra.mxu2 %v12478_v18  ;;  %v12482_v33 = vld [vmem:[#allocation227_spill] sm:$0xff] }
 0x8a5   : > { %5677 = vmatmul.bf16.gmra.mxu3 %v7847_v4  ;;  %v12485_v4 = vld [vmem:[#allocation222_spill] sm:$0xff] }
 0x8a6   : > { %6199 = vmatmul.bf16.gmra.mxu0 %v12479_v49  ;;  %v6487_v8 = vadd.f32 %v10970_v54, %v6356_v3 }
 0x8a7   : > { %v5112_v47 = vpop.f32.mrf.mxu2 }
 0x8a8   : > { %6615 = vst [vmem:[%s10753_s17 + $0x288] sm:$0xff] %v6487_v8  ;;  %v5309_v22 = vadd.f32 %v5112_v47, %v4787_v19  ;;  %v5638_v53 = vpop.f32.mrf.mxu3 }
 0x8a9   : > { %v4592_v56 = vpop.f32.mrf.mxu1 }
 0x8aa   : > { %v5835_v63 = vadd.f32 %v5638_v53, %v5309_v22  ;;  %v4788_v7 = vadd.f32 %v4592_v56, %v12481_v0  ;;  %v12487_v0 = vld [vmem:[#allocation98_spill] sm:$0xff] }
 0x8ab   : > { %v6162_v27 = vpop.f32.mrf.mxu0 }
 0x8ac   : > { %v6357_v46 = vadd.f32 %v6160_v43, %v5835_v63 }
 0x8ae   : > { %v6488_v14 = vadd.f32 %v10970_v54, %v6357_v46  ;;  %v12486_v46 = vld [vmem:[#allocation47_spill] sm:$0xff] }
 0x8af   : > { %v5114_v15 = vpop.f32.mrf.mxu2 }
 0x8b0   : > { %6616 = vst [vmem:[%s10753_s17 + $0x290] sm:$0xff] %v6488_v14  ;;  %v5310_v50 = vadd.f32 %v5114_v15, %v4788_v7  ;;  %v5640_v23 = vpop.f32.mrf.mxu3 }
 0x8b1   : > { %v4595_v30 = vpop.f32.mrf.mxu1 }
 0x8b2   : > { %v5836_v42 = vadd.f32 %v5640_v23, %v5310_v50  ;;  %v4789_v29 = vadd.f32 %v4595_v30, %v12484_v40 }
 0x8b3   : > { %v6165_v57 = vpop.f32.mrf.mxu0 }
 0x8b4   : > { %v6358_v51 = vadd.f32 %v6162_v27, %v5836_v42  ;;  %4634 = vmatmul.bf16.gmra.mxu1 %v12467_v45  ;;  %5156 = vmatmul.bf16.gmra.mxu2 %v12482_v33  ;;  %v7849_v27 = vld [vmem:[%s8458_s16 + $0x1b8] sm:$0xff] }
 0x8b5   : > { %5682 = vmatmul.bf16.gmra.mxu3 %v7848_v58  ;;  %v12488_v33 = vld [vmem:[#allocation224_spill] sm:$0xff] }
 0x8b6   : > { %6204 = vmatmul.bf16.gmra.mxu0 %v12483_v5  ;;  %v6489_v61 = vadd.f32 %v10970_v54, %v6358_v51  ;;  %v11185_v51 = vld [vmem:[#allocation10] ss:$0 sm:$0xff] }
 0x8b7   : > { %v5117_v26 = vpop.f32.mrf.mxu2 }
 0x8b8   : > { %6617 = vst [vmem:[%s10753_s17 + $0x298] sm:$0xff] %v6489_v61  ;;  %v5311_v1 = vadd.f32 %v5117_v26, %v4789_v29  ;;  %v5643_v31 = vpop.f32.mrf.mxu3 }
 0x8b9   : > { %v4597_v36 = vpop.f32.mrf.mxu1 }
 0x8ba   : > { %v5837_v43 = vadd.f32 %v5643_v31, %v5311_v1  ;;  %v4790_v8 = vadd.f32 %v4597_v36, %v12485_v4  ;;  %v7851_v36 = vld [vmem:[%s8458_s16 + $0x1c0] sm:$0xff] }
 0x8bb   : > { %v6167_v3 = vpop.f32.mrf.mxu0 }
 0x8bc   : > { %v6359_v45 = vadd.f32 %v6165_v57, %v5837_v43 }
 0x8be   : > { %v6490_v18 = vadd.f32 %v10970_v54, %v6359_v45 }
 0x8bf   : > { %v5119_v35 = vpop.f32.mrf.mxu2 }
 0x8c0   : > { %6618 = vst [vmem:[%s10753_s17 + $0x2a0] sm:$0xff] %v6490_v18  ;;  %v5312_v19 = vadd.f32 %v5119_v35, %v4790_v8  ;;  %v5645_v47 = vpop.f32.mrf.mxu3 }
 0x8c1   : > { %v4600_v22 = vpop.f32.mrf.mxu1 }
 0x8c2   : > { %v5838_v53 = vadd.f32 %v5645_v47, %v5312_v19  ;;  %v4791_v7 = vadd.f32 %v4600_v22, %v12487_v0  ;;  %v12490_v22 = vld [vmem:[#allocation226_spill] sm:$0xff] }
 0x8c3   : > { %v6170_v56 = vpop.f32.mrf.mxu0 }
 0x8c4   : > { %v6360_v63 = vadd.f32 %v6167_v3, %v5838_v53  ;;  %4639 = vmatmul.bf16.gmra.mxu1 %v12471_v11  ;;  %5161 = vmatmul.bf16.gmra.mxu2 %v10413_v28  ;;  %v12489_v3 = vld [vmem:[#allocation106_spill] sm:$0xff] }
 0x8c5   : > { %5687 = vmatmul.bf16.gmra.mxu3 %v7849_v27 }
 0x8c6   : > { %6209 = vmatmul.bf16.gmra.mxu0 %v12486_v46  ;;  %v6491_v14 = vadd.f32 %v10970_v54, %v6360_v63 }
 0x8c7   : > { %v5122_v15 = vpop.f32.mrf.mxu2 }
 0x8c8   : > { %6619 = vst [vmem:[%s10753_s17 + $0x2a8] sm:$0xff] %v6491_v14  ;;  %v5313_v50 = vadd.f32 %v5122_v15, %v4791_v7  ;;  %v5648_v23 = vpop.f32.mrf.mxu3 }
 0x8c9   : > { %v4602_v30 = vpop.f32.mrf.mxu1 }
 0x8ca   : > { %v5839_v42 = vadd.f32 %v5648_v23, %v5313_v50  ;;  %v4792_v58 = vadd.f32 %v4602_v30, %v12488_v33  ;;  %v7852_v50 = vld [vmem:[%s8458_s16 + $0x1c8] sm:$0xff]  ;;  %v12491_v30 = vld [vmem:[#allocation113_spill] sm:$0xff] }
 0x8cb   : > { %v6172_v57 = vpop.f32.mrf.mxu0 }
 0x8cc   : > { %v6361_v11 = vadd.f32 %v6170_v56, %v5839_v42 }
 0x8ce   : > { %v6492_v28 = vadd.f32 %v11185_v51, %v6361_v11 }
 0x8cf   : > { %v5124_v61 = vpop.f32.mrf.mxu2 }
 0x8d0   : > { %6620 = vst [vmem:[%s10753_s17 + $0x2b0] sm:$0xff] %v6492_v28  ;;  %v5314_v54 = vadd.f32 %v5124_v61, %v4792_v58  ;;  %v5650_v40 = vpop.f32.mrf.mxu3 }
 0x8d1   : > { %v4605_v29 = vpop.f32.mrf.mxu1 }
 0x8d2   : > { %v5840_v26 = vadd.f32 %v5650_v40, %v5314_v54  ;;  %v4793_v45 = vadd.f32 %v4605_v29, %v12489_v3  ;;  %v12492_v54 = vld [vmem:[#allocation228_spill] sm:$0xff] }
 0x8d3   : > { %v6175_v1 = vpop.f32.mrf.mxu0 }
 0x8d4   : > { %v6362_v31 = vadd.f32 %v6172_v57, %v5840_v26  ;;  %4644 = vmatmul.bf16.gmra.mxu1 %v12475_v41  ;;  %5166 = vmatmul.bf16.gmra.mxu2 %v10445_v2 }
 0x8d5   : > { %5692 = vmatmul.bf16.gmra.mxu3 %v7851_v36 }
 0x8d6   : > { %6214 = vmatmul.bf16.gmra.mxu0 %v10559_v17  ;;  %v6493_v43 = vadd.f32 %v11185_v51, %v6362_v31 }
 0x8d7   : > { %v5127_v18 = vpop.f32.mrf.mxu2 }
 0x8d8   : > { %6621 = vst [vmem:[%s10753_s17 + $0x2b8] sm:$0xff] %v6493_v43  ;;  %v5315_v4 = vadd.f32 %v5127_v18, %v4793_v45  ;;  %v5653_v8 = vpop.f32.mrf.mxu3  ;;  %v7853_v45 = vld [vmem:[%s8458_s16 + $0x1d0] sm:$0xff] }
 0x8d9   : > { %v4607_v35 = vpop.f32.mrf.mxu1 }
 0x8da   : > { %v5841_v19 = vadd.f32 %v5653_v8, %v5315_v4  ;;  %v4794_v53 = vadd.f32 %v4607_v35, %v12490_v22  ;;  %v12493_v4 = vld [vmem:[#allocation120_spill] sm:$0xff] }
 0x8db   : > { %v6177_v47 = vpop.f32.mrf.mxu0 }
 0x8dc   : > { %v6363_v41 = vadd.f32 %v6175_v1, %v5841_v19 }
 0x8de   : > { %v6494_v2 = vadd.f32 %v11185_v51, %v6363_v41 }
 0x8df   : > { %v5129_v56 = vpop.f32.mrf.mxu2 }
 0x8e0   : > { %6622 = vst [vmem:[%s10753_s17 + $0x2c0] sm:$0xff] %v6494_v2  ;;  %v5316_v63 = vadd.f32 %v5129_v56, %v4794_v53  ;;  %v5655_v27 = vpop.f32.mrf.mxu3  ;;  %v12494_v53 = vld [vmem:[#allocation229_spill] sm:$0xff] }
 0x8e1   : > { %v4610_v14 = vpop.f32.mrf.mxu1 }
 0x8e2   : > { %v5842_v0 = vadd.f32 %v5655_v27, %v5316_v63  ;;  %v4795_v42 = vadd.f32 %v4610_v14, %v12491_v30 }
 0x8e3   : > { %v6180_v7 = vpop.f32.mrf.mxu0 }
 0x8e4   : > { %v6364_v15 = vadd.f32 %v6177_v47, %v5842_v0  ;;  %4649 = vmatmul.bf16.gmra.mxu1 %v12479_v49  ;;  %5171 = vmatmul.bf16.gmra.mxu2 %v10474_v38 }
 0x8e5   : > { %5697 = vmatmul.bf16.gmra.mxu3 %v7852_v50 }
 0x8e6   : > { %6219 = vmatmul.bf16.gmra.mxu0 %v10589_v25  ;;  %v6495_v23 = vadd.f32 %v11185_v51, %v6364_v15 }
 0x8e7   : > { %v5132_v57 = vpop.f32.mrf.mxu2 }
 0x8e8   : > { %6623 = vst [vmem:[%s10753_s17 + $0x2c8] sm:$0xff] %v6495_v23  ;;  %v5317_v11 = vadd.f32 %v5132_v57, %v4795_v42  ;;  %v5658_v28 = vpop.f32.mrf.mxu3  ;;  %v7854_v23 = vld [vmem:[%s8458_s16 + $0x1d8] sm:$0xff]  ;;  %v12495_v42 = vld [vmem:[#allocation127_spill] sm:$0xff] }
 0x8e9   : > { %v4612_v33 = vpop.f32.mrf.mxu1 }
 0x8ea   : > { %v5843_v58 = vadd.f32 %v5658_v28, %v5317_v11  ;;  %v4796_v40 = vadd.f32 %v4612_v33, %v12492_v54 }
 0x8eb   : > { %v6182_v61 = vpop.f32.mrf.mxu0 }
 0x8ec   : > { %v6365_v49 = vadd.f32 %v6180_v7, %v5843_v58 }
 0x8ee   : > { %v6496_v38 = vadd.f32 %v11185_v51, %v6365_v49 }
 0x8ef   : > { %v5134_v29 = vpop.f32.mrf.mxu2 }
 0x8f0   : > { %6624 = vst [vmem:[%s10753_s17 + $0x2d0] sm:$0xff] %v6496_v38  ;;  %v5318_v26 = vadd.f32 %v5134_v29, %v4796_v40  ;;  %v5660_v1 = vpop.f32.mrf.mxu3  ;;  %v12498_v29 = vld [vmem:[#allocation230_spill] sm:$0xff] }
 0x8f1   : > { %v4615_v31 = vpop.f32.mrf.mxu1 }
 0x8f2   : > { %v5844_v36 = vadd.f32 %v5660_v1, %v5318_v26  ;;  %v4797_v8 = vadd.f32 %v4615_v31, %v12493_v4 }
 0x8f3   : > { %v6185_v43 = vpop.f32.mrf.mxu0 }
 0x8f4   : > { %v6366_v3 = vadd.f32 %v6182_v61, %v5844_v36  ;;  %4654 = vmatmul.bf16.gmra.mxu1 %v12483_v5  ;;  %5176 = vmatmul.bf16.gmra.mxu2 %v10503_v34  ;;  %v12496_v61 = vld [vmem:[#allocation233_spill] sm:$0xff]  ;;  %v12500_v36 = vld [vmem:[#allocation235_spill] sm:$0xff] }
 0x8f5   : > { %5702 = vmatmul.bf16.gmra.mxu3 %v7853_v45  ;;  %v12497_v49 = vshll.u32 %v12496_v61, 16  ;;  %v12499_v1 = vshrl.u32 %v12496_v61, 16 }
 0x8f6   : > { %6224 = vmatmul.bf16.gmra.mxu0 %v10618_v62  ;;  %v6497_v18 = vadd.f32 %v11185_v51, %v6366_v3 }
 0x8f7   : > { %v5137_v35 = vpop.f32.mrf.mxu2  ;;  %v1776_v38 = vrot.slane %v12497_v49, 1 }
 0x8f8   : > { %6625 = vst [vmem:[%s10753_s17 + $0x2d8] sm:$0xff] %v6497_v18  ;;  %v5319_v19 = vadd.f32 %v5137_v35, %v4797_v8  ;;  %v5663_v47 = vpop.f32.mrf.mxu3 }
 0x8f9   : > { %v4617_v41 = vpop.f32.mrf.mxu1  ;;  %v1777_v31 = vor.u32 %v1776_v38, %v12499_v1  ;;  %v12509_v1 = vld [vmem:[#allocation38_spill] sm:$0xff] }
 0x8fa   : > { %v5845_v2 = vadd.f32 %v5663_v47, %v5319_v19  ;;  %v4798_v56 = vadd.f32 %v4617_v41, %v12494_v53 }
 0x8fb   : > { %v6187_v22 = vpop.f32.mrf.mxu0 }
 0x8fc   : > { %v6367_v5 = vadd.f32 %v6185_v43, %v5845_v2  ;;  %v12501_v43 = vshll.u32 %v12500_v36, 16  ;;  %v12502_v2 = vld [vmem:[#allocation53_spill] sm:$0xff] }
 0x8fe   : > { %v6498_v34 = vadd.f32 %v11185_v51, %v6367_v5  ;;  %v1778_v3 = vrot.slane %v12501_v43, 1 }
 0x8ff   : > { %v5139_v63 = vpop.f32.mrf.mxu2 }
 0x900   : > { %6626 = vst [vmem:[%s10753_s17 + $0x2e0] sm:$0xff] %v6498_v34  ;;  %v5320_v27 = vadd.f32 %v5139_v63, %v4798_v56  ;;  %v5665_v14 = vpop.f32.mrf.mxu3  ;;  %v11237_v47 = vsel %vm1599_vm4, %v1777_v31, %v1778_v3  ;;  %v12503_v34 = vld [vmem:[#allocation32_spill] sm:$0xff] }
 0x901   : > { %v4620_v0 = vpop.f32.mrf.mxu1 }
 0x902   : > { %v5846_v7 = vadd.f32 %v5665_v14, %v5320_v27  ;;  %v4799_v57 = vadd.f32 %v4620_v0, %v12495_v42 }
 0x903   : > { %v6190_v15 = vpop.f32.mrf.mxu0 }
 0x904   : > { %v6368_v50 = vadd.f32 %v6187_v22, %v5846_v7  ;;  %4659 = vmatmul.bf16.gmra.mxu1 %v12486_v46  ;;  %5181 = vmatmul.bf16.gmra.mxu2 %v10531_v21  ;;  %v7855_v22 = vld [vmem:[%s8458_s16 + $0x1e0] sm:$0xff] }
 0x905   : > { %5707 = vmatmul.bf16.gmra.mxu3 %v7854_v23 }
 0x906   : > { %6229 = vmatmul.bf16.gmra.mxu0 %v10646_v32  ;;  %v6499_v30 = vadd.f32 %v11185_v51, %v6368_v50  ;;  %v12504_v50 = vld [vmem:[#allocation231_spill] sm:$0xff] }
 0x907   : > { %v5142_v11 = vpop.f32.mrf.mxu2 }
 0x908   : > { %6627 = vst [vmem:[%s10753_s17 + $0x2e8] sm:$0xff] %v6499_v30  ;;  %v5321_v28 = vadd.f32 %v5142_v11, %v4799_v57  ;;  %v5668_v33 = vpop.f32.mrf.mxu3  ;;  %v12505_v30 = vshrl.u32 %v12500_v36, 16  ;;  %v12506_v57 = vld [vmem:[#allocation237_spill] sm:$0xff] }
 0x909   : > { %v4622_v58 = vpop.f32.mrf.mxu1  ;;  %v12507_v11 = vshll.u32 %v12506_v57, 16 }
 0x90a   : > { %v5847_v46 = vadd.f32 %v5668_v33, %v5321_v28  ;;  %v4800_v26 = vadd.f32 %v4622_v58, %v12498_v29  ;;  %v1780_v42 = vor.u32 %v1778_v3, %v12505_v30  ;;  %v7856_v29 = vld [vmem:[%s8458_s16 + $0x1e8] sm:$0xff]  ;;  %v12514_v30 = vld [vmem:[#allocation44_spill] sm:$0xff] }
 0x90b   : > { %v6192_v54 = vpop.f32.mrf.mxu0  ;;  %v1781_v28 = vrot.slane %v12507_v11, 1  ;;  %v556_v11 = vld [vmem:[%s8465_s13] sm:$0xf] }
 0x90c   : > { %v6369_v21 = vadd.f32 %v6190_v15, %v5847_v46 }
 0x90e   : > { %v6500_v40 = vadd.f32 %v11185_v51, %v6369_v21 }
 0x90f   : > { %v5144_v45 = vpop.f32.mrf.mxu2 }
 0x910   : > { %6628 = vst [vmem:[%s10753_s17 + $0x2f0] sm:$0xff] %v6500_v40  ;;  %v5322_v18 = vadd.f32 %v5144_v45, %v4800_v26  ;;  %v5670_v4 = vpop.f32.mrf.mxu3  ;;  %v12508_v40 = vld [vmem:[#allocation59_spill] sm:$0xff] }
 0x911   : > { %v4625_v8 = vpop.f32.mrf.mxu1 }
 0x912   : > { %v5848_v35 = vadd.f32 %v5670_v4, %v5322_v18  ;;  %v4801_v53 = vadd.f32 %v4625_v8, %v12503_v34 }
 0x913   : > { %v6195_v19 = vpop.f32.mrf.mxu0 }
 0x914   : > { %v6370_v41 = vadd.f32 %v6192_v54, %v5848_v35  ;;  %4664 = vmatmul.bf16.gmra.mxu1 %v10559_v17  ;;  %5186 = vmatmul.bf16.gmra.mxu2 %v12502_v2  ;;  %v11254_v54 = vsel %vm1599_vm4, %v1780_v42, %v1781_v28  ;;  %v12510_v35 = vld [vmem:[#allocation232_spill] sm:$0xff] }
 0x915   : > { %5712 = vmatmul.bf16.gmra.mxu3 %v7855_v22  ;;  %v12512_v22 = vshll.u32 %v10624_v6, 16 }
 0x916   : > { %6234 = vmatmul.bf16.gmra.mxu0 %v11237_v47  ;;  %v6501_v5 = vadd.f32 %v11185_v51, %v6370_v41  ;;  %v12511_v41 = vshrl.u32 %v12506_v57, 16 }
 0x917   : > { %v5147_v56 = vpop.f32.mrf.mxu2 }
 0x918   : > { %6629 = vst [vmem:[%s10753_s17 + $0x2f8] sm:$0xff] %v6501_v5  ;;  %v5323_v63 = vadd.f32 %v5147_v56, %v4801_v53  ;;  %v5673_v27 = vpop.f32.mrf.mxu3  ;;  %v1783_v2 = vor.u32 %v1781_v28, %v12511_v41  ;;  %v1784_v5 = vrot.slane %v12512_v22, 1  ;;  %v557_v28 = vld [vmem:[%s8465_s13 + $0x4] sm:$0xf] }
 0x919   : > { %v4627_v14 = vpop.f32.mrf.mxu1 }
 0x91a   : > { %v5849_v0 = vadd.f32 %v5673_v27, %v5323_v63  ;;  %v4802_v23 = vadd.f32 %v4627_v14, %v12504_v50  ;;  %v7857_v50 = vld [vmem:[%s8458_s16 + $0x1f0] sm:$0xff] }
 0x91b   : > { %v6197_v7 = vpop.f32.mrf.mxu0 }
 0x91c   : > { %v6371_v15 = vadd.f32 %v6195_v19, %v5849_v0  ;;  %v11272_v0 = vsel %vm1599_vm4, %v1783_v2, %v1784_v5 }
 0x91e   : > { %v6502_v17 = vadd.f32 %v11185_v51, %v6371_v15  ;;  %v12513_v15 = vld [vmem:[#allocation65_spill] sm:$0xff] }
 0x91f   : > { %v5149_v33 = vpop.f32.mrf.mxu2 }
 0x920   : > { %6630 = vst [vmem:[%s10753_s17 + $0x300] sm:$0xff] %v6502_v17  ;;  %v5324_v58 = vadd.f32 %v5149_v33, %v4802_v23  ;;  %v5675_v61 = vpop.f32.mrf.mxu3  ;;  %v578_v17 = vstv %s577_s10 }
 0x921   : > { %v4630_v49 = vpop.f32.mrf.mxu1  ;;  %vm11282_vm7 = vcmp.eq.s32.totalorder %v578_v17, 1 }
 0x922   : > { %v5850_v38 = vadd.f32 %v5675_v61, %v5324_v58  ;;  %v4803_v31 = vadd.f32 %v4630_v49, %v12509_v1 }
 0x923   : > { %v6200_v46 = vpop.f32.mrf.mxu0 }
 0x924   : > { %v6372_v21 = vadd.f32 %v6197_v7, %v5850_v38  ;;  %4669 = vmatmul.bf16.gmra.mxu1 %v10589_v25  ;;  %5191 = vmatmul.bf16.gmra.mxu2 %v12508_v40 }
 0x925   : > { %5717 = vmatmul.bf16.gmra.mxu3 %v7856_v29  ;;  %v558_v29 = vld [vmem:[%s8465_s13 + $0x8] sm:$0xf] }
 0x926   : > { %6239 = vmatmul.bf16.gmra.mxu0 %v11254_v54  ;;  %v6503_v26 = vadd.f32 %v11185_v51, %v6372_v21  ;;  %v581_v21 = vsel %vm11282_vm7, %v557_v28, 0 }
 0x927   : > { %v5152_v36 = vpop.f32.mrf.mxu2 }
 0x928   : > { %6631 = vst [vmem:[%s10753_s17 + $0x308] sm:$0xff] %v6503_v26  ;;  %v5325_v43 = vadd.f32 %v5152_v36, %v4803_v31  ;;  %v5678_v3 = vpop.f32.mrf.mxu3  ;;  %v559_v26 = vld [vmem:[%s8465_s13 + $0xc] sm:$0xf]  ;;  %v869_v31 = vunpack.c.l.b16 %v581_v21 }
 0x929   : > { %v4632_v45 = vpop.f32.mrf.mxu1 }
 0x92a   : > { %v5851_v18 = vadd.f32 %v5678_v3, %v5325_v43  ;;  %v4804_v19 = vadd.f32 %v4632_v45, %v12510_v35  ;;  %v12517_v43 = vld [vmem:[#allocation234_spill] sm:$0xff]  ;;  %v12518_v45 = vshrl.u32 %v10624_v6, 16 }
 0x92b   : > { %v6202_v4 = vpop.f32.mrf.mxu0 }
 0x92c   : > { %v6373_v8 = vadd.f32 %v6200_v46, %v5851_v18  ;;  %v580_v46 = vsel %vm11282_vm7, %v556_v11, 0  ;;  %v1786_v18 = vor.u32 %v1784_v5, %v12518_v45 }
 0x92d   : > { %v868_v1 = vunpack.c.l.b16 %v580_v46  ;;  %v561_v46 = vld [vmem:[%s8465_s13 + $0x14] sm:$0xf] }
 0x92e   : > { %v6504_v25 = vadd.f32 %v11185_v51, %v6373_v8  ;;  %v582_v8 = vsel %vm11282_vm7, %v558_v29, 0  ;;  %v11304_v6 = vsel %vm8843_vm6, %v1786_v18, 0  ;;  %v12521_v29 = vld [vmem:[#allocation236_spill] sm:$0xff] }
 0x92f   : > { %v5154_v34 = vpop.f32.mrf.mxu2  ;;  %v944_v2 = vpack.c.b16 %v869_v31, %v868_v1  ;;  %v870_v5 = vunpack.c.l.b16 %v582_v8 }
 0x930   : > { %6632 = vst [vmem:[%s10753_s17 + $0x310] sm:$0xff] %v6504_v25  ;;  %v5326_v53 = vadd.f32 %v5154_v34, %v4804_v19  ;;  %v5680_v56 = vpop.f32.mrf.mxu3  ;;  %v583_v25 = vsel %vm11282_vm7, %v559_v26, 0 }
 0x931   : > { %v4635_v63 = vpop.f32.mrf.mxu1 }
 0x932   : > { %v5852_v27 = vadd.f32 %v5680_v56, %v5326_v53  ;;  %v4805_v42 = vadd.f32 %v4635_v63, %v12514_v30  ;;  %v871_v53 = vunpack.c.l.b16 %v583_v25  ;;  %v12519_v63 = vld [vmem:[#allocation71_spill] sm:$0xff] }
 0x933   : > { %v6205_v14 = vpop.f32.mrf.mxu0 }
 0x934   : > { %v6374_v7 = vadd.f32 %v6202_v4, %v5852_v27  ;;  %4674 = vmatmul.bf16.gmra.mxu1 %v10618_v62  ;;  %5196 = vmatmul.bf16.gmra.mxu2 %v12513_v15  ;;  %v7858_v27 = vld [vmem:[%s8458_s16 + $0x1f8] sm:$0xff]  ;;  %v12520_v15 = vld [vmem:[#allocation50_spill] sm:$0xff]  ;;  %s8024_s16 = sshra.s32 %s6681_s22, 4  ;;  %s8025_s16 = int_to_ptr.hbm [resolvable:$true] %s8024_s16 }
 0x935   : > { %5722 = vmatmul.bf16.gmra.mxu3 %v7857_v50  ;;  %v1480_v50 = vshll.u32 %v944_v2, 16  ;;  %s8026_s12 = scalar_lea.hbm %s8025_s16, 1024  ;;  %p8031_p11 = scmp.lt.s32.totalorder %s8025_s16, %s12534_s0 }
 0x936   : > { %6244 = vmatmul.bf16.gmra.mxu0 %v11272_v0  ;;  %v6505_v23 = vadd.f32 %v11185_v51, %v6374_v7  ;;  %p8027_p0 = scmp.ne.s32.totalorder %s8025_s16, %s8026_s12  ;;  %p8032_p5 = scmp.lt.s32.totalorder %s8030_s14, %s8026_s12 }
 0x937   : > { %v5157_v57 = vpop.f32.mrf.mxu2 }
 0x938   : > { %6633 = vst [vmem:[%s10753_s17 + $0x318] sm:$0xff] %v6505_v23  ;;  %v5327_v62 = vadd.f32 %v5157_v57, %v4805_v42  ;;  %v5683_v58 = vpop.f32.mrf.mxu3  ;;  %v11312_v23 = vpack.c.b16 %v871_v53, %v870_v5  ;;  %p8028_p6 = pnand %p8027_p0, %p8331_p2  ;;  %p8033_p8 = por %p8032_p5, %p8031_p11 }
 0x939   : > { %v4637_v61 = vpop.f32.mrf.mxu1 }
 0x93a   : > { %v5853_v49 = vadd.f32 %v5683_v58, %v5327_v62  ;;  %v4806_v3 = vadd.f32 %v4637_v61, %v12517_v43  ;;  %v1787_v58 = vrot.slane %v1480_v50, 1  ;;  %v1487_v61 = vshll.u32 %v11312_v23, 16  ;;  %p8029_p10 = pneg %p8028_p6 }
 0x93b   : > { %v6207_v38 = vpop.f32.mrf.mxu0  ;;  %v1484_v53 = vshrl.u32 %v11312_v23, 16 }
 0x93c   : > { %v6375_v40 = vadd.f32 %v6205_v14, %v5853_v49  ;;  %v1477_v14 = vshrl.u32 %v944_v2, 16  ;;  %v1789_v31 = vrot.slane %v1487_v61, 1  ;;  %p8034_p13 = pnand %p8033_p8, %p8029_p10 }
 0x93e   : > { %v6506_v36 = vadd.f32 %v11185_v51, %v6375_v40  ;;  %v1479_v11 = vrot.slane %v1477_v14, 7  ;;  %v1788_v1 = vor.u32 %v1787_v58, %v1477_v14 }
 0x93f   : > { %v5159_v4 = vpop.f32.mrf.mxu2 }
 0x940   : > { %6634 = vst [vmem:[%s10753_s17 + $0x320] sm:$0xff] %v6506_v36  ;;  %v5328_v35 = vadd.f32 %v5159_v4, %v4806_v3  ;;  %v5685_v19 = vpop.f32.mrf.mxu3  ;;  %v1482_v21 = vor.u32 %v1480_v50, %v1479_v11  ;;  %v585_v3 = vsel %vm11282_vm7, %v561_v46, 0  ;;  %v1791_v46 = vor.u32 %v1789_v31, %v1484_v53 }
 0x941   : > { %v4640_v41 = vpop.f32.mrf.mxu1 }
 0x942   : > { %v5854_v22 = vadd.f32 %v5685_v19, %v5328_v35  ;;  %v4807_v17 = vadd.f32 %v4640_v41, %v12520_v15  ;;  %v1598_v25 = vsel %vm8744_vm3, 0, %v1482_v21  ;;  %v1790_v41 = vsel %vm1599_vm4, %v1788_v1, %v1789_v31 }
 0x943   : > { %v6210_v34 = vpop.f32.mrf.mxu0 }
 0x944   : > { %v6376_v56 = vadd.f32 %v6207_v38, %v5854_v22  ;;  %4679 = vmatmul.bf16.gmra.mxu1 %v10646_v32  ;;  %5201 = vmatmul.bf16.gmra.mxu2 %v12519_v63  ;;  %v560_v38 = vld [vmem:[%s8465_s13 + $0x10] sm:$0xf] }
 0x945   : > { %5727 = vmatmul.bf16.gmra.mxu3 %v7858_v27  ;;  %v584_v43 = vsel %vm11282_vm7, %v560_v38, 0  ;;  %v12523_v63 = vld [vmem:[#allocation56_spill] sm:$0xff] }
 0x946   : > { %6249 = vmatmul.bf16.gmra.mxu0 %v11304_v6  ;;  %v6507_v7 = vadd.f32 %v11185_v51, %v6376_v56  ;;  %v872_v22 = vunpack.c.l.b16 %v584_v43 }
 0x947   : > { %v5162_v30 = vpop.f32.mrf.mxu2 }
 0x948   : > { %6635 = vst [vmem:[%s10753_s17 + $0x328] sm:$0xff] %v6507_v7  ;;  %v5329_v42 = vadd.f32 %v5162_v30, %v4807_v17  ;;  %v5688_v32 = vpop.f32.mrf.mxu3 }
 0x949   : > { %v4642_v57 = vpop.f32.mrf.mxu1 }
 0x94a   : > { %v5855_v28 = vadd.f32 %v5688_v32, %v5329_v42  ;;  %v4808_v26 = vadd.f32 %v4642_v57, %v12521_v29  ;;  %v562_v57 = vld [vmem:[%s8465_s13 + $0x18] sm:$0xf] }
 0x94b   : > { %v6212_v62 = vpop.f32.mrf.mxu0  ;;  %v586_v29 = vsel %vm11282_vm7, %v562_v57, 0 }
 0x94c   : > { %v6377_v49 = vadd.f32 %v6210_v34, %v5855_v28  ;;  %v873_v34 = vunpack.c.l.b16 %v585_v3  ;;  %v563_v28 = vld [vmem:[%s8465_s13 + $0x1c] sm:$0xf]  ;;  %v874_v31 = vunpack.c.l.b16 %v586_v29 }
 0x94e   : > { %v6508_v40 = vadd.f32 %v11185_v51, %v6377_v49  ;;  %v11332_v14 = vpack.c.b16 %v873_v34, %v872_v22  ;;  %v12524_v49 = vld [vmem:[#allocation238_spill] sm:$0xff] }
 0x94f   : > { %v5164_v36 = vpop.f32.mrf.mxu2 }
 0x950   : > { %6636 = vst [vmem:[%s10753_s17 + $0x330] sm:$0xff] %v6508_v40  ;;  %v5330_v45 = vadd.f32 %v5164_v36, %v4808_v26  ;;  %v5690_v18 = vpop.f32.mrf.mxu3  ;;  %v1495_v42 = vshll.u32 %v11332_v14, 16  ;;  %v587_v26 = vsel %vm11282_vm7, %v563_v28, 0  ;;  %v1492_v33 = vshrl.u32 %v11332_v14, 16 }
 0x951   : > { %v4645_v4 = vpop.f32.mrf.mxu1 }
 0x952   : > { %v5856_v35 = vadd.f32 %v5690_v18, %v5330_v45  ;;  %v4809_v27 = vadd.f32 %v4645_v4, %v12523_v63  ;;  %v1792_v21 = vrot.slane %v1495_v42, 1  ;;  %v875_v4 = vunpack.c.l.b16 %v587_v26 }
 0x953   : > { %v6215_v19 = vpop.f32.mrf.mxu0 }
 0x954   : > { %v6378_v5 = vadd.f32 %v6212_v62, %v5856_v35  ;;  %4684 = vmatmul.bf16.gmra.mxu1 %v11237_v47  ;;  %5206 = vmatmul.bf16.gmra.mxu2 %v1598_v25  ;;  %v1486_v47 = vrot.slane %v1484_v53, 7  ;;  %v1793_v18 = vsel %vm1599_vm4, %v1791_v46, %v1792_v21  ;;  %v12525_v35 = vld [vmem:[#allocation62_spill] sm:$0xff]  ;;  %v1494_v53 = vrot.slane %v1492_v33, 7 }
 0x955   : > { %5732 = vmatmul.bf16.gmra.mxu3 %v944_v2 }
 0x956   : > { %6254 = vmatmul.bf16.gmra.mxu0 %v1790_v41  ;;  %v6509_v56 = vadd.f32 %v11185_v51, %v6378_v5  ;;  %v1489_v62 = vor.u32 %v1487_v61, %v1486_v47 }
 0x957   : > { %v5167_v7 = vpop.f32.mrf.mxu2 }
 0x958   : > { %6637 = vst [vmem:[%s10753_s17 + $0x338] sm:$0xff] %v6509_v56  ;;  %v5331_v15 = vadd.f32 %v5167_v7, %v4809_v27  ;;  %v5693_v17 = vpop.f32.mrf.mxu3  ;;  %v1490_v3 = vsel %vm948_vm1, %v1479_v11, %v1489_v62 }
 0x959   : > { %v4647_v50 = vpop.f32.mrf.mxu1 }
 0x95a   : > { %v5857_v30 = vadd.f32 %v5693_v17, %v5331_v15  ;;  %v4810_v38 = vadd.f32 %v4647_v50, %v12524_v49  ;;  %v12526_v15 = vld [vmem:[#allocation239_spill] sm:$0xff]  ;;  %v1794_v50 = vor.u32 %v1792_v21, %v1492_v33 }
 0x95b   : > { %v6217_v2 = vpop.f32.mrf.mxu0 }
 0x95c   : > { %v6379_v32 = vadd.f32 %v6215_v19, %v5857_v30  ;;  %v947_v19 = vpack.c.b16 %v875_v4, %v874_v31 }
 0x95e   : > { %v6510_v58 = vadd.f32 %v11185_v51, %v6379_v32  ;;  %v1503_v63 = vshll.u32 %v947_v19, 16 }
 0x95f   : > { %v5169_v40 = vpop.f32.mrf.mxu2 }
 0x960   : > { %6638 = vst [vmem:[%s10753_s17 + $0x340] sm:$0xff] %v6510_v58  ;;  %v5332_v1 = vadd.f32 %v5169_v40, %v4810_v38  ;;  %v5695_v36 = vpop.f32.mrf.mxu3  ;;  %v1795_v30 = vrot.slane %v1503_v63, 1  ;;  %v12527_v40 = vld [vmem:[#allocation68_spill] sm:$0xff] }
 0x961   : > { %v4650_v43 = vpop.f32.mrf.mxu1 }
 0x962   : > { %v5858_v61 = vadd.f32 %v5695_v36, %v5332_v1  ;;  %v4811_v11 = vadd.f32 %v4650_v43, %v12525_v35  ;;  %v1796_v38 = vsel %vm1599_vm4, %v1794_v50, %v1795_v30 }
 0x963   : > { %v6220_v45 = vpop.f32.mrf.mxu0 }
 0x964   : > { %v6380_v8 = vadd.f32 %v6217_v2, %v5858_v61  ;;  %4689 = vmatmul.bf16.gmra.mxu1 %v11254_v54  ;;  %5211 = vmatmul.bf16.gmra.mxu2 %v1490_v3 }
 0x965   : > { %5737 = vmatmul.bf16.gmra.mxu3 %v11312_v23  ;;  %v1497_v23 = vor.u32 %v1495_v42, %v1494_v53  ;;  %v1500_v42 = vshrl.u32 %v947_v19, 16 }
 0x966   : > { %6259 = vmatmul.bf16.gmra.mxu0 %v1793_v18  ;;  %v6511_v25 = vadd.f32 %v11185_v51, %v6380_v8 }
 0x967   : > { %v5172_v41 = vpop.f32.mrf.mxu2  ;;  %v1498_v62 = vsel %vm948_vm1, %v1486_v47, %v1497_v23  ;;  %v1502_v43 = vrot.slane %v1500_v42, 7  ;;  %v1797_v4 = vor.u32 %v1795_v30, %v1500_v42 }
 0x968   : > { %6639 = vst [vmem:[%s10753_s17 + $0x348] sm:$0xff] %v6511_v25  ;;  %v5333_v22 = vadd.f32 %v5172_v41, %v4811_v11  ;;  %v5698_v34 = vpop.f32.mrf.mxu3 }
 0x969   : > { %v4652_v5 = vpop.f32.mrf.mxu1 }
 0x96a   : > { %v5859_v56 = vadd.f32 %v5698_v34, %v5333_v22  ;;  %v4812_v17 = vadd.f32 %v4652_v5, %v12526_v15  ;;  %v1889_v34 = vsel %vm8843_vm6, %v1797_v4, 0 }
 0x96b   : > { %v6222_v54 = vpop.f32.mrf.mxu0 }
 0x96c   : > { %v6381_v27 = vadd.f32 %v6220_v45, %v5859_v56 }
 0x96e   : > { %v6512_v7 = vadd.f32 %v11185_v51, %v6381_v27 }
 0x96f   : > { %v5174_v2 = vpop.f32.mrf.mxu2 }
 0x970   : > { %6640 = vst [vmem:[%s10753_s17 + $0x350] sm:$0xff] %v6512_v7  ;;  %v5334_v32 = vadd.f32 %v5174_v2, %v4812_v17  ;;  %v5700_v57 = vpop.f32.mrf.mxu3 }
 0x971   : > { %v4655_v28 = vpop.f32.mrf.mxu1 }
 0x972   : > { %v5860_v58 = vadd.f32 %v5700_v57, %v5334_v32  ;;  %v4813_v29 = vadd.f32 %v4655_v28, %v12527_v40 }
 0x973   : > { %v6225_v49 = vpop.f32.mrf.mxu0 }
 0x974   : > { %v6382_v46 = vadd.f32 %v6222_v54, %v5860_v58  ;;  %4694 = vmatmul.bf16.gmra.mxu1 %v11272_v0  ;;  %5216 = vmatmul.bf16.gmra.mxu2 %v1498_v62  ;;  %v1505_v0 = vor.u32 %v1503_v63, %v1502_v43  ;;  %v12529_v54 = vld [vmem:[#allocation74_spill] sm:$0xff] }
 0x975   : > { %5742 = vmatmul.bf16.gmra.mxu3 %v11332_v14  ;;  %v12528_v14 = vld [vmem:[#allocation240_spill] sm:$0xff] }
 0x976   : > { %6264 = vmatmul.bf16.gmra.mxu0 %v1796_v38  ;;  %v6513_v21 = vadd.f32 %v11185_v51, %v6382_v46  ;;  %v1506_v11 = vsel %vm948_vm1, %v1494_v53, %v1505_v0 }
 0x977   : > { %v5177_v26 = vpop.f32.mrf.mxu2 }
 0x978   : > { %6641 = vst [vmem:[%s10753_s17 + $0x358] sm:$0xff] %v6513_v21  ;;  %v5335_v47 = vadd.f32 %v5177_v26, %v4813_v29  ;;  %v5703_v1 = vpop.f32.mrf.mxu3 }
 0x979   : > { %v4657_v36 = vpop.f32.mrf.mxu1 }
 0x97a   : > { %v5861_v3 = vadd.f32 %v5703_v1, %v5335_v47  ;;  %v4814_v31 = vadd.f32 %v4657_v36, %v12528_v14  ;;  %v12531_v36 = vld [vmem:[#allocation104_spill] sm:$0xff] }
 0x97b   : > { %v6227_v61 = vpop.f32.mrf.mxu0 }
 0x97c   : > { %v6383_v45 = vadd.f32 %v6225_v49, %v5861_v3 }
 0x97e   : > { %v6514_v18 = vadd.f32 %v11185_v51, %v6383_v45 }
 0x97f   : > { %v5179_v8 = vpop.f32.mrf.mxu2 }
 0x980   : > { %6642 = vst [vmem:[%s10753_s17 + $0x360] sm:$0xff] %v6514_v18  ;;  %v5336_v33 = vadd.f32 %v5179_v8, %v4814_v31  ;;  %v5705_v25 = vpop.f32.mrf.mxu3 }
 0x981   : > { %v4660_v35 = vpop.f32.mrf.mxu1 }
 0x982   : > { %v5862_v41 = vadd.f32 %v5705_v25, %v5336_v33  ;;  %v4815_v63 = vadd.f32 %v4660_v35, %v12529_v54 }
 0x983   : > { %v6230_v22 = vpop.f32.mrf.mxu0 }
 0x984   : > { %v6384_v5 = vadd.f32 %v6227_v61, %v5862_v41  ;;  %4699 = vmatmul.bf16.gmra.mxu1 %v11304_v6  ;;  %5221 = vmatmul.bf16.gmra.mxu2 %v1506_v11  ;;  %v12530_v6 = vld [vmem:[#allocation78_spill] sm:$0xff] }
 0x985   : > { %5747 = vmatmul.bf16.gmra.mxu3 %v947_v19 }
 0x986   : > { %6269 = vmatmul.bf16.gmra.mxu0 %v1889_v34  ;;  %v6515_v56 = vadd.f32 %v11185_v51, %v6384_v5  ;;  %v12532_v5 = vld [vmem:[#allocation105_spill] sm:$0xff] }
 0x987   : > { %v5182_v27 = vpop.f32.mrf.mxu2 }
 0x988   : > { %6643 = vst [vmem:[%s10753_s17 + $0x368] sm:$0xff] %v6515_v56  ;;  %v5337_v23 = vadd.f32 %v5182_v27, %v4815_v63  ;;  %v5708_v53 = vpop.f32.mrf.mxu3 }
 0x989   : > { %v4662_v7 = vpop.f32.mrf.mxu1 }
 0x98a   : > { %v5863_v15 = vadd.f32 %v5708_v53, %v5337_v23  ;;  %v4816_v30 = vadd.f32 %v4662_v7, %v12530_v6 }
 0x98b   : > { %v6232_v60 = vpop.f32.mrf.mxu0 }
 0x98c   : > { %v6385_v17 = vadd.f32 %v6230_v22, %v5863_v15 }
 0x98e   : > { %v6516_v50 = vadd.f32 %v11185_v51, %v6385_v17 }
 0x98f   : > { %v5184_v2 = vpop.f32.mrf.mxu2 }
 0x990   : > { %6644 = vst [vmem:[%s10753_s17 + $0x370] sm:$0xff] %v6516_v50  ;;  %v5338_v19 = vadd.f32 %v5184_v2, %v4816_v30  ;;  %v5710_v32 = vpop.f32.mrf.mxu3 }
 0x991   : > { %v4665_v57 = vpop.f32.mrf.mxu1 }
 0x992   : > { %v5864_v28 = vadd.f32 %v5710_v32, %v5338_v19  ;;  %v4817_v38 = vadd.f32 %v4665_v57, %v10668_v16 }
 0x993   : > { %v6235_v62 = vpop.f32.mrf.mxu0 }
 0x994   : > { %v6386_v58 = vadd.f32 %v6232_v60, %v5864_v28 }
 0x996   : > { %v6517_v49 = vadd.f32 %v11185_v51, %v6386_v58 }
 0x997   : > { %v5187_v46 = vpop.f32.mrf.mxu2 }
 0x998   : > { %6645 = vst [vmem:[%s10753_s17 + $0x378] sm:$0xff] %v6517_v49  ;;  %v5339_v42 = vadd.f32 %v5187_v46, %v4817_v38  ;;  %v5713_v21 = vpop.f32.mrf.mxu3 }
 0x999   : > { %v4667_v40 = vpop.f32.mrf.mxu1 }
 0x99a   : > { %v5865_v29 = vadd.f32 %v5713_v21, %v5339_v42  ;;  %v4818_v43 = vadd.f32 %v4667_v40, %v12531_v36 }
 0x99b   : > { %v6237_v26 = vpop.f32.mrf.mxu0 }
 0x99c   : > { %v6387_v47 = vadd.f32 %v6235_v62, %v5865_v29 }
 0x99e   : > { %v6518_v1 = vadd.f32 %v11185_v51, %v6387_v47 }
 0x99f   : > { %v5189_v3 = vpop.f32.mrf.mxu2 }
 0x9a0   : > { %6646 = vst [vmem:[%s10753_s17 + $0x380] sm:$0xff] %v6518_v1  ;;  %v5340_v61 = vadd.f32 %v5189_v3, %v4818_v43  ;;  %v5715_v45 = vpop.f32.mrf.mxu3 }
 0x9a1   : > { %v4670_v0 = vpop.f32.mrf.mxu1 }
 0x9a2   : > { %v5866_v18 = vadd.f32 %v5715_v45, %v5340_v61  ;;  %v4819_v4 = vadd.f32 %v4670_v0, %v10678_v12 }
 0x9a3   : > { %v6240_v16 = vpop.f32.mrf.mxu0 }
 0x9a4   : > { %v6388_v14 = vadd.f32 %v6237_v26, %v5866_v18 }
 0x9a6   : > { %v6519_v31 = vadd.f32 %v11185_v51, %v6388_v14 }
 0x9a7   : > { %v5192_v8 = vpop.f32.mrf.mxu2 }
 0x9a8   : > { %6647 = vst [vmem:[%s10753_s17 + $0x388] sm:$0xff] %v6519_v31  ;;  %v5341_v33 = vadd.f32 %v5192_v8, %v4819_v4  ;;  %v5718_v25 = vpop.f32.mrf.mxu3 }
 0x9a9   : > { %v4672_v35 = vpop.f32.mrf.mxu1 }
 0x9aa   : > { %v5867_v11 = vadd.f32 %v5718_v25, %v5341_v33  ;;  %v4820_v56 = vadd.f32 %v4672_v35, %v12532_v5 }
 0x9ab   : > { %v6242_v41 = vpop.f32.mrf.mxu0 }
 0x9ac   : > { %v6389_v22 = vadd.f32 %v6240_v16, %v5867_v11 }
 0x9ae   : > { %v6520_v34 = vadd.f32 %v11185_v51, %v6389_v22 }
 0x9af   : > { %v5194_v54 = vpop.f32.mrf.mxu2 }
 0x9b0   : > { %6648 = vst [vmem:[%s10753_s17 + $0x390] sm:$0xff] %v6520_v34  ;;  %v5342_v63 = vadd.f32 %v5194_v54, %v4820_v56  ;;  %v5720_v27 = vpop.f32.mrf.mxu3 }
 0x9b1   : > { %v4675_v23 = vpop.f32.mrf.mxu1 }
 0x9b2   : > { %v5868_v53 = vadd.f32 %v5720_v27, %v5342_v63  ;;  %v4821_v60 = vadd.f32 %v4675_v23, %v10688_v48 }
 0x9b3   : > { %v6245_v12 = vpop.f32.mrf.mxu0 }
 0x9b4   : > { %v6390_v7 = vadd.f32 %v6242_v41, %v5868_v53 }
 0x9b6   : > { %v6521_v15 = vadd.f32 %v11185_v51, %v6390_v7 }
 0x9b7   : > { %v5197_v17 = vpop.f32.mrf.mxu2 }
 0x9b8   : > { %6649 = vst [vmem:[%s10753_s17 + $0x398] sm:$0xff] %v6521_v15  ;;  %v5343_v50 = vadd.f32 %v5197_v17, %v4821_v60  ;;  %v5723_v6 = vpop.f32.mrf.mxu3 }
 0x9b9   : > { %v4677_v30 = vpop.f32.mrf.mxu1 }
 0x9ba   : > { %v5869_v2 = vadd.f32 %v5723_v6, %v5343_v50  ;;  %v4822_v28 = vadd.f32 %v4677_v30, %v10693_v52 }
 0x9bb   : > { %v6247_v19 = vpop.f32.mrf.mxu0 }
 0x9bc   : > { %v6391_v32 = vadd.f32 %v6245_v12, %v5869_v2 }
 0x9be   : > { %v6522_v57 = vadd.f32 %v11185_v51, %v6391_v32 }
 0x9bf   : > { %v5199_v62 = vpop.f32.mrf.mxu2 }
 0x9c0   : > { %6650 = vst [vmem:[%s10753_s17 + $0x3a0] sm:$0xff] %v6522_v57  ;;  %v5344_v58 = vadd.f32 %v5199_v62, %v4822_v28  ;;  %v5725_v49 = vpop.f32.mrf.mxu3 }
 0x9c1   : > { %v4680_v38 = vpop.f32.mrf.mxu1 }
 0x9c2   : > { %v5870_v46 = vadd.f32 %v5725_v49, %v5344_v58  ;;  %v4823_v40 = vadd.f32 %v4680_v38, %v10698_v9 }
 0x9c3   : > { %v6250_v48 = vpop.f32.mrf.mxu0 }
 0x9c4   : > { %v6392_v42 = vadd.f32 %v6247_v19, %v5870_v46 }
 0x9c6   : > { %v6523_v21 = vadd.f32 %v11185_v51, %v6392_v42 }
 0x9c7   : > { %v5202_v29 = vpop.f32.mrf.mxu2 }
 0x9c8   : > { %6651 = vst [vmem:[%s10753_s17 + $0x3a8] sm:$0xff] %v6523_v21  ;;  %v5345_v26 = vadd.f32 %v5202_v29, %v4823_v40  ;;  %v5728_v47 = vpop.f32.mrf.mxu3 }
 0x9c9   : > { %v4682_v1 = vpop.f32.mrf.mxu1 }
 0x9ca   : > { %v5871_v36 = vadd.f32 %v5728_v47, %v5345_v26  ;;  %v4824_v61 = vadd.f32 %v4682_v1, %v10703_v20 }
 0x9cb   : > { %v6252_v52 = vpop.f32.mrf.mxu0 }
 0x9cc   : > { %v6393_v43 = vadd.f32 %v6250_v48, %v5871_v36 }
 0x9ce   : > { %v6524_v3 = vadd.f32 %v11185_v51, %v6393_v43 }
 0x9cf   : > { %v5204_v45 = vpop.f32.mrf.mxu2 }
 0x9d0   : > { %6652 = vst [vmem:[%s10753_s17 + $0x3b0] sm:$0xff] %v6524_v3  ;;  %v5346_v0 = vadd.f32 %v5204_v45, %v4824_v61  ;;  %v5730_v18 = vpop.f32.mrf.mxu3  ;;  %v7859_v45 = vld [vmem:[#allocation10] ss:$0 sm:$0xff] }
 0x9d1   : > { %v4685_v16 = vpop.f32.mrf.mxu1 }
 0x9d2   : > { %v5872_v14 = vadd.f32 %v5730_v18, %v5346_v0  ;;  %v4825_v8 = vadd.f32 %v4685_v16, %v10708_v13 }
 0x9d3   : > { %v6255_v9 = vpop.f32.mrf.mxu0 }
 0x9d4   : > { %v6394_v31 = vadd.f32 %v6252_v52, %v5872_v14 }
 0x9d6   : > { %v6525_v4 = vadd.f32 %v11185_v51, %v6394_v31 }
 0x9d7   : > { %v5207_v33 = vpop.f32.mrf.mxu2 }
 0x9d8   : > { %6653 = vst [vmem:[%s10753_s17 + $0x3b8] sm:$0xff] %v6525_v4  ;;  %v5347_v25 = vadd.f32 %v5207_v33, %v4825_v8  ;;  %v5733_v35 = vpop.f32.mrf.mxu3 }
 0x9d9   : > { %v4687_v11 = vpop.f32.mrf.mxu1 }
 0x9da   : > { %v5873_v41 = vadd.f32 %v5733_v35, %v5347_v25  ;;  %v4826_v5 = vadd.f32 %v4687_v11, %v10713_v59 }
 0x9db   : > { %v6257_v20 = vpop.f32.mrf.mxu0 }
 0x9dc   : > { %v6395_v22 = vadd.f32 %v6255_v9, %v5873_v41 }
 0x9de   : > { %v6526_v34 = vadd.f32 %v11185_v51, %v6395_v22 }
 0x9df   : > { %v5209_v56 = vpop.f32.mrf.mxu2 }
 0x9e0   : > { %6654 = vst [vmem:[%s10753_s17 + $0x3c0] sm:$0xff] %v6526_v34  ;;  %v5348_v54 = vadd.f32 %v5209_v56, %v4826_v5  ;;  %v5735_v63 = vpop.f32.mrf.mxu3 }
 0x9e1   : > { %v4690_v27 = vpop.f32.mrf.mxu1 }
 0x9e2   : > { %v5874_v23 = vadd.f32 %v5735_v63, %v5348_v54  ;;  %v4827_v7 = vadd.f32 %v4690_v27, %v10718_v10 }
 0x9e3   : > { %v6260_v13 = vpop.f32.mrf.mxu0 }
 0x9e4   : > { %v6396_v53 = vadd.f32 %v6257_v20, %v5874_v23 }
 0x9e6   : > { %v6527_v12 = vadd.f32 %v11185_v51, %v6396_v53 }
 0x9e7   : > { %v5212_v15 = vpop.f32.mrf.mxu2 }
 0x9e8   : > { %6655 = vst [vmem:[%s10753_s17 + $0x3c8] sm:$0xff] %v6527_v12  ;;  %v5349_v60 = vadd.f32 %v5212_v15, %v4827_v7  ;;  %v5738_v17 = vpop.f32.mrf.mxu3 }
 0x9e9   : > { %v4692_v50 = vpop.f32.mrf.mxu1 }
 0x9ea   : > { %v5875_v6 = vadd.f32 %v5738_v17, %v5349_v60  ;;  %v4828_v19 = vadd.f32 %v4692_v50, %v10723_v37 }
 0x9eb   : > { %v6262_v59 = vpop.f32.mrf.mxu0 }
 0x9ec   : > { %v6397_v30 = vadd.f32 %v6260_v13, %v5875_v6 }
 0x9ee   : > { %v6528_v2 = vadd.f32 %v11185_v51, %v6397_v30 }
 0x9ef   : > { %v5214_v32 = vpop.f32.mrf.mxu2 }
 0x9f0   : > { %6656 = vst [vmem:[%s10753_s17 + $0x3d0] sm:$0xff] %v6528_v2  ;;  %v5350_v57 = vadd.f32 %v5214_v32, %v4828_v19  ;;  %v5740_v28 = vpop.f32.mrf.mxu3 }
 0x9f1   : > { %v4695_v62 = vpop.f32.mrf.mxu1 }
 0x9f2   : > { %v5876_v58 = vadd.f32 %v5740_v28, %v5350_v57  ;;  %v4829_v46 = vadd.f32 %v4695_v62, %v10728_v55 }
 0x9f3   : > { %v6265_v49 = vpop.f32.mrf.mxu0 }
 0x9f4   : > { %v6398_v10 = vadd.f32 %v6262_v59, %v5876_v58 }
 0x9f6   : > { %v6529_v38 = vadd.f32 %v11185_v51, %v6398_v10 }
 0x9f7   : > { %v5217_v48 = vpop.f32.mrf.mxu2 }
 0x9f8   : > { %6657 = vst [vmem:[%s10753_s17 + $0x3d8] sm:$0xff] %v6529_v38  ;;  %v5351_v42 = vadd.f32 %v5217_v48, %v4829_v46  ;;  %v5743_v21 = vpop.f32.mrf.mxu3 }
 0x9f9   : > { %v4697_v40 = vpop.f32.mrf.mxu1 }
 0x9fa   : > { %v5877_v37 = vadd.f32 %v5743_v21, %v5351_v42  ;;  %v4830_v47 = vadd.f32 %v4697_v40, %v10733_v39 }
 0x9fb   : > { %v6267_v1 = vpop.f32.mrf.mxu0 }
 0x9fc   : > { %v6399_v29 = vadd.f32 %v6265_v49, %v5877_v37 }
 0x9fe   : > { %v6530_v26 = vadd.f32 %v11185_v51, %v6399_v29 }
 0x9ff   : > { %v5219_v36 = vpop.f32.mrf.mxu2 }
 0xa00   : > { %6658 = vst [vmem:[%s10753_s17 + $0x3e0] sm:$0xff] %v6530_v26  ;;  %v5352_v52 = vadd.f32 %v5219_v36, %v4830_v47  ;;  %v5745_v43 = vpop.f32.mrf.mxu3 }
 0xa01   : > { %v4700_v55 = vpop.f32.mrf.mxu1 }
 0xa02   : > { %v5878_v3 = vadd.f32 %v5745_v43, %v5352_v52  ;;  %v4831_v18 = vadd.f32 %v4700_v55, %v10738_v44 }
 0xa03   : > { %v6270_v14 = vpop.f32.mrf.mxu0 }
 0xa04   : > { %v6400_v61 = vadd.f32 %v6267_v1, %v5878_v3 }
 0xa06   : > { %v6531_v0 = vadd.f32 %v7859_v45, %v6400_v61 }
 0xa07   : > { %v5222_v16 = vpop.f32.mrf.mxu2 }
 0xa08   : > { %6659 = vst [vmem:[%s10753_s17 + $0x3e8] sm:$0xff] %v6531_v0  ;;  %v5353_v51 = vadd.f32 %v5222_v16, %v4831_v18  ;;  %v5748_v39 = vpop.f32.mrf.mxu3 }
 0xa09   : > { %v4702_v31 = vpop.f32.mrf.mxu1 }
 0xa0a   : > { %v5879_v9 = vadd.f32 %v5748_v39, %v5353_v51  ;;  %v4832_v33 = vadd.f32 %v4702_v31, %v10743_v24 }
 0xa0b   : > { %v6272_v41 = vpop.f32.mrf.mxu0 }
 0xa0c   : > { %v6401_v4 = vadd.f32 %v6270_v14, %v5879_v9 }
 0xa0e   : > { %v6532_v8 = vadd.f32 %v7859_v45, %v6401_v4 }
 0xa0f   : > { %v5224_v44 = vpop.f32.mrf.mxu2 }
 0xa10   : > { %6660 = vst [vmem:[%s10753_s17 + $0x3f0] sm:$0xff] %v6532_v8  ;;  %v5354_v25 = vadd.f32 %v5224_v44, %v4832_v33  ;;  %v5750_v35 = vpop.f32.mrf.mxu3 }
 0xa12   : > { %v5880_v11 = vadd.f32 %v5750_v35, %v5354_v25 }
 0xa14   : > { %v6402_v20 = vadd.f32 %v6272_v41, %v5880_v11 }
 0xa16   : > { %v6533_v22 = vadd.f32 %v7859_v45, %v6402_v20 }
 0xa18   : > { %6661 = vst [vmem:[%s10753_s17 + $0x3f8] sm:$0xff] %v6533_v22 }
 0xa19   : > { %8037 = shalt.err (!%p8034_p13)
}
 0xa1a   : > { %s8174_s11 = smov 128   ;;  %s8175_s17 = smov 8  }
 0xa1b   : > { %7601 = dma.vmem_to_hbm [thread:$0]  (%p8331_p2), %s6679_s18, 16384, %s6681_s22, %s6663_s15, %s8174_s11, %s8174_s11, %s8175_s17  }
 0xa1c PF: > { %s12536_s10 = sld [smem:[#allocation17_spill]]  ;;  %p7629_p12 = scmp.ge.s32.totalorder %s8168_s6, 2 }
 0xa1e   : > { %p7621_p7 = pnand %p7629_p12, %p8339_p4 }
 0xa20   : > { %p7622_p9 = pneg %p7621_p7 }
 0xa22   : > { %s6695_s28 = sand.u32 1, %s12536_s10  }
 0xa23   : > { %s6696_s8 = scalar_lea.sflag [#allocation4], %s6695_s28 }
 0xa24   : > { %8111 = dma.done.wait (%p7622_p9), %s6696_s8, 16384  }
 0xa25   : > { %8113 = vsyncadd (%p7622_p9), %s6696_s8, 4294950912  ;;  %s25_s6 = sadd.s32 1, %s8168_s6   ;;  %s12539_s5 = sld [smem:[#allocation18_spill]] }
 0xa26   : > { %p11445_p3 = scmp.ge.s32.totalorder %s25_s6, 10   ;;  %s12540_s1 = sld [smem:[#allocation29_spill]] }
 0xa27   : > { %s12541_s29 = smov %s8395_s21  ;;  %s12542_s27 = sld [smem:[#allocation21_spill]] }
 0xa28   : > { %s12543_s28 = sld [smem:[#allocation22_spill]]  ;;  %s12546_s18 = smov %s8120_s19 }
 0xa29   : > { %s12544_s30 = sld [smem:[#allocation24_spill]]  ;;  %s12547_s19 = smov %s8124_s20 }
 0xa2a   : > { %s12545_s15 = sld [smem:[#allocation25_spill]]  ;;  %s12548_s20 = smov %s8430_s9 }
 0xa2b   : > { %s12549_s21 = smov %s12539_s5  ;;  %s12550_s22 = smov %s8136_s23 }
 0xa2c   : > { %s12551_s23 = smov %s12540_s1  ;;  %s12552_s24 = smov %s8144_s25 }
 0xa2d   : > { %s12553_s25 = smov %s8148_s26  ;;  %s12554_s26 = smov %s12541_s29 }
 0xa2e   :  { %24 = sbr.rel (!%p11445_p3) target bundleno = 20 (0x14), region = 125 }
 0xa2f   : > { %s12555_s29 = smov %s12544_s30 }
 0xa30   : > { %s12556_s30 = smov %s12545_s15 }
 0xa33   :  { %6702 = vsyncpa [#allocation3], 1 }
 0xa34   :  { %6704 = vsyncpa [#allocation3 + $0x1], 1 }
 0xa35   :  { %6705 = vsyncpa [#allocation6], 1 }
 0xa36   :  { %6707 = vsyncpa [#allocation6 + $0x1], 1 }
 0xa37   :  { %6708 = vsyncpa [#allocation9], 1 }
 0xa38   :  { %6709 = vsyncpa [#allocation4], 1 }
 0xa39   :  { %6711 = vsyncpa [#allocation4 + $0x1], 1 }

</bundles_post_ra>
